<compile_context>
chip_gen: v7x
topology: tpu7x:2x2x1
jax: 0.10.0
libtpu: 0.0.40
codegen_flags: <defaults>
</compile_context>

<pallas_src>
import numpy as np
import jax
import jax.numpy as jnp
from jax.experimental import pallas as pl
from jax.experimental.pallas import tpu as pltpu

EPS = 1e-5
MXU_DTYPE = jnp.bfloat16   # matmul inputs; accumulation stays f32
IO_DTYPE = jnp.bfloat16    # x / output at the HBM boundary


def decoder_bottleneck_kernel(
    xc_ref,              # (TILE_H, W, Cin) bf16   centre rows of x
    xt_ref, xb_ref,      # (W, Cin)         bf16   halo row above / below (clamped fetch)
    s1_ref, b1_ref,      # (1, Cin) f32             folded BN1
    w1_ref,              # (Cin, Ch) bf16           conv1 weight with BN2 scale folded in
    b2_ref,              # (1, Ch)  f32             BN2 shift (bias before ReLU2)
    w2_ref,              # (9, Ch, Ch) bf16         3x3 conv weights (BN3 scale folded), tap-major
    b3_ref,              # (1, Ch)  f32             BN3 shift
    s4_ref, b4_ref,      # (1, Cin) f32             folded BN4 (down_scale branch)
    w3_ref,              # (Ch, Cd) bf16            conv3 weight
    w4_ref,              # (Cin, Cd) bf16           down_scale conv weight
    out_ref,             # (TILE_H, W, Cd) bf16
    hp_ref,              # scratch (TILE_H+2, W+2, Ch) bf16: zero-padded ReLU2 activations
):
    TILE_H, W, Cin = xc_ref.shape
    Ch = w1_ref.shape[1]
    Cd = out_ref.shape[-1]
    M = TILE_H * W
    MH = (TILE_H + 2) * W

    i = pl.program_id(1)
    last = pl.num_programs(1) - 1

    # ---- weight_layer1 (+ BN2 folded): BN1 -> ReLU -> 1x1 conv -> +b2 -> ReLU ----
    # One matmul over tile rows + both halo rows (halo folded into the main matmul).
    xw = jnp.concatenate(
        [xt_ref[...].reshape(1, W, Cin), xc_ref[...], xb_ref[...].reshape(1, W, Cin)],
        axis=0).astype(jnp.float32).reshape(MH, Cin)
    a = jnp.maximum(xw * s1_ref[...] + b1_ref[...], 0.0)
    h = jnp.dot(a.astype(MXU_DTYPE), w1_ref[...], preferred_element_type=jnp.float32)
    h = jnp.maximum(h + b2_ref[...], 0.0)               # (MH, Ch) = ReLU(BN2(conv1(...)))

    # ---- fill the zero-padded bf16 scratch for the 3x3 conv (single interior store) ----
    zcol = jnp.zeros((TILE_H + 2, 1, Ch), hp_ref.dtype)
    hp_ref[:, 0:1, :] = zcol                             # left  zero column (W padding)
    hp_ref[:, W + 1:W + 2, :] = zcol                     # right zero column
    hp_ref[:, 1:W + 1, :] = h.reshape(TILE_H + 2, W, Ch).astype(hp_ref.dtype)

    # At the image boundary the 3x3 conv zero-pads h (PyTorch pads h, not x); the halo
    # fetches were clamped to valid rows, so overwrite those rows with zeros here.
    zrow = jnp.zeros((1, W, Ch), hp_ref.dtype)

    @pl.when(i == 0)
    def _():
        hp_ref[0:1, 1:W + 1, :] = zrow

    @pl.when(i == last)
    def _():
        hp_ref[TILE_H + 1:TILE_H + 2, 1:W + 1, :] = zrow

    # ---- weight_layer2 (+ BN3 folded): 3x3 conv as 9 accumulated MXU dots (K = Ch) ----
    h2 = None
    for di in range(3):
        for dj in range(3):
            tap = hp_ref[di:di + TILE_H, dj:dj + W, :].reshape(M, Ch)    # bf16
            d = jnp.dot(tap, w2_ref[di * 3 + dj], preferred_element_type=jnp.float32)
            h2 = d if h2 is None else h2 + d
    h2 = jnp.maximum(h2 + b3_ref[...], 0.0)              # ReLU(BN3(conv2)) : (M, Ch) f32

    # ---- weight_layer3 + down_scale; residual add in the f32 accumulator ----
    xc = xc_ref[...].astype(jnp.float32).reshape(M, Cin)
    idn = jnp.maximum(xc * s4_ref[...] + b4_ref[...], 0.0)               # (M, Cin)
    y = jnp.dot(h2.astype(MXU_DTYPE), w3_ref[...], preferred_element_type=jnp.float32)
    y = y + jnp.dot(idn.astype(MXU_DTYPE), w4_ref[...], preferred_element_type=jnp.float32)

    out_ref[...] = y.reshape(TILE_H, W, Cd).astype(out_ref.dtype)


def bn_fold(gamma, beta, mean, var, eps=EPS):
    scale = gamma / jnp.sqrt(var + eps)
    shift = beta - mean * scale
    return scale, shift


def decoder_bottleneck_forward(x_nchw, params, tile_h=16):
    # TODO(synk): keep the surrounding model NHWC to avoid these boundary transposes.
    x = jnp.transpose(x_nchw, (0, 2, 3, 1)).astype(IO_DTYPE)            # NCHW -> NHWC bf16
    N, H, W, Cin = x.shape
    Ch = params["w1"].shape[1]
    Cd = params["w3"].shape[1]
    assert H % tile_h == 0, "demo assumes H divisible by tile_h"
    n_h = H // tile_h

    s1, b1 = bn_fold(*params["bn1"])
    s2, b2 = bn_fold(*params["bn2"])
    s3, b3 = bn_fold(*params["bn3"])
    s4, b4 = bn_fold(*params["bn4"])

    # Fold BN2/BN3 scales into the preceding conv weights (host-side, free).
    w1f = (params["w1"] * s2[None, :]).astype(MXU_DTYPE)                # (Cin, Ch)
    w2f = (params["w2"] * s3[None, None, None, :]).reshape(9, Ch, Ch).astype(MXU_DTYPE)
    w3f = params["w3"].astype(MXU_DTYPE)                                # (Ch, Cd)
    w4f = params["w4"].astype(MXU_DTYPE)                                # (Cin, Cd)

    row = lambda v: v.reshape(1, -1).astype(jnp.float32)
    s1r, b1r, b2r, b3r, s4r, b4r = row(s1), row(b1), row(b2), row(b3), row(s4), row(b4)

    # ---- BlockSpecs: tile over (batch, H-row tiles); weights stay resident ----
    x_spec = pl.BlockSpec((None, tile_h, W, Cin), lambda n, i: (n, i, 0, 0))
    top_spec = pl.BlockSpec((None, None, W, Cin),
                            lambda n, i: (n, jnp.maximum(i * tile_h - 1, 0), 0, 0))
    bot_spec = pl.BlockSpec((None, None, W, Cin),
                            lambda n, i: (n, jnp.minimum((i + 1) * tile_h, H - 1), 0, 0))
    resident = lambda a: pl.BlockSpec(a.shape, lambda n, i, _nd=a.ndim: (0,) * _nd)
    out_spec = pl.BlockSpec((None, tile_h, W, Cd), lambda n, i: (n, i, 0, 0))

    flops = 2 * N * H * W * (Cin * Ch + 9 * Ch * Ch + Ch * Cd + Cin * Cd)
    bytes_accessed = int(
        x.size * 2                                       # x tiles (bf16)
        + 2 * N * n_h * W * Cin * 2                      # halo rows (bf16)
        + N * H * W * Cd * 2                             # output (bf16)
        + 2 * (w1f.size + w2f.size + w3f.size + w4f.size))
    cost = pl.CostEstimate(flops=flops, transcendentals=0, bytes_accessed=bytes_accessed)

    out = pl.pallas_call(
        decoder_bottleneck_kernel,
        out_shape=jax.ShapeDtypeStruct((N, H, W, Cd), IO_DTYPE),
        grid_spec=pltpu.PrefetchScalarGridSpec(
            num_scalar_prefetch=0,
            grid=(N, n_h),
            in_specs=[x_spec, top_spec, bot_spec,
                      resident(s1r), resident(b1r), resident(w1f), resident(b2r),
                      resident(w2f), resident(b3r), resident(s4r), resident(b4r),
                      resident(w3f), resident(w4f)],
            out_specs=out_spec,
            scratch_shapes=[pltpu.VMEM((tile_h + 2, W + 2, Ch), jnp.bfloat16)],
        ),
        compiler_params=pltpu.CompilerParams(
            dimension_semantics=("parallel", "parallel"),   # shard across TCs on v7x
            # TODO(synk): derive tile_h / this limit per generation (keep <= ~48 MB on v7x,
            #             ~96-100 MB is available on v5e/v6e).
            vmem_limit_bytes=32 * 1024 * 1024,
        ),
        cost_estimate=cost,
    )(x, x, x, s1r, b1r, w1f, b2r, w2f, b3r, s4r, b4r, w3f, w4f)

    return jnp.transpose(out, (0, 3, 1, 2)).astype(jnp.float32)          # NHWC -> NCHW


# ---------------- pure-JAX reference (f32) for correctness check ----------------
def _conv_nhwc(x, w, padding):
    return jax.lax.conv_general_dilated(
        x, w, window_strides=(1, 1), padding=padding,
        dimension_numbers=("NHWC", "HWIO", "NHWC"))


def reference_forward(x_nchw, params):
    x = jnp.transpose(x_nchw, (0, 2, 3, 1))
    s1, b1 = bn_fold(*params["bn1"])
    s2, b2 = bn_fold(*params["bn2"])
    s3, b3 = bn_fold(*params["bn3"])
    s4, b4 = bn_fold(*params["bn4"])
    Cin, Ch = params["w1"].shape
    Cd = params["w3"].shape[1]

    h = jnp.maximum(x * s1 + b1, 0.0)
    h = _conv_nhwc(h, params["w1"].reshape(1, 1, Cin, Ch), "VALID")
    h = jnp.maximum(h * s2 + b2, 0.0)
    h = _conv_nhwc(h, params["w2"], [(1, 1), (1, 1)])
    h = jnp.maximum(h * s3 + b3, 0.0)
    h = _conv_nhwc(h, params["w3"].reshape(1, 1, Ch, Cd), "VALID")
    idn = jnp.maximum(x * s4 + b4, 0.0)
    idn = _conv_nhwc(idn, params["w4"].reshape(1, 1, Cin, Cd), "VALID")
    return jnp.transpose(h + idn, (0, 3, 1, 2))


def init_params(key, in_channels, hidden_channels, down_channels):
    ks = jax.random.split(key, 8)

    def bn(k, c):
        k1, k2, k3, k4 = jax.random.split(k, 4)
        return (jax.random.uniform(k1, (c,), jnp.float32, 0.5, 1.5),
                0.1 * jax.random.normal(k2, (c,), jnp.float32),
                0.1 * jax.random.normal(k3, (c,), jnp.float32),
                jax.random.uniform(k4, (c,), jnp.float32, 0.5, 1.5))

    w = lambda k, shape: 0.05 * jax.random.normal(k, shape, jnp.float32)
    return {
        "bn1": bn(ks[0], in_channels),
        "w1": w(ks[1], (in_channels, hidden_channels)),
        "bn2": bn(ks[2], hidden_channels),
        "w2": w(ks[3], (3, 3, hidden_channels, hidden_channels)),
        "bn3": bn(ks[4], hidden_channels),
        "w3": w(ks[5], (hidden_channels, down_channels)),
        "bn4": bn(ks[6], in_channels),
        "w4": w(ks[7], (in_channels, down_channels)),
    }


if __name__ == "__main__":
    # upsample=False, in_channels != down_channels -> down_scale branch.
    # Channel counts are multiples of 128 so every matmul operand / store is lane-dense;
    # tile_h=16, W=32 -> M=512 rows per MXU pass; grid=(2, 2).
    N, Cin, Ch, Cd, H, W = 2, 256, 128, 128, 32, 32
    TILE_H = 16

    key = jax.random.PRNGKey(0)
    kx, kp = jax.random.split(key)
    x = jax.random.normal(kx, (N, Cin, H, W), jnp.float32)    # NCHW, like the PyTorch module
    params = init_params(kp, Cin, Ch, Cd)

    fwd = jax.jit(lambda xx, pp: decoder_bottleneck_forward(xx, pp, tile_h=TILE_H))
    out = jax.block_until_ready(fwd(x, params))

    ref = jax.block_until_ready(reference_forward(x, params))
    # bf16 x / scratch / MXU inputs (f32 accumulate) -> loosened tolerance vs f32 reference.
    np.testing.assert_allclose(np.asarray(out), np.asarray(ref), rtol=5e-2, atol=5e-2)
    assert out.shape == (N, Cd, H, W)

    print("KERNEL_OK")
</pallas_src>

<mosaic_0001>
module attributes {stable_mosaic.version = 11 : i64} {
  func.func @decoder_bottleneck_kernel(%arg0: i32, %arg1: i32, %arg2: memref<1x16x32x256xbf16, #tpu.memory_space<vmem>>, %arg3: memref<1x1x32x256xbf16, #tpu.memory_space<vmem>>, %arg4: memref<1x1x32x256xbf16, #tpu.memory_space<vmem>>, %arg5: memref<1x256xf32, #tpu.memory_space<vmem>>, %arg6: memref<1x256xf32, #tpu.memory_space<vmem>>, %arg7: memref<256x128xbf16, #tpu.memory_space<vmem>>, %arg8: memref<1x128xf32, #tpu.memory_space<vmem>>, %arg9: memref<9x128x128xbf16, #tpu.memory_space<vmem>>, %arg10: memref<1x128xf32, #tpu.memory_space<vmem>>, %arg11: memref<1x256xf32, #tpu.memory_space<vmem>>, %arg12: memref<1x256xf32, #tpu.memory_space<vmem>>, %arg13: memref<128x128xbf16, #tpu.memory_space<vmem>>, %arg14: memref<256x128xbf16, #tpu.memory_space<vmem>>, %arg15: memref<1x16x32x128xbf16, #tpu.memory_space<vmem>>, %arg16: memref<18x34x128xbf16, #tpu.memory_space<vmem>>) attributes {dimension_semantics = [#tpu.dimension_semantics<parallel>, #tpu.dimension_semantics<parallel>], iteration_bounds = array<i64: 2, 2>, scalar_prefetch = 0 : i64, scratch_operands = 1 : i64, tpu.core_type = #tpu.core_type<tc>, window_params = [{transform_indices = @transform_0, window_bounds = array<i64: 1, 16, 32, 256>}, {transform_indices = @transform_1, window_bounds = array<i64: 1, 1, 32, 256>}, {transform_indices = @transform_2, window_bounds = array<i64: 1, 1, 32, 256>}, {pipeline_mode = #tpu.pipeline_mode<synchronous>, transform_indices = @transform_3, window_bounds = array<i64: 1, 256>}, {pipeline_mode = #tpu.pipeline_mode<synchronous>, transform_indices = @transform_4, window_bounds = array<i64: 1, 256>}, {pipeline_mode = #tpu.pipeline_mode<synchronous>, transform_indices = @transform_5, window_bounds = array<i64: 256, 128>}, {pipeline_mode = #tpu.pipeline_mode<synchronous>, transform_indices = @transform_6, window_bounds = array<i64: 1, 128>}, {pipeline_mode = #tpu.pipeline_mode<synchronous>, transform_indices = @transform_7, window_bounds = array<i64: 9, 128, 128>}, {pipeline_mode = #tpu.pipeline_mode<synchronous>, transform_indices = @transform_8, window_bounds = array<i64: 1, 128>}, {pipeline_mode = #tpu.pipeline_mode<synchronous>, transform_indices = @transform_9, window_bounds = array<i64: 1, 256>}, {pipeline_mode = #tpu.pipeline_mode<synchronous>, transform_indices = @transform_10, window_bounds = array<i64: 1, 256>}, {pipeline_mode = #tpu.pipeline_mode<synchronous>, transform_indices = @transform_11, window_bounds = array<i64: 128, 128>}, {pipeline_mode = #tpu.pipeline_mode<synchronous>, transform_indices = @transform_12, window_bounds = array<i64: 256, 128>}, {transform_indices = @transform_13, window_bounds = array<i64: 1, 16, 32, 128>}]} {
    %c0 = arith.constant 0 : index
    %c0_0 = arith.constant 0 : index
    %c0_1 = arith.constant 0 : index
    %c0_2 = arith.constant 0 : index
    %0 = vector.load %arg3[%c0, %c0_0, %c0_1, %c0_2] : memref<1x1x32x256xbf16, #tpu.memory_space<vmem>>, vector<1x1x32x256xbf16>
    %1 = vector.shape_cast %0 : vector<1x1x32x256xbf16> to vector<32x256xbf16>
    %2 = vector.shape_cast %1 : vector<32x256xbf16> to vector<1x32x256xbf16>
    %c0_3 = arith.constant 0 : index
    %c0_4 = arith.constant 0 : index
    %c0_5 = arith.constant 0 : index
    %c0_6 = arith.constant 0 : index
    %3 = vector.load %arg2[%c0_3, %c0_4, %c0_5, %c0_6] : memref<1x16x32x256xbf16, #tpu.memory_space<vmem>>, vector<1x16x32x256xbf16>
    %4 = vector.shape_cast %3 : vector<1x16x32x256xbf16> to vector<16x32x256xbf16>
    %c0_7 = arith.constant 0 : index
    %c0_8 = arith.constant 0 : index
    %c0_9 = arith.constant 0 : index
    %c0_10 = arith.constant 0 : index
    %5 = vector.load %arg4[%c0_7, %c0_8, %c0_9, %c0_10] : memref<1x1x32x256xbf16, #tpu.memory_space<vmem>>, vector<1x1x32x256xbf16>
    %6 = vector.shape_cast %5 : vector<1x1x32x256xbf16> to vector<32x256xbf16>
    %7 = vector.shape_cast %6 : vector<32x256xbf16> to vector<1x32x256xbf16>
    %8 = tpu.concatenate %2, %4, %7 in 0 : vector<1x32x256xbf16>, vector<16x32x256xbf16>, vector<1x32x256xbf16> -> vector<18x32x256xbf16>
    %9 = arith.extf %8 : vector<18x32x256xbf16> to vector<18x32x256xf32>
    %10 = vector.shape_cast %9 : vector<18x32x256xf32> to vector<576x256xf32>
    %c0_11 = arith.constant 0 : index
    %c0_12 = arith.constant 0 : index
    %11 = vector.load %arg5[%c0_11, %c0_12] : memref<1x256xf32, #tpu.memory_space<vmem>>, vector<1x256xf32>
    %12 = vector.broadcast %11 : vector<1x256xf32> to vector<576x256xf32>
    %13 = arith.mulf %10, %12 : vector<576x256xf32>
    %c0_13 = arith.constant 0 : index
    %c0_14 = arith.constant 0 : index
    %14 = vector.load %arg6[%c0_13, %c0_14] : memref<1x256xf32, #tpu.memory_space<vmem>>, vector<1x256xf32>
    %15 = vector.broadcast %14 : vector<1x256xf32> to vector<576x256xf32>
    %16 = arith.addf %13, %15 : vector<576x256xf32>
    %cst = arith.constant 0.000000e+00 : f32
    %17 = vector.broadcast %cst : f32 to vector<576x256xf32>
    %18 = arith.maximumf %16, %17 : vector<576x256xf32>
    %19 = arith.truncf %18 : vector<576x256xf32> to vector<576x256xbf16>
    %c0_15 = arith.constant 0 : index
    %c0_16 = arith.constant 0 : index
    %20 = vector.load %arg7[%c0_15, %c0_16] : memref<256x128xbf16, #tpu.memory_space<vmem>>, vector<256x128xbf16>
    %cst_17 = arith.constant dense<0.000000e+00> : vector<576x128xf32>
    %21 = tpu.matmul %19, %20, %cst_17 {dimension_numbers = #tpu.dot_dimension_numbers<[1], [0], [0], [1], [0, 0, 1, 1], [], []>} : vector<576x256xbf16>, vector<256x128xbf16>, vector<576x128xf32> -> vector<576x128xf32>
    %c0_18 = arith.constant 0 : index
    %c0_19 = arith.constant 0 : index
    %22 = vector.load %arg8[%c0_18, %c0_19] : memref<1x128xf32, #tpu.memory_space<vmem>>, vector<1x128xf32>
    %23 = vector.broadcast %22 : vector<1x128xf32> to vector<576x128xf32>
    %24 = arith.addf %21, %23 : vector<576x128xf32>
    %cst_20 = arith.constant 0.000000e+00 : f32
    %25 = vector.broadcast %cst_20 : f32 to vector<576x128xf32>
    %26 = arith.maximumf %24, %25 : vector<576x128xf32>
    %cst_21 = arith.constant 0.000000e+00 : bf16
    %27 = vector.broadcast %cst_21 : bf16 to vector<18x1x128xbf16>
    %c0_22 = arith.constant 0 : index
    %c0_23 = arith.constant 0 : index
    %c0_24 = arith.constant 0 : index
    %28 = vector.load %arg16[%c0_22, %c0_23, %c0_24] : memref<18x34x128xbf16, #tpu.memory_space<vmem>>, vector<18x1x128xbf16>
    tpu.vector_store %arg16[%c0_22, %c0_23, %c0_24], %27 {strides = array<i32>} : memref<18x34x128xbf16, #tpu.memory_space<vmem>>, vector<18x1x128xbf16>,
    %c0_25 = arith.constant 0 : index
    %c33 = arith.constant 33 : index
    %c0_26 = arith.constant 0 : index
    %29 = vector.load %arg16[%c0_25, %c33, %c0_26] : memref<18x34x128xbf16, #tpu.memory_space<vmem>>, vector<18x1x128xbf16>
    tpu.vector_store %arg16[%c0_25, %c33, %c0_26], %27 {strides = array<i32>} : memref<18x34x128xbf16, #tpu.memory_space<vmem>>, vector<18x1x128xbf16>,
    %30 = vector.shape_cast %26 : vector<576x128xf32> to vector<18x32x128xf32>
    %31 = arith.truncf %30 : vector<18x32x128xf32> to vector<18x32x128xbf16>
    %c0_27 = arith.constant 0 : index
    %c1 = arith.constant 1 : index
    %c0_28 = arith.constant 0 : index
    %32 = vector.load %arg16[%c0_27, %c1, %c0_28] : memref<18x34x128xbf16, #tpu.memory_space<vmem>>, vector<18x32x128xbf16>
    tpu.vector_store %arg16[%c0_27, %c1, %c0_28], %31 {strides = array<i32>} : memref<18x34x128xbf16, #tpu.memory_space<vmem>>, vector<18x32x128xbf16>,
    %cst_29 = arith.constant 0.000000e+00 : bf16
    %33 = vector.broadcast %cst_29 : bf16 to vector<1x32x128xbf16>
    %c0_i32 = arith.constant 0 : i32
    %34 = arith.cmpi eq, %arg1, %c0_i32 : i32
    %35 = arith.extui %34 : i1 to i32
    %c0_i32_30 = arith.constant 0 : i32
    %36 = arith.cmpi ne, %35, %c0_i32_30 : i32
    scf.if %36 {
      %c0_110 = arith.constant 0 : index
      %c1_111 = arith.constant 1 : index
      %c0_112 = arith.constant 0 : index
      %122 = vector.load %arg16[%c0_110, %c1_111, %c0_112] : memref<18x34x128xbf16, #tpu.memory_space<vmem>>, vector<1x32x128xbf16>
      tpu.vector_store %arg16[%c0_110, %c1_111, %c0_112], %33 {strides = array<i32>} : memref<18x34x128xbf16, #tpu.memory_space<vmem>>, vector<1x32x128xbf16>,
    } else {
    }
    %c1_i32 = arith.constant 1 : i32
    %37 = arith.cmpi eq, %arg1, %c1_i32 : i32
    %38 = arith.extui %37 : i1 to i32
    %c0_i32_31 = arith.constant 0 : i32
    %39 = arith.cmpi ne, %38, %c0_i32_31 : i32
    scf.if %39 {
      %c17 = arith.constant 17 : index
      %c1_110 = arith.constant 1 : index
      %c0_111 = arith.constant 0 : index
      %122 = vector.load %arg16[%c17, %c1_110, %c0_111] : memref<18x34x128xbf16, #tpu.memory_space<vmem>>, vector<1x32x128xbf16>
      tpu.vector_store %arg16[%c17, %c1_110, %c0_111], %33 {strides = array<i32>} : memref<18x34x128xbf16, #tpu.memory_space<vmem>>, vector<1x32x128xbf16>,
    } else {
    }
    %c0_32 = arith.constant 0 : index
    %c0_33 = arith.constant 0 : index
    %c0_34 = arith.constant 0 : index
    %40 = vector.load %arg16[%c0_32, %c0_33, %c0_34] : memref<18x34x128xbf16, #tpu.memory_space<vmem>>, vector<16x32x128xbf16>
    %41 = vector.shape_cast %40 : vector<16x32x128xbf16> to vector<512x128xbf16>
    %c0_35 = arith.constant 0 : index
    %c0_36 = arith.constant 0 : index
    %c0_37 = arith.constant 0 : index
    %42 = vector.load %arg9[%c0_35, %c0_36, %c0_37] : memref<9x128x128xbf16, #tpu.memory_space<vmem>>, vector<1x128x128xbf16>
    %43 = vector.shape_cast %42 : vector<1x128x128xbf16> to vector<128x128xbf16>
    %cst_38 = arith.constant dense<0.000000e+00> : vector<512x128xf32>
    %44 = tpu.matmul %41, %43, %cst_38 {dimension_numbers = #tpu.dot_dimension_numbers<[1], [0], [0], [1], [0, 0, 1, 1], [], []>} : vector<512x128xbf16>, vector<128x128xbf16>, vector<512x128xf32> -> vector<512x128xf32>
    %c0_39 = arith.constant 0 : index
    %c1_40 = arith.constant 1 : index
    %c0_41 = arith.constant 0 : index
    %45 = vector.load %arg16[%c0_39, %c1_40, %c0_41] : memref<18x34x128xbf16, #tpu.memory_space<vmem>>, vector<16x32x128xbf16>
    %46 = vector.shape_cast %45 : vector<16x32x128xbf16> to vector<512x128xbf16>
    %c1_42 = arith.constant 1 : index
    %c0_43 = arith.constant 0 : index
    %c0_44 = arith.constant 0 : index
    %47 = vector.load %arg9[%c1_42, %c0_43, %c0_44] : memref<9x128x128xbf16, #tpu.memory_space<vmem>>, vector<1x128x128xbf16>
    %48 = vector.shape_cast %47 : vector<1x128x128xbf16> to vector<128x128xbf16>
    %cst_45 = arith.constant dense<0.000000e+00> : vector<512x128xf32>
    %49 = tpu.matmul %46, %48, %cst_45 {dimension_numbers = #tpu.dot_dimension_numbers<[1], [0], [0], [1], [0, 0, 1, 1], [], []>} : vector<512x128xbf16>, vector<128x128xbf16>, vector<512x128xf32> -> vector<512x128xf32>
    %50 = arith.addf %44, %49 : vector<512x128xf32>
    %c0_46 = arith.constant 0 : index
    %c2 = arith.constant 2 : index
    %c0_47 = arith.constant 0 : index
    %51 = vector.load %arg16[%c0_46, %c2, %c0_47] : memref<18x34x128xbf16, #tpu.memory_space<vmem>>, vector<16x32x128xbf16>
    %52 = vector.shape_cast %51 : vector<16x32x128xbf16> to vector<512x128xbf16>
    %c2_48 = arith.constant 2 : index
    %c0_49 = arith.constant 0 : index
    %c0_50 = arith.constant 0 : index
    %53 = vector.load %arg9[%c2_48, %c0_49, %c0_50] : memref<9x128x128xbf16, #tpu.memory_space<vmem>>, vector<1x128x128xbf16>
    %54 = vector.shape_cast %53 : vector<1x128x128xbf16> to vector<128x128xbf16>
    %cst_51 = arith.constant dense<0.000000e+00> : vector<512x128xf32>
    %55 = tpu.matmul %52, %54, %cst_51 {dimension_numbers = #tpu.dot_dimension_numbers<[1], [0], [0], [1], [0, 0, 1, 1], [], []>} : vector<512x128xbf16>, vector<128x128xbf16>, vector<512x128xf32> -> vector<512x128xf32>
    %56 = arith.addf %50, %55 : vector<512x128xf32>
    %c1_52 = arith.constant 1 : index
    %c0_53 = arith.constant 0 : index
    %c0_54 = arith.constant 0 : index
    %57 = vector.load %arg16[%c1_52, %c0_53, %c0_54] : memref<18x34x128xbf16, #tpu.memory_space<vmem>>, vector<16x32x128xbf16>
    %58 = vector.shape_cast %57 : vector<16x32x128xbf16> to vector<512x128xbf16>
    %c3 = arith.constant 3 : index
    %c0_55 = arith.constant 0 : index
    %c0_56 = arith.constant 0 : index
    %59 = vector.load %arg9[%c3, %c0_55, %c0_56] : memref<9x128x128xbf16, #tpu.memory_space<vmem>>, vector<1x128x128xbf16>
    %60 = vector.shape_cast %59 : vector<1x128x128xbf16> to vector<128x128xbf16>
    %cst_57 = arith.constant dense<0.000000e+00> : vector<512x128xf32>
    %61 = tpu.matmul %58, %60, %cst_57 {dimension_numbers = #tpu.dot_dimension_numbers<[1], [0], [0], [1], [0, 0, 1, 1], [], []>} : vector<512x128xbf16>, vector<128x128xbf16>, vector<512x128xf32> -> vector<512x128xf32>
    %62 = arith.addf %56, %61 : vector<512x128xf32>
    %c1_58 = arith.constant 1 : index
    %c1_59 = arith.constant 1 : index
    %c0_60 = arith.constant 0 : index
    %63 = vector.load %arg16[%c1_58, %c1_59, %c0_60] : memref<18x34x128xbf16, #tpu.memory_space<vmem>>, vector<16x32x128xbf16>
    %64 = vector.shape_cast %63 : vector<16x32x128xbf16> to vector<512x128xbf16>
    %c4 = arith.constant 4 : index
    %c0_61 = arith.constant 0 : index
    %c0_62 = arith.constant 0 : index
    %65 = vector.load %arg9[%c4, %c0_61, %c0_62] : memref<9x128x128xbf16, #tpu.memory_space<vmem>>, vector<1x128x128xbf16>
    %66 = vector.shape_cast %65 : vector<1x128x128xbf16> to vector<128x128xbf16>
    %cst_63 = arith.constant dense<0.000000e+00> : vector<512x128xf32>
    %67 = tpu.matmul %64, %66, %cst_63 {dimension_numbers = #tpu.dot_dimension_numbers<[1], [0], [0], [1], [0, 0, 1, 1], [], []>} : vector<512x128xbf16>, vector<128x128xbf16>, vector<512x128xf32> -> vector<512x128xf32>
    %68 = arith.addf %62, %67 : vector<512x128xf32>
    %c1_64 = arith.constant 1 : index
    %c2_65 = arith.constant 2 : index
    %c0_66 = arith.constant 0 : index
    %69 = vector.load %arg16[%c1_64, %c2_65, %c0_66] : memref<18x34x128xbf16, #tpu.memory_space<vmem>>, vector<16x32x128xbf16>
    %70 = vector.shape_cast %69 : vector<16x32x128xbf16> to vector<512x128xbf16>
    %c5 = arith.constant 5 : index
    %c0_67 = arith.constant 0 : index
    %c0_68 = arith.constant 0 : index
    %71 = vector.load %arg9[%c5, %c0_67, %c0_68] : memref<9x128x128xbf16, #tpu.memory_space<vmem>>, vector<1x128x128xbf16>
    %72 = vector.shape_cast %71 : vector<1x128x128xbf16> to vector<128x128xbf16>
    %cst_69 = arith.constant dense<0.000000e+00> : vector<512x128xf32>
    %73 = tpu.matmul %70, %72, %cst_69 {dimension_numbers = #tpu.dot_dimension_numbers<[1], [0], [0], [1], [0, 0, 1, 1], [], []>} : vector<512x128xbf16>, vector<128x128xbf16>, vector<512x128xf32> -> vector<512x128xf32>
    %74 = arith.addf %68, %73 : vector<512x128xf32>
    %c2_70 = arith.constant 2 : index
    %c0_71 = arith.constant 0 : index
    %c0_72 = arith.constant 0 : index
    %75 = vector.load %arg16[%c2_70, %c0_71, %c0_72] : memref<18x34x128xbf16, #tpu.memory_space<vmem>>, vector<16x32x128xbf16>
    %76 = vector.shape_cast %75 : vector<16x32x128xbf16> to vector<512x128xbf16>
    %c6 = arith.constant 6 : index
    %c0_73 = arith.constant 0 : index
    %c0_74 = arith.constant 0 : index
    %77 = vector.load %arg9[%c6, %c0_73, %c0_74] : memref<9x128x128xbf16, #tpu.memory_space<vmem>>, vector<1x128x128xbf16>
    %78 = vector.shape_cast %77 : vector<1x128x128xbf16> to vector<128x128xbf16>
    %cst_75 = arith.constant dense<0.000000e+00> : vector<512x128xf32>
    %79 = tpu.matmul %76, %78, %cst_75 {dimension_numbers = #tpu.dot_dimension_numbers<[1], [0], [0], [1], [0, 0, 1, 1], [], []>} : vector<512x128xbf16>, vector<128x128xbf16>, vector<512x128xf32> -> vector<512x128xf32>
    %80 = arith.addf %74, %79 : vector<512x128xf32>
    %c2_76 = arith.constant 2 : index
    %c1_77 = arith.constant 1 : index
    %c0_78 = arith.constant 0 : index
    %81 = vector.load %arg16[%c2_76, %c1_77, %c0_78] : memref<18x34x128xbf16, #tpu.memory_space<vmem>>, vector<16x32x128xbf16>
    %82 = vector.shape_cast %81 : vector<16x32x128xbf16> to vector<512x128xbf16>
    %c7 = arith.constant 7 : index
    %c0_79 = arith.constant 0 : index
    %c0_80 = arith.constant 0 : index
    %83 = vector.load %arg9[%c7, %c0_79, %c0_80] : memref<9x128x128xbf16, #tpu.memory_space<vmem>>, vector<1x128x128xbf16>
    %84 = vector.shape_cast %83 : vector<1x128x128xbf16> to vector<128x128xbf16>
    %cst_81 = arith.constant dense<0.000000e+00> : vector<512x128xf32>
    %85 = tpu.matmul %82, %84, %cst_81 {dimension_numbers = #tpu.dot_dimension_numbers<[1], [0], [0], [1], [0, 0, 1, 1], [], []>} : vector<512x128xbf16>, vector<128x128xbf16>, vector<512x128xf32> -> vector<512x128xf32>
    %86 = arith.addf %80, %85 : vector<512x128xf32>
    %c2_82 = arith.constant 2 : index
    %c2_83 = arith.constant 2 : index
    %c0_84 = arith.constant 0 : index
    %87 = vector.load %arg16[%c2_82, %c2_83, %c0_84] : memref<18x34x128xbf16, #tpu.memory_space<vmem>>, vector<16x32x128xbf16>
    %88 = vector.shape_cast %87 : vector<16x32x128xbf16> to vector<512x128xbf16>
    %c8 = arith.constant 8 : index
    %c0_85 = arith.constant 0 : index
    %c0_86 = arith.constant 0 : index
    %89 = vector.load %arg9[%c8, %c0_85, %c0_86] : memref<9x128x128xbf16, #tpu.memory_space<vmem>>, vector<1x128x128xbf16>
    %90 = vector.shape_cast %89 : vector<1x128x128xbf16> to vector<128x128xbf16>
    %cst_87 = arith.constant dense<0.000000e+00> : vector<512x128xf32>
    %91 = tpu.matmul %88, %90, %cst_87 {dimension_numbers = #tpu.dot_dimension_numbers<[1], [0], [0], [1], [0, 0, 1, 1], [], []>} : vector<512x128xbf16>, vector<128x128xbf16>, vector<512x128xf32> -> vector<512x128xf32>
    %92 = arith.addf %86, %91 : vector<512x128xf32>
    %c0_88 = arith.constant 0 : index
    %c0_89 = arith.constant 0 : index
    %93 = vector.load %arg10[%c0_88, %c0_89] : memref<1x128xf32, #tpu.memory_space<vmem>>, vector<1x128xf32>
    %94 = vector.broadcast %93 : vector<1x128xf32> to vector<512x128xf32>
    %95 = arith.addf %92, %94 : vector<512x128xf32>
    %cst_90 = arith.constant 0.000000e+00 : f32
    %96 = vector.broadcast %cst_90 : f32 to vector<512x128xf32>
    %97 = arith.maximumf %95, %96 : vector<512x128xf32>
    %c0_91 = arith.constant 0 : index
    %c0_92 = arith.constant 0 : index
    %c0_93 = arith.constant 0 : index
    %c0_94 = arith.constant 0 : index
    %98 = vector.load %arg2[%c0_91, %c0_92, %c0_93, %c0_94] : memref<1x16x32x256xbf16, #tpu.memory_space<vmem>>, vector<1x16x32x256xbf16>
    %99 = vector.shape_cast %98 : vector<1x16x32x256xbf16> to vector<16x32x256xbf16>
    %100 = arith.extf %99 : vector<16x32x256xbf16> to vector<16x32x256xf32>
    %101 = vector.shape_cast %100 : vector<16x32x256xf32> to vector<512x256xf32>
    %c0_95 = arith.constant 0 : index
    %c0_96 = arith.constant 0 : index
    %102 = vector.load %arg11[%c0_95, %c0_96] : memref<1x256xf32, #tpu.memory_space<vmem>>, vector<1x256xf32>
    %103 = vector.broadcast %102 : vector<1x256xf32> to vector<512x256xf32>
    %104 = arith.mulf %101, %103 : vector<512x256xf32>
    %c0_97 = arith.constant 0 : index
    %c0_98 = arith.constant 0 : index
    %105 = vector.load %arg12[%c0_97, %c0_98] : memref<1x256xf32, #tpu.memory_space<vmem>>, vector<1x256xf32>
    %106 = vector.broadcast %105 : vector<1x256xf32> to vector<512x256xf32>
    %107 = arith.addf %104, %106 : vector<512x256xf32>
    %cst_99 = arith.constant 0.000000e+00 : f32
    %108 = vector.broadcast %cst_99 : f32 to vector<512x256xf32>
    %109 = arith.maximumf %107, %108 : vector<512x256xf32>
    %110 = arith.truncf %97 : vector<512x128xf32> to vector<512x128xbf16>
    %c0_100 = arith.constant 0 : index
    %c0_101 = arith.constant 0 : index
    %111 = vector.load %arg13[%c0_100, %c0_101] : memref<128x128xbf16, #tpu.memory_space<vmem>>, vector<128x128xbf16>
    %cst_102 = arith.constant dense<0.000000e+00> : vector<512x128xf32>
    %112 = tpu.matmul %110, %111, %cst_102 {dimension_numbers = #tpu.dot_dimension_numbers<[1], [0], [0], [1], [0, 0, 1, 1], [], []>} : vector<512x128xbf16>, vector<128x128xbf16>, vector<512x128xf32> -> vector<512x128xf32>
    %113 = arith.truncf %109 : vector<512x256xf32> to vector<512x256xbf16>
    %c0_103 = arith.constant 0 : index
    %c0_104 = arith.constant 0 : index
    %114 = vector.load %arg14[%c0_103, %c0_104] : memref<256x128xbf16, #tpu.memory_space<vmem>>, vector<256x128xbf16>
    %cst_105 = arith.constant dense<0.000000e+00> : vector<512x128xf32>
    %115 = tpu.matmul %113, %114, %cst_105 {dimension_numbers = #tpu.dot_dimension_numbers<[1], [0], [0], [1], [0, 0, 1, 1], [], []>} : vector<512x256xbf16>, vector<256x128xbf16>, vector<512x128xf32> -> vector<512x128xf32>
    %116 = arith.addf %112, %115 : vector<512x128xf32>
    %117 = vector.shape_cast %116 : vector<512x128xf32> to vector<16x32x128xf32>
    %118 = arith.truncf %117 : vector<16x32x128xf32> to vector<16x32x128xbf16>
    %c0_106 = arith.constant 0 : index
    %c0_107 = arith.constant 0 : index
    %c0_108 = arith.constant 0 : index
    %c0_109 = arith.constant 0 : index
    %119 = vector.load %arg15[%c0_106, %c0_107, %c0_108, %c0_109] : memref<1x16x32x128xbf16, #tpu.memory_space<vmem>>, vector<1x16x32x128xbf16>
    %120 = vector.shape_cast %119 : vector<1x16x32x128xbf16> to vector<16x32x128xbf16>
    %121 = vector.shape_cast %118 : vector<16x32x128xbf16> to vector<1x16x32x128xbf16>
    tpu.vector_store %arg15[%c0_106, %c0_107, %c0_108, %c0_109], %121 {strides = array<i32>} : memref<1x16x32x128xbf16, #tpu.memory_space<vmem>>, vector<1x16x32x128xbf16>,
    return
  }
  func.func @transform_0(%arg0: i32, %arg1: i32) -> (i32, i32, i32, i32) {
    %c0_i32 = arith.constant 0 : i32
    %c0_i32_0 = arith.constant 0 : i32
    %c0_i32_1 = arith.constant 0 : i32
    return %arg0, %arg1, %c0_i32, %c0_i32_0 : i32, i32, i32, i32
  }
  func.func @transform_1(%arg0: i32, %arg1: i32) -> (i32, i32, i32, i32) {
    %c16_i32 = arith.constant 16 : i32
    %0 = arith.muli %arg1, %c16_i32 : i32
    %c1_i32 = arith.constant 1 : i32
    %1 = arith.subi %0, %c1_i32 : i32
    %c0_i32 = arith.constant 0 : i32
    %2 = arith.maxsi %1, %c0_i32 : i32
    %c0_i32_0 = arith.constant 0 : i32
    %c0_i32_1 = arith.constant 0 : i32
    %c0_i32_2 = arith.constant 0 : i32
    return %arg0, %2, %c0_i32_0, %c0_i32_1 : i32, i32, i32, i32
  }
  func.func @transform_2(%arg0: i32, %arg1: i32) -> (i32, i32, i32, i32) {
    %c1_i32 = arith.constant 1 : i32
    %0 = arith.addi %arg1, %c1_i32 : i32
    %c16_i32 = arith.constant 16 : i32
    %1 = arith.muli %0, %c16_i32 : i32
    %c31_i32 = arith.constant 31 : i32
    %2 = arith.minsi %1, %c31_i32 : i32
    %c0_i32 = arith.constant 0 : i32
    %c0_i32_0 = arith.constant 0 : i32
    %c0_i32_1 = arith.constant 0 : i32
    return %arg0, %2, %c0_i32, %c0_i32_0 : i32, i32, i32, i32
  }
  func.func @transform_3(%arg0: i32, %arg1: i32) -> (i32, i32) {
    %c0_i32 = arith.constant 0 : i32
    %c0_i32_0 = arith.constant 0 : i32
    %c0_i32_1 = arith.constant 0 : i32
    return %c0_i32, %c0_i32_0 : i32, i32
  }
  func.func @transform_4(%arg0: i32, %arg1: i32) -> (i32, i32) {
    %c0_i32 = arith.constant 0 : i32
    %c0_i32_0 = arith.constant 0 : i32
    %c0_i32_1 = arith.constant 0 : i32
    return %c0_i32, %c0_i32_0 : i32, i32
  }
  func.func @transform_5(%arg0: i32, %arg1: i32) -> (i32, i32) {
    %c0_i32 = arith.constant 0 : i32
    %c0_i32_0 = arith.constant 0 : i32
    %c0_i32_1 = arith.constant 0 : i32
    return %c0_i32, %c0_i32_0 : i32, i32
  }
  func.func @transform_6(%arg0: i32, %arg1: i32) -> (i32, i32) {
    %c0_i32 = arith.constant 0 : i32
    %c0_i32_0 = arith.constant 0 : i32
    %c0_i32_1 = arith.constant 0 : i32
    return %c0_i32, %c0_i32_0 : i32, i32
  }
  func.func @transform_7(%arg0: i32, %arg1: i32) -> (i32, i32, i32) {
    %c0_i32 = arith.constant 0 : i32
    %c0_i32_0 = arith.constant 0 : i32
    %c0_i32_1 = arith.constant 0 : i32
    %c0_i32_2 = arith.constant 0 : i32
    return %c0_i32, %c0_i32_0, %c0_i32_1 : i32, i32, i32
  }
  func.func @transform_8(%arg0: i32, %arg1: i32) -> (i32, i32) {
    %c0_i32 = arith.constant 0 : i32
    %c0_i32_0 = arith.constant 0 : i32
    %c0_i32_1 = arith.constant 0 : i32
    return %c0_i32, %c0_i32_0 : i32, i32
  }
  func.func @transform_9(%arg0: i32, %arg1: i32) -> (i32, i32) {
    %c0_i32 = arith.constant 0 : i32
    %c0_i32_0 = arith.constant 0 : i32
    %c0_i32_1 = arith.constant 0 : i32
    return %c0_i32, %c0_i32_0 : i32, i32
  }
  func.func @transform_10(%arg0: i32, %arg1: i32) -> (i32, i32) {
    %c0_i32 = arith.constant 0 : i32
    %c0_i32_0 = arith.constant 0 : i32
    %c0_i32_1 = arith.constant 0 : i32
    return %c0_i32, %c0_i32_0 : i32, i32
  }
  func.func @transform_11(%arg0: i32, %arg1: i32) -> (i32, i32) {
    %c0_i32 = arith.constant 0 : i32
    %c0_i32_0 = arith.constant 0 : i32
    %c0_i32_1 = arith.constant 0 : i32
    return %c0_i32, %c0_i32_0 : i32, i32
  }
  func.func @transform_12(%arg0: i32, %arg1: i32) -> (i32, i32) {
    %c0_i32 = arith.constant 0 : i32
    %c0_i32_0 = arith.constant 0 : i32
    %c0_i32_1 = arith.constant 0 : i32
    return %c0_i32, %c0_i32_0 : i32, i32
  }
  func.func @transform_13(%arg0: i32, %arg1: i32) -> (i32, i32, i32, i32) {
    %c0_i32 = arith.constant 0 : i32
    %c0_i32_0 = arith.constant 0 : i32
    %c0_i32_1 = arith.constant 0 : i32
    return %arg0, %arg1, %c0_i32, %c0_i32_0 : i32, i32, i32, i32
  }
}

</mosaic_0001>

<bundles_post_ra>
// kernel: _lambda_.1
= control target key start
LH: loop header
LB: loop body
LE: loop exit
PB: predicated region body
PF: predicated region fallthrough
CT: control target
= control target key end

     0   :  { %s16956_s25 = smov 0   ;;  %s16958_s26 = smov 0   ;;  %s21652_s0 = inlined_call_operand.vmem [shape: bf16[2,32,32,256], index: 0, kind: input, shape index: {}, may-alias: {0,1,2}]   ;;  %s21653_s1 = inlined_call_operand.vmem [shape: bf16[2,32,32,256], index: 1, kind: input, shape index: {}, may-alias: {0,1,2}]   ;;  %s21654_s2 = inlined_call_operand.vmem [shape: bf16[2,32,32,256], index: 2, kind: input, shape index: {}, may-alias: {0,1,2}]   ;;  %s21655_s3 = inlined_call_operand.vmem [shape: f32[1,256], index: 3, kind: input, shape index: {}]   ;;  %s21656_s4 = inlined_call_operand.vmem [shape: f32[1,256], index: 4, kind: input, shape index: {}]   ;;  %s21657_s5 = inlined_call_operand.vmem [shape: bf16[256,128], index: 5, kind: input, shape index: {}]   ;;  %s21658_s6 = inlined_call_operand.vmem [shape: f32[1,128], index: 6, kind: input, shape index: {}]   ;;  %s21659_s7 = inlined_call_operand.vmem [shape: bf16[9,128,128], index: 7, kind: input, shape index: {}]   ;;  %s21660_s8 = inlined_call_operand.vmem [shape: f32[1,128], index: 8, kind: input, shape index: {}]   ;;  %s21661_s9 = inlined_call_operand.vmem [shape: f32[1,256], index: 9, kind: input, shape index: {}]   ;;  %s21662_s10 = inlined_call_operand.vmem [shape: f32[1,256], index: 10, kind: input, shape index: {}]   ;;  %s21663_s11 = inlined_call_operand.vmem [shape: bf16[128,128], index: 11, kind: input, shape index: {}]   ;;  %s21664_s12 = inlined_call_operand.vmem [shape: bf16[256,128], index: 12, kind: input, shape index: {}]   ;;  %s21665_s13 = inlined_call_operand.vmem [shape: bf16[2,32,32,128], index: 13, kind: output, shape index: {}]  }
   0x1   :  { %21705 = sst [smem:[#allocation63_spill]] %s21660_s8  ;;  %s16960_s27 = smov 0  }
   0x2   :  { %21706 = sst [smem:[#allocation64_spill]] %s21662_s10  ;;  %s16962_s28 = smov 0  }
   0x3   :  { %21707 = sst [smem:[#allocation65_spill]] %s21663_s11  ;;  %s16964_s29 = smov 0  }
   0x4 LB: > { %21708 = sst [smem:[#allocation3_spill]] %s16873_s27  ;;  %s32_s30 = sadd.s32 1, %s16873_s27  ;;  %s16881_s29 = sphi %s16964_s29, %s23_s29   ;;  %s16877_s28 = sphi %s16962_s28, %s21975_s28   ;;  %s16873_s27 = sphi %s16960_s27, %s21974_s27   ;;  %s16869_s26 = sphi %s16958_s26, %s21973_s26   ;;  %s16865_s25 = sphi %s16956_s25, %s21972_s25  }
   0x5   : > { %21709 = sst [smem:[#allocation4_spill]] %s16877_s28  ;;  %s35_s14 = sadd.s32 1, %s16877_s28 }
   0x6   : > { %21710 = sst [smem:[#allocation5_spill]] %s16881_s29  ;;  %p33_p0 = scmp.ge.s32.totalorder %s32_s30, 2 }
   0x7   : > { %p13525_p1 = scmp.ge.s32.totalorder %s16881_s29, 1  ;;  %p473_p2 = scmp.lt.s32.totalorder %s16881_s29, 5 }
   0x8   : > { %s21977_s30 = smov (%p33_p0, %s32_s30), 0  ;;  %s21979_s14 = smov (!%p33_p0, %s35_s14), %s16877_s28 }
   0x9   : > { %21711 = sst [smem:[#allocation6_spill]] %s21977_s30  ;;  %p474_p3 = pnand %p13525_p1, %p473_p2 }
   0xa   : > { %p37_p4 = scmp.ge.s32.totalorder %s21979_s14, 2 }
   0xb   : > { %477 = sbr.rel (%p474_p3) target bundleno = 1997 (0x7cd), region = 72 }
   0xc   : > { %s21981_s14 = smov (%p37_p4, %s21979_s14), 0 }
   0xd   : > { %21712 = sst [smem:[#allocation7_spill]] %s21981_s14 }
  0x12   : > { %v16375_v0 = vld [vmem:[%s21657_s5] sm:$0xff]   ;;  %v21670_v1 = vmov 0   ;;  %v16376_v2 = vld [vmem:[%s21657_s5 + $0x8] sm:$0xff]   ;;  %p554_p5 = scmp.lt.s32.totalorder %s16869_s26, 1  ;;  %s16997_s19 = sshll.u32 %s16865_s25, 4  ;;  %v16377_v3 = vld [vmem:[%s21657_s5 + $0x10] sm:$0xff]   ;;  %v828_v5 = vlaneseq }
  0x13   : > { %1489 = vmatprep.subr.bf16.mxu0 %v21670_v1  ;;  %p556_p6 = scmp.lt.s32.totalorder %s16997_s19, 31  ;;  %s13531_s22 = sadd.s32 4294967295, %s16997_s19  ;;  %v16378_v4 = vld [vmem:[%s21657_s5 + $0x18] sm:$0xff]   ;;  %v16379_v6 = vld [vmem:[%s21657_s5 + $0x20] sm:$0xff]   ;;  %v16380_v9 = vld [vmem:[%s21657_s5 + $0x28] sm:$0xff]   ;;  %vm1882_vm0 = vcmask 1040384  }
  0x14   : > { %1490 = vmatpush1.bf16.msra.mxu0 %v16375_v0  ;;  %s21983_s26 = smov (!%p554_p5, %s16869_s26), 1  ;;  %p566_p7 = scmp.gt.s32.totalorder %s13531_s22, 0  ;;  %v829_v7 = vshrl.u32 %v828_v5, 7  ;;  %v826_v8 = vld [vmem:[%s21655_s3] sm:$0x3]  ;;  %v16381_v18 = vld [vmem:[%s21657_s5 + $0x30] sm:$0xff]  }
  0x15   : > { %1491 = vmatprep.subr.bf16.mxu0 %v21670_v1  ;;  %s17006_s23 = scalar_select %p556_p6, %s16997_s19, 31  ;;  %v982_v11 = vld [vmem:[%s21656_s4] sm:$0x3]  ;;  %v16382_v23 = vld [vmem:[%s21657_s5 + $0x38] sm:$0xff]   ;;  %v16384_v28 = vld [vmem:[%s21657_s5 + $0x48] sm:$0xff]   ;;  %vm2933_vm5 = vcmask 1043456  }
  0x16   : > { %p13532_p8 = scmp.lt.s32.totalorder %s13531_s22, 31  ;;  %s21985_s22 = smov (!%p566_p7, %s13531_s22), 0  ;;  %v17031_v10 = vsub.s32 1, %v829_v7  ;;  %v16383_v27 = vld [vmem:[%s21657_s5 + $0x40] sm:$0xff]   ;;  %v16385_v29 = vld [vmem:[%s21657_s5 + $0x50] sm:$0xff]   ;;  %v17075_v30 = vsub.s32 0, %v829_v7 }
  0x17   : > { %s17012_s16 = sshll.u32 %s21983_s26, 8  ;;  %s13548_s17 = sshll.u32 %s17006_s23, 2  ;;  %v16386_v31 = vld [vmem:[%s21657_s5 + $0x58] sm:$0xff]   ;;  %v16387_v37 = vld [vmem:[%s21657_s5 + $0x60] sm:$0xff]   ;;  %v16388_v43 = vld [vmem:[%s21657_s5 + $0x68] sm:$0xff]  }
  0x18   : > { %1492 = vmatpush1.bf16.msra.mxu0 %v16376_v2  ;;  %s21987_s22 = smov (!%p13532_p8, %s21985_s22), 31  ;;  %s13549_s21 = sshll.u32 %s21983_s26, 7  ;;  %21713 = vst [vmem:[#allocation8_spill] sm:$0xff] %v17031_v10  ;;  %v17045_v14 = vrot.slane %v826_v8, %v17031_v10  ;;  %v17048_v17 = vrot.slane %v982_v11, %v17031_v10  ;;  %21714 = vst [vmem:[#allocation9_spill] sm:$0xff] %v17075_v30  ;;  %v17085_v36 = vrot.slane %v826_v8, %v17075_v30  ;;  %v16389_v52 = vld [vmem:[%s21657_s5 + $0x70] sm:$0xff]   ;;  %v16390_v61 = vld [vmem:[%s21657_s5 + $0x78] sm:$0xff]  }
  0x19   : > { %1493 = vmatprep.subr.bf16.mxu0 %v21670_v1  ;;  %s13537_s24 = sshll.u32 %s21987_s22, 3  ;;  %s605_s15 = sadd.s32 %s13549_s21, %s13548_s17  ;;  %v17097_v40 = vrot.slane %v982_v11, %v17075_v30  ;;  %vm1883_vm1 = vsmask.f32 256  ;;  %vm1939_vm3 = vsmask.f32 7938 }
  0x1a   : > { %s574_s14 = sadd.s32 %s13537_s24, %s17012_s16  ;;  %s13550_s30 = sshll.u32 %s605_s15, 2  ;;  %vm17243_vm2 = vmand %vm1882_vm0, %vm1883_vm1  ;;  %vm2211_vm6 = vsmask.f32 4368 }
  0x1b   : > { %s13539_s18 = sshll.u32 %s574_s14, 2  ;;  %s17029_s10 = scalar_lea.vmem %s21665_s13, %s13550_s30  ;;  %vm17267_vm4 = vmand %vm1882_vm0, %vm1939_vm3 }
  0x1c   : > { %1494 = vmatpush1.bf16.msra.mxu0 %v16377_v3  ;;  %s17040_s17 = scalar_lea.vmem %s21653_s1, %s13539_s18  ;;  %s13527_s26 = sshll.u32 %s17006_s23, 3  ;;  %vm17505_vm7 = vmand %vm2933_vm5, %vm1939_vm3 }
  0x1d   : > { %1495 = vmatprep.subr.bf16.mxu0 %v21670_v1  ;;  %v610_v12 = vld [vmem:[%s17040_s17] sm:$0xff]  ;;  %v611_v13 = vld [vmem:[%s17040_s17 + $0x8] sm:$0xff]  ;;  %s560_s28 = sadd.s32 %s17012_s16, %s13527_s26  ;;  %v612_v32 = vld [vmem:[%s17040_s17 + $0x10] sm:$0xff]  ;;  %s14276_s27 = sadd.s32 16, %s16997_s19 }
  0x1e   : > { %v683_v15 = vunpack.c.h.bf16 %v610_v12  ;;  %v685_v16 = vunpack.c.h.bf16 %v611_v13  ;;  %v613_v33 = vld [vmem:[%s17040_s17 + $0x18] sm:$0xff]  ;;  %s13529_s8 = sshll.u32 %s560_s28, 2  ;;  %v682_v34 = vunpack.c.l.bf16 %v610_v12  ;;  %v684_v35 = vunpack.c.l.bf16 %v611_v13  ;;  %p17478_p9 = scmp.lt.s32.totalorder %s14276_s27, 31  ;;  %vm17514_vm8 = vmor %vm1883_vm1, %vm2211_vm6 }
  0x1f   : > { %v687_v38 = vunpack.c.h.bf16 %v612_v32  ;;  %v689_v39 = vunpack.c.h.bf16 %v613_v33  ;;  %s17094_s14 = scalar_lea.vmem %s21652_s0, %s13529_s8  ;;  %v686_v50 = vunpack.c.l.bf16 %v612_v32  ;;  %v688_v51 = vunpack.c.l.bf16 %v613_v33  ;;  %p13640_p10 = scmp.ne.s32.totalorder %s16865_s25, 0 }
  0x20   : > { %1496 = vmatpush1.bf16.msra.mxu0 %v16378_v4  ;;  %v839_v19 = vmul.f32 %v17045_v14, %v683_v15  ;;  %v841_v20 = vmul.f32 %v17045_v14, %v685_v16  ;;  %v838_v41 = vmul.f32 %v17085_v36, %v682_v34  ;;  %v840_v42 = vmul.f32 %v17085_v36, %v684_v35  ;;  %v614_v46 = vld [vmem:[%s17094_s14] sm:$0xff]  ;;  %v615_v47 = vld [vmem:[%s17094_s14 + $0x8] sm:$0xff]  ;;  %v616_v3 = vld [vmem:[%s17094_s14 + $0x10] sm:$0xff]  ;;  %s21989_s27 = smov (!%p17478_p9, %s14276_s27), 31 }
  0x21   : > { %1497 = vmatprep.subr.bf16.mxu0 %v21670_v1  ;;  %v843_v44 = vmul.f32 %v17045_v14, %v687_v38  ;;  %v845_v45 = vmul.f32 %v17045_v14, %v689_v39  ;;  %v691_v55 = vunpack.c.h.bf16 %v614_v46  ;;  %v693_v56 = vunpack.c.h.bf16 %v615_v47  ;;  %v617_v4 = vld [vmem:[%s17094_s14 + $0x18] sm:$0xff]  ;;  %s21991_s27 = smov (!%p17478_p9, %s21989_s27), 31 }
  0x22   : > { %v995_v21 = vadd.f32 %v17048_v17, %v839_v19  ;;  %v997_v22 = vadd.f32 %v17048_v17, %v841_v20  ;;  %v994_v48 = vadd.f32 %v17097_v40, %v838_v41  ;;  %v996_v49 = vadd.f32 %v17097_v40, %v840_v42  ;;  %s17549_s19 = sshll.u32 %s21991_s27, 3 }
  0x23   : > { %v999_v53 = vadd.f32 %v17048_v17, %v843_v44  ;;  %v1001_v54 = vadd.f32 %v17048_v17, %v845_v45  ;;  %v842_v59 = vmul.f32 %v17085_v36, %v686_v50  ;;  %v844_v60 = vmul.f32 %v17085_v36, %v688_v51  ;;  %v621_v50 = vld [vmem:[%s17094_s14 + $0x38] sm:$0xff]  ;;  %s591_s8 = sadd.s32 %s17549_s19, %s17012_s16 }
  0x24   : > { %1498 = vmatpush1.bf16.msra.mxu0 %v16379_v6  ;;  %v1139_v24 = vmax.f32 %v995_v21, 0.0  ;;  %v1141_v25 = vmax.f32 %v997_v22, 0.0  ;;  %v1138_v57 = vmax.f32 %v994_v48, 0.0  ;;  %v1140_v58 = vmax.f32 %v996_v49, 0.0  ;;  %v620_v49 = vld [vmem:[%s17094_s14 + $0x30] sm:$0xff]  ;;  %s13546_s16 = sshll.u32 %s591_s8, 2 }
  0x25   : > { %1499 = vmatprep.subr.bf16.mxu0 %v21670_v1  ;;  %v1143_v62 = vmax.f32 %v999_v53, 0.0  ;;  %v1145_v63 = vmax.f32 %v1001_v54, 0.0  ;;  %v847_v0 = vmul.f32 %v17045_v14, %v691_v55  ;;  %v849_v2 = vmul.f32 %v17045_v14, %v693_v56  ;;  %s17584_s29 = scalar_lea.vmem %s21654_s2, %s13546_s16 }
  0x26   : > { %v1283_v26 = vpack.c.bf16 %v1141_v25, %v1139_v24  ;;  %v690_v5 = vunpack.c.l.bf16 %v614_v46  ;;  %v692_v6 = vunpack.c.l.bf16 %v615_v47  ;;  %v1282_v7 = vpack.c.bf16 %v1140_v58, %v1138_v57 }
  0x27   : > { %v998_v8 = vadd.f32 %v17097_v40, %v842_v59  ;;  %v695_v11 = vunpack.c.h.bf16 %v616_v3  ;;  %v1285_v12 = vpack.c.bf16 %v1145_v63, %v1143_v62  ;;  %v1003_v13 = vadd.f32 %v17048_v17, %v847_v0 }
  0x28   : > { %1500 = vmatpush1.bf16.msra.mxu0 %v16380_v9  ;;  %1521 = vmatprep.mubr.bf16.mxu0 %v1283_v26  ;;  %v1000_v9 = vadd.f32 %v17097_v40, %v844_v60  ;;  %v1005_v15 = vadd.f32 %v17048_v17, %v849_v2  ;;  %v697_v16 = vunpack.c.h.bf16 %v617_v4  ;;  %v848_v19 = vmul.f32 %v17085_v36, %v692_v6  ;;  %v618_v26 = vld [vmem:[%s17094_s14 + $0x20] sm:$0xff] }
  0x29   : > { %1501 = vmatprep.subr.bf16.mxu0 %v21670_v1  ;;  %v1142_v20 = vmax.f32 %v998_v8, 0.0  ;;  %v851_v22 = vmul.f32 %v17045_v14, %v695_v11  ;;  %v696_v34 = vunpack.c.l.bf16 %v617_v4  ;;  %v699_v38 = vunpack.c.h.bf16 %v618_v26  ;;  %v622_v6 = vld [vmem:[%s17094_s14 + $0x40] sm:$0xff] }
  0x2a   : > { %v1144_v21 = vmax.f32 %v1000_v9, 0.0  ;;  %v1149_v24 = vmax.f32 %v1005_v15, 0.0  ;;  %v853_v25 = vmul.f32 %v17045_v14, %v697_v16  ;;  %v698_v54 = vunpack.c.l.bf16 %v618_v26 }
  0x2b   : > { %v1007_v33 = vadd.f32 %v17048_v17, %v851_v22  ;;  %v852_v44 = vmul.f32 %v17085_v36, %v696_v34  ;;  %v855_v47 = vmul.f32 %v17045_v14, %v699_v38  ;;  %v703_v56 = vunpack.c.h.bf16 %v620_v49 }
  0x2c   : > { %1502 = vmatpush1.bf16.msra.mxu0 %v16381_v18  ;;  %v846_v18 = vmul.f32 %v17085_v36, %v690_v5  ;;  %v1284_v32 = vpack.c.bf16 %v1144_v21, %v1142_v20  ;;  %v705_v60 = vunpack.c.h.bf16 %v621_v50  ;;  %v854_v63 = vmul.f32 %v17085_v36, %v698_v54 }
  0x2d   : > { %1503 = vmatprep.subr.bf16.mxu0 %v21670_v1  ;;  %v1151_v45 = vmax.f32 %v1007_v33, 0.0  ;;  %v1008_v53 = vadd.f32 %v17097_v40, %v852_v44  ;;  %v1011_v58 = vadd.f32 %v17048_v17, %v855_v47  ;;  %v859_v2 = vmul.f32 %v17045_v14, %v703_v56 }
  0x2e   : > { %v861_v5 = vmul.f32 %v17045_v14, %v705_v60  ;;  %v702_v8 = vunpack.c.l.bf16 %v620_v49  ;;  %v704_v9 = vunpack.c.l.bf16 %v621_v50 }
  0x2f   : > { %v1152_v62 = vmax.f32 %v1008_v53, 0.0  ;;  %v1015_v15 = vadd.f32 %v17048_v17, %v859_v2  ;;  %v627_v53 = vld [vmem:[%s17094_s14 + $0x68] sm:$0xff] }
  0x30   : > { %1504 = vmatpush1.bf16.msra.mxu0 %v16382_v23  ;;  %v1147_v23 = vmax.f32 %v1003_v13, 0.0  ;;  %v858_v21 = vmul.f32 %v17085_v36, %v702_v8  ;;  %v860_v22 = vmul.f32 %v17085_v36, %v704_v9  ;;  %v628_v9 = vld [vmem:[%s17094_s14 + $0x70] sm:$0xff] }
  0x31   : > { %1505 = vmatprep.subr.bf16.mxu0 %v21670_v1 }
  0x32   : > { %v1287_v35 = vpack.c.bf16 %v1149_v24, %v1147_v23  ;;  %v1016_v33 = vadd.f32 %v17097_v40, %v860_v22 }
  0x34   : > { %1506 = vmatpush1.bf16.msra.mxu0 %v16383_v27  ;;  %v619_v27 = vld [vmem:[%s17094_s14 + $0x28] sm:$0xff] }
  0x35   : > { %1507 = vmatprep.subr.bf16.mxu0 %v21670_v1  ;;  %v701_v39 = vunpack.c.h.bf16 %v619_v27  ;;  %v700_v55 = vunpack.c.l.bf16 %v619_v27 }
  0x37   : > { %v857_v48 = vmul.f32 %v17045_v14, %v701_v39  ;;  %v856_v0 = vmul.f32 %v17085_v36, %v700_v55 }
  0x38   : > { %1508 = vmatpush1.bf16.msra.mxu0 %v16384_v28  ;;  %v1002_v28 = vadd.f32 %v17097_v40, %v846_v18  ;;  %v1017_v18 = vadd.f32 %v17048_v17, %v861_v5 }
  0x39   : > { %1509 = vmatprep.subr.bf16.mxu0 %v21670_v1  ;;  %v1013_v59 = vadd.f32 %v17048_v17, %v857_v48  ;;  %v1012_v13 = vadd.f32 %v17097_v40, %v856_v0 }
  0x3a   : > { %v1146_v41 = vmax.f32 %v1002_v28, 0.0  ;;  %v1161_v26 = vmax.f32 %v1017_v18, 0.0 }
  0x3b   : > { %v1157_v4 = vmax.f32 %v1013_v59, 0.0  ;;  %v1156_v24 = vmax.f32 %v1012_v13, 0.0  ;;  %v716_v13 = vunpack.c.l.bf16 %v627_v53 }
  0x3c   : > { %1510 = vmatpush1.bf16.msra.mxu0 %v16385_v29  ;;  %v1004_v29 = vadd.f32 %v17097_v40, %v848_v19  ;;  %v707_v19 = vunpack.c.h.bf16 %v622_v6 }
  0x3d   : > { %1511 = vmatprep.subr.bf16.mxu0 %v21670_v1 }
  0x3e   : > { %v1148_v42 = vmax.f32 %v1004_v29, 0.0  ;;  %v863_v27 = vmul.f32 %v17045_v14, %v707_v19  ;;  %v624_v29 = vld [vmem:[%s17094_s14 + $0x50] sm:$0xff]  ;;  %v719_v19 = vunpack.c.h.bf16 %v628_v9 }
  0x3f   : > { %v711_v38 = vunpack.c.h.bf16 %v624_v29  ;;  %v710_v55 = vunpack.c.l.bf16 %v624_v29 }
  0x40   : > { %1512 = vmatpush1.bf16.msra.mxu0 %v16386_v31  ;;  %v694_v31 = vunpack.c.l.bf16 %v616_v3  ;;  %v1286_v51 = vpack.c.bf16 %v1148_v42, %v1146_v41  ;;  %v1155_v3 = vmax.f32 %v1011_v58, 0.0  ;;  %v1019_v41 = vadd.f32 %v17048_v17, %v863_v27 }
  0x41   : > { %1513 = vmatprep.subr.bf16.mxu0 %v21670_v1  ;;  %v867_v48 = vmul.f32 %v17045_v14, %v711_v38  ;;  %v718_v38 = vunpack.c.l.bf16 %v628_v9 }
  0x42   : > { %v1291_v16 = vpack.c.bf16 %v1157_v4, %v1155_v3  ;;  %v1163_v49 = vmax.f32 %v1019_v41, 0.0  ;;  %v866_v3 = vmul.f32 %v17085_v36, %v710_v55  ;;  %v632_v55 = vld [vmem:[%s17094_s14 + $0x90] sm:$0xff] }
  0x43   : > { %v1023_v58 = vadd.f32 %v17048_v17, %v867_v48 }
  0x44   : > { %1514 = vmatpush1.bf16.msra.mxu0 %v16387_v37  ;;  %v1009_v37 = vadd.f32 %v17048_v17, %v853_v25  ;;  %v1159_v25 = vmax.f32 %v1015_v15, 0.0 }
  0x45   : > { %1515 = vmatprep.subr.bf16.mxu0 %v21670_v1  ;;  %v1167_v5 = vmax.f32 %v1023_v58, 0.0 }
  0x46   : > { %v1153_v46 = vmax.f32 %v1009_v37, 0.0  ;;  %v1293_v39 = vpack.c.bf16 %v1161_v26, %v1159_v25  ;;  %v872_v25 = vmul.f32 %v17085_v36, %v716_v13  ;;  %v634_v13 = vld [vmem:[%s17094_s14 + $0xa0] sm:$0xff] }
  0x48   : > { %1516 = vmatpush1.bf16.msra.mxu0 %v16388_v43  ;;  %v850_v43 = vmul.f32 %v17085_v36, %v694_v31  ;;  %v1289_v57 = vpack.c.bf16 %v1153_v46, %v1151_v45  ;;  %v625_v31 = vld [vmem:[%s17094_s14 + $0x58] sm:$0xff]  ;;  %v1160_v45 = vmax.f32 %v1016_v33, 0.0  ;;  %v630_v33 = vld [vmem:[%s17094_s14 + $0x80] sm:$0xff] }
  0x49   : > { %1517 = vmatprep.subr.bf16.mxu0 %v21670_v1  ;;  %v712_v59 = vunpack.c.l.bf16 %v625_v31 }
  0x4b   : > { %v868_v4 = vmul.f32 %v17085_v36, %v712_v59 }
  0x4c   : > { %1518 = vmatpush1.bf16.msra.mxu0 %v16389_v52  ;;  %v1006_v52 = vadd.f32 %v17097_v40, %v850_v43  ;;  %v713_v43 = vunpack.c.h.bf16 %v625_v31 }
  0x4d   : > { %1519 = vmatprep.subr.bf16.mxu0 %v21670_v1  ;;  %v1024_v18 = vadd.f32 %v17097_v40, %v868_v4 }
  0x4f   : > { %v1168_v27 = vmax.f32 %v1024_v18, 0.0 }
  0x50   : > { %1520 = vmatpush1.bf16.msra.mxu0 %v16390_v61  ;;  %v1150_v61 = vmax.f32 %v1006_v52, 0.0  ;;  %v626_v52 = vld [vmem:[%s17094_s14 + $0x60] sm:$0xff] }
  0x52   : > { %v1288_v11 = vpack.c.bf16 %v1152_v62, %v1150_v61  ;;  %v715_v62 = vunpack.c.h.bf16 %v626_v52 }
  0x53   : > { %1522 = vmatmul.mubr.bf16.vlgmr.msra.gmra.mrb[0].mxu0 %v1282_v7  ;;  %v623_v7 = vld [vmem:[%s17094_s14 + $0x48] sm:$0xff] }
  0x54   : > { %1529 = vmatprep.mubr.bf16.mxu0 %v1285_v12  ;;  %v1010_v12 = vadd.f32 %v17097_v40, %v854_v63  ;;  %v709_v20 = vunpack.c.h.bf16 %v623_v7  ;;  %v708_v37 = vunpack.c.l.bf16 %v623_v7  ;;  %v717_v63 = vunpack.c.h.bf16 %v627_v53 }
  0x55   : > { %v871_v7 = vmul.f32 %v17045_v14, %v715_v62  ;;  %v727_v62 = vunpack.c.h.bf16 %v632_v55 }
  0x56   : > { %v1154_v23 = vmax.f32 %v1010_v12, 0.0  ;;  %v865_v28 = vmul.f32 %v17045_v14, %v709_v20  ;;  %v864_v47 = vmul.f32 %v17085_v36, %v708_v37  ;;  %v873_v8 = vmul.f32 %v17045_v14, %v717_v63 }
  0x57   : > { %v714_v12 = vunpack.c.l.bf16 %v626_v52  ;;  %v1028_v37 = vadd.f32 %v17097_v40, %v872_v25  ;;  %v731_v25 = vunpack.c.h.bf16 %v634_v13 }
  0x58   : > { %v1290_v34 = vpack.c.bf16 %v1156_v24, %v1154_v23  ;;  %v1021_v42 = vadd.f32 %v17048_v17, %v865_v28  ;;  %v1029_v22 = vadd.f32 %v17048_v17, %v873_v8  ;;  %v875_v28 = vmul.f32 %v17045_v14, %v719_v19 }
  0x59   : > { %v870_v24 = vmul.f32 %v17085_v36, %v714_v12  ;;  %v1172_v48 = vmax.f32 %v1028_v37, 0.0  ;;  %v883_v8 = vmul.f32 %v17045_v14, %v727_v62  ;;  %v636_v37 = vld [vmem:[%s17094_s14 + $0xb0] sm:$0xff] }
  0x5a   : > { %v1165_v50 = vmax.f32 %v1021_v42, 0.0  ;;  %v1173_v31 = vmax.f32 %v1029_v22, 0.0  ;;  %v1031_v41 = vadd.f32 %v17048_v17, %v875_v28 }
  0x5b   : > { %1530 = vmatmul.mubr.bf16.gmra.mrb[4].mxu0 %v1284_v32  ;;  %v1014_v32 = vadd.f32 %v17097_v40, %v858_v21  ;;  %v1027_v21 = vadd.f32 %v17048_v17, %v871_v7  ;;  %v1039_v22 = vadd.f32 %v17048_v17, %v883_v8  ;;  %v1885_v8 = vld [vmem:[#allocation2] sm:$0x1] }
  0x5c   : > { %1537 = vmatprep.mubr.bf16.mxu0 %v1287_v35  ;;  %v706_v35 = vunpack.c.l.bf16 %v622_v6  ;;  %v1295_v60 = vpack.c.bf16 %v1165_v50, %v1163_v49  ;;  %v874_v49 = vmul.f32 %v17085_v36, %v718_v38  ;;  %v637_v38 = vld [vmem:[%s17094_s14 + $0xb8] sm:$0xff] }
  0x5d   : > { %v1158_v44 = vmax.f32 %v1014_v32, 0.0  ;;  %v1171_v29 = vmax.f32 %v1027_v21, 0.0 }
  0x5e   : > { %v862_v46 = vmul.f32 %v17085_v36, %v706_v35  ;;  %v1026_v35 = vadd.f32 %v17097_v40, %v870_v24  ;;  %v1030_v58 = vadd.f32 %v17097_v40, %v874_v49 }
  0x5f   : > { %v1292_v54 = vpack.c.bf16 %v1160_v45, %v1158_v44  ;;  %v723_v45 = vunpack.c.h.bf16 %v630_v33 }
  0x60   : > { %v1018_v56 = vadd.f32 %v17097_v40, %v862_v46  ;;  %v1174_v4 = vmax.f32 %v1030_v58, 0.0  ;;  %v638_v58 = vld [vmem:[%s17094_s14 + $0xc0] sm:$0xff] }
  0x61   : > { %v879_v53 = vmul.f32 %v17045_v14, %v723_v45  ;;  %v735_v45 = vunpack.c.h.bf16 %v636_v37 }
  0x62   : > { %v1162_v0 = vmax.f32 %v1018_v56, 0.0  ;;  %v633_v56 = vld [vmem:[%s17094_s14 + $0x98] sm:$0xff] }
  0x63   : > { %1538 = vmatmul.mubr.bf16.gmra.mrb[8].mxu0 %v1286_v51  ;;  %v869_v51 = vmul.f32 %v17045_v14, %v713_v43  ;;  %v1299_v43 = vpack.c.bf16 %v1173_v31, %v1171_v29  ;;  %v728_v18 = vunpack.c.l.bf16 %v633_v56 }
  0x64   : > { %1545 = vmatprep.mubr.bf16.mxu0 %v1289_v57  ;;  %v1020_v57 = vadd.f32 %v17097_v40, %v864_v47  ;;  %v1170_v47 = vmax.f32 %v1026_v35, 0.0 }
  0x65   : > { %v1025_v61 = vadd.f32 %v17048_v17, %v869_v51  ;;  %v1175_v51 = vmax.f32 %v1031_v41, 0.0  ;;  %v884_v28 = vmul.f32 %v17085_v36, %v728_v18 }
  0x66   : > { %v1164_v2 = vmax.f32 %v1020_v57, 0.0  ;;  %v1298_v57 = vpack.c.bf16 %v1172_v48, %v1170_v47 }
  0x67   : > { %v1169_v6 = vmax.f32 %v1025_v61, 0.0  ;;  %v1040_v41 = vadd.f32 %v17097_v40, %v884_v28 }
  0x68   : > { %v1294_v15 = vpack.c.bf16 %v1164_v2, %v1162_v0  ;;  %v1035_v0 = vadd.f32 %v17048_v17, %v879_v53 }
  0x69   : > { %v1297_v20 = vpack.c.bf16 %v1169_v6, %v1167_v5 }
  0x6a   : > { %v1179_v9 = vmax.f32 %v1035_v0, 0.0 }
  0x6b   : > { %1546 = vmatmul.mubr.bf16.gmra.mrb[12].mxu0 %v1288_v11  ;;  %v629_v11 = vld [vmem:[%s17094_s14 + $0x78] sm:$0xff] }
  0x6c   : > { %1553 = vmatprep.mubr.bf16.mxu0 %v1291_v16  ;;  %v1022_v16 = vadd.f32 %v17097_v40, %v866_v3  ;;  %v721_v23 = vunpack.c.h.bf16 %v629_v11  ;;  %v720_v42 = vunpack.c.l.bf16 %v629_v11  ;;  %v729_v3 = vunpack.c.h.bf16 %v633_v56 }
  0x6e   : > { %v1166_v26 = vmax.f32 %v1022_v16, 0.0  ;;  %v877_v32 = vmul.f32 %v17045_v14, %v721_v23  ;;  %v876_v50 = vmul.f32 %v17085_v36, %v720_v42  ;;  %v885_v12 = vmul.f32 %v17045_v14, %v729_v3 }
  0x6f   : > { %v726_v16 = vunpack.c.l.bf16 %v632_v55  ;;  %v730_v42 = vunpack.c.l.bf16 %v634_v13  ;;  %v736_v3 = vunpack.c.l.bf16 %v637_v38  ;;  %v1886_v13 = vsel %vm17243_vm2, 0, %v1885_v8  ;;  %v645_v8 = vld [vmem:[%s17094_s14 + $0xf8] sm:$0xff] }
  0x70   : > { %v1033_v44 = vadd.f32 %v17048_v17, %v877_v32  ;;  %v1032_v59 = vadd.f32 %v17097_v40, %v876_v50  ;;  %v1041_v24 = vadd.f32 %v17048_v17, %v885_v12  ;;  %v1183_v32 = vmax.f32 %v1039_v22, 0.0  ;;  %1887 = vst [vmem:[#allocation2] sm:$0x1] %v1886_v13  ;;  %v641_v22 = vld [vmem:[%s17094_s14 + $0xd8] sm:$0xff] }
  0x72   : > { %v1177_v52 = vmax.f32 %v1033_v44, 0.0  ;;  %v1176_v5 = vmax.f32 %v1032_v59, 0.0  ;;  %v639_v59 = vld [vmem:[%s17094_s14 + $0xc8] sm:$0xff] }
  0x73   : > { %1554 = vmatmul.mubr.bf16.gmra.mrb[16].mxu0 %v1290_v34  ;;  %v631_v34 = vld [vmem:[%s17094_s14 + $0x88] sm:$0xff] }
  0x74   : > { %1561 = vmatprep.mubr.bf16.mxu0 %v1293_v39  ;;  %v1296_v39 = vpack.c.bf16 %v1168_v27, %v1166_v26  ;;  %v725_v46 = vunpack.c.h.bf16 %v631_v34  ;;  %v724_v61 = vunpack.c.l.bf16 %v631_v34  ;;  %v1301_v63 = vpack.c.bf16 %v1177_v52, %v1175_v51 }
  0x75   : > { %v1300_v19 = vpack.c.bf16 %v1176_v5, %v1174_v4  ;;  %v882_v27 = vmul.f32 %v17085_v36, %v726_v16  ;;  %v887_v34 = vmul.f32 %v17045_v14, %v731_v25  ;;  %v1184_v51 = vmax.f32 %v1040_v41, 0.0 }
  0x76   : > { %v880_v7 = vmul.f32 %v17085_v36, %v724_v61  ;;  %v886_v52 = vmul.f32 %v17085_v36, %v730_v42  ;;  %v739_v4 = vunpack.c.h.bf16 %v638_v58 }
  0x77   : > { %v1043_v48 = vadd.f32 %v17048_v17, %v887_v34 }
  0x78   : > { %v1036_v21 = vadd.f32 %v17097_v40, %v880_v7  ;;  %v1042_v61 = vadd.f32 %v17097_v40, %v886_v52 }
  0x79   : > { %v1187_v56 = vmax.f32 %v1043_v48, 0.0 }
  0x7a   : > { %v1180_v31 = vmax.f32 %v1036_v21, 0.0  ;;  %v640_v21 = vld [vmem:[%s17094_s14 + $0xd0] sm:$0xff] }
  0x7b   : > { %1562 = vmatmul.mubr.bf16.gmra.mrb[20].mxu0 %v1292_v54  ;;  %v881_v54 = vmul.f32 %v17045_v14, %v725_v46  ;;  %v737_v46 = vunpack.c.h.bf16 %v637_v38  ;;  %v743_v28 = vunpack.c.h.bf16 %v640_v21  ;;  %v742_v48 = vunpack.c.l.bf16 %v640_v21 }
  0x7c   : > { %1569 = vmatprep.mubr.bf16.mxu0 %v1295_v60  ;;  %v722_v60 = vunpack.c.l.bf16 %v630_v33  ;;  %v1185_v33 = vmax.f32 %v1041_v24, 0.0  ;;  %v753_v21 = vunpack.c.h.bf16 %v645_v8 }
  0x7d   : > { %v1037_v2 = vadd.f32 %v17048_v17, %v881_v54  ;;  %v891_v54 = vmul.f32 %v17045_v14, %v735_v45  ;;  %v893_v55 = vmul.f32 %v17045_v14, %v737_v46  ;;  %v642_v45 = vld [vmem:[%s17094_s14 + $0xe0] sm:$0xff]  ;;  %v643_v46 = vld [vmem:[%s17094_s14 + $0xe8] sm:$0xff] }
  0x7e   : > { %v878_v6 = vmul.f32 %v17085_v36, %v722_v60  ;;  %v1305_v47 = vpack.c.bf16 %v1185_v33, %v1183_v32  ;;  %v745_v33 = vunpack.c.h.bf16 %v641_v22  ;;  %v746_v13 = vunpack.c.l.bf16 %v642_v45 }
  0x7f   : > { %v1181_v11 = vmax.f32 %v1037_v2, 0.0  ;;  %v1047_v0 = vadd.f32 %v17048_v17, %v891_v54  ;;  %v1049_v2 = vadd.f32 %v17048_v17, %v893_v55 }
  0x81   : > { %v1303_v23 = vpack.c.bf16 %v1181_v11, %v1179_v9  ;;  %v1186_v9 = vmax.f32 %v1042_v61, 0.0  ;;  %v1191_v16 = vmax.f32 %v1047_v0, 0.0  ;;  %v1193_v18 = vmax.f32 %v1049_v2, 0.0  ;;  %v1888_v61 = vld [vmem:[#allocation2 + $0x14] sm:$0x1] }
  0x82   : > { %v1889_v0 = vsel %vm17243_vm2, 0, %v1888_v61 }
  0x83   : > { %1570 = vmatmul.mubr.bf16.gmra.mrb[24].mxu0 %v1294_v15  ;;  %v635_v15 = vld [vmem:[%s17094_s14 + $0xa8] sm:$0xff]  ;;  %1890 = vst [vmem:[#allocation2 + $0x14] sm:$0x1] %v1889_v0 }
  0x84   : > { %1577 = vmatprep.mubr.bf16.mxu0 %v1297_v20  ;;  %v1034_v20 = vadd.f32 %v17097_v40, %v878_v6  ;;  %v733_v26 = vunpack.c.h.bf16 %v635_v15  ;;  %v741_v6 = vunpack.c.h.bf16 %v639_v59 }
  0x86   : > { %v1178_v29 = vmax.f32 %v1034_v20, 0.0  ;;  %v889_v35 = vmul.f32 %v17045_v14, %v733_v26  ;;  %v897_v20 = vmul.f32 %v17045_v14, %v741_v6  ;;  %v738_v26 = vunpack.c.l.bf16 %v638_v58  ;;  %v644_v6 = vld [vmem:[%s17094_s14 + $0xf0] sm:$0xff] }
  0x87   : > { %v749_v58 = vunpack.c.h.bf16 %v643_v46 }
  0x88   : > { %v1302_v44 = vpack.c.bf16 %v1180_v31, %v1178_v29  ;;  %v1045_v49 = vadd.f32 %v17048_v17, %v889_v35  ;;  %v1309_v29 = vpack.c.bf16 %v1193_v18, %v1191_v16  ;;  %v1053_v32 = vadd.f32 %v17048_v17, %v897_v20 }
  0x89   : > { %v751_v16 = vunpack.c.h.bf16 %v644_v6 }
  0x8a   : > { %v1197_v42 = vmax.f32 %v1053_v32, 0.0  ;;  %v646_v32 = vld [vmem:[%s17094_s14 + $0x100] sm:$0xff] }
  0x8b   : > { %1578 = vmatmul.mubr.bf16.gmra.mrb[28].mxu0 %v1296_v39  ;;  %v1038_v39 = vadd.f32 %v17097_v40, %v882_v27  ;;  %v740_v27 = vunpack.c.l.bf16 %v639_v59  ;;  %v898_v59 = vmul.f32 %v17085_v36, %v742_v48 }
  0x8c   : > { %1585 = vmatprep.mubr.bf16.mxu0 %v1299_v43  ;;  %v732_v43 = vunpack.c.l.bf16 %v635_v15  ;;  %v892_v15 = vmul.f32 %v17085_v36, %v736_v3 }
  0x8d   : > { %v1182_v50 = vmax.f32 %v1038_v39, 0.0  ;;  %v896_v38 = vmul.f32 %v17085_v36, %v740_v27  ;;  %v899_v39 = vmul.f32 %v17045_v14, %v743_v28 }
  0x8e   : > { %v888_v53 = vmul.f32 %v17085_v36, %v732_v43  ;;  %v1048_v25 = vadd.f32 %v17097_v40, %v892_v15  ;;  %v901_v43 = vmul.f32 %v17045_v14, %v745_v33  ;;  %v748_v15 = vunpack.c.l.bf16 %v643_v46  ;;  %v647_v33 = vld [vmem:[%s17094_s14 + $0x108] sm:$0xff] }
  0x8f   : > { %v1304_v60 = vpack.c.bf16 %v1184_v51, %v1182_v50  ;;  %v1055_v54 = vadd.f32 %v17048_v17, %v899_v39  ;;  %v757_v46 = vunpack.c.h.bf16 %v647_v33  ;;  %v756_v61 = vunpack.c.l.bf16 %v647_v33 }
  0x90   : > { %v1044_v62 = vadd.f32 %v17097_v40, %v888_v53  ;;  %v1192_v35 = vmax.f32 %v1048_v25, 0.0  ;;  %v1052_v53 = vadd.f32 %v17097_v40, %v896_v38  ;;  %v904_v25 = vmul.f32 %v17085_v36, %v748_v15 }
  0x91   : > { %v1199_v2 = vmax.f32 %v1055_v54, 0.0 }
  0x92   : > { %v1188_v11 = vmax.f32 %v1044_v62, 0.0  ;;  %v1060_v39 = vadd.f32 %v17097_v40, %v904_v25 }
  0x93   : > { %1586 = vmatmul.mubr.bf16.gmra.mrb[32].mxu0 %v1298_v57  ;;  %v1189_v57 = vmax.f32 %v1045_v49, 0.0  ;;  %v744_v49 = vunpack.c.l.bf16 %v641_v22 }
  0x94   : > { %1593 = vmatprep.mubr.bf16.mxu0 %v1301_v63  ;;  %v734_v63 = vunpack.c.l.bf16 %v636_v37  ;;  %v894_v37 = vmul.f32 %v17085_v36, %v738_v26  ;;  %v907_v26 = vmul.f32 %v17045_v14, %v751_v16 }
  0x95   : > { %v1307_v5 = vpack.c.bf16 %v1189_v57, %v1187_v56  ;;  %v1057_v56 = vadd.f32 %v17048_v17, %v901_v43  ;;  %v747_v57 = vunpack.c.h.bf16 %v642_v45  ;;  %v755_v45 = vunpack.c.h.bf16 %v646_v32 }
  0x96   : > { %v890_v12 = vmul.f32 %v17085_v36, %v734_v63  ;;  %v1050_v52 = vadd.f32 %v17097_v40, %v894_v37  ;;  %v1196_v63 = vmax.f32 %v1052_v53, 0.0  ;;  %v750_v37 = vunpack.c.l.bf16 %v644_v6 }
  0x97   : > { %v1201_v3 = vmax.f32 %v1057_v56, 0.0  ;;  %v911_v56 = vmul.f32 %v17045_v14, %v755_v45 }
  0x98   : > { %v1046_v24 = vadd.f32 %v17097_v40, %v890_v12  ;;  %v1194_v62 = vmax.f32 %v1050_v52, 0.0  ;;  %v906_v48 = vmul.f32 %v17085_v36, %v750_v37 }
  0x99   : > { %v1313_v18 = vpack.c.bf16 %v1201_v3, %v1199_v2 }
  0x9a   : > { %v1190_v34 = vmax.f32 %v1046_v24, 0.0  ;;  %v1310_v12 = vpack.c.bf16 %v1196_v63, %v1194_v62  ;;  %v902_v24 = vmul.f32 %v17085_v36, %v746_v13  ;;  %v1062_v63 = vadd.f32 %v17097_v40, %v906_v48  ;;  %v653_v48 = vld [vmem:[%s17094_s14 + $0x138] sm:$0xff] }
  0x9b   : > { %1594 = vmatmul.mubr.bf16.gmra.mrb[36].mxu0 %v1300_v19  ;;  %v895_v19 = vmul.f32 %v17045_v14, %v739_v4  ;;  %v903_v4 = vmul.f32 %v17045_v14, %v747_v57  ;;  %v913_v57 = vmul.f32 %v17045_v14, %v757_v46  ;;  %v652_v46 = vld [vmem:[%s17094_s14 + $0x130] sm:$0xff] }
  0x9c   : > { %1601 = vmatprep.mubr.bf16.mxu0 %v1303_v23  ;;  %v1306_v23 = vpack.c.bf16 %v1188_v11, %v1186_v9  ;;  %v1308_v51 = vpack.c.bf16 %v1192_v35, %v1190_v34  ;;  %v1054_v9 = vadd.f32 %v17097_v40, %v898_v59  ;;  %v1058_v38 = vadd.f32 %v17097_v40, %v902_v24  ;;  %v649_v59 = vld [vmem:[%s17094_s14 + $0x118] sm:$0xff] }
  0x9d   : > { %v1051_v31 = vadd.f32 %v17048_v17, %v895_v19  ;;  %v1059_v19 = vadd.f32 %v17048_v17, %v903_v4  ;;  %v1067_v4 = vadd.f32 %v17048_v17, %v911_v56  ;;  %v761_v6 = vunpack.c.h.bf16 %v649_v59 }
  0x9e   : > { %v1198_v22 = vmax.f32 %v1054_v9, 0.0  ;;  %v912_v9 = vmul.f32 %v17085_v36, %v756_v61 }
  0x9f   : > { %v1195_v41 = vmax.f32 %v1051_v31, 0.0  ;;  %v1203_v27 = vmax.f32 %v1059_v19, 0.0  ;;  %v1944_v31 = vld [vmem:[#allocation2 + $0x24] sm:$0x1]  ;;  %v1211_v15 = vmax.f32 %v1067_v4, 0.0 }
  0xa0   : > { %v1945_v34 = vsel %vm17267_vm4, 0, %v1944_v31  ;;  %v1947_v19 = vld [vmem:[#allocation2 + $0x38] sm:$0x1]  ;;  %v1068_v24 = vadd.f32 %v17097_v40, %v912_v9  ;;  %v1950_v4 = vld [vmem:[#allocation2 + $0x4c] sm:$0x1]  ;;  %v766_v9 = vunpack.c.l.bf16 %v652_v46 }
  0xa1   : > { %v1311_v55 = vpack.c.bf16 %v1197_v42, %v1195_v41  ;;  %1946 = vst [vmem:[#allocation2 + $0x24] sm:$0x1] %v1945_v34  ;;  %v1063_v41 = vadd.f32 %v17048_v17, %v907_v26  ;;  %v752_v42 = vunpack.c.l.bf16 %v645_v8 }
  0xa3   : > { %1602 = vmatmul.mubr.bf16.gmra.mrb[40].mxu0 %v1302_v44  ;;  %v1941_v44 = vld [vmem:[#allocation2 + $0x10] sm:$0x1]  ;;  %v908_v52 = vmul.f32 %v17085_v36, %v752_v42  ;;  %v1207_v54 = vmax.f32 %v1063_v41, 0.0 }
  0xa4   : > { %1609 = vmatprep.mubr.bf16.mxu0 %v1305_v47  ;;  %v1942_v50 = vsel %vm17267_vm4, 0, %v1941_v44 }
  0xa5   : > { %1943 = vst [vmem:[#allocation2 + $0x10] sm:$0x1] %v1942_v50  ;;  %v1202_v50 = vmax.f32 %v1058_v38, 0.0  ;;  %v1064_v0 = vadd.f32 %v17097_v40, %v908_v52  ;;  %v1894_v38 = vld [vmem:[#allocation2 + $0x3c] sm:$0x1] }
  0xa6   : > { %v1895_v41 = vsel %vm17243_vm2, 0, %v1894_v38 }
  0xa7   : > { %1896 = vst [vmem:[#allocation2 + $0x3c] sm:$0x1] %v1895_v41 }
  0xab   : > { %1610 = vmatmul.mubr.bf16.gmra.mrb[44].mxu0 %v1304_v60  ;;  %v900_v60 = vmul.f32 %v17085_v36, %v744_v49  ;;  %v1891_v49 = vld [vmem:[#allocation2 + $0x28] sm:$0x1] }
  0xac   : > { %1617 = vmatprep.mubr.bf16.mxu0 %v1307_v5  ;;  %v905_v5 = vmul.f32 %v17045_v14, %v749_v58  ;;  %v1892_v53 = vsel %vm17243_vm2, 0, %v1891_v49  ;;  %v648_v58 = vld [vmem:[%s17094_s14 + $0x110] sm:$0xff] }
  0xad   : > { %v1056_v11 = vadd.f32 %v17097_v40, %v900_v60  ;;  %1893 = vst [vmem:[#allocation2 + $0x28] sm:$0x1] %v1892_v53  ;;  %v754_v60 = vunpack.c.l.bf16 %v646_v32  ;;  %v759_v2 = vunpack.c.h.bf16 %v648_v58  ;;  %v758_v25 = vunpack.c.l.bf16 %v648_v58 }
  0xae   : > { %v1061_v20 = vadd.f32 %v17048_v17, %v905_v5  ;;  %v1069_v5 = vadd.f32 %v17048_v17, %v913_v57  ;;  %v769_v58 = vunpack.c.h.bf16 %v653_v48 }
  0xaf   : > { %v910_v8 = vmul.f32 %v17085_v36, %v754_v60  ;;  %v915_v13 = vmul.f32 %v17045_v14, %v759_v2  ;;  %v914_v37 = vmul.f32 %v17085_v36, %v758_v25 }
  0xb0   : > { %v1205_v28 = vmax.f32 %v1061_v20, 0.0  ;;  %v1213_v16 = vmax.f32 %v1069_v5, 0.0  ;;  %v650_v20 = vld [vmem:[%s17094_s14 + $0x120] sm:$0xff] }
  0xb1   : > { %v763_v32 = vunpack.c.h.bf16 %v650_v20  ;;  %v762_v52 = vunpack.c.l.bf16 %v650_v20  ;;  %v654_v5 = vld [vmem:[%s17094_s14 + $0x140] sm:$0xff] }
  0xb2   : > { %v1315_v43 = vpack.c.bf16 %v1205_v28, %v1203_v27  ;;  %v1071_v27 = vadd.f32 %v17048_v17, %v915_v13  ;;  %v760_v28 = vunpack.c.l.bf16 %v649_v59  ;;  %v771_v20 = vunpack.c.h.bf16 %v654_v5 }
  0xb3   : > { %1618 = vmatmul.mubr.bf16.gmra.mrb[48].mxu0 %v1306_v23  ;;  %v1200_v23 = vmax.f32 %v1056_v11, 0.0  ;;  %v1206_v11 = vmax.f32 %v1062_v63, 0.0  ;;  %v918_v61 = vmul.f32 %v17085_v36, %v762_v52 }
  0xb4   : > { %1625 = vmatprep.mubr.bf16.mxu0 %v1309_v29  ;;  %v909_v29 = vmul.f32 %v17045_v14, %v753_v21  ;;  %v651_v21 = vld [vmem:[%s17094_s14 + $0x128] sm:$0xff]  ;;  %v1215_v42 = vmax.f32 %v1071_v27, 0.0 }
  0xb5   : > { %v1312_v35 = vpack.c.bf16 %v1200_v23, %v1198_v22  ;;  %v1948_v22 = vsel %vm17267_vm4, 0, %v1947_v19  ;;  %v1066_v23 = vadd.f32 %v17097_v40, %v910_v8  ;;  %v765_v33 = vunpack.c.h.bf16 %v651_v21 }
  0xb6   : > { %v1065_v44 = vadd.f32 %v17048_v17, %v909_v29  ;;  %1949 = vst [vmem:[#allocation2 + $0x38] sm:$0x1] %v1948_v22  ;;  %v1319_v29 = vpack.c.bf16 %v1213_v16, %v1211_v15  ;;  %v764_v53 = vunpack.c.l.bf16 %v651_v21  ;;  %v1951_v8 = vsel %vm17267_vm4, 0, %v1950_v4 }
  0xb7   : > { %v1210_v34 = vmax.f32 %v1066_v23, 0.0  ;;  %v921_v45 = vmul.f32 %v17045_v14, %v765_v33  ;;  %1952 = vst [vmem:[#allocation2 + $0x4c] sm:$0x1] %v1951_v8  ;;  %v1074_v13 = vadd.f32 %v17097_v40, %v918_v61  ;;  %v922_v22 = vmul.f32 %v17085_v36, %v766_v9  ;;  %v656_v33 = vld [vmem:[%s17094_s14 + $0x150] sm:$0xff]  ;;  %v1900_v9 = vld [vmem:[#allocation2 + $0x64] sm:$0x1] }
  0xb8   : > { %v774_v61 = vunpack.c.l.bf16 %v656_v33 }
  0xb9   : > { %v1077_v57 = vadd.f32 %v17048_v17, %v921_v45  ;;  %v1218_v25 = vmax.f32 %v1074_v13, 0.0 }
  0xba   : > { %v930_v8 = vmul.f32 %v17085_v36, %v774_v61 }
  0xbb   : > { %1626 = vmatmul.mubr.bf16.gmra.mrb[52].mxu0 %v1308_v51  ;;  %v1204_v51 = vmax.f32 %v1060_v39, 0.0  ;;  %v916_v39 = vmul.f32 %v17085_v36, %v760_v28  ;;  %v1221_v2 = vmax.f32 %v1077_v57, 0.0  ;;  %v658_v57 = vld [vmem:[%s17094_s14 + $0x160] sm:$0xff] }
  0xbc   : > { %1633 = vmatprep.mubr.bf16.mxu0 %v1311_v55  ;;  %v1209_v55 = vmax.f32 %v1065_v44, 0.0  ;;  %v919_v44 = vmul.f32 %v17045_v14, %v763_v32 }
  0xbd   : > { %v1314_v62 = vpack.c.bf16 %v1204_v51, %v1202_v50  ;;  %v1070_v50 = vadd.f32 %v17097_v40, %v914_v37  ;;  %v1072_v51 = vadd.f32 %v17097_v40, %v916_v39  ;;  %v770_v39 = vunpack.c.l.bf16 %v654_v5 }
  0xbe   : > { %v1317_v3 = vpack.c.bf16 %v1209_v55, %v1207_v54  ;;  %v767_v54 = vunpack.c.h.bf16 %v652_v46  ;;  %v1075_v56 = vadd.f32 %v17048_v17, %v919_v44  ;;  %v779_v5 = vunpack.c.h.bf16 %v658_v57 }
  0xbf   : > { %v1214_v59 = vmax.f32 %v1070_v50, 0.0  ;;  %v1216_v60 = vmax.f32 %v1072_v51, 0.0  ;;  %v926_v50 = vmul.f32 %v17085_v36, %v770_v39 }
  0xc0   : > { %v923_v63 = vmul.f32 %v17045_v14, %v767_v54 }
  0xc2   : > { %v1079_v16 = vadd.f32 %v17048_v17, %v923_v63 }
  0xc3   : > { %1634 = vmatmul.mubr.bf16.gmra.mrb[56].mxu0 %v1310_v12  ;;  %v1208_v12 = vmax.f32 %v1064_v0, 0.0  ;;  %v1219_v0 = vmax.f32 %v1075_v56, 0.0  ;;  %v1953_v56 = vld [vmem:[#allocation2 + $0x60] sm:$0x1] }
  0xc4   : > { %1641 = vmatprep.mubr.bf16.mxu0 %v1313_v18  ;;  %v917_v18 = vmul.f32 %v17045_v14, %v761_v6  ;;  %v655_v6 = vld [vmem:[%s17094_s14 + $0x148] sm:$0xff]  ;;  %v1223_v28 = vmax.f32 %v1079_v16, 0.0  ;;  %v1901_v16 = vsel %vm17243_vm2, 0, %v1900_v9  ;;  %v664_v9 = vld [vmem:[%s17094_s14 + $0x190] sm:$0xff] }
  0xc5   : > { %v1316_v26 = vpack.c.bf16 %v1208_v12, %v1206_v11  ;;  %v768_v11 = vunpack.c.l.bf16 %v653_v48  ;;  %v1320_v12 = vpack.c.bf16 %v1216_v60, %v1214_v59  ;;  %v773_v21 = vunpack.c.h.bf16 %v655_v6  ;;  %1902 = vst [vmem:[#allocation2 + $0x64] sm:$0x1] %v1901_v16 }
  0xc6   : > { %v1073_v31 = vadd.f32 %v17048_v17, %v917_v18  ;;  %v1323_v18 = vpack.c.bf16 %v1221_v2, %v1219_v0  ;;  %v772_v41 = vunpack.c.l.bf16 %v655_v6  ;;  %v1954_v59 = vsel %vm17267_vm4, 0, %v1953_v56 }
  0xc7   : > { %v924_v23 = vmul.f32 %v17085_v36, %v768_v11  ;;  %v929_v32 = vmul.f32 %v17045_v14, %v773_v21  ;;  %1955 = vst [vmem:[#allocation2 + $0x60] sm:$0x1] %v1954_v59 }
  0xc8   : > { %v928_v51 = vmul.f32 %v17085_v36, %v772_v41 }
  0xc9   : > { %v1080_v37 = vadd.f32 %v17097_v40, %v924_v23  ;;  %v1085_v45 = vadd.f32 %v17048_v17, %v929_v32  ;;  %v778_v23 = vunpack.c.l.bf16 %v658_v57 }
  0xca   : > { %v1084_v63 = vadd.f32 %v17097_v40, %v928_v51 }
  0xcb   : > { %1642 = vmatmul.mubr.bf16.gmra.mrb[60].mxu0 %v1312_v35  ;;  %v1212_v35 = vmax.f32 %v1068_v24, 0.0  ;;  %v1897_v24 = vld [vmem:[#allocation2 + $0x50] sm:$0x1]  ;;  %v1229_v54 = vmax.f32 %v1085_v45, 0.0  ;;  %v662_v45 = vld [vmem:[%s17094_s14 + $0x180] sm:$0xff] }
  0xcc   : > { %1649 = vmatprep.mubr.bf16.mxu0 %v1315_v43  ;;  %v1217_v43 = vmax.f32 %v1073_v31, 0.0  ;;  %v1898_v27 = vsel %vm17243_vm2, 0, %v1897_v24  ;;  %v927_v31 = vmul.f32 %v17045_v14, %v771_v20  ;;  %v935_v20 = vmul.f32 %v17045_v14, %v779_v5 }
  0xcd   : > { %v1318_v49 = vpack.c.bf16 %v1212_v35, %v1210_v34  ;;  %1899 = vst [vmem:[#allocation2 + $0x50] sm:$0x1] %v1898_v27  ;;  %v657_v34 = vld [vmem:[%s17094_s14 + $0x158] sm:$0xff]  ;;  %v1078_v35 = vadd.f32 %v17097_v40, %v922_v22  ;;  %v1086_v27 = vadd.f32 %v17097_v40, %v930_v8  ;;  %v787_v57 = vunpack.c.h.bf16 %v662_v45 }
  0xce   : > { %v1321_v55 = vpack.c.bf16 %v1217_v43, %v1215_v42  ;;  %v775_v42 = vunpack.c.h.bf16 %v656_v33  ;;  %v1083_v44 = vadd.f32 %v17048_v17, %v927_v31  ;;  %v777_v46 = vunpack.c.h.bf16 %v657_v34  ;;  %v661_v22 = vld [vmem:[%s17094_s14 + $0x178] sm:$0xff] }
  0xcf   : > { %v1222_v48 = vmax.f32 %v1078_v35, 0.0  ;;  %v776_v2 = vunpack.c.l.bf16 %v657_v34  ;;  %v1091_v32 = vadd.f32 %v17048_v17, %v935_v20  ;;  %v934_v34 = vmul.f32 %v17085_v36, %v778_v23 }
  0xd0   : > { %v931_v52 = vmul.f32 %v17045_v14, %v775_v42  ;;  %v943_v5 = vmul.f32 %v17045_v14, %v787_v57 }
  0xd1   : > { %v932_v13 = vmul.f32 %v17085_v36, %v776_v2  ;;  %v1235_v42 = vmax.f32 %v1091_v32, 0.0 }
  0xd2   : > { %v1087_v0 = vadd.f32 %v17048_v17, %v931_v52 }
  0xd3   : > { %1650 = vmatmul.mubr.bf16.gmra.mrb[64].mxu0 %v1314_v62  ;;  %v920_v62 = vmul.f32 %v17085_v36, %v764_v53  ;;  %v1227_v53 = vmax.f32 %v1083_v44, 0.0  ;;  %v1956_v44 = vld [vmem:[#allocation2 + $0x74] sm:$0x1] }
  0xd4   : > { %1657 = vmatprep.mubr.bf16.mxu0 %v1317_v3  ;;  %v925_v3 = vmul.f32 %v17045_v14, %v769_v58  ;;  %v659_v58 = vld [vmem:[%s17094_s14 + $0x168] sm:$0xff] }
  0xd5   : > { %v1076_v15 = vadd.f32 %v17097_v40, %v920_v62  ;;  %v1082_v62 = vadd.f32 %v17097_v40, %v926_v50  ;;  %v781_v6 = vunpack.c.h.bf16 %v659_v58  ;;  %v780_v24 = vunpack.c.l.bf16 %v659_v58 }
  0xd6   : > { %v1081_v19 = vadd.f32 %v17048_v17, %v925_v3  ;;  %v1327_v3 = vpack.c.bf16 %v1229_v54, %v1227_v53 }
  0xd7   : > { %v1226_v11 = vmax.f32 %v1082_v62, 0.0  ;;  %v937_v21 = vmul.f32 %v17045_v14, %v781_v6  ;;  %v936_v35 = vmul.f32 %v17085_v36, %v780_v24  ;;  %v790_v24 = vunpack.c.l.bf16 %v664_v9 }
  0xd9   : > { %v1093_v33 = vadd.f32 %v17048_v17, %v937_v21  ;;  %v1092_v50 = vadd.f32 %v17097_v40, %v936_v35  ;;  %v791_v21 = vunpack.c.h.bf16 %v664_v9 }
  0xdb   : > { %1658 = vmatmul.mubr.bf16.gmra.mrb[68].mxu0 %v1316_v26  ;;  %v1220_v26 = vmax.f32 %v1076_v15, 0.0  ;;  %v660_v15 = vld [vmem:[%s17094_s14 + $0x170] sm:$0xff] }
  0xdc   : > { %1665 = vmatprep.mubr.bf16.mxu0 %v1319_v29  ;;  %v1225_v29 = vmax.f32 %v1081_v19, 0.0  ;;  %v782_v52 = vunpack.c.l.bf16 %v660_v15 }
  0xdd   : > { %v1322_v38 = vpack.c.bf16 %v1220_v26, %v1218_v25  ;;  %v783_v25 = vunpack.c.h.bf16 %v660_v15 }
  0xde   : > { %v1325_v43 = vpack.c.bf16 %v1225_v29, %v1223_v28  ;;  %v1088_v28 = vadd.f32 %v17097_v40, %v932_v13  ;;  %v785_v29 = vunpack.c.h.bf16 %v661_v22  ;;  %v938_v62 = vmul.f32 %v17085_v36, %v782_v52 }
  0xe0   : > { %v1232_v39 = vmax.f32 %v1088_v28, 0.0  ;;  %v941_v41 = vmul.f32 %v17045_v14, %v785_v29  ;;  %v666_v29 = vld [vmem:[%s17094_s14 + $0x1a0] sm:$0xff] }
  0xe2   : > { %v1097_v54 = vadd.f32 %v17048_v17, %v941_v41 }
  0xe3   : > { %1666 = vmatmul.mubr.bf16.gmra.mrb[72].mxu0 %v1318_v49  ;;  %v1224_v49 = vmax.f32 %v1080_v37, 0.0  ;;  %v939_v37 = vmul.f32 %v17045_v14, %v783_v25 }
  0xe4   : > { %1673 = vmatprep.mubr.bf16.mxu0 %v1321_v55  ;;  %v933_v55 = vmul.f32 %v17045_v14, %v777_v46  ;;  %v663_v46 = vld [vmem:[%s17094_s14 + $0x188] sm:$0xff] }
  0xe5   : > { %v1324_v60 = vpack.c.bf16 %v1224_v49, %v1222_v48  ;;  %v1957_v48 = vsel %vm17267_vm4, 0, %v1956_v44  ;;  %v1090_v49 = vadd.f32 %v17097_v40, %v934_v34  ;;  %v1095_v51 = vadd.f32 %v17048_v17, %v939_v37  ;;  %v1959_v37 = vld [vmem:[#allocation2 + $0x88] sm:$0x1] }
  0xe6   : > { %v1089_v4 = vadd.f32 %v17048_v17, %v933_v55  ;;  %1958 = vst [vmem:[#allocation2 + $0x74] sm:$0x1] %v1957_v48  ;;  %v784_v55 = vunpack.c.l.bf16 %v661_v22  ;;  %v789_v58 = vunpack.c.h.bf16 %v663_v46  ;;  %v788_v8 = vunpack.c.l.bf16 %v663_v46  ;;  %v668_v48 = vld [vmem:[%s17094_s14 + $0x1b0] sm:$0xff] }
  0xe7   : > { %v1234_v59 = vmax.f32 %v1090_v49, 0.0  ;;  %v1239_v61 = vmax.f32 %v1095_v51, 0.0  ;;  %v947_v34 = vmul.f32 %v17045_v14, %v791_v21 }
  0xe8   : > { %v1233_v19 = vmax.f32 %v1089_v4, 0.0  ;;  %v940_v2 = vmul.f32 %v17085_v36, %v784_v55  ;;  %v945_v6 = vmul.f32 %v17045_v14, %v789_v58  ;;  %v944_v23 = vmul.f32 %v17085_v36, %v788_v8 }
  0xea   : > { %v1096_v16 = vadd.f32 %v17097_v40, %v940_v2  ;;  %v1101_v20 = vadd.f32 %v17048_v17, %v945_v6 }
  0xeb   : > { %1674 = vmatmul.mubr.bf16.gmra.mrb[76].mxu0 %v1320_v12  ;;  %v1228_v12 = vmax.f32 %v1084_v63, 0.0  ;;  %v1903_v63 = vld [vmem:[#allocation2 + $0x78] sm:$0x1] }
  0xec   : > { %1681 = vmatprep.mubr.bf16.mxu0 %v1323_v18  ;;  %v1231_v18 = vmax.f32 %v1087_v0, 0.0  ;;  %v1241_v0 = vmax.f32 %v1097_v54, 0.0  ;;  %v1904_v4 = vsel %vm17243_vm2, 0, %v1903_v63  ;;  %v671_v63 = vld [vmem:[%s17094_s14 + $0x1c8] sm:$0xff] }
  0xed   : > { %v1326_v26 = vpack.c.bf16 %v1228_v12, %v1226_v11  ;;  %1905 = vst [vmem:[#allocation2 + $0x78] sm:$0x1] %v1904_v4  ;;  %v665_v11 = vld [vmem:[%s17094_s14 + $0x198] sm:$0xff]  ;;  %v1094_v12 = vadd.f32 %v17097_v40, %v938_v62  ;;  %v670_v62 = vld [vmem:[%s17094_s14 + $0x1c0] sm:$0xff] }
  0xee   : > { %v1329_v31 = vpack.c.bf16 %v1233_v19, %v1231_v18  ;;  %v1333_v15 = vpack.c.bf16 %v1241_v0, %v1239_v61  ;;  %v1099_v19 = vadd.f32 %v17048_v17, %v943_v5  ;;  %v793_v22 = vunpack.c.h.bf16 %v665_v11  ;;  %v1906_v0 = vld [vmem:[#allocation2 + $0x8c] sm:$0x1] }
  0xef   : > { %v792_v25 = vunpack.c.l.bf16 %v665_v11  ;;  %v799_v61 = vunpack.c.h.bf16 %v668_v48  ;;  %v1907_v5 = vsel %vm17243_vm2, 0, %v1906_v0 }
  0xf0   : > { %v1243_v32 = vmax.f32 %v1099_v19, 0.0  ;;  %v949_v35 = vmul.f32 %v17045_v14, %v793_v22  ;;  %1908 = vst [vmem:[#allocation2 + $0x8c] sm:$0x1] %v1907_v5 }
  0xf1   : > { %v948_v41 = vmul.f32 %v17085_v36, %v792_v25 }
  0xf2   : > { %v1105_v51 = vadd.f32 %v17048_v17, %v949_v35 }
  0xf3   : > { %1682 = vmatmul.mubr.bf16.gmra.mrb[80].mxu0 %v1322_v38  ;;  %v1230_v38 = vmax.f32 %v1086_v27, 0.0  ;;  %v1240_v27 = vmax.f32 %v1096_v16, 0.0  ;;  %v1104_v57 = vadd.f32 %v17097_v40, %v948_v41 }
  0xf4   : > { %1689 = vmatprep.mubr.bf16.mxu0 %v1325_v43  ;;  %v1237_v43 = vmax.f32 %v1093_v33, 0.0  ;;  %v1245_v33 = vmax.f32 %v1101_v20, 0.0  ;;  %v1249_v8 = vmax.f32 %v1105_v51, 0.0  ;;  %v955_v20 = vmul.f32 %v17045_v14, %v799_v61 }
  0xf5   : > { %v1328_v53 = vpack.c.bf16 %v1232_v39, %v1230_v38  ;;  %v1100_v38 = vadd.f32 %v17097_v40, %v944_v23  ;;  %v946_v39 = vmul.f32 %v17085_v36, %v790_v24  ;;  %v1248_v16 = vmax.f32 %v1104_v57, 0.0 }
  0xf6   : > { %v1331_v56 = vpack.c.bf16 %v1237_v43, %v1235_v42  ;;  %v1960_v42 = vsel %vm17267_vm4, 0, %v1959_v37  ;;  %v795_v43 = vunpack.c.h.bf16 %v666_v29  ;;  %v1335_v49 = vpack.c.bf16 %v1245_v33, %v1243_v32  ;;  %v672_v32 = vld [vmem:[%s17094_s14 + $0x1d0] sm:$0xff] }
  0xf7   : > { %1961 = vst [vmem:[#allocation2 + $0x88] sm:$0x1] %v1960_v42  ;;  %v1244_v55 = vmax.f32 %v1100_v38, 0.0  ;;  %v1111_v37 = vadd.f32 %v17048_v17, %v955_v20 }
  0xf8   : > { %v951_v58 = vmul.f32 %v17045_v14, %v795_v43  ;;  %v673_v43 = vld [vmem:[%s17094_s14 + $0x1d8] sm:$0xff] }
  0xf9   : > { %v809_v57 = vunpack.c.h.bf16 %v673_v43  ;;  %v808_v5 = vunpack.c.l.bf16 %v673_v43 }
  0xfb   : > { %1690 = vmatmul.mubr.bf16.gmra.mrb[84].mxu0 %v1324_v60  ;;  %v1236_v60 = vmax.f32 %v1092_v50, 0.0  ;;  %v1103_v50 = vadd.f32 %v17048_v17, %v947_v34 }
  0xfc   : > { %1697 = vmatprep.mubr.bf16.mxu0 %v1327_v3  ;;  %v786_v3 = vunpack.c.l.bf16 %v662_v45  ;;  %v794_v45 = vunpack.c.l.bf16 %v666_v29 }
  0xfd   : > { %v1330_v13 = vpack.c.bf16 %v1236_v60, %v1234_v59  ;;  %v1247_v6 = vmax.f32 %v1103_v50, 0.0  ;;  %v1962_v50 = vld [vmem:[#allocation2 + $0x9c] sm:$0x1] }
  0xfe   : > { %v942_v18 = vmul.f32 %v17085_v36, %v786_v3  ;;  %v950_v60 = vmul.f32 %v17085_v36, %v794_v45  ;;  %v798_v3 = vunpack.c.l.bf16 %v668_v48 }
  0xff   : > { %v1337_v25 = vpack.c.bf16 %v1249_v8, %v1247_v6 }
 0x100   : > { %v1098_v28 = vadd.f32 %v17097_v40, %v942_v18  ;;  %v1107_v18 = vadd.f32 %v17048_v17, %v951_v58  ;;  %v1106_v21 = vadd.f32 %v17097_v40, %v950_v60  ;;  %v954_v23 = vmul.f32 %v17085_v36, %v798_v3 }
 0x101   : > { %v806_v58 = vunpack.c.l.bf16 %v672_v32 }
 0x102   : > { %v1242_v54 = vmax.f32 %v1098_v28, 0.0  ;;  %v804_v28 = vunpack.c.l.bf16 %v671_v63  ;;  %v1251_v34 = vmax.f32 %v1107_v18, 0.0  ;;  %v1250_v38 = vmax.f32 %v1106_v21, 0.0  ;;  %v1909_v18 = vld [vmem:[#allocation2 + $0xa0] sm:$0x1] }
 0x103   : > { %1698 = vmatmul.mubr.bf16.gmra.mrb[88].mxu0 %v1326_v26  ;;  %v1238_v26 = vmax.f32 %v1094_v12, 0.0  ;;  %v1110_v41 = vadd.f32 %v17097_v40, %v954_v23  ;;  %v675_v23 = vld [vmem:[%s17094_s14 + $0x1e8] sm:$0xff] }
 0x104   : > { %1705 = vmatprep.mubr.bf16.mxu0 %v1329_v31  ;;  %v667_v31 = vld [vmem:[%s17094_s14 + $0x1a8] sm:$0xff]  ;;  %v1334_v11 = vpack.c.bf16 %v1244_v55, %v1242_v54  ;;  %v960_v48 = vmul.f32 %v17085_v36, %v804_v28  ;;  %v964_v28 = vmul.f32 %v17085_v36, %v808_v5 }
 0x105   : > { %v797_v44 = vunpack.c.h.bf16 %v667_v31  ;;  %v1332_v46 = vpack.c.bf16 %v1240_v27, %v1238_v26  ;;  %v796_v52 = vunpack.c.l.bf16 %v667_v31  ;;  %v802_v27 = vunpack.c.l.bf16 %v670_v62 }
 0x106   : > { %v17467_v3 = vadd.f32 %v17097_v40, %v960_v48 }
 0x107   : > { %v953_v59 = vmul.f32 %v17045_v14, %v797_v44  ;;  %v952_v9 = vmul.f32 %v17085_v36, %v796_v52  ;;  %v17454_v44 = vld [vmem:[%s21658_s6] ss:$0 sm:$0xff] }
 0x109   : > { %v1109_v19 = vadd.f32 %v17048_v17, %v953_v59  ;;  %v1108_v26 = vadd.f32 %v17097_v40, %v952_v9 }
 0x10b   : > { %1706 = vmatmul.mubr.bf16.gmra.mrb[92].mxu0 %v1328_v53  ;;  %v669_v53 = vld [vmem:[%s17094_s14 + $0x1b8] sm:$0xff]  ;;  %v1253_v35 = vmax.f32 %v1109_v19, 0.0  ;;  %v1252_v45 = vmax.f32 %v1108_v26, 0.0 }
 0x10c   : > { %1713 = vmatprep.mubr.bf16.mxu0 %v1331_v56  ;;  %v1102_v56 = vadd.f32 %v17097_v40, %v946_v39  ;;  %v801_v2 = vunpack.c.h.bf16 %v669_v53  ;;  %v800_v4 = vunpack.c.l.bf16 %v669_v53  ;;  %v1963_v53 = vsel %vm17267_vm4, 0, %v1962_v50 }
 0x10d   : > { %v1339_v55 = vpack.c.bf16 %v1253_v35, %v1251_v34  ;;  %1964 = vst [vmem:[#allocation2 + $0x9c] sm:$0x1] %v1963_v53 }
 0x10e   : > { %v1246_v12 = vmax.f32 %v1102_v56, 0.0  ;;  %v957_v22 = vmul.f32 %v17045_v14, %v801_v2  ;;  %v956_v24 = vmul.f32 %v17085_v36, %v800_v4  ;;  %v1255_v56 = vmax.f32 %v1111_v37, 0.0 }
 0x110   : > { %v1336_v33 = vpack.c.bf16 %v1248_v16, %v1246_v12  ;;  %v1113_v39 = vadd.f32 %v17048_v17, %v957_v22  ;;  %v1112_v42 = vadd.f32 %v17097_v40, %v956_v24  ;;  %v962_v16 = vmul.f32 %v17085_v36, %v806_v58  ;;  %v674_v22 = vld [vmem:[%s17094_s14 + $0x1e0] sm:$0xff] }
 0x111   : > { %v1910_v24 = vsel %vm17243_vm2, 0, %v1909_v18  ;;  %v810_v53 = vunpack.c.l.bf16 %v674_v22 }
 0x112   : > { %v1257_v61 = vmax.f32 %v1113_v39, 0.0  ;;  %1911 = vst [vmem:[#allocation2 + $0xa0] sm:$0x1] %v1910_v24  ;;  %v17494_v37 = vadd.f32 %v17097_v40, %v962_v16  ;;  %v813_v39 = vunpack.c.h.bf16 %v675_v23 }
 0x113   : > { %1714 = vmatmul.mubr.bf16.gmra.mrb[96].mxu0 %v1330_v13  ;;  %v803_v13 = vunpack.c.h.bf16 %v670_v62  ;;  %v1254_v62 = vmax.f32 %v1110_v41, 0.0 }
 0x114   : > { %1721 = vmatprep.mubr.bf16.mxu0 %v1333_v15  ;;  %v805_v15 = vunpack.c.h.bf16 %v671_v63  ;;  %v1256_v63 = vmax.f32 %v1112_v42, 0.0  ;;  %v1341_v21 = vpack.c.bf16 %v1257_v61, %v1255_v56  ;;  %v1262_v18 = vmax.f32 %v17494_v37, 0.0 }
 0x115   : > { %v959_v29 = vmul.f32 %v17045_v14, %v803_v13  ;;  %v1338_v13 = vpack.c.bf16 %v1252_v45, %v1250_v38  ;;  %v811_v38 = vunpack.c.h.bf16 %v674_v22 }
 0x116   : > { %v961_v31 = vmul.f32 %v17045_v14, %v805_v15  ;;  %v965_v15 = vmul.f32 %v17045_v14, %v809_v57 }
 0x117   : > { %v1115_v51 = vadd.f32 %v17048_v17, %v959_v29 }
 0x118   : > { %v1117_v52 = vadd.f32 %v17048_v17, %v961_v31  ;;  %v1121_v35 = vadd.f32 %v17048_v17, %v965_v15 }
 0x11a   : > { %v1261_v12 = vmax.f32 %v1117_v52, 0.0  ;;  %v17510_v52 = vadd.f32 %v17097_v40, %v964_v28 }
 0x11b   : > { %1722 = vmatmul.mubr.bf16.gmra.mrb[100].mxu0 %v1332_v46  ;;  %v958_v46 = vmul.f32 %v17085_v36, %v802_v27 }
 0x11c   : > { %1729 = vmatprep.mubr.bf16.mxu0 %v1335_v49  ;;  %v807_v49 = vunpack.c.h.bf16 %v672_v32 }
 0x11d   : > { %v17464_v2 = vadd.f32 %v17097_v40, %v958_v46 }
 0x11e   : > { %v963_v4 = vmul.f32 %v17045_v14, %v807_v49  ;;  %v2935_v49 = vld [vmem:[#allocation2] sm:$0xf] }
 0x11f   : > { %v1258_v26 = vmax.f32 %v17464_v2, 0.0 }
 0x120   : > { %v1119_v27 = vadd.f32 %v17048_v17, %v963_v4 }
 0x123   : > { %1730 = vmatmul.mubr.bf16.gmra.mrb[104].mxu0 %v1334_v11  ;;  %v1259_v11 = vmax.f32 %v1115_v51, 0.0  ;;  %v1263_v51 = vmax.f32 %v1119_v27, 0.0 }
 0x124   : > { %1737 = vmatprep.mubr.bf16.mxu0 %v1337_v25  ;;  %v17484_v25 = vpack.c.bf16 %v1256_v63, %v1254_v62  ;;  %v1265_v62 = vmax.f32 %v1121_v35, 0.0  ;;  %v967_v63 = vmul.f32 %v17045_v14, %v811_v38 }
 0x125   : > { %v17489_v32 = vpack.c.bf16 %v1261_v12, %v1259_v11  ;;  %v1965_v12 = vld [vmem:[#allocation2 + $0xb0] sm:$0x1] }
 0x126   : > { %v1523_v54 = vpop.f32.mrb[0].mxu0  ;;  %v17538_v22 = vpack.c.bf16 %v1265_v62, %v1263_v51  ;;  %v17542_v24 = vadd.f32 %v17048_v17, %v967_v63 }
 0x127   : > { %v1524_v59 = vadd.f32 %v17454_v44, %v1523_v54  ;;  %v1525_v60 = vpop.f32.mrb[1].mxu0  ;;  %v812_v54 = vunpack.c.l.bf16 %v675_v23  ;;  %v1264_v23 = vmax.f32 %v17510_v52, 0.0 }
 0x128   : > { %v1526_v0 = vpop.f32.mrb[2].mxu0 }
 0x129   : > { %v1810_v6 = vmax.f32 %v1524_v59, 0.0  ;;  %v1527_v8 = vadd.f32 %v17454_v44, %v1526_v0  ;;  %v1528_v9 = vpop.f32.mrb[3].mxu0  ;;  %v969_v0 = vmul.f32 %v17045_v14, %v813_v39  ;;  %v968_v11 = vmul.f32 %v17085_v36, %v812_v54 }
 0x12a   : > { %v966_v9 = vmul.f32 %v17085_v36, %v810_v53 }
 0x12b   : > { %v14277_v19 = vpack.c.bf16 %v1810_v6, %v1810_v6  ;;  %v1811_v20 = vmax.f32 %v1527_v8, 0.0  ;;  %1738 = vmatmul.mubr.bf16.gmra.mrb[108].mxu0 %v1336_v33  ;;  %v1260_v33 = vmax.f32 %v17467_v3, 0.0  ;;  %v17555_v39 = vadd.f32 %v17097_v40, %v968_v11 }
 0x12c   : > { %1745 = vmatprep.mubr.bf16.mxu0 %v1339_v55  ;;  %v17552_v38 = vadd.f32 %v17097_v40, %v966_v9 }
 0x12d   : > { %v2214_v29 = vshrl.u32 %v14277_v19, 16  ;;  %v14278_v31 = vpack.c.bf16 %v1811_v20, %v1811_v20  ;;  %v2217_v42 = vshll.u32 %v14277_v19, 16  ;;  %v17526_v8 = vpack.c.bf16 %v1260_v33, %v1258_v26  ;;  %v677_v33 = vld [vmem:[%s17094_s14 + $0x1f8] sm:$0xff] }
 0x12e   : > { %v1531_v34 = vpop.f32.mrb[4].mxu0  ;;  %v1966_v19 = vsel %vm17267_vm4, 0, %v1965_v12  ;;  %v817_v53 = vunpack.c.h.bf16 %v677_v33 }
 0x12f   : > { %v2216_v41 = vrot.slane %v2214_v29, 7  ;;  %v2222_v43 = vshrl.u32 %v14278_v31, 16  ;;  %v1532_v45 = vadd.f32 %v17454_v44, %v1531_v34  ;;  %v1533_v46 = vpop.f32.mrb[5].mxu0  ;;  %v2225_v57 = vshll.u32 %v14278_v31, 16  ;;  %1967 = vst [vmem:[#allocation2 + $0xb0] sm:$0x1] %v1966_v19 }
 0x130   : > { %v1534_v50 = vpop.f32.mrb[6].mxu0  ;;  %v17546_v31 = vadd.f32 %v17048_v17, %v969_v0 }
 0x131   : > { %v2219_v55 = vor.u32 %v2217_v42, %v2216_v41  ;;  %v2224_v56 = vrot.slane %v2222_v43, 7  ;;  %v1812_v58 = vmax.f32 %v1532_v45, 0.0  ;;  %v1536_v59 = vpop.f32.mrb[7].mxu0  ;;  %v1535_v61 = vadd.f32 %v17454_v44, %v1534_v50 }
 0x132   : > { %v2220_v2 = vrot.slane %v2216_v41, 4 }
 0x133   : > { %v2936_v3 = vsel %vm17505_vm7, %v2219_v55, %v2935_v49  ;;  %v2227_v4 = vor.u32 %v2225_v57, %v2224_v56  ;;  %v14279_v5 = vpack.c.bf16 %v1812_v58, %v1812_v58  ;;  %1746 = vmatmul.mubr.bf16.gmra.mrb[112].mxu0 %v1338_v13  ;;  %v1813_v6 = vmax.f32 %v1535_v61, 0.0  ;;  %v17534_v13 = vld [vmem:[%s17094_s14 + $0x1f0] sm:$0xff] }
 0x134   : > { %2937 = vst [vmem:[#allocation2] sm:$0xf] %v2936_v3  ;;  %1753 = vmatprep.mubr.bf16.mxu0 %v1341_v21  ;;  %v815_v41 = vunpack.c.h.bf16 %v17534_v13  ;;  %v2229_v42 = vrot.slane %v2224_v56, 4  ;;  %v814_v54 = vunpack.c.l.bf16 %v17534_v13  ;;  %v1912_v55 = vld [vmem:[#allocation2 + $0xb4] sm:$0x1] }
 0x135   : > { %v2228_v15 = vsel %vm17514_vm8, %v2220_v2, %v2227_v4  ;;  %v2231_v16 = vshrl.u32 %v14279_v5, 16  ;;  %v14280_v20 = vpack.c.bf16 %v1813_v6, %v1813_v6  ;;  %v2234_v27 = vshll.u32 %v14279_v5, 16  ;;  %v2941_v58 = vld [vmem:[#allocation2 + $0x10] sm:$0x1] }
 0x136   : > { %2938 = vst [vmem:[#allocation2 + $0x4] sm:$0xf] %v2228_v15  ;;  %v1539_v21 = vpop.f32.mrb[8].mxu0  ;;  %v1913_v56 = vsel %vm17243_vm2, 0, %v1912_v55  ;;  %v816_v2 = vunpack.c.l.bf16 %v677_v33  ;;  %v1267_v5 = vmax.f32 %v17542_v24, 0.0  ;;  %v1269_v6 = vmax.f32 %v17546_v31, 0.0 }
 0x137   : > { %v2233_v26 = vrot.slane %v2231_v16, 7  ;;  %v1540_v28 = vadd.f32 %v17454_v44, %v1539_v21  ;;  %v1541_v29 = vpop.f32.mrb[9].mxu0  ;;  %v2240_v34 = vshrl.u32 %v14280_v20, 16  ;;  %v2243_v51 = vshll.u32 %v14280_v20, 16  ;;  %1914 = vst [vmem:[#allocation2 + $0xb4] sm:$0x1] %v1913_v56 }
 0x138   : > { %v1542_v35 = vpop.f32.mrb[10].mxu0  ;;  %v971_v12 = vmul.f32 %v17045_v14, %v815_v41  ;;  %v2944_v21 = vld [vmem:[#allocation2 + $0x14] sm:$0xf]  ;;  %v972_v29 = vmul.f32 %v17085_v36, %v816_v2  ;;  %v1347_v52 = vpack.c.bf16 %v1269_v6, %v1267_v5 }
 0x139   : > { %v2236_v43 = vor.u32 %v2234_v27, %v2233_v26  ;;  %v1814_v45 = vmax.f32 %v1540_v28, 0.0  ;;  %v1543_v46 = vadd.f32 %v17454_v44, %v1542_v35  ;;  %v1544_v49 = vpop.f32.mrb[11].mxu0  ;;  %v2242_v50 = vrot.slane %v2240_v34, 7 }
 0x13a   : > { %v2238_v62 = vrot.slane %v2233_v26, 4  ;;  %v1266_v26 = vmax.f32 %v17552_v38, 0.0  ;;  %v1268_v27 = vmax.f32 %v17555_v39, 0.0  ;;  %v970_v28 = vmul.f32 %v17085_v36, %v814_v54  ;;  %v1968_v54 = vld [vmem:[#allocation2 + $0xc4] sm:$0x1] }
 0x13b   : > { %v2237_v57 = vsel %vm17514_vm8, %v2229_v42, %v2236_v43  ;;  %v14281_v59 = vpack.c.bf16 %v1814_v45, %v1814_v45  ;;  %v1815_v61 = vmax.f32 %v1543_v46, 0.0  ;;  %1754 = vmatmul.mubr.bf16.gmra.mrb[116].mxu0 %v17484_v25  ;;  %v2245_v63 = vor.u32 %v2243_v51, %v2242_v50  ;;  %v678_v51 = vld [vmem:[%s17584_s29] sm:$0xff] }
 0x13c   : > { %2939 = vst [vmem:[#allocation2 + $0x8] sm:$0xf] %v2237_v57  ;;  %v2247_v0 = vrot.slane %v2242_v50, 4  ;;  %1761 = vmatprep.mubr.bf16.mxu0 %v17489_v32  ;;  %v973_v32 = vmul.f32 %v17045_v14, %v817_v53  ;;  %v1344_v39 = vpack.c.bf16 %v1264_v23, %v1262_v18  ;;  %v17592_v42 = vadd.f32 %v17048_v17, %v971_v12  ;;  %v679_v53 = vld [vmem:[%s17584_s29 + $0x8] sm:$0xff] }
 0x13d   : > { %v2249_v3 = vshrl.u32 %v14281_v59, 16  ;;  %v14282_v4 = vpack.c.bf16 %v1815_v61, %v1815_v61  ;;  %v2246_v25 = vsel %vm17514_vm8, %v2238_v62, %v2245_v63  ;;  %v2252_v16 = vshll.u32 %v14281_v59, 16 }
 0x13e   : > { %v2942_v9 = vsel %vm17243_vm2, %v2247_v0, %v2941_v58  ;;  %v1547_v11 = vpop.f32.mrb[12].mxu0  ;;  %2940 = vst [vmem:[#allocation2 + $0xc] sm:$0xf] %v2246_v25  ;;  %v17595_v43 = vadd.f32 %v17048_v17, %v973_v32  ;;  %v17603_v18 = vpack.c.bf16 %v1268_v27, %v1266_v26  ;;  %v17606_v23 = vadd.f32 %v17097_v40, %v970_v28  ;;  %v1915_v26 = vld [vmem:[#allocation2 + $0xc8] sm:$0x1] }
 0x13f   : > { %2943 = vst [vmem:[#allocation2 + $0x10] sm:$0x1] %v2942_v9  ;;  %v2251_v15 = vrot.slane %v2249_v3, 7  ;;  %v2257_v13 = vshrl.u32 %v14282_v4, 16  ;;  %v1548_v19 = vadd.f32 %v17454_v44, %v1547_v11  ;;  %v1549_v20 = vpop.f32.mrb[13].mxu0  ;;  %v2260_v34 = vshll.u32 %v14282_v4, 16 }
 0x140   : > { %v1550_v24 = vpop.f32.mrb[14].mxu0  ;;  %v17611_v58 = vadd.f32 %v17097_v40, %v972_v29  ;;  %v1271_v61 = vmax.f32 %v17592_v42, 0.0  ;;  %v819_v56 = vunpack.c.h.bf16 %v678_v51  ;;  %v821_v62 = vunpack.c.h.bf16 %v679_v53  ;;  %v2950_v28 = vld [vmem:[#allocation2 + $0x24] sm:$0x1] }
 0x141   : > { %v2254_v31 = vor.u32 %v2252_v16, %v2251_v15  ;;  %v2259_v33 = vrot.slane %v2257_v13, 7  ;;  %v1816_v35 = vmax.f32 %v1548_v19, 0.0  ;;  %v1552_v41 = vpop.f32.mrb[15].mxu0  ;;  %v1551_v38 = vadd.f32 %v17454_v44, %v1550_v24 }
 0x142   : > { %v2255_v45 = vrot.slane %v2251_v15, 4  ;;  %v1273_v4 = vmax.f32 %v17595_v43, 0.0  ;;  %v1270_v25 = vmax.f32 %v17606_v23, 0.0  ;;  %v818_v9 = vunpack.c.l.bf16 %v678_v51 }
 0x143   : > { %v2945_v46 = vsel %vm17505_vm7, %v2254_v31, %v2944_v21  ;;  %v2262_v49 = vor.u32 %v2260_v34, %v2259_v33  ;;  %v14283_v50 = vpack.c.bf16 %v1816_v35, %v1816_v35  ;;  %1762 = vmatmul.mubr.bf16.gmra.mrb[120].mxu0 %v17526_v8  ;;  %v1817_v37 = vmax.f32 %v1551_v38, 0.0 }
 0x144   : > { %2946 = vst [vmem:[#allocation2 + $0x14] sm:$0xf] %v2945_v46  ;;  %1769 = vmatprep.mubr.bf16.mxu0 %v17538_v22  ;;  %v1969_v8 = vsel %vm17267_vm4, 0, %v1968_v54  ;;  %v820_v11 = vunpack.c.l.bf16 %v679_v53  ;;  %v2264_v12 = vrot.slane %v2259_v33, 4  ;;  %v975_v21 = vmul.f32 %v17045_v14, %v819_v56  ;;  %v17625_v33 = vld [vmem:[%s17584_s29 + $0x10] sm:$0xff] }
 0x145   : > { %v2263_v55 = vsel %vm17514_vm8, %v2255_v45, %v2262_v49  ;;  %v2266_v57 = vshrl.u32 %v14283_v50, 16  ;;  %v14284_v59 = vpack.c.bf16 %v1817_v37, %v1817_v37  ;;  %1970 = vst [vmem:[#allocation2 + $0xc4] sm:$0x1] %v1969_v8  ;;  %v2269_v0 = vshll.u32 %v14283_v50, 16 }
 0x146   : > { %2947 = vst [vmem:[#allocation2 + $0x18] sm:$0xf] %v2263_v55  ;;  %v1555_v22 = vpop.f32.mrb[16].mxu0  ;;  %v977_v24 = vmul.f32 %v17045_v14, %v821_v62  ;;  %v1916_v34 = vsel %vm17243_vm2, 0, %v1915_v26  ;;  %v974_v42 = vmul.f32 %v17085_v36, %v818_v9  ;;  %v1272_v46 = vmax.f32 %v17611_v58, 0.0 }
 0x147   : > { %v2268_v63 = vrot.slane %v2266_v57, 7  ;;  %v1556_v2 = vadd.f32 %v17454_v44, %v1555_v22  ;;  %v1557_v3 = vpop.f32.mrb[17].mxu0  ;;  %v2275_v5 = vshrl.u32 %v14284_v59, 16  ;;  %v2278_v20 = vshll.u32 %v14284_v59, 16  ;;  %1917 = vst [vmem:[#allocation2 + $0xc8] sm:$0x1] %v1916_v34 }
 0x148   : > { %v1558_v6 = vpop.f32.mrb[18].mxu0  ;;  %v976_v49 = vmul.f32 %v17085_v36, %v820_v11  ;;  %v1131_v37 = vadd.f32 %v17048_v17, %v975_v21  ;;  %v2953_v59 = vld [vmem:[#allocation2 + $0x28] sm:$0xf]  ;;  %v1349_v56 = vpack.c.bf16 %v1273_v4, %v1271_v61  ;;  %v1133_v62 = vadd.f32 %v17048_v17, %v977_v24  ;;  %v1971_v26 = vld [vmem:[#allocation2 + $0xd8] sm:$0x1] }
 0x149   : > { %v2271_v32 = vor.u32 %v2269_v0, %v2268_v63  ;;  %v1818_v15 = vmax.f32 %v1556_v2, 0.0  ;;  %v1559_v16 = vadd.f32 %v17454_v44, %v1558_v6  ;;  %v1560_v13 = vpop.f32.mrb[19].mxu0  ;;  %v2277_v19 = vrot.slane %v2275_v5, 7 }
 0x14a   : > { %v2273_v35 = vrot.slane %v2268_v63, 4  ;;  %v17644_v63 = vadd.f32 %v17097_v40, %v974_v42  ;;  %v822_v24 = vunpack.c.l.bf16 %v17625_v33 }
 0x14b   : > { %v2272_v27 = vsel %vm17514_vm8, %v2264_v12, %v2271_v32  ;;  %v14285_v29 = vpack.c.bf16 %v1818_v15, %v1818_v15  ;;  %v1819_v31 = vmax.f32 %v1559_v16, 0.0  ;;  %1770 = vmatmul.mubr.bf16.gmra.mrb[124].mxu0 %v1344_v39  ;;  %v2280_v41 = vor.u32 %v2278_v20, %v2277_v19  ;;  %v17633_v39 = vld [vmem:[%s17584_s29 + $0x18] sm:$0xff] }
 0x14c   : > { %2948 = vst [vmem:[#allocation2 + $0x1c] sm:$0xf] %v2272_v27  ;;  %v2282_v38 = vrot.slane %v2277_v19, 4  ;;  %1777 = vmatprep.mubr.bf16.mxu0 %v1347_v52  ;;  %v823_v52 = vunpack.c.h.bf16 %v17625_v33  ;;  %v825_v0 = vunpack.c.h.bf16 %v17633_v39  ;;  %v1275_v12 = vmax.f32 %v1131_v37, 0.0 }
 0x14d   : > { %v2284_v43 = vshrl.u32 %v14285_v29, 16  ;;  %v14286_v45 = vpack.c.bf16 %v1819_v31, %v1819_v31  ;;  %v2281_v50 = vsel %vm17514_vm8, %v2273_v35, %v2280_v41  ;;  %v2287_v55 = vshll.u32 %v14285_v29, 16 }
 0x14e   : > { %v2951_v51 = vsel %vm17243_vm2, %v2282_v38, %v2950_v28  ;;  %v1563_v53 = vpop.f32.mrb[20].mxu0  ;;  %2949 = vst [vmem:[#allocation2 + $0x20] sm:$0xf] %v2281_v50  ;;  %v1132_v32 = vadd.f32 %v17097_v40, %v976_v49  ;;  %v979_v15 = vmul.f32 %v17045_v14, %v823_v52  ;;  %v1277_v20 = vmax.f32 %v1133_v62, 0.0 }
 0x14f   : > { %2952 = vst [vmem:[#allocation2 + $0x24] sm:$0x1] %v2951_v51  ;;  %v2286_v54 = vrot.slane %v2284_v43, 7  ;;  %v2292_v57 = vshrl.u32 %v14286_v45, 16  ;;  %v1564_v58 = vadd.f32 %v17454_v44, %v1563_v53  ;;  %v1565_v8 = vpop.f32.mrb[21].mxu0  ;;  %v2295_v5 = vshll.u32 %v14286_v45, 16 }
 0x150   : > { %v1566_v22 = vpop.f32.mrb[22].mxu0  ;;  %v981_v21 = vmul.f32 %v17045_v14, %v825_v0  ;;  %v1348_v29 = vpack.c.bf16 %v1272_v46, %v1270_v25  ;;  %v1972_v31 = vsel %vm17267_vm4, 0, %v1971_v26  ;;  %v1274_v35 = vmax.f32 %v17644_v63, 0.0  ;;  %v1918_v8 = vld [vmem:[#allocation2 + $0xdc] sm:$0x1] }
 0x151   : > { %v2289_v2 = vor.u32 %v2287_v55, %v2286_v54  ;;  %v2294_v3 = vrot.slane %v2292_v57, 7  ;;  %v1820_v6 = vmax.f32 %v1564_v58, 0.0  ;;  %v1568_v9 = vpop.f32.mrb[23].mxu0  ;;  %v1567_v11 = vadd.f32 %v17454_v44, %v1566_v22  ;;  %1973 = vst [vmem:[#allocation2 + $0xd8] sm:$0x1] %v1972_v31 }
 0x152   : > { %v2290_v61 = vrot.slane %v2286_v54, 4  ;;  %v1135_v14 = vadd.f32 %v17048_v17, %v979_v15  ;;  %v824_v33 = vunpack.c.l.bf16 %v17633_v39  ;;  %v1276_v23 = vmax.f32 %v1132_v32, 0.0  ;;  %v2959_v22 = vld [vmem:[#allocation2 + $0x38] sm:$0x1] }
 0x153   : > { %v2954_v4 = vsel %vm17505_vm7, %v2289_v2, %v2953_v59  ;;  %v2297_v16 = vor.u32 %v2295_v5, %v2294_v3  ;;  %v14287_v13 = vpack.c.bf16 %v1820_v6, %v1820_v6  ;;  %1778 = vmatmul.mubr.bf16.gmra.mrb[128].mxu0 %v17603_v18  ;;  %v1821_v19 = vmax.f32 %v1567_v11, 0.0 }
 0x154   : > { %2955 = vst [vmem:[#allocation2 + $0x28] sm:$0xf] %v2954_v4  ;;  %1785 = vmatprep.mubr.bf16.mxu0 %v1349_v56  ;;  %v1351_v46 = vpack.c.bf16 %v1277_v20, %v1275_v12  ;;  %v1137_v49 = vadd.f32 %v17048_v17, %v981_v21  ;;  %v978_v50 = vmul.f32 %v17085_v36, %v822_v24  ;;  %v2299_v51 = vrot.slane %v2294_v3, 4  ;;  %v2962_v20 = vld [vmem:[#allocation2 + $0x3c] sm:$0xf] }
 0x155   : > { %v2298_v27 = vsel %vm17514_vm8, %v2290_v61, %v2297_v16  ;;  %v2301_v28 = vshrl.u32 %v14287_v13, 16  ;;  %v14288_v18 = vpack.c.bf16 %v1821_v19, %v1821_v19  ;;  %v2304_v38 = vshll.u32 %v14287_v13, 16 }
 0x156   : > { %2956 = vst [vmem:[#allocation2 + $0x2c] sm:$0xf] %v2298_v27  ;;  %v1571_v34 = vpop.f32.mrb[24].mxu0  ;;  %v1279_v57 = vmax.f32 %v1135_v14, 0.0  ;;  %v980_v58 = vmul.f32 %v17085_v36, %v824_v33  ;;  %v1919_v62 = vsel %vm17243_vm2, 0, %v1918_v8  ;;  %v1281_v3 = vmax.f32 %v1137_v49, 0.0 }
 0x157   : > { %v2303_v41 = vrot.slane %v2301_v28, 7  ;;  %v1572_v42 = vadd.f32 %v17454_v44, %v1571_v34  ;;  %v1573_v43 = vpop.f32.mrb[25].mxu0  ;;  %v2310_v25 = vshrl.u32 %v14288_v18, 16  ;;  %v2313_v55 = vshll.u32 %v14288_v18, 16  ;;  %1920 = vst [vmem:[#allocation2 + $0xdc] sm:$0x1] %v1919_v62 }
 0x158   : > { %v1574_v45 = vpop.f32.mrb[26].mxu0  ;;  %v1350_v6 = vpack.c.bf16 %v1276_v23, %v1274_v35  ;;  %v1134_v32 = vadd.f32 %v17097_v40, %v978_v50  ;;  %v1136_v15 = vadd.f32 %v17097_v40, %v980_v58  ;;  %v1353_v24 = vpack.c.bf16 %v1281_v3, %v1279_v57  ;;  %v2968_v62 = vld [vmem:[#allocation2 + $0x4c] sm:$0x1] }
 0x159   : > { %v2306_v53 = vor.u32 %v2304_v38, %v2303_v41  ;;  %v1822_v37 = vmax.f32 %v1572_v42, 0.0  ;;  %v1575_v52 = vadd.f32 %v17454_v44, %v1574_v45  ;;  %v1576_v39 = vpop.f32.mrb[27].mxu0  ;;  %v2312_v54 = vrot.slane %v2310_v25, 7  ;;  %v1974_v42 = vld [vmem:[#allocation2 + $0xec] sm:$0x1] }
 0x15a   : > { %v2308_v63 = vrot.slane %v2303_v41, 4  ;;  %v1278_v34 = vmax.f32 %v1134_v32, 0.0  ;;  %v1280_v40 = vmax.f32 %v1136_v15, 0.0  ;;  %v1975_v25 = vsel %vm17267_vm4, 0, %v1974_v42 }
 0x15b   : > { %v2307_v59 = vsel %vm17514_vm8, %v2299_v51, %v2306_v53  ;;  %v14289_v56 = vpack.c.bf16 %v1822_v37, %v1822_v37  ;;  %v1823_v17 = vmax.f32 %v1575_v52, 0.0  ;;  %1786 = vmatmul.mubr.bf16.gmra.mrb[132].mxu0 %v1348_v29  ;;  %v2315_v0 = vor.u32 %v2313_v55, %v2312_v54  ;;  %1976 = vst [vmem:[#allocation2 + $0xec] sm:$0x1] %v1975_v25 }
 0x15c   : > { %2957 = vst [vmem:[#allocation2 + $0x30] sm:$0xf] %v2307_v59  ;;  %v2317_v2 = vrot.slane %v2312_v54, 4  ;;  %1793 = vmatprep.mubr.bf16.mxu0 %v1351_v46  ;;  %v1352_v37 = vpack.c.bf16 %v1280_v40, %v1278_v34 }
 0x15d   : > { %v2319_v5 = vshrl.u32 %v14289_v56, 16  ;;  %v14290_v36 = vpack.c.bf16 %v1823_v17, %v1823_v17  ;;  %v2316_v9 = vsel %vm17514_vm8, %v2308_v63, %v2315_v0  ;;  %v2322_v4 = vshll.u32 %v14289_v56, 16  ;;  %v1921_v56 = vld [vmem:[#allocation2 + $0xf0] sm:$0x1] }
 0x15e   : > { %v2960_v11 = vsel %vm17243_vm2, %v2317_v2, %v2959_v22  ;;  %v1579_v12 = vpop.f32.mrb[28].mxu0  ;;  %2958 = vst [vmem:[#allocation2 + $0x34] sm:$0xf] %v2316_v9  ;;  %v1922_v2 = vsel %vm17243_vm2, 0, %v1921_v56 }
 0x15f   : > { %2961 = vst [vmem:[#allocation2 + $0x38] sm:$0x1] %v2960_v11  ;;  %v2321_v61 = vrot.slane %v2319_v5, 7  ;;  %v2327_v16 = vshrl.u32 %v14290_v36, 16  ;;  %v1580_v13 = vadd.f32 %v17454_v44, %v1579_v12  ;;  %v1581_v19 = vpop.f32.mrb[29].mxu0  ;;  %v2330_v28 = vshll.u32 %v14290_v36, 16 }
 0x160   : > { %v1582_v21 = vpop.f32.mrb[30].mxu0  ;;  %1923 = vst [vmem:[#allocation2 + $0xf0] sm:$0x1] %v1922_v2  ;;  %v2971_v19 = vld [vmem:[#allocation2 + $0x50] sm:$0xf] }
 0x161   : > { %v2324_v26 = vor.u32 %v2322_v4, %v2321_v61  ;;  %v2329_v27 = vrot.slane %v2327_v16, 7  ;;  %v1824_v29 = vmax.f32 %v1580_v13, 0.0  ;;  %v1584_v31 = vpop.f32.mrb[31].mxu0  ;;  %v1583_v18 = vadd.f32 %v17454_v44, %v1582_v21 }
 0x162   : > { %v2325_v35 = vrot.slane %v2321_v61, 4 }
 0x163   : > { %v2963_v14 = vsel %vm17505_vm7, %v2324_v26, %v2962_v20  ;;  %v2332_v33 = vor.u32 %v2330_v28, %v2329_v27  ;;  %v14291_v41 = vpack.c.bf16 %v1824_v29, %v1824_v29  ;;  %1794 = vmatmul.mubr.bf16.gmra.mrb[136].mxu0 %v1350_v6  ;;  %v1825_v38 = vmax.f32 %v1583_v18, 0.0 }
 0x164   : > { %2964 = vst [vmem:[#allocation2 + $0x3c] sm:$0xf] %v2963_v14  ;;  %1801 = vmatprep.mubr.bf16.mxu0 %v1353_v24  ;;  %v2334_v54 = vrot.slane %v2329_v27, 4  ;;  %v1977_v14 = vld [vmem:[#allocation2 + $0x100] sm:$0x1] }
 0x165   : > { %v2333_v43 = vsel %vm17514_vm8, %v2325_v35, %v2332_v33  ;;  %v2336_v23 = vshrl.u32 %v14291_v41, 16  ;;  %v14292_v45 = vpack.c.bf16 %v1825_v38, %v1825_v38  ;;  %v2339_v50 = vshll.u32 %v14291_v41, 16 }
 0x166   : > { %2965 = vst [vmem:[#allocation2 + $0x40] sm:$0xf] %v2333_v43  ;;  %v1587_v46 = vpop.f32.mrb[32].mxu0  ;;  %v1978_v38 = vsel %vm17267_vm4, 0, %v1977_v14 }
 0x167   : > { %v2338_v49 = vrot.slane %v2336_v23, 7  ;;  %v1588_v51 = vadd.f32 %v17454_v44, %v1587_v46  ;;  %v1589_v53 = vpop.f32.mrb[33].mxu0  ;;  %v2345_v52 = vshrl.u32 %v14292_v45, 16  ;;  %v2348_v22 = vshll.u32 %v14292_v45, 16  ;;  %1979 = vst [vmem:[#allocation2 + $0x100] sm:$0x1] %v1978_v38 }
 0x168   : > { %v1590_v39 = vpop.f32.mrb[34].mxu0 }
 0x169   : > { %v2341_v55 = vor.u32 %v2339_v50, %v2338_v49  ;;  %v1826_v57 = vmax.f32 %v1588_v51, 0.0  ;;  %v1591_v58 = vadd.f32 %v17454_v44, %v1590_v39  ;;  %v1592_v8 = vpop.f32.mrb[35].mxu0  ;;  %v2347_v59 = vrot.slane %v2345_v52, 7 }
 0x16a   : > { %v2343_v3 = vrot.slane %v2338_v49, 4  ;;  %v2977_v8 = vld [vmem:[#allocation2 + $0x60] sm:$0x1] }
 0x16b   : > { %v2342_v17 = vsel %vm17514_vm8, %v2334_v54, %v2341_v55  ;;  %v14293_v63 = vpack.c.bf16 %v1826_v57, %v1826_v57  ;;  %v1827_v0 = vmax.f32 %v1591_v58, 0.0  ;;  %1802 = vmatmul.mubr.bf16.gmra.mrb[140].mxu0 %v1352_v37  ;;  %v2350_v5 = vor.u32 %v2348_v22, %v2347_v59  ;;  %v1924_v57 = vld [vmem:[#allocation2 + $0x104] sm:$0x1] }
 0x16c   : > { %2966 = vst [vmem:[#allocation2 + $0x44] sm:$0xf] %v2342_v17  ;;  %v2352_v36 = vrot.slane %v2347_v59, 4  ;;  %v1925_v56 = vsel %vm17243_vm2, 0, %v1924_v57 }
 0x16d   : > { %v2354_v6 = vshrl.u32 %v14293_v63, 16  ;;  %v14294_v9 = vpack.c.bf16 %v1827_v0, %v1827_v0  ;;  %v2351_v11 = vsel %vm17514_vm8, %v2343_v3, %v2350_v5  ;;  %v2357_v61 = vshll.u32 %v14293_v63, 16  ;;  %1926 = vst [vmem:[#allocation2 + $0x104] sm:$0x1] %v1925_v56 }
 0x16e   : > { %v2969_v12 = vsel %vm17243_vm2, %v2352_v36, %v2968_v62  ;;  %v1595_v32 = vpop.f32.mrb[36].mxu0  ;;  %2967 = vst [vmem:[#allocation2 + $0x48] sm:$0xf] %v2351_v11 }
 0x16f   : > { %2970 = vst [vmem:[#allocation2 + $0x4c] sm:$0x1] %v2969_v12  ;;  %v2356_v15 = vrot.slane %v2354_v6, 7  ;;  %v2362_v4 = vshrl.u32 %v14294_v9, 16  ;;  %v1596_v16 = vadd.f32 %v17454_v44, %v1595_v32  ;;  %v1597_v13 = vpop.f32.mrb[37].mxu0  ;;  %v2365_v26 = vshll.u32 %v14294_v9, 16 }
 0x170   : > { %v1598_v20 = vpop.f32.mrb[38].mxu0 }
 0x171   : > { %v2359_v21 = vor.u32 %v2357_v61, %v2356_v15  ;;  %v2364_v24 = vrot.slane %v2362_v4, 7  ;;  %v1828_v27 = vmax.f32 %v1596_v16, 0.0  ;;  %v1600_v28 = vpop.f32.mrb[39].mxu0  ;;  %v1599_v29 = vadd.f32 %v17454_v44, %v1598_v20 }
 0x172   : > { %v2360_v31 = vrot.slane %v2356_v15, 4  ;;  %v2980_v15 = vld [vmem:[#allocation2 + $0x64] sm:$0xf] }
 0x173   : > { %v2972_v18 = vsel %vm17505_vm7, %v2359_v21, %v2971_v19  ;;  %v2367_v34 = vor.u32 %v2365_v26, %v2364_v24  ;;  %v14295_v40 = vpack.c.bf16 %v1828_v27, %v1828_v27  ;;  %v1829_v35 = vmax.f32 %v1599_v29, 0.0 }
 0x174   : > { %2973 = vst [vmem:[#allocation2 + $0x50] sm:$0xf] %v2972_v18  ;;  %v2369_v51 = vrot.slane %v2364_v24, 4 }
 0x175   : > { %v2368_v33 = vsel %vm17514_vm8, %v2360_v31, %v2367_v34  ;;  %v2371_v41 = vshrl.u32 %v14295_v40, 16  ;;  %v14296_v42 = vpack.c.bf16 %v1829_v35, %v1829_v35  ;;  %v2374_v25 = vshll.u32 %v14295_v40, 16  ;;  %v1980_v31 = vld [vmem:[#allocation2 + $0x114] sm:$0x1] }
 0x176   : > { %2974 = vst [vmem:[#allocation2 + $0x54] sm:$0xf] %v2368_v33  ;;  %v1603_v43 = vpop.f32.mrb[40].mxu0  ;;  %v1981_v40 = vsel %vm17267_vm4, 0, %v1980_v31 }
 0x177   : > { %v2373_v23 = vrot.slane %v2371_v41, 7  ;;  %v1604_v45 = vadd.f32 %v17454_v44, %v1603_v43  ;;  %v1605_v46 = vpop.f32.mrb[41].mxu0  ;;  %v2380_v49 = vshrl.u32 %v14296_v42, 16  ;;  %v2383_v55 = vshll.u32 %v14296_v42, 16  ;;  %1982 = vst [vmem:[#allocation2 + $0x114] sm:$0x1] %v1981_v40 }
 0x178   : > { %v1606_v50 = vpop.f32.mrb[42].mxu0 }
 0x179   : > { %v2376_v53 = vor.u32 %v2374_v25, %v2373_v23  ;;  %v1830_v37 = vmax.f32 %v1604_v45, 0.0  ;;  %v1607_v52 = vadd.f32 %v17454_v44, %v1606_v50  ;;  %v1608_v39 = vpop.f32.mrb[43].mxu0  ;;  %v2382_v54 = vrot.slane %v2380_v49, 7 }
 0x17a   : > { %v2378_v17 = vrot.slane %v2373_v23, 4  ;;  %v2986_v39 = vld [vmem:[#allocation2 + $0x74] sm:$0x1] }
 0x17b   : > { %v2377_v58 = vsel %vm17514_vm8, %v2369_v51, %v2376_v53  ;;  %v14297_v59 = vpack.c.bf16 %v1830_v37, %v1830_v37  ;;  %v1831_v22 = vmax.f32 %v1607_v52, 0.0  ;;  %v2385_v62 = vor.u32 %v2383_v55, %v2382_v54  ;;  %v1927_v37 = vld [vmem:[#allocation2 + $0x118] sm:$0x1] }
 0x17c   : > { %2975 = vst [vmem:[#allocation2 + $0x58] sm:$0xf] %v2377_v58  ;;  %v2387_v63 = vrot.slane %v2382_v54, 4  ;;  %v1928_v57 = vsel %vm17243_vm2, 0, %v1927_v37 }
 0x17d   : > { %v2389_v0 = vshrl.u32 %v14297_v59, 16  ;;  %v14298_v2 = vpack.c.bf16 %v1831_v22, %v1831_v22  ;;  %v2386_v3 = vsel %vm17514_vm8, %v2378_v17, %v2385_v62  ;;  %v2392_v9 = vshll.u32 %v14297_v59, 16  ;;  %1929 = vst [vmem:[#allocation2 + $0x118] sm:$0x1] %v1928_v57 }
 0x17e   : > { %v2978_v5 = vsel %vm17243_vm2, %v2387_v63, %v2977_v8  ;;  %v1611_v36 = vpop.f32.mrb[44].mxu0  ;;  %2976 = vst [vmem:[#allocation2 + $0x5c] sm:$0xf] %v2386_v3  ;;  %v17736_v3 = vld [vmem:[%s21658_s6] ss:$0 sm:$0xff] }
 0x17f   : > { %2979 = vst [vmem:[#allocation2 + $0x60] sm:$0x1] %v2978_v5  ;;  %v2391_v6 = vrot.slane %v2389_v0, 7  ;;  %v2397_v11 = vshrl.u32 %v14298_v2, 16  ;;  %v1612_v12 = vadd.f32 %v17454_v44, %v1611_v36  ;;  %v1613_v32 = vpop.f32.mrb[45].mxu0  ;;  %v2400_v13 = vshll.u32 %v14298_v2, 16 }
 0x180   : > { %v1614_v61 = vpop.f32.mrb[46].mxu0 }
 0x181   : > { %v2394_v4 = vor.u32 %v2392_v9, %v2391_v6  ;;  %v2399_v16 = vrot.slane %v2397_v11, 7  ;;  %v1832_v19 = vmax.f32 %v1612_v12, 0.0  ;;  %v1616_v20 = vpop.f32.mrb[47].mxu0  ;;  %v1615_v21 = vadd.f32 %v17454_v44, %v1614_v61 }
 0x182   : > { %v2395_v24 = vrot.slane %v2391_v6, 4  ;;  %v2989_v6 = vld [vmem:[#allocation2 + $0x78] sm:$0xf] }
 0x183   : > { %v2981_v26 = vsel %vm17505_vm7, %v2394_v4, %v2980_v15  ;;  %v2402_v27 = vor.u32 %v2400_v13, %v2399_v16  ;;  %v14299_v28 = vpack.c.bf16 %v1832_v19, %v1832_v19  ;;  %v1833_v29 = vmax.f32 %v1615_v21, 0.0 }
 0x184   : > { %2982 = vst [vmem:[#allocation2 + $0x64] sm:$0xf] %v2981_v26  ;;  %v2404_v25 = vrot.slane %v2399_v16, 4 }
 0x185   : > { %v2403_v18 = vsel %vm17514_vm8, %v2395_v24, %v2402_v27  ;;  %v2406_v34 = vshrl.u32 %v14299_v28, 16  ;;  %v14300_v35 = vpack.c.bf16 %v1833_v29, %v1833_v29  ;;  %v2409_v41 = vshll.u32 %v14299_v28, 16  ;;  %v1983_v24 = vld [vmem:[#allocation2 + $0x128] sm:$0x1] }
 0x186   : > { %2983 = vst [vmem:[#allocation2 + $0x68] sm:$0xf] %v2403_v18  ;;  %v1619_v14 = vpop.f32.mrb[48].mxu0  ;;  %v1984_v28 = vsel %vm17267_vm4, 0, %v1983_v24 }
 0x187   : > { %v2408_v33 = vrot.slane %v2406_v34, 7  ;;  %v1620_v38 = vadd.f32 %v17454_v44, %v1619_v14  ;;  %v1621_v42 = vpop.f32.mrb[49].mxu0  ;;  %v2415_v43 = vshrl.u32 %v14300_v35, 16  ;;  %v2418_v53 = vshll.u32 %v14300_v35, 16  ;;  %1985 = vst [vmem:[#allocation2 + $0x128] sm:$0x1] %v1984_v28 }
 0x188   : > { %v1622_v23 = vpop.f32.mrb[50].mxu0 }
 0x189   : > { %v2411_v45 = vor.u32 %v2409_v41, %v2408_v33  ;;  %v1834_v46 = vmax.f32 %v1620_v38, 0.0  ;;  %v1623_v49 = vadd.f32 %v17454_v44, %v1622_v23  ;;  %v1624_v50 = vpop.f32.mrb[51].mxu0  ;;  %v2417_v51 = vrot.slane %v2415_v43, 7 }
 0x18a   : > { %v2413_v58 = vrot.slane %v2408_v33, 4  ;;  %v2995_v50 = vld [vmem:[#allocation2 + $0x88] sm:$0x1] }
 0x18b   : > { %v2412_v52 = vsel %vm17514_vm8, %v2404_v25, %v2411_v45  ;;  %v14301_v54 = vpack.c.bf16 %v1834_v46, %v1834_v46  ;;  %v1835_v55 = vmax.f32 %v1623_v49, 0.0  ;;  %v2420_v8 = vor.u32 %v2418_v53, %v2417_v51  ;;  %v1930_v46 = vld [vmem:[#allocation2 + $0x12c] sm:$0x1] }
 0x18c   : > { %2984 = vst [vmem:[#allocation2 + $0x6c] sm:$0xf] %v2412_v52  ;;  %v2422_v59 = vrot.slane %v2417_v51, 4  ;;  %v1931_v37 = vsel %vm17243_vm2, 0, %v1930_v46 }
 0x18d   : > { %v2424_v22 = vshrl.u32 %v14301_v54, 16  ;;  %v14302_v44 = vpack.c.bf16 %v1835_v55, %v1835_v55  ;;  %v2421_v56 = vsel %vm17514_vm8, %v2413_v58, %v2420_v8  ;;  %v2427_v0 = vshll.u32 %v14301_v54, 16  ;;  %1932 = vst [vmem:[#allocation2 + $0x12c] sm:$0x1] %v1931_v37 }
 0x18e   : > { %v2987_v17 = vsel %vm17243_vm2, %v2422_v59, %v2986_v39  ;;  %v1627_v62 = vpop.f32.mrb[52].mxu0  ;;  %2985 = vst [vmem:[#allocation2 + $0x70] sm:$0xf] %v2421_v56 }
 0x18f   : > { %2988 = vst [vmem:[#allocation2 + $0x74] sm:$0x1] %v2987_v17  ;;  %v2426_v63 = vrot.slane %v2424_v22, 7  ;;  %v2432_v2 = vshrl.u32 %v14302_v44, 16  ;;  %v1628_v5 = vadd.f32 %v17736_v3, %v1627_v62  ;;  %v1629_v36 = vpop.f32.mrb[53].mxu0  ;;  %v2435_v32 = vshll.u32 %v14302_v44, 16 }
 0x190   : > { %v1630_v9 = vpop.f32.mrb[54].mxu0 }
 0x191   : > { %v2429_v11 = vor.u32 %v2427_v0, %v2426_v63  ;;  %v2434_v12 = vrot.slane %v2432_v2, 7  ;;  %v1836_v15 = vmax.f32 %v1628_v5, 0.0  ;;  %v1632_v61 = vpop.f32.mrb[55].mxu0  ;;  %v1631_v4 = vadd.f32 %v17736_v3, %v1630_v9 }
 0x192   : > { %v2430_v16 = vrot.slane %v2426_v63, 4  ;;  %v2998_v63 = vld [vmem:[#allocation2 + $0x8c] sm:$0xf] }
 0x193   : > { %v2990_v13 = vsel %vm17505_vm7, %v2429_v11, %v2989_v6  ;;  %v2437_v19 = vor.u32 %v2435_v32, %v2434_v12  ;;  %v14303_v20 = vpack.c.bf16 %v1836_v15, %v1836_v15  ;;  %v1837_v21 = vmax.f32 %v1631_v4, 0.0 }
 0x194   : > { %2991 = vst [vmem:[#allocation2 + $0x78] sm:$0xf] %v2990_v13  ;;  %v2439_v41 = vrot.slane %v2434_v12, 4 }
 0x195   : > { %v2438_v26 = vsel %vm17514_vm8, %v2430_v16, %v2437_v19  ;;  %v2441_v27 = vshrl.u32 %v14303_v20, 16  ;;  %v14304_v29 = vpack.c.bf16 %v1837_v21, %v1837_v21  ;;  %v2444_v34 = vshll.u32 %v14303_v20, 16  ;;  %v1986_v16 = vld [vmem:[#allocation2 + $0x13c] sm:$0x1] }
 0x196   : > { %2992 = vst [vmem:[#allocation2 + $0x7c] sm:$0xf] %v2438_v26  ;;  %v1635_v31 = vpop.f32.mrb[56].mxu0  ;;  %v1987_v20 = vsel %vm17267_vm4, 0, %v1986_v16 }
 0x197   : > { %v2443_v18 = vrot.slane %v2441_v27, 7  ;;  %v1636_v40 = vadd.f32 %v17736_v3, %v1635_v31  ;;  %v1637_v35 = vpop.f32.mrb[57].mxu0  ;;  %v2450_v14 = vshrl.u32 %v14304_v29, 16  ;;  %v2453_v45 = vshll.u32 %v14304_v29, 16  ;;  %1988 = vst [vmem:[#allocation2 + $0x13c] sm:$0x1] %v1987_v20 }
 0x198   : > { %v1638_v33 = vpop.f32.mrb[58].mxu0 }
 0x199   : > { %v2446_v38 = vor.u32 %v2444_v34, %v2443_v18  ;;  %v1838_v42 = vmax.f32 %v1636_v40, 0.0  ;;  %v1639_v43 = vadd.f32 %v17736_v3, %v1638_v33  ;;  %v1640_v23 = vpop.f32.mrb[59].mxu0  ;;  %v2452_v25 = vrot.slane %v2450_v14, 7 }
 0x19a   : > { %v2448_v52 = vrot.slane %v2443_v18, 4  ;;  %v3004_v23 = vld [vmem:[#allocation2 + $0x9c] sm:$0x1] }
 0x19b   : > { %v2447_v49 = vsel %vm17514_vm8, %v2439_v41, %v2446_v38  ;;  %v14305_v51 = vpack.c.bf16 %v1838_v42, %v1838_v42  ;;  %v1839_v53 = vmax.f32 %v1639_v43, 0.0  ;;  %v2455_v39 = vor.u32 %v2453_v45, %v2452_v25  ;;  %v1933_v42 = vld [vmem:[#allocation2 + $0x140] sm:$0x1] }
 0x19c   : > { %2993 = vst [vmem:[#allocation2 + $0x80] sm:$0xf] %v2447_v49  ;;  %v2457_v54 = vrot.slane %v2452_v25, 4  ;;  %v1934_v46 = vsel %vm17243_vm2, 0, %v1933_v42 }
 0x19d   : > { %v2459_v55 = vshrl.u32 %v14305_v51, 16  ;;  %v14306_v57 = vpack.c.bf16 %v1839_v53, %v1839_v53  ;;  %v2456_v58 = vsel %vm17514_vm8, %v2448_v52, %v2455_v39  ;;  %v2462_v44 = vshll.u32 %v14305_v51, 16  ;;  %1935 = vst [vmem:[#allocation2 + $0x140] sm:$0x1] %v1934_v46 }
 0x19e   : > { %v2996_v8 = vsel %vm17243_vm2, %v2457_v54, %v2995_v50  ;;  %v1643_v59 = vpop.f32.mrb[60].mxu0  ;;  %2994 = vst [vmem:[#allocation2 + $0x84] sm:$0xf] %v2456_v58 }
 0x19f   : > { %2997 = vst [vmem:[#allocation2 + $0x88] sm:$0x1] %v2996_v8  ;;  %v2461_v22 = vrot.slane %v2459_v55, 7  ;;  %v2467_v56 = vshrl.u32 %v14306_v57, 16  ;;  %v1644_v17 = vadd.f32 %v17736_v3, %v1643_v59  ;;  %v1645_v62 = vpop.f32.mrb[61].mxu0  ;;  %v2470_v36 = vshll.u32 %v14306_v57, 16 }
 0x1a0   : > { %v1646_v0 = vpop.f32.mrb[62].mxu0 }
 0x1a1   : > { %v2464_v2 = vor.u32 %v2462_v44, %v2461_v22  ;;  %v2469_v5 = vrot.slane %v2467_v56, 7  ;;  %v1840_v6 = vmax.f32 %v1644_v17, 0.0  ;;  %v1648_v9 = vpop.f32.mrb[63].mxu0  ;;  %v1647_v11 = vadd.f32 %v17736_v3, %v1646_v0 }
 0x1a2   : > { %v2465_v12 = vrot.slane %v2461_v22, 4  ;;  %v3007_v22 = vld [vmem:[#allocation2 + $0xa0] sm:$0xf] }
 0x1a3   : > { %v2999_v32 = vsel %vm17505_vm7, %v2464_v2, %v2998_v63  ;;  %v2472_v15 = vor.u32 %v2470_v36, %v2469_v5  ;;  %v14307_v61 = vpack.c.bf16 %v1840_v6, %v1840_v6  ;;  %v1841_v4 = vmax.f32 %v1647_v11, 0.0 }
 0x1a4   : > { %3000 = vst [vmem:[#allocation2 + $0x8c] sm:$0xf] %v2999_v32  ;;  %v2474_v34 = vrot.slane %v2469_v5, 4 }
 0x1a5   : > { %v2473_v13 = vsel %vm17514_vm8, %v2465_v12, %v2472_v15  ;;  %v2476_v19 = vshrl.u32 %v14307_v61, 16  ;;  %v14308_v21 = vpack.c.bf16 %v1841_v4, %v1841_v4  ;;  %v2479_v27 = vshll.u32 %v14307_v61, 16  ;;  %v1989_v12 = vld [vmem:[#allocation2 + $0x150] sm:$0x1] }
 0x1a6   : > { %3001 = vst [vmem:[#allocation2 + $0x90] sm:$0xf] %v2473_v13  ;;  %v1651_v24 = vpop.f32.mrb[64].mxu0  ;;  %v1990_v61 = vsel %vm17267_vm4, 0, %v1989_v12 }
 0x1a7   : > { %v2478_v26 = vrot.slane %v2476_v19, 7  ;;  %v1652_v28 = vadd.f32 %v17736_v3, %v1651_v24  ;;  %v1653_v29 = vpop.f32.mrb[65].mxu0  ;;  %v2485_v31 = vshrl.u32 %v14308_v21, 16  ;;  %v2488_v38 = vshll.u32 %v14308_v21, 16  ;;  %1991 = vst [vmem:[#allocation2 + $0x150] sm:$0x1] %v1990_v61 }
 0x1a8   : > { %v1654_v18 = vpop.f32.mrb[66].mxu0 }
 0x1a9   : > { %v2481_v40 = vor.u32 %v2479_v27, %v2478_v26  ;;  %v1842_v35 = vmax.f32 %v1652_v28, 0.0  ;;  %v1655_v14 = vadd.f32 %v17736_v3, %v1654_v18  ;;  %v1656_v33 = vpop.f32.mrb[67].mxu0  ;;  %v2487_v41 = vrot.slane %v2485_v31, 7 }
 0x1aa   : > { %v2483_v49 = vrot.slane %v2478_v26, 4  ;;  %v3013_v33 = vld [vmem:[#allocation2 + $0xb0] sm:$0x1] }
 0x1ab   : > { %v2482_v43 = vsel %vm17514_vm8, %v2474_v34, %v2481_v40  ;;  %v14309_v25 = vpack.c.bf16 %v1842_v35, %v1842_v35  ;;  %v1843_v45 = vmax.f32 %v1655_v14, 0.0  ;;  %v2490_v50 = vor.u32 %v2488_v38, %v2487_v41  ;;  %v1936_v35 = vld [vmem:[#allocation2 + $0x154] sm:$0x1] }
 0x1ac   : > { %3002 = vst [vmem:[#allocation2 + $0x94] sm:$0xf] %v2482_v43  ;;  %v2492_v51 = vrot.slane %v2487_v41, 4  ;;  %v1937_v42 = vsel %vm17243_vm2, 0, %v1936_v35 }
 0x1ad   : > { %v2494_v53 = vshrl.u32 %v14309_v25, 16  ;;  %v14310_v37 = vpack.c.bf16 %v1843_v45, %v1843_v45  ;;  %v2491_v52 = vsel %vm17514_vm8, %v2483_v49, %v2490_v50  ;;  %v2497_v57 = vshll.u32 %v14309_v25, 16  ;;  %1938 = vst [vmem:[#allocation2 + $0x154] sm:$0x1] %v1937_v42 }
 0x1ae   : > { %v3005_v39 = vsel %vm17243_vm2, %v2492_v51, %v3004_v23  ;;  %v1659_v54 = vpop.f32.mrb[68].mxu0  ;;  %3003 = vst [vmem:[#allocation2 + $0x98] sm:$0xf] %v2491_v52 }
 0x1af   : > { %3006 = vst [vmem:[#allocation2 + $0x9c] sm:$0x1] %v3005_v39  ;;  %v2496_v55 = vrot.slane %v2494_v53, 7  ;;  %v2502_v58 = vshrl.u32 %v14310_v37, 16  ;;  %v1660_v8 = vadd.f32 %v17736_v3, %v1659_v54  ;;  %v1661_v59 = vpop.f32.mrb[69].mxu0  ;;  %v2505_v62 = vshll.u32 %v14310_v37, 16 }
 0x1b0   : > { %v1662_v44 = vpop.f32.mrb[70].mxu0 }
 0x1b1   : > { %v2499_v56 = vor.u32 %v2497_v57, %v2496_v55  ;;  %v2504_v17 = vrot.slane %v2502_v58, 7  ;;  %v1844_v63 = vmax.f32 %v1660_v8, 0.0  ;;  %v1664_v0 = vpop.f32.mrb[71].mxu0  ;;  %v1663_v2 = vadd.f32 %v17736_v3, %v1662_v44 }
 0x1b2   : > { %v2500_v5 = vrot.slane %v2496_v55, 4  ;;  %v3016_v55 = vld [vmem:[#allocation2 + $0xb4] sm:$0xf] }
 0x1b3   : > { %v3008_v36 = vsel %vm17505_vm7, %v2499_v56, %v3007_v22  ;;  %v2507_v6 = vor.u32 %v2505_v62, %v2504_v17  ;;  %v14311_v9 = vpack.c.bf16 %v1844_v63, %v1844_v63  ;;  %v1845_v11 = vmax.f32 %v1663_v2, 0.0 }
 0x1b4   : > { %3009 = vst [vmem:[#allocation2 + $0xa0] sm:$0xf] %v3008_v36  ;;  %v2509_v27 = vrot.slane %v2504_v17, 4 }
 0x1b5   : > { %v2508_v32 = vsel %vm17514_vm8, %v2500_v5, %v2507_v6  ;;  %v2511_v15 = vshrl.u32 %v14311_v9, 16  ;;  %v14312_v4 = vpack.c.bf16 %v1845_v11, %v1845_v11  ;;  %v2514_v19 = vshll.u32 %v14311_v9, 16  ;;  %v1992_v5 = vld [vmem:[#allocation2 + $0x164] sm:$0x1] }
 0x1b6   : > { %3010 = vst [vmem:[#allocation2 + $0xa4] sm:$0xf] %v2508_v32  ;;  %v1667_v16 = vpop.f32.mrb[72].mxu0  ;;  %v1993_v9 = vsel %vm17267_vm4, 0, %v1992_v5 }
 0x1b7   : > { %v2513_v13 = vrot.slane %v2511_v15, 7  ;;  %v1668_v20 = vadd.f32 %v17736_v3, %v1667_v16  ;;  %v1669_v21 = vpop.f32.mrb[73].mxu0  ;;  %v2520_v24 = vshrl.u32 %v14312_v4, 16  ;;  %v2523_v40 = vshll.u32 %v14312_v4, 16  ;;  %1994 = vst [vmem:[#allocation2 + $0x164] sm:$0x1] %v1993_v9 }
 0x1b8   : > { %v1670_v26 = vpop.f32.mrb[74].mxu0 }
 0x1b9   : > { %v2516_v28 = vor.u32 %v2514_v19, %v2513_v13  ;;  %v1846_v29 = vmax.f32 %v1668_v20, 0.0  ;;  %v1671_v31 = vadd.f32 %v17736_v3, %v1670_v26  ;;  %v1672_v18 = vpop.f32.mrb[75].mxu0  ;;  %v2522_v34 = vrot.slane %v2520_v24, 7 }
 0x1ba   : > { %v2518_v43 = vrot.slane %v2513_v13, 4 }
 0x1bb   : > { %v2517_v14 = vsel %vm17514_vm8, %v2509_v27, %v2516_v28  ;;  %v14313_v41 = vpack.c.bf16 %v1846_v29, %v1846_v29  ;;  %v1847_v38 = vmax.f32 %v1671_v31, 0.0  ;;  %v2525_v23 = vor.u32 %v2523_v40, %v2522_v34  ;;  %v3022_v29 = vld [vmem:[#allocation2 + $0xc4] sm:$0x1] }
 0x1bc   : > { %3011 = vst [vmem:[#allocation2 + $0xa8] sm:$0xf] %v2517_v14  ;;  %v2527_v25 = vrot.slane %v2522_v34, 4 }
 0x1bd   : > { %v2529_v45 = vshrl.u32 %v14313_v41, 16  ;;  %v14314_v46 = vpack.c.bf16 %v1847_v38, %v1847_v38  ;;  %v2526_v49 = vsel %vm17514_vm8, %v2518_v43, %v2525_v23  ;;  %v2532_v37 = vshll.u32 %v14313_v41, 16 }
 0x1be   : > { %v3014_v50 = vsel %vm17243_vm2, %v2527_v25, %v3013_v33  ;;  %v1675_v51 = vpop.f32.mrb[76].mxu0  ;;  %3012 = vst [vmem:[#allocation2 + $0xac] sm:$0xf] %v2526_v49  ;;  %v3025_v49 = vld [vmem:[#allocation2 + $0xc8] sm:$0xf] }
 0x1bf   : > { %3015 = vst [vmem:[#allocation2 + $0xb0] sm:$0x1] %v3014_v50  ;;  %v2531_v53 = vrot.slane %v2529_v45, 7  ;;  %v2537_v52 = vshrl.u32 %v14314_v46, 16  ;;  %v1676_v39 = vadd.f32 %v17736_v3, %v1675_v51  ;;  %v1677_v54 = vpop.f32.mrb[77].mxu0  ;;  %v2540_v59 = vshll.u32 %v14314_v46, 16 }
 0x1c0   : > { %v1678_v57 = vpop.f32.mrb[78].mxu0 }
 0x1c1   : > { %v2534_v58 = vor.u32 %v2532_v37, %v2531_v53  ;;  %v2539_v8 = vrot.slane %v2537_v52, 7  ;;  %v1848_v22 = vmax.f32 %v1676_v39, 0.0  ;;  %v1680_v44 = vpop.f32.mrb[79].mxu0  ;;  %v1679_v56 = vadd.f32 %v17736_v3, %v1678_v57 }
 0x1c2   : > { %v2535_v17 = vrot.slane %v2531_v53, 4 }
 0x1c3   : > { %v3017_v62 = vsel %vm17505_vm7, %v2534_v58, %v3016_v55  ;;  %v2542_v63 = vor.u32 %v2540_v59, %v2539_v8  ;;  %v14315_v0 = vpack.c.bf16 %v1848_v22, %v1848_v22  ;;  %v1849_v2 = vmax.f32 %v1679_v56, 0.0 }
 0x1c4   : > { %3018 = vst [vmem:[#allocation2 + $0xb4] sm:$0xf] %v3017_v62  ;;  %v2544_v19 = vrot.slane %v2539_v8, 4 }
 0x1c5   : > { %v2543_v36 = vsel %vm17514_vm8, %v2535_v17, %v2542_v63  ;;  %v2546_v6 = vshrl.u32 %v14315_v0, 16  ;;  %v14316_v11 = vpack.c.bf16 %v1849_v2, %v1849_v2  ;;  %v2549_v15 = vshll.u32 %v14315_v0, 16 }
 0x1c6   : > { %3019 = vst [vmem:[#allocation2 + $0xb8] sm:$0xf] %v2543_v36  ;;  %v1683_v12 = vpop.f32.mrb[80].mxu0 }
 0x1c7   : > { %v2548_v32 = vrot.slane %v2546_v6, 7  ;;  %v1684_v61 = vadd.f32 %v17736_v3, %v1683_v12  ;;  %v1685_v4 = vpop.f32.mrb[81].mxu0  ;;  %v2555_v16 = vshrl.u32 %v14316_v11, 16  ;;  %v2558_v47 = vshll.u32 %v14316_v11, 16 }
 0x1c8   : > { %v1686_v13 = vpop.f32.mrb[82].mxu0 }
 0x1c9   : > { %v2551_v20 = vor.u32 %v2549_v15, %v2548_v32  ;;  %v1850_v21 = vmax.f32 %v1684_v61, 0.0  ;;  %v1687_v24 = vadd.f32 %v17736_v3, %v1686_v13  ;;  %v1688_v26 = vpop.f32.mrb[83].mxu0  ;;  %v2557_v27 = vrot.slane %v2555_v16, 7  ;;  %v3031_v16 = vld [vmem:[#allocation2 + $0xd8] sm:$0x1] }
 0x1ca   : > { %v2553_v34 = vrot.slane %v2548_v32, 4 }
 0x1cb   : > { %v2552_v28 = vsel %vm17514_vm8, %v2544_v19, %v2551_v20  ;;  %v14317_v31 = vpack.c.bf16 %v1850_v21, %v1850_v21  ;;  %v1851_v18 = vmax.f32 %v1687_v24, 0.0  ;;  %v2560_v40 = vor.u32 %v2558_v47, %v2557_v27 }
 0x1cc   : > { %3020 = vst [vmem:[#allocation2 + $0xbc] sm:$0xf] %v2552_v28  ;;  %v2562_v35 = vrot.slane %v2557_v27, 4 }
 0x1cd   : > { %v2564_v14 = vshrl.u32 %v14317_v31, 16  ;;  %v14318_v33 = vpack.c.bf16 %v1851_v18, %v1851_v18  ;;  %v2561_v41 = vsel %vm17514_vm8, %v2553_v34, %v2560_v40  ;;  %v2567_v23 = vshll.u32 %v14317_v31, 16 }
 0x1ce   : > { %v3023_v38 = vsel %vm17243_vm2, %v2562_v35, %v3022_v29  ;;  %v1691_v42 = vpop.f32.mrb[84].mxu0  ;;  %3021 = vst [vmem:[#allocation2 + $0xc0] sm:$0xf] %v2561_v41 }
 0x1cf   : > { %3024 = vst [vmem:[#allocation2 + $0xc4] sm:$0x1] %v3023_v38  ;;  %v2566_v43 = vrot.slane %v2564_v14, 7  ;;  %v2572_v25 = vshrl.u32 %v14318_v33, 16  ;;  %v1692_v45 = vadd.f32 %v17736_v3, %v1691_v42  ;;  %v1693_v46 = vpop.f32.mrb[85].mxu0  ;;  %v2575_v37 = vshll.u32 %v14318_v33, 16 }
 0x1d0   : > { %v1694_v50 = vpop.f32.mrb[86].mxu0  ;;  %v3034_v14 = vld [vmem:[#allocation2 + $0xdc] sm:$0xf] }
 0x1d1   : > { %v2569_v51 = vor.u32 %v2567_v23, %v2566_v43  ;;  %v2574_v53 = vrot.slane %v2572_v25, 7  ;;  %v1852_v52 = vmax.f32 %v1692_v45, 0.0  ;;  %v1696_v39 = vpop.f32.mrb[87].mxu0  ;;  %v1695_v54 = vadd.f32 %v17736_v3, %v1694_v50 }
 0x1d2   : > { %v2570_v55 = vrot.slane %v2566_v43, 4 }
 0x1d3   : > { %v3026_v57 = vsel %vm17505_vm7, %v2569_v51, %v3025_v49  ;;  %v2577_v58 = vor.u32 %v2575_v37, %v2574_v53  ;;  %v14319_v8 = vpack.c.bf16 %v1852_v52, %v1852_v52  ;;  %v1853_v59 = vmax.f32 %v1695_v54, 0.0 }
 0x1d4   : > { %3027 = vst [vmem:[#allocation2 + $0xc8] sm:$0xf] %v3026_v57  ;;  %v2579_v6 = vrot.slane %v2574_v53, 4 }
 0x1d5   : > { %v2578_v22 = vsel %vm17514_vm8, %v2570_v55, %v2577_v58  ;;  %v2581_v44 = vshrl.u32 %v14319_v8, 16  ;;  %v14320_v56 = vpack.c.bf16 %v1853_v59, %v1853_v59  ;;  %v2584_v63 = vshll.u32 %v14319_v8, 16 }
 0x1d6   : > { %3028 = vst [vmem:[#allocation2 + $0xcc] sm:$0xf] %v2578_v22  ;;  %v1699_v17 = vpop.f32.mrb[88].mxu0 }
 0x1d7   : > { %v2583_v62 = vrot.slane %v2581_v44, 7  ;;  %v1700_v0 = vadd.f32 %v17736_v3, %v1699_v17  ;;  %v1701_v2 = vpop.f32.mrb[89].mxu0  ;;  %v2590_v5 = vshrl.u32 %v14320_v56, 16  ;;  %v2593_v61 = vshll.u32 %v14320_v56, 16 }
 0x1d8   : > { %v1702_v36 = vpop.f32.mrb[90].mxu0 }
 0x1d9   : > { %v2586_v9 = vor.u32 %v2584_v63, %v2583_v62  ;;  %v1854_v11 = vmax.f32 %v1700_v0, 0.0  ;;  %v1703_v12 = vadd.f32 %v17736_v3, %v1702_v36  ;;  %v1704_v32 = vpop.f32.mrb[91].mxu0  ;;  %v2592_v15 = vrot.slane %v2590_v5, 7  ;;  %v3040_v5 = vld [vmem:[#allocation2 + $0xec] sm:$0x1] }
 0x1da   : > { %v2588_v20 = vrot.slane %v2583_v62, 4 }
 0x1db   : > { %v2587_v4 = vsel %vm17514_vm8, %v2579_v6, %v2586_v9  ;;  %v14321_v13 = vpack.c.bf16 %v1854_v11, %v1854_v11  ;;  %v1855_v19 = vmax.f32 %v1703_v12, 0.0  ;;  %v2595_v21 = vor.u32 %v2593_v61, %v2592_v15 }
 0x1dc   : > { %3029 = vst [vmem:[#allocation2 + $0xd0] sm:$0xf] %v2587_v4  ;;  %v2597_v24 = vrot.slane %v2592_v15, 4 }
 0x1dd   : > { %v2599_v26 = vshrl.u32 %v14321_v13, 16  ;;  %v14322_v27 = vpack.c.bf16 %v1855_v19, %v1855_v19  ;;  %v2596_v47 = vsel %vm17514_vm8, %v2588_v20, %v2595_v21  ;;  %v2602_v18 = vshll.u32 %v14321_v13, 16 }
 0x1de   : > { %v3032_v28 = vsel %vm17243_vm2, %v2597_v24, %v3031_v16  ;;  %v1707_v29 = vpop.f32.mrb[92].mxu0  ;;  %3030 = vst [vmem:[#allocation2 + $0xd4] sm:$0xf] %v2596_v47 }
 0x1df   : > { %3033 = vst [vmem:[#allocation2 + $0xd8] sm:$0x1] %v3032_v28  ;;  %v2601_v31 = vrot.slane %v2599_v26, 7  ;;  %v2607_v34 = vshrl.u32 %v14322_v27, 16  ;;  %v1708_v40 = vadd.f32 %v17736_v3, %v1707_v29  ;;  %v1709_v35 = vpop.f32.mrb[93].mxu0  ;;  %v2610_v42 = vshll.u32 %v14322_v27, 16 }
 0x1e0   : > { %v1710_v33 = vpop.f32.mrb[94].mxu0  ;;  %v3043_v26 = vld [vmem:[#allocation2 + $0xf0] sm:$0xf] }
 0x1e1   : > { %v2604_v41 = vor.u32 %v2602_v18, %v2601_v31  ;;  %v2609_v38 = vrot.slane %v2607_v34, 7  ;;  %v1856_v43 = vmax.f32 %v1708_v40, 0.0  ;;  %v1712_v23 = vpop.f32.mrb[95].mxu0  ;;  %v1711_v25 = vadd.f32 %v17736_v3, %v1710_v33 }
 0x1e2   : > { %v2605_v45 = vrot.slane %v2601_v31, 4 }
 0x1e3   : > { %v3035_v46 = vsel %vm17505_vm7, %v2604_v41, %v3034_v14  ;;  %v2612_v49 = vor.u32 %v2610_v42, %v2609_v38  ;;  %v14323_v50 = vpack.c.bf16 %v1856_v43, %v1856_v43  ;;  %v1857_v51 = vmax.f32 %v1711_v25, 0.0 }
 0x1e4   : > { %3036 = vst [vmem:[#allocation2 + $0xdc] sm:$0xf] %v3035_v46  ;;  %v2614_v22 = vrot.slane %v2609_v38, 4 }
 0x1e5   : > { %v2613_v53 = vsel %vm17514_vm8, %v2605_v45, %v2612_v49  ;;  %v2616_v37 = vshrl.u32 %v14323_v50, 16  ;;  %v14324_v52 = vpack.c.bf16 %v1857_v51, %v1857_v51  ;;  %v2619_v55 = vshll.u32 %v14323_v50, 16 }
 0x1e6   : > { %3037 = vst [vmem:[#allocation2 + $0xe0] sm:$0xf] %v2613_v53  ;;  %v1715_v39 = vpop.f32.mrb[96].mxu0 }
 0x1e7   : > { %v2618_v54 = vrot.slane %v2616_v37, 7  ;;  %v1716_v57 = vadd.f32 %v17736_v3, %v1715_v39  ;;  %v1717_v58 = vpop.f32.mrb[97].mxu0  ;;  %v2625_v8 = vshrl.u32 %v14324_v52, 16  ;;  %v2628_v0 = vshll.u32 %v14324_v52, 16 }
 0x1e8   : > { %v1718_v59 = vpop.f32.mrb[98].mxu0 }
 0x1e9   : > { %v2621_v44 = vor.u32 %v2619_v55, %v2618_v54  ;;  %v1858_v56 = vmax.f32 %v1716_v57, 0.0  ;;  %v1719_v17 = vadd.f32 %v17736_v3, %v1718_v59  ;;  %v1720_v62 = vpop.f32.mrb[99].mxu0  ;;  %v2627_v63 = vrot.slane %v2625_v8, 7  ;;  %v3049_v8 = vld [vmem:[#allocation2 + $0x100] sm:$0x1] }
 0x1ea   : > { %v2623_v9 = vrot.slane %v2618_v54, 4 }
 0x1eb   : > { %v2622_v2 = vsel %vm17514_vm8, %v2614_v22, %v2621_v44  ;;  %v14325_v36 = vpack.c.bf16 %v1858_v56, %v1858_v56  ;;  %v1859_v6 = vmax.f32 %v1719_v17, 0.0  ;;  %v2630_v11 = vor.u32 %v2628_v0, %v2627_v63 }
 0x1ec   : > { %3038 = vst [vmem:[#allocation2 + $0xe4] sm:$0xf] %v2622_v2  ;;  %v2632_v12 = vrot.slane %v2627_v63, 4 }
 0x1ed   : > { %v2634_v32 = vshrl.u32 %v14325_v36, 16  ;;  %v14326_v15 = vpack.c.bf16 %v1859_v6, %v1859_v6  ;;  %v2631_v61 = vsel %vm17514_vm8, %v2623_v9, %v2630_v11  ;;  %v2637_v19 = vshll.u32 %v14325_v36, 16 }
 0x1ee   : > { %v3041_v4 = vsel %vm17243_vm2, %v2632_v12, %v3040_v5  ;;  %v1723_v16 = vpop.f32.mrb[100].mxu0  ;;  %3039 = vst [vmem:[#allocation2 + $0xe8] sm:$0xf] %v2631_v61 }
 0x1ef   : > { %3042 = vst [vmem:[#allocation2 + $0xec] sm:$0x1] %v3041_v4  ;;  %v2636_v13 = vrot.slane %v2634_v32, 7  ;;  %v2642_v20 = vshrl.u32 %v14326_v15, 16  ;;  %v1724_v21 = vadd.f32 %v17736_v3, %v1723_v16  ;;  %v1725_v24 = vpop.f32.mrb[101].mxu0  ;;  %v2645_v29 = vshll.u32 %v14326_v15, 16 }
 0x1f0   : > { %v1726_v27 = vpop.f32.mrb[102].mxu0  ;;  %v3052_v32 = vld [vmem:[#allocation2 + $0x104] sm:$0xf] }
 0x1f1   : > { %v2639_v47 = vor.u32 %v2637_v19, %v2636_v13  ;;  %v2644_v28 = vrot.slane %v2642_v20, 7  ;;  %v1860_v31 = vmax.f32 %v1724_v21, 0.0  ;;  %v1728_v18 = vpop.f32.mrb[103].mxu0  ;;  %v1727_v34 = vadd.f32 %v17736_v3, %v1726_v27 }
 0x1f2   : > { %v2640_v40 = vrot.slane %v2636_v13, 4 }
 0x1f3   : > { %v3044_v35 = vsel %vm17505_vm7, %v2639_v47, %v3043_v26  ;;  %v2647_v14 = vor.u32 %v2645_v29, %v2644_v28  ;;  %v14327_v33 = vpack.c.bf16 %v1860_v31, %v1860_v31  ;;  %v1861_v41 = vmax.f32 %v1727_v34, 0.0 }
 0x1f4   : > { %3045 = vst [vmem:[#allocation2 + $0xf0] sm:$0xf] %v3044_v35  ;;  %v2649_v53 = vrot.slane %v2644_v28, 4 }
 0x1f5   : > { %v2648_v38 = vsel %vm17514_vm8, %v2640_v40, %v2647_v14  ;;  %v2651_v42 = vshrl.u32 %v14327_v33, 16  ;;  %v14328_v43 = vpack.c.bf16 %v1861_v41, %v1861_v41  ;;  %v2654_v45 = vshll.u32 %v14327_v33, 16 }
 0x1f6   : > { %3046 = vst [vmem:[#allocation2 + $0xf4] sm:$0xf] %v2648_v38  ;;  %v1731_v23 = vpop.f32.mrb[104].mxu0 }
 0x1f7   : > { %v2653_v25 = vrot.slane %v2651_v42, 7  ;;  %v1732_v46 = vadd.f32 %v17736_v3, %v1731_v23  ;;  %v1733_v49 = vpop.f32.mrb[105].mxu0  ;;  %v2660_v50 = vshrl.u32 %v14328_v43, 16  ;;  %v2663_v57 = vshll.u32 %v14328_v43, 16 }
 0x1f8   : > { %v1734_v51 = vpop.f32.mrb[106].mxu0 }
 0x1f9   : > { %v2656_v37 = vor.u32 %v2654_v45, %v2653_v25  ;;  %v1862_v52 = vmax.f32 %v1732_v46, 0.0  ;;  %v1735_v39 = vadd.f32 %v17736_v3, %v1734_v51  ;;  %v1736_v54 = vpop.f32.mrb[107].mxu0  ;;  %v2662_v55 = vrot.slane %v2660_v50, 7  ;;  %v3058_v50 = vld [vmem:[#allocation2 + $0x114] sm:$0x1] }
 0x1fa   : > { %v2658_v44 = vrot.slane %v2653_v25, 4 }
 0x1fb   : > { %v2657_v58 = vsel %vm17514_vm8, %v2649_v53, %v2656_v37  ;;  %v14329_v59 = vpack.c.bf16 %v1862_v52, %v1862_v52  ;;  %v1863_v22 = vmax.f32 %v1735_v39, 0.0  ;;  %v2665_v56 = vor.u32 %v2663_v57, %v2662_v55 }
 0x1fc   : > { %3047 = vst [vmem:[#allocation2 + $0xf8] sm:$0xf] %v2657_v58  ;;  %v2667_v17 = vrot.slane %v2662_v55, 4 }
 0x1fd   : > { %v2669_v62 = vshrl.u32 %v14329_v59, 16  ;;  %v14330_v63 = vpack.c.bf16 %v1863_v22, %v1863_v22  ;;  %v2666_v0 = vsel %vm17514_vm8, %v2658_v44, %v2665_v56  ;;  %v2672_v6 = vshll.u32 %v14329_v59, 16 }
 0x1fe   : > { %v3050_v2 = vsel %vm17243_vm2, %v2667_v17, %v3049_v8  ;;  %v1739_v5 = vpop.f32.mrb[108].mxu0  ;;  %3048 = vst [vmem:[#allocation2 + $0xfc] sm:$0xf] %v2666_v0 }
 0x1ff   : > { %3051 = vst [vmem:[#allocation2 + $0x100] sm:$0x1] %v3050_v2  ;;  %v2671_v36 = vrot.slane %v2669_v62, 7  ;;  %v2677_v9 = vshrl.u32 %v14330_v63, 16  ;;  %v1740_v11 = vadd.f32 %v17736_v3, %v1739_v5  ;;  %v1741_v12 = vpop.f32.mrb[109].mxu0  ;;  %v2680_v16 = vshll.u32 %v14330_v63, 16 }
 0x200   : > { %v1742_v15 = vpop.f32.mrb[110].mxu0  ;;  %v3061_v62 = vld [vmem:[#allocation2 + $0x118] sm:$0xf] }
 0x201   : > { %v2674_v61 = vor.u32 %v2672_v6, %v2671_v36  ;;  %v2679_v4 = vrot.slane %v2677_v9, 7  ;;  %v1864_v13 = vmax.f32 %v1740_v11, 0.0  ;;  %v1744_v19 = vpop.f32.mrb[111].mxu0  ;;  %v1743_v20 = vadd.f32 %v17736_v3, %v1742_v15 }
 0x202   : > { %v2675_v21 = vrot.slane %v2671_v36, 4 }
 0x203   : > { %v3053_v24 = vsel %vm17505_vm7, %v2674_v61, %v3052_v32  ;;  %v2682_v26 = vor.u32 %v2680_v16, %v2679_v4  ;;  %v14331_v27 = vpack.c.bf16 %v1864_v13, %v1864_v13  ;;  %v1865_v47 = vmax.f32 %v1743_v20, 0.0 }
 0x204   : > { %3054 = vst [vmem:[#allocation2 + $0x104] sm:$0xf] %v3053_v24  ;;  %v2684_v38 = vrot.slane %v2679_v4, 4 }
 0x205   : > { %v2683_v28 = vsel %vm17514_vm8, %v2675_v21, %v2682_v26  ;;  %v2686_v29 = vshrl.u32 %v14331_v27, 16  ;;  %v14332_v31 = vpack.c.bf16 %v1865_v47, %v1865_v47  ;;  %v2689_v40 = vshll.u32 %v14331_v27, 16 }
 0x206   : > { %3055 = vst [vmem:[#allocation2 + $0x108] sm:$0xf] %v2683_v28  ;;  %v1747_v18 = vpop.f32.mrb[112].mxu0 }
 0x207   : > { %v2688_v34 = vrot.slane %v2686_v29, 7  ;;  %v1748_v35 = vadd.f32 %v17736_v3, %v1747_v18  ;;  %v1749_v14 = vpop.f32.mrb[113].mxu0  ;;  %v2695_v33 = vshrl.u32 %v14332_v31, 16  ;;  %v2698_v46 = vshll.u32 %v14332_v31, 16 }
 0x208   : > { %v1750_v41 = vpop.f32.mrb[114].mxu0 }
 0x209   : > { %v2691_v42 = vor.u32 %v2689_v40, %v2688_v34  ;;  %v1866_v43 = vmax.f32 %v1748_v35, 0.0  ;;  %v1751_v23 = vadd.f32 %v17736_v3, %v1750_v41  ;;  %v1752_v25 = vpop.f32.mrb[115].mxu0  ;;  %v2697_v45 = vrot.slane %v2695_v33, 7  ;;  %v3067_v33 = vld [vmem:[#allocation2 + $0x128] sm:$0x1] }
 0x20a   : > { %v2693_v37 = vrot.slane %v2688_v34, 4 }
 0x20b   : > { %v2692_v49 = vsel %vm17514_vm8, %v2684_v38, %v2691_v42  ;;  %v14333_v51 = vpack.c.bf16 %v1866_v43, %v1866_v43  ;;  %v1867_v53 = vmax.f32 %v1751_v23, 0.0  ;;  %v2700_v52 = vor.u32 %v2698_v46, %v2697_v45 }
 0x20c   : > { %3056 = vst [vmem:[#allocation2 + $0x10c] sm:$0xf] %v2692_v49  ;;  %v2702_v39 = vrot.slane %v2697_v45, 4 }
 0x20d   : > { %v2704_v54 = vshrl.u32 %v14333_v51, 16  ;;  %v14334_v55 = vpack.c.bf16 %v1867_v53, %v1867_v53  ;;  %v2701_v57 = vsel %vm17514_vm8, %v2693_v37, %v2700_v52  ;;  %v2707_v22 = vshll.u32 %v14333_v51, 16 }
 0x20e   : > { %v3059_v58 = vsel %vm17243_vm2, %v2702_v39, %v3058_v50  ;;  %v1755_v8 = vpop.f32.mrb[116].mxu0  ;;  %3057 = vst [vmem:[#allocation2 + $0x110] sm:$0xf] %v2701_v57 }
 0x20f   : > { %3060 = vst [vmem:[#allocation2 + $0x114] sm:$0x1] %v3059_v58  ;;  %v2706_v59 = vrot.slane %v2704_v54, 7  ;;  %v2712_v44 = vshrl.u32 %v14334_v55, 16  ;;  %v1756_v56 = vadd.f32 %v17736_v3, %v1755_v8  ;;  %v1757_v17 = vpop.f32.mrb[117].mxu0  ;;  %v2715_v5 = vshll.u32 %v14334_v55, 16 }
 0x210   : > { %v1758_v63 = vpop.f32.mrb[118].mxu0  ;;  %v3070_v54 = vld [vmem:[#allocation2 + $0x12c] sm:$0xf] }
 0x211   : > { %v2709_v0 = vor.u32 %v2707_v22, %v2706_v59  ;;  %v2714_v2 = vrot.slane %v2712_v44, 7  ;;  %v1868_v36 = vmax.f32 %v1756_v56, 0.0  ;;  %v1760_v6 = vpop.f32.mrb[119].mxu0  ;;  %v1759_v9 = vadd.f32 %v17736_v3, %v1758_v63 }
 0x212   : > { %v2710_v11 = vrot.slane %v2706_v59, 4 }
 0x213   : > { %v3062_v12 = vsel %vm17505_vm7, %v2709_v0, %v3061_v62  ;;  %v2717_v32 = vor.u32 %v2715_v5, %v2714_v2  ;;  %v14335_v15 = vpack.c.bf16 %v1868_v36, %v1868_v36  ;;  %v1869_v61 = vmax.f32 %v1759_v9, 0.0 }
 0x214   : > { %3063 = vst [vmem:[#allocation2 + $0x118] sm:$0xf] %v3062_v12  ;;  %v2719_v28 = vrot.slane %v2714_v2, 4 }
 0x215   : > { %v2718_v4 = vsel %vm17514_vm8, %v2710_v11, %v2717_v32  ;;  %v2721_v16 = vshrl.u32 %v14335_v15, 16  ;;  %v14336_v13 = vpack.c.bf16 %v1869_v61, %v1869_v61  ;;  %v2724_v21 = vshll.u32 %v14335_v15, 16 }
 0x216   : > { %3064 = vst [vmem:[#allocation2 + $0x11c] sm:$0xf] %v2718_v4  ;;  %v1763_v19 = vpop.f32.mrb[120].mxu0 }
 0x217   : > { %v2723_v20 = vrot.slane %v2721_v16, 7  ;;  %v1764_v24 = vadd.f32 %v17736_v3, %v1763_v19  ;;  %v1765_v26 = vpop.f32.mrb[121].mxu0  ;;  %v2730_v27 = vshrl.u32 %v14336_v13, 16  ;;  %v2733_v35 = vshll.u32 %v14336_v13, 16 }
 0x218   : > { %v1766_v47 = vpop.f32.mrb[122].mxu0 }
 0x219   : > { %v2726_v29 = vor.u32 %v2724_v21, %v2723_v20  ;;  %v1870_v31 = vmax.f32 %v1764_v24, 0.0  ;;  %v1767_v18 = vadd.f32 %v17736_v3, %v1766_v47  ;;  %v1768_v34 = vpop.f32.mrb[123].mxu0  ;;  %v2732_v40 = vrot.slane %v2730_v27, 7  ;;  %v3076_v27 = vld [vmem:[#allocation2 + $0x13c] sm:$0x1] }
 0x21a   : > { %v2728_v42 = vrot.slane %v2723_v20, 4 }
 0x21b   : > { %v2727_v14 = vsel %vm17514_vm8, %v2719_v28, %v2726_v29  ;;  %v14337_v41 = vpack.c.bf16 %v1870_v31, %v1870_v31  ;;  %v1871_v38 = vmax.f32 %v1767_v18, 0.0  ;;  %v2735_v43 = vor.u32 %v2733_v35, %v2732_v40 }
 0x21c   : > { %3065 = vst [vmem:[#allocation2 + $0x120] sm:$0xf] %v2727_v14  ;;  %v2737_v23 = vrot.slane %v2732_v40, 4 }
 0x21d   : > { %v2739_v25 = vshrl.u32 %v14337_v41, 16  ;;  %v14338_v45 = vpack.c.bf16 %v1871_v38, %v1871_v38  ;;  %v2736_v46 = vsel %vm17514_vm8, %v2728_v42, %v2735_v43  ;;  %v2742_v53 = vshll.u32 %v14337_v41, 16 }
 0x21e   : > { %v3068_v49 = vsel %vm17243_vm2, %v2737_v23, %v3067_v33  ;;  %v1771_v50 = vpop.f32.mrb[124].mxu0  ;;  %3066 = vst [vmem:[#allocation2 + $0x124] sm:$0xf] %v2736_v46 }
 0x21f   : > { %3069 = vst [vmem:[#allocation2 + $0x128] sm:$0x1] %v3068_v49  ;;  %v2741_v51 = vrot.slane %v2739_v25, 7  ;;  %v2747_v37 = vshrl.u32 %v14338_v45, 16  ;;  %v1772_v52 = vadd.f32 %v17736_v3, %v1771_v50  ;;  %v1773_v39 = vpop.f32.mrb[125].mxu0  ;;  %v2750_v8 = vshll.u32 %v14338_v45, 16 }
 0x220   : > { %v1774_v55 = vpop.f32.mrb[126].mxu0  ;;  %v3079_v25 = vld [vmem:[#allocation2 + $0x140] sm:$0xf] }
 0x221   : > { %v2744_v57 = vor.u32 %v2742_v53, %v2741_v51  ;;  %v2749_v58 = vrot.slane %v2747_v37, 7  ;;  %v1872_v59 = vmax.f32 %v1772_v52, 0.0  ;;  %v1776_v22 = vpop.f32.mrb[127].mxu0  ;;  %v1775_v44 = vadd.f32 %v17736_v3, %v1774_v55  ;;  %v17887_v3 = vld [vmem:[%s21658_s6] ss:$0 sm:$0xff] }
 0x222   : > { %v2745_v56 = vrot.slane %v2741_v51, 4 }
 0x223   : > { %v3071_v17 = vsel %vm17505_vm7, %v2744_v57, %v3070_v54  ;;  %v2752_v62 = vor.u32 %v2750_v8, %v2749_v58  ;;  %v14339_v63 = vpack.c.bf16 %v1872_v59, %v1872_v59  ;;  %v1873_v0 = vmax.f32 %v1775_v44, 0.0 }
 0x224   : > { %3072 = vst [vmem:[#allocation2 + $0x12c] sm:$0xf] %v3071_v17  ;;  %v2754_v4 = vrot.slane %v2749_v58, 4 }
 0x225   : > { %v2753_v2 = vsel %vm17514_vm8, %v2745_v56, %v2752_v62  ;;  %v2756_v5 = vshrl.u32 %v14339_v63, 16  ;;  %v14340_v36 = vpack.c.bf16 %v1873_v0, %v1873_v0  ;;  %v2759_v11 = vshll.u32 %v14339_v63, 16 }
 0x226   : > { %3073 = vst [vmem:[#allocation2 + $0x130] sm:$0xf] %v2753_v2  ;;  %v1779_v6 = vpop.f32.mrb[128].mxu0 }
 0x227   : > { %v2758_v9 = vrot.slane %v2756_v5, 7  ;;  %v1780_v12 = vadd.f32 %v17887_v3, %v1779_v6  ;;  %v1781_v32 = vpop.f32.mrb[129].mxu0  ;;  %v2765_v15 = vshrl.u32 %v14340_v36, 16  ;;  %v2768_v24 = vshll.u32 %v14340_v36, 16 }
 0x228   : > { %v1782_v61 = vpop.f32.mrb[130].mxu0 }
 0x229   : > { %v2761_v16 = vor.u32 %v2759_v11, %v2758_v9  ;;  %v1874_v13 = vmax.f32 %v1780_v12, 0.0  ;;  %v1783_v19 = vadd.f32 %v17887_v3, %v1782_v61  ;;  %v1784_v20 = vpop.f32.mrb[131].mxu0  ;;  %v2767_v21 = vrot.slane %v2765_v15, 7  ;;  %v3085_v15 = vld [vmem:[#allocation2 + $0x150] sm:$0x1] }
 0x22a   : > { %v2763_v29 = vrot.slane %v2758_v9, 4 }
 0x22b   : > { %v2762_v26 = vsel %vm17514_vm8, %v2754_v4, %v2761_v16  ;;  %v14341_v47 = vpack.c.bf16 %v1874_v13, %v1874_v13  ;;  %v1875_v28 = vmax.f32 %v1783_v19, 0.0  ;;  %v2770_v31 = vor.u32 %v2768_v24, %v2767_v21 }
 0x22c   : > { %3074 = vst [vmem:[#allocation2 + $0x134] sm:$0xf] %v2762_v26  ;;  %v2772_v18 = vrot.slane %v2767_v21, 4 }
 0x22d   : > { %v2774_v34 = vshrl.u32 %v14341_v47, 16  ;;  %v14342_v40 = vpack.c.bf16 %v1875_v28, %v1875_v28  ;;  %v2771_v35 = vsel %vm17514_vm8, %v2763_v29, %v2770_v31  ;;  %v2777_v38 = vshll.u32 %v14341_v47, 16 }
 0x22e   : > { %v3077_v14 = vsel %vm17243_vm2, %v2772_v18, %v3076_v27  ;;  %v1787_v33 = vpop.f32.mrb[132].mxu0  ;;  %3075 = vst [vmem:[#allocation2 + $0x138] sm:$0xf] %v2771_v35 }
 0x22f   : > { %3078 = vst [vmem:[#allocation2 + $0x13c] sm:$0x1] %v3077_v14  ;;  %v2776_v41 = vrot.slane %v2774_v34, 7  ;;  %v2782_v42 = vshrl.u32 %v14342_v40, 16  ;;  %v1788_v43 = vadd.f32 %v17887_v3, %v1787_v33  ;;  %v1789_v23 = vpop.f32.mrb[133].mxu0  ;;  %v2785_v50 = vshll.u32 %v14342_v40, 16 }
 0x230   : > { %v1790_v45 = vpop.f32.mrb[134].mxu0  ;;  %v3088_v34 = vld [vmem:[#allocation2 + $0x154] sm:$0xf] }
 0x231   : > { %v2779_v46 = vor.u32 %v2777_v38, %v2776_v41  ;;  %v2784_v49 = vrot.slane %v2782_v42, 7  ;;  %v1876_v51 = vmax.f32 %v1788_v43, 0.0  ;;  %v1792_v53 = vpop.f32.mrb[135].mxu0  ;;  %v1791_v37 = vadd.f32 %v17887_v3, %v1790_v45 }
 0x232   : > { %v2780_v52 = vrot.slane %v2776_v41, 4 }
 0x233   : > { %v3080_v39 = vsel %vm17505_vm7, %v2779_v46, %v3079_v25  ;;  %v2787_v54 = vor.u32 %v2785_v50, %v2784_v49  ;;  %v14343_v55 = vpack.c.bf16 %v1876_v51, %v1876_v51  ;;  %v1877_v57 = vmax.f32 %v1791_v37, 0.0 }
 0x234   : > { %3081 = vst [vmem:[#allocation2 + $0x140] sm:$0xf] %v3080_v39  ;;  %v2789_v2 = vrot.slane %v2784_v49, 4 }
 0x235   : > { %v2788_v58 = vsel %vm17514_vm8, %v2780_v52, %v2787_v54  ;;  %v2791_v8 = vshrl.u32 %v14343_v55, 16  ;;  %v14344_v59 = vpack.c.bf16 %v1877_v57, %v1877_v57  ;;  %v2794_v56 = vshll.u32 %v14343_v55, 16 }
 0x236   : > { %3082 = vst [vmem:[#allocation2 + $0x144] sm:$0xf] %v2788_v58  ;;  %v1795_v22 = vpop.f32.mrb[136].mxu0  ;;  %v3094_v58 = vld [vmem:[#allocation2 + $0x164] sm:$0x1] }
 0x237   : > { %v2793_v44 = vrot.slane %v2791_v8, 7  ;;  %v1796_v17 = vadd.f32 %v17887_v3, %v1795_v22  ;;  %v1797_v62 = vpop.f32.mrb[137].mxu0  ;;  %v2800_v63 = vshrl.u32 %v14344_v59, 16  ;;  %v2803_v12 = vshll.u32 %v14344_v59, 16 }
 0x238   : > { %v1798_v0 = vpop.f32.mrb[138].mxu0  ;;  %v3107_v62 = vld [vmem:[#allocation2 + $0x10] sm:$0x1] (!%p13640_p10) }
 0x239   : > { %v2796_v5 = vor.u32 %v2794_v56, %v2793_v44  ;;  %v1878_v36 = vmax.f32 %v1796_v17, 0.0  ;;  %v1799_v6 = vadd.f32 %v17887_v3, %v1798_v0  ;;  %v1800_v9 = vpop.f32.mrb[139].mxu0  ;;  %v2802_v11 = vrot.slane %v2800_v63, 7  ;;  %v3101_v17 = vld [vmem:[#allocation2] sm:$0xf] (!%p13640_p10) }
 0x23a   : > { %v2798_v16 = vrot.slane %v2793_v44, 4  ;;  %v3102_v63 = vsel (!%p13640_p10), %vm17505_vm7, 0, %v3101_v17  ;;  %v16884_v0 = vmov (!%p13640_p10), 0   ;;  %v3108_v60 = vsel (!%p13640_p10), %vm17243_vm2, 0, %v3107_v62 }
 0x23b   : > { %v2797_v32 = vsel %vm17514_vm8, %v2789_v2, %v2796_v5  ;;  %v14345_v61 = vpack.c.bf16 %v1878_v36, %v1878_v36  ;;  %v1879_v4 = vmax.f32 %v1799_v6, 0.0  ;;  %v2805_v13 = vor.u32 %v2803_v12, %v2802_v11  ;;  %3104 = vst [vmem:[#allocation2 + $0x4] sm:$0xf] (!%p13640_p10), %v16884_v0  ;;  %3105 = vst [vmem:[#allocation2 + $0x8] sm:$0xf] (!%p13640_p10), %v16884_v0 }
 0x23c   : > { %3083 = vst [vmem:[#allocation2 + $0x148] sm:$0xf] %v2797_v32  ;;  %v2807_v19 = vrot.slane %v2802_v11, 4  ;;  %3106 = vst [vmem:[#allocation2 + $0xc] sm:$0xf] (!%p13640_p10), %v16884_v0 }
 0x23d   : > { %v2809_v20 = vshrl.u32 %v14345_v61, 16  ;;  %v14346_v21 = vpack.c.bf16 %v1879_v4, %v1879_v4  ;;  %v2806_v24 = vsel %vm17514_vm8, %v2798_v16, %v2805_v13  ;;  %v2812_v28 = vshll.u32 %v14345_v61, 16  ;;  %3103 = vst [vmem:[#allocation2] sm:$0xf] (!%p13640_p10), %v3102_v63  ;;  %3109 = vst [vmem:[#allocation2 + $0x10] sm:$0x1] (!%p13640_p10), %v3108_v60 }
 0x23e   : > { %v3086_v26 = vsel %vm17243_vm2, %v2807_v19, %v3085_v15  ;;  %v1803_v27 = vpop.f32.mrb[140].mxu0  ;;  %3084 = vst [vmem:[#allocation2 + $0x14c] sm:$0xf] %v2806_v24 }
 0x23f   : > { %3087 = vst [vmem:[#allocation2 + $0x150] sm:$0x1] %v3086_v26  ;;  %v2811_v47 = vrot.slane %v2809_v20, 7  ;;  %v2817_v29 = vshrl.u32 %v14346_v21, 16  ;;  %v1804_v31 = vadd.f32 %v17887_v3, %v1803_v27  ;;  %v1805_v18 = vpop.f32.mrb[141].mxu0  ;;  %v2820_v33 = vshll.u32 %v14346_v21, 16 }
 0x240   : > { %v1806_v40 = vpop.f32.mrb[142].mxu0 }
 0x241   : > { %v2814_v35 = vor.u32 %v2812_v28, %v2811_v47  ;;  %v2819_v14 = vrot.slane %v2817_v29, 7  ;;  %v1880_v41 = vmax.f32 %v1804_v31, 0.0  ;;  %v1808_v38 = vpop.f32.mrb[143].mxu0  ;;  %v1807_v42 = vadd.f32 %v17887_v3, %v1806_v40 }
 0x242   : > { %v2815_v43 = vrot.slane %v2811_v47, 4 }
 0x243   : > { %v3089_v23 = vsel %vm17505_vm7, %v2814_v35, %v3088_v34  ;;  %v2822_v25 = vor.u32 %v2820_v33, %v2819_v14  ;;  %v14347_v45 = vpack.c.bf16 %v1880_v41, %v1880_v41  ;;  %v1881_v46 = vmax.f32 %v1807_v42, 0.0 }
 0x244   : > { %3090 = vst [vmem:[#allocation2 + $0x154] sm:$0xf] %v3089_v23  ;;  %v2824_v39 = vrot.slane %v2819_v14, 4 }
 0x245   : > { %v2823_v49 = vsel %vm17514_vm8, %v2815_v43, %v2822_v25  ;;  %v2826_v50 = vshrl.u32 %v14347_v45, 16  ;;  %v14348_v51 = vpack.c.bf16 %v1881_v46, %v1881_v46  ;;  %v2829_v37 = vshll.u32 %v14347_v45, 16 }
 0x246   : > { %3091 = vst [vmem:[#allocation2 + $0x158] sm:$0xf] %v2823_v49 }
 0x247   : > { %v2828_v53 = vrot.slane %v2826_v50, 7  ;;  %v2835_v52 = vshrl.u32 %v14348_v51, 16  ;;  %v2838_v55 = vshll.u32 %v14348_v51, 16 }
 0x248   : > { %3100 = sbr.rel (%p13640_p10) target bundleno = 591 (0x24f), region = 76 }
 0x249   : > { %v2831_v54 = vor.u32 %v2829_v37, %v2828_v53  ;;  %v2837_v3 = vrot.slane %v2835_v52, 7  ;;  %v2833_v8 = vrot.slane %v2828_v53, 4 }
 0x24b   : > { %v2832_v57 = vsel %vm17514_vm8, %v2824_v39, %v2831_v54  ;;  %v2840_v59 = vor.u32 %v2838_v55, %v2837_v3  ;;  %v2842_v22 = vrot.slane %v2837_v3, 4 }
 0x24c   : > { %3092 = vst [vmem:[#allocation2 + $0x15c] sm:$0xf] %v2832_v57 }
 0x24d   : > { %v2841_v44 = vsel %vm17514_vm8, %v2833_v8, %v2840_v59  ;;  %v3095_v56 = vsel %vm17243_vm2, %v2842_v22, %v3094_v58 }
 0x24e   : > { %3093 = vst [vmem:[#allocation2 + $0x160] sm:$0xf] %v2841_v44  ;;  %3096 = vst [vmem:[#allocation2 + $0x164] sm:$0x1] %v3095_v56 }
 0x24f PF: > { %p13641_p11 = scmp.ne.s32.totalorder %s16865_s25, 1 }
 0x250   : > { %v3115_v2 = vld [vmem:[#allocation2 + $0x154] sm:$0xf] (!%p13641_p11)  ;;  %v16885_v6 = vmov (!%p13641_p11), 0  }
 0x251   : > { %3113 = sbr.rel (%p13641_p11) target bundleno = 600 (0x258), region = 80  ;;  %v3116_v36 = vsel (!%p13641_p11), %vm17505_vm7, 0, %v3115_v2  ;;  %3118 = vst [vmem:[#allocation2 + $0x158] sm:$0xf] (!%p13641_p11), %v16885_v6  ;;  %3119 = vst [vmem:[#allocation2 + $0x15c] sm:$0xf] (!%p13641_p11), %v16885_v6 }
 0x252   : > { %3120 = vst [vmem:[#allocation2 + $0x160] sm:$0xf] (!%p13641_p11), %v16885_v6  ;;  %3117 = vst [vmem:[#allocation2 + $0x154] sm:$0xf] (!%p13641_p11), %v3116_v36 }
 0x255   : > { %v3121_v5 = vld [vmem:[#allocation2 + $0x164] sm:$0x1] (!%p13641_p11) }
 0x256   : > { %v3122_v9 = vsel (!%p13641_p11), %vm17243_vm2, 0, %v3121_v5 }
 0x257   : > { %3123 = vst [vmem:[#allocation2 + $0x164] sm:$0x1] (!%p13641_p11), %v3122_v9 }
 0x258 PF: > { %v16393_v11 = vld [vmem:[%s21659_s7] sm:$0xff]   ;;  %v16394_v12 = vld [vmem:[%s21659_s7 + $0x8] sm:$0xff]   ;;  %v16395_v48 = vld [vmem:[%s21659_s7 + $0x10] sm:$0xff]   ;;  %vm4986_vm9 = vcmask 1042432   ;;  %vm4987_vm10 = vcmask 1046532   ;;  %s21810_s25 = sld [smem:[#allocation64_spill]] }
 0x259   : > { %15804 = vmatprep.subr.bf16.mxu1 %v16393_v11  ;;  %v16396_v7 = vld [vmem:[%s21659_s7 + $0x18] sm:$0xff]   ;;  %v3172_v32 = vld [vmem:[#allocation2 + $0xf0] sm:$0xf]  ;;  %v17945_v15 = vld [vmem:[#allocation2 + $0xf4] sm:$0xf]  ;;  %s21813_s28 = sld [smem:[#allocation65_spill]] }
 0x25a   : > { %15812 = vmatpush3.bf16.msra.mxu1 %v16393_v11  ;;  %v13722_v61 = vcombine.low %v3172_v32, %v17945_v15  ;;  %v16397_v4 = vld [vmem:[%s21659_s7 + $0x20] sm:$0xff]   ;;  %v16398_v16 = vld [vmem:[%s21659_s7 + $0x28] sm:$0xff]   ;;  %v16399_v13 = vld [vmem:[%s21659_s7 + $0x30] sm:$0xff]   ;;  %vm3220_vm12 = vsmask.f32 3328  ;;  %s21887_s22 = sld [smem:[#allocation63_spill]] }
 0x25b   : > { %15805 = vmatprep.subr.bf16.mxu1 %v16394_v12  ;;  %v16400_v19 = vld [vmem:[%s21659_s7 + $0x38] sm:$0xff]   ;;  %v16403_v24 = vld [vmem:[%s21659_s7 + $0x80] sm:$0xff]   ;;  %v17967_v27 = vld [vmem:[#allocation2 + $0x108] sm:$0xf]  ;;  %vm3221_vm13 = vsmask.f32 7440 }
 0x25c   : > { %15148 = vmatprep.mubr.bf16.mxu1 %v13722_v61  ;;  %v17960_v20 = vld [vmem:[#allocation2 + $0xf8] sm:$0xf]  ;;  %v17962_v21 = vld [vmem:[#allocation2 + $0xfc] sm:$0xf]  ;;  %v3176_v26 = vld [vmem:[#allocation2 + $0x104] sm:$0xf] }
 0x25d   : > { %v13723_v47 = vcombine.low %v17960_v20, %v17962_v21  ;;  %v13724_v28 = vcombine.low %v3176_v26, %v17967_v27  ;;  %v16404_v29 = vld [vmem:[%s21659_s7 + $0x88] sm:$0xff]   ;;  %v17977_v18 = vld [vmem:[#allocation2 + $0x110] sm:$0xf]  ;;  %v3180_v40 = vld [vmem:[#allocation2 + $0x118] sm:$0xf] }
 0x25e   : > { %15813 = vmatpush3.bf16.msra.mxu1 %v16394_v12  ;;  %v17975_v31 = vld [vmem:[#allocation2 + $0x10c] sm:$0xf]  ;;  %v16407_v34 = vld [vmem:[%s21659_s7 + $0x90] sm:$0xff]   ;;  %v17982_v35 = vld [vmem:[#allocation2 + $0x11c] sm:$0xf] }
 0x25f   : > { %15806 = vmatprep.subr.bf16.mxu1 %v16395_v48  ;;  %21724 = vst [vmem:[#allocation10_spill] sm:$0xff] %v17982_v35  ;;  %v13725_v14 = vcombine.low %v17975_v31, %v17977_v18  ;;  %v13726_v33 = vcombine.low %v3180_v40, %v17982_v35  ;;  %v16408_v41 = vld [vmem:[%s21659_s7 + $0x98] sm:$0xff]   ;;  %v3125_v38 = vld [vmem:[#allocation2 + $0x4] sm:$0xf]  ;;  %v3182_v42 = vld [vmem:[#allocation2 + $0x120] sm:$0xf]  ;;  %s21814_s19 = smov %s21813_s28 }
 0x260   : > { %v3183_v43 = vld [vmem:[#allocation2 + $0x124] sm:$0xf]  ;;  %v3184_v23 = vld [vmem:[#allocation2 + $0x12c] sm:$0xf]  ;;  %v3185_v45 = vld [vmem:[#allocation2 + $0x130] sm:$0xf] }
 0x261   : > { %v16411_v25 = vld [vmem:[%s21659_s7 + $0xa0] sm:$0xff]   ;;  %v4991_v49 = vrot.slane %v3125_v38, 5  ;;  %v3126_v50 = vld [vmem:[#allocation2 + $0x8] sm:$0xf]  ;;  %v13727_v51 = vcombine.low %v3182_v42, %v3183_v43  ;;  %v3186_v53 = vld [vmem:[#allocation2 + $0x134] sm:$0xf]  ;;  %v13728_v3 = vcombine.low %v3184_v23, %v3185_v45 }
 0x262   : > { %15814 = vmatpush3.bf16.msra.mxu1 %v16395_v48  ;;  %v4938_v46 = vld [vmem:[#allocation2] sm:$0xe]  ;;  %v3187_v37 = vld [vmem:[#allocation2 + $0x138] sm:$0xf]  ;;  %v3127_v52 = vld [vmem:[#allocation2 + $0xc] sm:$0xf] }
 0x263   : > { %15807 = vmatprep.subr.bf16.mxu1 %v16396_v7  ;;  %v3129_v39 = vld [vmem:[#allocation2 + $0x18] sm:$0xf]  ;;  %v16412_v54 = vld [vmem:[%s21659_s7 + $0xa8] sm:$0xff]   ;;  %v13738_v55 = vrot.slane %v4938_v46, 9  ;;  %v3130_v57 = vld [vmem:[#allocation2 + $0x1c] sm:$0xf]  ;;  %v13729_v36 = vcombine.low %v3186_v53, %v3187_v37 }
 0x264   : > { %v17996_v58 = vld [vmem:[#allocation2 + $0x20] sm:$0xf]  ;;  %v4993_v8 = vrot.slane %v4991_v49, 4  ;;  %v4994_v59 = vrot.slane %v3126_v50, 5  ;;  %v3204_v22 = vld [vmem:[#allocation2 + $0x10] sm:$0x1]  ;;  %vm18002_vm11 = vmor %vm4986_vm9, %vm4987_vm10 }
 0x265   : > { %v17998_v44 = vld [vmem:[#allocation2 + $0x2c] sm:$0xf]  ;;  %v4997_v17 = vrot.slane %v3127_v52, 5  ;;  %v5004_v62 = vrot.slane %v3129_v39, 5  ;;  %v18006_v63 = vld [vmem:[#allocation2 + $0x30] sm:$0xf]  ;;  %v4992_v48 = vsel %vm18002_vm11, %v13738_v55, %v4991_v49  ;;  %vm18641_vm14 = vmor %vm3220_vm12, %vm3221_vm13 }
 0x266   : > { %15815 = vmatpush3.bf16.msra.mxu1 %v16396_v7  ;;  %v4939_v0 = vld [vmem:[#allocation2 + $0x14] sm:$0xe]  ;;  %v5007_v60 = vrot.slane %v3130_v57, 5  ;;  %v5010_v2 = vrot.slane %v17996_v58, 5  ;;  %v18010_v6 = vld [vmem:[#allocation2 + $0x24] sm:$0x1]  ;;  %v4995_v7 = vsel %vm18002_vm11, %v4993_v8, %v4994_v59 }
 0x267   : > { %15808 = vmatprep.subr.bf16.mxu1 %v16397_v4  ;;  %v18012_v9 = vld [vmem:[#allocation2 + $0x28] sm:$0xe]  ;;  %v5017_v11 = vrot.slane %v17998_v44, 5  ;;  %v16415_v12 = vld [vmem:[%s21659_s7 + $0xb0] sm:$0xff]   ;;  %v5000_v32 = vrot.slane %v3204_v22, 5  ;;  %v5020_v61 = vrot.slane %v18006_v63, 5 }
 0x268   : > { %v18025_v26 = vld [vmem:[#allocation2 + $0x40] sm:$0xf]  ;;  %v13740_v40 = vrot.slane %v18012_v9, 9  ;;  %v18041_v42 = vld [vmem:[#allocation2 + $0x44] sm:$0xf] }
 0x269   : > { %v18045_v43 = vrot.slane %v5020_v61, 4  ;;  %v21679_v23 = vrot.slane %v18025_v26, 5  ;;  %v18050_v45 = vld [vmem:[#allocation2 + $0x54] sm:$0xf]  ;;  %v18052_v46 = vld [vmem:[#allocation2 + $0x58] sm:$0xf] }
 0x26a   : > { %15816 = vmatpush3.bf16.msra.mxu1 %v16397_v4  ;;  %v18023_v4 = vld [vmem:[#allocation2 + $0x34] sm:$0xf]  ;;  %v18062_v37 = vld [vmem:[#allocation2 + $0x3c] sm:$0xe]  ;;  %v18064_v52 = vld [vmem:[#allocation2 + $0x4c] sm:$0x1] }
 0x26b   : > { %15809 = vmatprep.subr.bf16.mxu1 %v16398_v16  ;;  %v21681_v38 = vrot.slane %v18023_v4, 5  ;;  %v18066_v39 = vld [vmem:[#allocation2 + $0x5c] sm:$0xf]  ;;  %v21676_v57 = vrot.slane %v18041_v42, 5  ;;  %v21673_v22 = vrot.slane %v18050_v45, 5  ;;  %v21729_v30 = vrot.slane %v18025_v26, 5 }
 0x26c   : > { %v18124_v1 = vld [vmem:[#allocation2 + $0x64] sm:$0xe]  ;;  %v18166_v58 = vld [vmem:[#allocation2 + $0x98] sm:$0xf]  ;;  %v18251_v26 = vld [vmem:[#allocation2 + $0xac] sm:$0xf] }
 0x26e   : > { %15817 = vmatpush3.bf16.msra.mxu1 %v16398_v16  ;;  %v4996_v16 = vrot.slane %v4994_v59, 4  ;;  %v18078_v59 = vld [vmem:[#allocation2 + $0x50] sm:$0xe] }
 0x26f   : > { %15810 = vmatprep.subr.bf16.mxu1 %v16399_v13 }
 0x270   : > { %v4998_v49 = vsel %vm18002_vm11, %v4996_v16, %v4997_v17  ;;  %v18096_v16 = vld [vmem:[#allocation2 + $0x6c] sm:$0xf] }
 0x272   : > { %15818 = vmatpush3.bf16.msra.mxu1 %v16399_v13  ;;  %v4999_v13 = vrot.slane %v4997_v17, 4  ;;  %v21672_v17 = vrot.slane %v18052_v46, 5 }
 0x273   : > { %15811 = vmatprep.subr.bf16.mxu1 %v16400_v19 }
 0x274   : > { %v5001_v50 = vsel %vm18002_vm11, %v4999_v13, %v5000_v32  ;;  %v18094_v32 = vld [vmem:[#allocation2 + $0x60] sm:$0x1]  ;;  %v18098_v13 = vld [vmem:[#allocation2 + $0x70] sm:$0xf] }
 0x276   : > { %15819 = vmatpush3.bf16.msra.mxu1 %v16400_v19  ;;  %v13739_v19 = vrot.slane %v4939_v0, 9  ;;  %v18187_v0 = vld [vmem:[#allocation2 + $0x8c] sm:$0xe] }
 0x277   : > { %15164 = vmatprep.subr.bf16.mxu1 %v16403_v24 }
 0x279   : > { %15149 = vmatmul.mubr.bf16.vlgmr.msra.gmra.mrb[0].mxu1 %v13723_v47  ;;  %v16416_v47 = vld [vmem:[%s21659_s7 + $0xb8] sm:$0xff]  }
 0x27a   : > { %15165 = vmatpush3.bf16.msra.mxu1 %v16403_v24  ;;  %15152 = vmatprep.mubr.bf16.mxu1 %v13724_v28  ;;  %v5006_v24 = vrot.slane %v5004_v62, 4  ;;  %v5009_v28 = vrot.slane %v5007_v60, 4 }
 0x27b   : > { %15166 = vmatprep.subr.bf16.mxu1 %v16404_v29 }
 0x27c   : > { %v5008_v53 = vsel %vm18002_vm11, %v5006_v24, %v5007_v60  ;;  %v18087_v60 = vrot.slane %v21679_v23, 4  ;;  %v18190_v23 = vld [vmem:[#allocation2 + $0x9c] sm:$0x1] }
 0x27e   : > { %15167 = vmatpush3.bf16.msra.mxu1 %v16404_v29  ;;  %v5012_v29 = vrot.slane %v5010_v2, 4 }
 0x27f   : > { %15168 = vmatprep.subr.bf16.mxu1 %v16407_v34 }
 0x281   : > { %15153 = vmatmul.mubr.bf16.gmra.mrb[4].mxu1 %v13725_v14  ;;  %v13770_v14 = vcombine.low %v4992_v48, %v4995_v7  ;;  %v16418_v7 = vld [vmem:[%s21659_s7 + $0xc8] sm:$0xff]  }
 0x282   : > { %15169 = vmatpush3.bf16.msra.mxu1 %v16407_v34  ;;  %15156 = vmatprep.mubr.bf16.mxu1 %v13726_v33  ;;  %v5013_v34 = vrot.slane %v18010_v6, 5  ;;  %v18036_v33 = vrot.slane %v5017_v11, 4  ;;  %v21674_v6 = vrot.slane %v18066_v39, 5 }
 0x283   : > { %15170 = vmatprep.subr.bf16.mxu1 %v16408_v41 }
 0x284   : > { %v18128_v5 = vrot.slane %v21674_v6, 4 }
 0x286   : > { %15171 = vmatpush3.bf16.msra.mxu1 %v16408_v41  ;;  %v18038_v41 = vld [vmem:[#allocation2 + $0x38] sm:$0x1] }
 0x287   : > { %15172 = vmatprep.subr.bf16.mxu1 %v16411_v25 }
 0x289   : > { %15157 = vmatmul.mubr.bf16.gmra.mrb[8].mxu1 %v13727_v51  ;;  %v5005_v51 = vsel %vm18002_vm11, %v13739_v19, %v5004_v62  ;;  %v18082_v62 = vld [vmem:[#allocation2 + $0x68] sm:$0xf]  ;;  %v18102_v19 = vrot.slane %v21676_v57, 4  ;;  %v5018_v57 = vsel %vm18002_vm11, %v13740_v40, %v5017_v11 }
 0x28a   : > { %15173 = vmatpush3.bf16.msra.mxu1 %v16411_v25  ;;  %15160 = vmatprep.mubr.bf16.mxu1 %v13728_v3  ;;  %v18048_v25 = vld [vmem:[#allocation2 + $0x48] sm:$0xf]  ;;  %v18073_v3 = vrot.slane %v21681_v38, 4  ;;  %v13772_v48 = vcombine.low %v5005_v51, %v5008_v53  ;;  %v18118_v51 = vrot.slane %v21673_v22, 4  ;;  %v18122_v53 = vrot.slane %v21672_v17, 4 }
 0x28b   : > { %15174 = vmatprep.subr.bf16.mxu1 %v16412_v54  ;;  %v21675_v8 = vrot.slane %v18048_v25, 5  ;;  %v18138_v17 = vld [vmem:[#allocation2 + $0x7c] sm:$0xf]  ;;  %v18142_v22 = vld [vmem:[#allocation2 + $0x84] sm:$0xf] }
 0x28c   : > { %v21682_v44 = vrot.slane %v18138_v17, 5  ;;  %v18181_v40 = vld [vmem:[#allocation2 + $0x88] sm:$0x1] }
 0x28d   : > { %v18106_v24 = vrot.slane %v21675_v8, 4 }
 0x28e   : > { %15175 = vmatpush3.bf16.msra.mxu1 %v16412_v54  ;;  %v16417_v54 = vld [vmem:[%s21659_s7 + $0xc0] sm:$0xff]   ;;  %v18197_v55 = vrot.slane %v21682_v44, 4 }
 0x28f   : > { %15176 = vmatprep.subr.bf16.mxu1 %v16415_v12  ;;  %v18215_v44 = vld [vmem:[#allocation2 + $0xa0] sm:$0xe] }
 0x291   : > { %15161 = vmatmul.mubr.bf16.gmra.mrb[12].mxu1 %v13729_v36  ;;  %v18149_v36 = vld [vmem:[#allocation2 + $0x78] sm:$0xe] }
 0x292   : > { %15177 = vmatpush3.bf16.msra.mxu1 %v16415_v12  ;;  %15180 = vmatprep.mubr.bf16.mxu1 %v13770_v14  ;;  %v13771_v12 = vcombine.low %v4998_v49, %v5001_v50  ;;  %v21677_v49 = vrot.slane %v18082_v62, 5  ;;  %v5011_v50 = vsel %vm18002_vm11, %v5009_v28, %v5010_v2  ;;  %v21678_v2 = vrot.slane %v18096_v16, 5  ;;  %v18132_v28 = vld [vmem:[#allocation2 + $0x74] sm:$0x1]  ;;  %v18140_v14 = vld [vmem:[#allocation2 + $0x80] sm:$0xf] }
 0x293   : > { %15178 = vmatprep.subr.bf16.mxu1 %v16416_v47  ;;  %v21683_v9 = vrot.slane %v18140_v14, 5 }
 0x294   : > { %v18147_v6 = vrot.slane %v21677_v49, 4  ;;  %v18174_v63 = vrot.slane %v21678_v2, 4  ;;  %v18213_v2 = vld [vmem:[#allocation2 + $0xa8] sm:$0xf] }
 0x295   : > { %v18201_v38 = vrot.slane %v21683_v9, 4  ;;  %v16421_v9 = vld [vmem:[%s21659_s7 + $0xe0] sm:$0xff]  }
 0x296   : > { %15179 = vmatpush3.bf16.msra.mxu1 %v16416_v47  ;;  %v5014_v47 = vsel %vm18002_vm11, %v5012_v29, %v5013_v34  ;;  %v21680_v29 = vrot.slane %v18098_v13, 5  ;;  %v16419_v34 = vld [vmem:[%s21659_s7 + $0xd0] sm:$0xff]  }
 0x297   : > { %15244 = vmatprep.subr.bf16.mxu1 %v16417_v54  ;;  %v13773_v8 = vcombine.low %v5011_v50, %v5014_v47  ;;  %v21684_v47 = vrot.slane %v18142_v22, 5 }
 0x298   : > { %v18178_v11 = vrot.slane %v21680_v29, 4 }
 0x299   : > { %15181 = vmatmul.mubr.bf16.vlgmr.msra.gmra.mrb[16].mxu1 %v13771_v12  ;;  %v18151_v12 = vld [vmem:[#allocation2 + $0x90] sm:$0xf] }
 0x29a   : > { %15245 = vmatpush3.bf16.msra.mxu1 %v16417_v54  ;;  %15184 = vmatprep.mubr.bf16.mxu1 %v13772_v48  ;;  %v5021_v54 = vsel %vm18002_vm11, %v18036_v33, %v5020_v61  ;;  %v18164_v48 = vld [vmem:[#allocation2 + $0x94] sm:$0xf]  ;;  %v16420_v33 = vld [vmem:[%s21659_s7 + $0xd8] sm:$0xff]   ;;  %v21685_v50 = vrot.slane %v18151_v12, 5  ;;  %v18193_v61 = vld [vmem:[#allocation2 + $0xa4] sm:$0xf] }
 0x29b   : > { %15246 = vmatprep.subr.bf16.mxu1 %v16418_v7  ;;  %v13774_v49 = vcombine.low %v5018_v57, %v5021_v54  ;;  %v18205_v57 = vrot.slane %v21684_v47, 4  ;;  %v21727_v47 = vrot.slane %v18023_v4, 5  ;;  %v21728_v54 = vrot.slane %v18038_v41, 5 }
 0x29c   : > { %v18211_v29 = vrot.slane %v21685_v50, 4  ;;  %v21690_v10 = vrot.slane %v18193_v61, 5 }
 0x29d   : > { %v5027_v50 = vsel %vm18002_vm11, %v18073_v3, %v21728_v54  ;;  %v21732_v3 = vrot.slane %v18164_v48, 5 }
 0x29e   : > { %15247 = vmatpush3.bf16.msra.mxu1 %v16418_v7  ;;  %v18265_v7 = vld [vmem:[#allocation2 + $0xb8] sm:$0xf] }
 0x29f   : > { %15248 = vmatprep.subr.bf16.mxu1 %v16419_v34  ;;  %v5108_v35 = vrot.slane %v18265_v7, 5 }
 0x2a1   : > { %15185 = vmatmul.mubr.bf16.gmra.mrb[20].mxu1 %v13773_v8  ;;  %v5024_v8 = vsel %vm18002_vm11, %v18045_v43, %v21727_v47  ;;  %v21731_v43 = vrot.slane %v18041_v42, 5  ;;  %v21733_v47 = vrot.slane %v18166_v58, 5 }
 0x2a2   : > { %15188 = vmatprep.mubr.bf16.mxu1 %v13774_v49  ;;  %15249 = vmatpush3.bf16.msra.mxu1 %v16419_v34  ;;  %v21730_v49 = vrot.slane %v18062_v37, 9  ;;  %v18245_v34 = vrot.slane %v21732_v3, 4  ;;  %v13775_v42 = vcombine.low %v5024_v8, %v5027_v50  ;;  %v18262_v3 = vrot.slane %v21690_v10, 4  ;;  %v18267_v37 = vld [vmem:[#allocation2 + $0xbc] sm:$0xf] }
 0x2a3   : > { %v5034_v41 = vsel %vm18002_vm11, %v18087_v60, %v21731_v43  ;;  %15250 = vmatprep.subr.bf16.mxu1 %v16420_v33  ;;  %v18249_v54 = vrot.slane %v21733_v47, 4  ;;  %v16422_v60 = vld [vmem:[%s21659_s7 + $0xe8] sm:$0xff]   ;;  %v18269_v50 = vld [vmem:[#allocation2 + $0xb4] sm:$0xe]  ;;  %v21735_v47 = vrot.slane %v18064_v52, 5  ;;  %v21739_v52 = vrot.slane %v18052_v46, 5 }
 0x2a4   : > { %v5031_v4 = vsel %vm18002_vm11, %v21730_v49, %v21729_v30  ;;  %v21691_v30 = vrot.slane %v18213_v2, 5  ;;  %v18255_v49 = vld [vmem:[#allocation2 + $0xb0] sm:$0x1]  ;;  %v18316_v46 = vrot.slane %v5108_v35, 4 }
 0x2a5   : > { %v13776_v43 = vcombine.low %v5031_v4, %v5034_v41  ;;  %v16423_v4 = vld [vmem:[%s21659_s7 + $0xf0] sm:$0xff]   ;;  %v21734_v41 = vrot.slane %v18048_v25, 5  ;;  %v21738_v25 = vrot.slane %v18078_v59, 9  ;;  %v16424_v59 = vld [vmem:[%s21659_s7 + $0xf8] sm:$0xff]  }
 0x2a6   : > { %15251 = vmatpush3.bf16.msra.mxu1 %v16420_v33  ;;  %v18273_v8 = vrot.slane %v21691_v30, 4  ;;  %v21736_v30 = vrot.slane %v18251_v26, 5 }
 0x2a7   : > { %15252 = vmatprep.subr.bf16.mxu1 %v16421_v9  ;;  %v5037_v10 = vsel %vm18002_vm11, %v18102_v19, %v21734_v41 }
 0x2a8   : > { %v18291_v33 = vrot.slane %v21736_v30, 4  ;;  %v5111_v30 = vrot.slane %v18267_v37, 5 }
 0x2a9   : > { %15189 = vmatmul.mubr.bf16.gmra.mrb[24].mxu1 %v13775_v42  ;;  %v5040_v42 = vsel %vm18002_vm11, %v18106_v24, %v21735_v47  ;;  %v5047_v24 = vsel %vm18002_vm11, %v18118_v51, %v21739_v52  ;;  %v13747_v47 = vrot.slane %v18269_v50, 9  ;;  %v18333_v52 = vld [vmem:[%s21659_s7 + $0x100] sm:$0xff]  }
 0x2aa   : > { %15192 = vmatprep.mubr.bf16.mxu1 %v13776_v43  ;;  %15253 = vmatpush3.bf16.msra.mxu1 %v16421_v9  ;;  %v21737_v43 = vrot.slane %v18050_v45, 5  ;;  %v18307_v9 = vld [vmem:[#allocation2 + $0xc0] sm:$0xf]  ;;  %v13777_v41 = vcombine.low %v5037_v10, %v5040_v42  ;;  %v18309_v45 = vld [vmem:[#allocation2 + $0xcc] sm:$0xf]  ;;  %v21741_v42 = vrot.slane %v18094_v32, 5 }
 0x2ab   : > { %15254 = vmatprep.subr.bf16.mxu1 %v16422_v60  ;;  %v5114_v51 = vrot.slane %v18307_v9, 5  ;;  %v21744_v32 = vrot.slane %v18096_v16, 5 }
 0x2ac   : > { %v5044_v19 = vsel %vm18002_vm11, %v21738_v25, %v21737_v43  ;;  %v21740_v25 = vrot.slane %v18066_v39, 5  ;;  %v21742_v39 = vrot.slane %v18082_v62, 5 }
 0x2ad   : > { %v13778_v43 = vcombine.low %v5044_v19, %v5047_v24  ;;  %v5121_v19 = vrot.slane %v18309_v45, 5  ;;  %v21743_v24 = vrot.slane %v18124_v1, 9  ;;  %v18355_v1 = vrot.slane %v5111_v30, 4 }
 0x2ae   : > { %15255 = vmatpush3.bf16.msra.mxu1 %v16422_v60  ;;  %v5050_v10 = vsel %vm18002_vm11, %v18122_v53, %v21740_v25  ;;  %v5053_v60 = vsel %vm18002_vm11, %v18128_v5, %v21741_v42  ;;  %v5060_v5 = vsel %vm18002_vm11, %v18147_v6, %v21744_v32  ;;  %v18350_v25 = vld [vmem:[#allocation2 + $0xd0] sm:$0xf]  ;;  %v18359_v6 = vrot.slane %v5114_v51, 4 }
 0x2af   : > { %15256 = vmatprep.subr.bf16.mxu1 %v16423_v4  ;;  %v5057_v53 = vsel %vm18002_vm11, %v21743_v24, %v21742_v39  ;;  %v18375_v24 = vrot.slane %v5121_v19, 4  ;;  %v21747_v32 = vrot.slane %v18138_v17, 5 }
 0x2b0   : > { %v13780_v62 = vcombine.low %v5057_v53, %v5060_v5  ;;  %v5124_v53 = vrot.slane %v18350_v25, 5  ;;  %v21763_v25 = vld [vmem:[#allocation10_spill] sm:$0xff] }
 0x2b1   : > { %15193 = vmatmul.mubr.bf16.gmra.mrb[28].mxu1 %v13777_v41  ;;  %v18348_v41 = vld [vmem:[#allocation2 + $0xc8] sm:$0xe] }
 0x2b2   : > { %15196 = vmatprep.mubr.bf16.mxu1 %v13778_v43  ;;  %15257 = vmatpush3.bf16.msra.mxu1 %v16423_v4  ;;  %v18346_v4 = vld [vmem:[#allocation2 + $0xc4] sm:$0x1]  ;;  %v13779_v43 = vcombine.low %v5050_v10, %v5053_v60  ;;  %v13748_v42 = vrot.slane %v18348_v41, 9  ;;  %v21745_v10 = vrot.slane %v18098_v13, 5  ;;  %v21746_v60 = vrot.slane %v18132_v28, 5 }
 0x2b3   : > { %15258 = vmatprep.subr.bf16.mxu1 %v16424_v59  ;;  %v5117_v16 = vrot.slane %v18346_v4, 5  ;;  %v21748_v13 = vrot.slane %v18149_v36, 9  ;;  %v18397_v17 = vrot.slane %v5124_v53, 4  ;;  %v5125_v9 = vsel %vm18002_vm11, %v18375_v24, %v5124_v53  ;;  %v3217_v24 = vld [vmem:[#allocation2 + $0x114] sm:$0x1] }
 0x2b4   : > { %v5066_v39 = vsel %vm18002_vm11, %v18178_v11, %v21746_v60  ;;  %v18389_v11 = vld [vmem:[#allocation2 + $0xd4] sm:$0xf]  ;;  %v5166_v41 = vrot.slane %v17977_v18, 5 }
 0x2b5   : > { %v5070_v5 = vsel %vm18002_vm11, %v21748_v13, %v21747_v32  ;;  %v5127_v36 = vrot.slane %v18389_v11, 5  ;;  %v4949_v11 = vld [vmem:[#allocation2 + $0xdc] sm:$0xe]  ;;  %v5118_v37 = vsel %vm18002_vm11, %v18359_v6, %v5117_v16  ;;  %v5163_v6 = vrot.slane %v17975_v31, 5  ;;  %v4952_v31 = vld [vmem:[#allocation2 + $0x118] sm:$0xe] }
 0x2b6   : > { %15259 = vmatpush3.bf16.msra.mxu1 %v16424_v59  ;;  %v5063_v59 = vsel %vm18002_vm11, %v18174_v63, %v21745_v10  ;;  %v21749_v63 = vrot.slane %v18140_v14, 5  ;;  %v18393_v10 = vld [vmem:[#allocation2 + $0xe0] sm:$0xf]  ;;  %v21750_v14 = vrot.slane %v18142_v22, 5  ;;  %v5173_v16 = vrot.slane %v21763_v25, 5 }
 0x2b7   : > { %15324 = vmatprep.subr.bf16.mxu1 %v18333_v52  ;;  %v5134_v13 = vrot.slane %v18393_v10, 5  ;;  %v5128_v45 = vsel %vm18002_vm11, %v18397_v17, %v5127_v36  ;;  %v5165_v17 = vrot.slane %v5163_v6, 4 }
 0x2b8   : > { %v5073_v28 = vsel %vm18002_vm11, %v18197_v55, %v21749_v63  ;;  %v5076_v55 = vsel %vm18002_vm11, %v18201_v38, %v21750_v14  ;;  %v21753_v63 = vrot.slane %v18187_v0, 9  ;;  %v13749_v0 = vrot.slane %v4949_v11, 9 }
 0x2b9   : > { %15197 = vmatmul.mubr.bf16.gmra.mrb[32].mxu1 %v13779_v43  ;;  %v13781_v43 = vcombine.low %v5063_v59, %v5066_v39  ;;  %v13782_v60 = vcombine.low %v5070_v5, %v5073_v28  ;;  %v21751_v59 = vrot.slane %v18181_v40, 5  ;;  %v21752_v5 = vrot.slane %v18151_v12, 5  ;;  %v3170_v40 = vld [vmem:[#allocation2 + $0xe4] sm:$0xf] }
 0x2ba   : > { %15200 = vmatprep.mubr.bf16.mxu1 %v13780_v62  ;;  %v18391_v62 = vld [vmem:[#allocation2 + $0xd8] sm:$0x1]  ;;  %v21754_v28 = vrot.slane %v18164_v48, 5  ;;  %v5129_v12 = vrot.slane %v5127_v36, 4  ;;  %v5137_v14 = vrot.slane %v3170_v40, 5  ;;  %v21755_v48 = vrot.slane %v18166_v58, 5 }
 0x2bb   : > { %v5079_v39 = vsel %vm18002_vm11, %v18205_v57, %v21751_v59  ;;  %v5130_v32 = vrot.slane %v18391_v62, 5  ;;  %v5083_v22 = vsel %vm18002_vm11, %v21753_v63, %v21752_v5  ;;  %v18425_v62 = vld [vmem:[#allocation2 + $0xec] sm:$0x1]  ;;  %v21756_v59 = vrot.slane %v18190_v23, 5 }
 0x2bc   : > { %v5086_v38 = vsel %vm18002_vm11, %v18211_v29, %v21754_v28  ;;  %v13783_v57 = vcombine.low %v5076_v55, %v5079_v39  ;;  %v5089_v29 = vsel %vm18002_vm11, %v18245_v34, %v21755_v48  ;;  %v5143_v5 = vrot.slane %v18425_v62, 5  ;;  %v4950_v34 = vld [vmem:[#allocation2 + $0xf0] sm:$0xe] }
 0x2bd   : > { %v13784_v10 = vcombine.low %v5083_v22, %v5086_v38  ;;  %v5092_v55 = vsel %vm18002_vm11, %v18249_v54, %v21756_v59  ;;  %v21757_v63 = vrot.slane %v18193_v61, 5  ;;  %v21758_v22 = vrot.slane %v18215_v44, 9 }
 0x2be   : > { %v21759_v28 = vrot.slane %v18213_v2, 5  ;;  %v13785_v38 = vcombine.low %v5089_v29, %v5092_v55  ;;  %v5139_v40 = vrot.slane %v5137_v14, 4  ;;  %v13750_v11 = vrot.slane %v4950_v34, 9 }
 0x2bf   : > { %v5096_v58 = vsel %vm18002_vm11, %v21758_v22, %v21757_v63  ;;  %v21760_v61 = vrot.slane %v18251_v26, 5  ;;  %v5109_v26 = vsel %vm18002_vm11, %v13747_v47, %v5108_v35  ;;  %v5115_v35 = vsel %vm18002_vm11, %v18355_v1, %v5114_v51  ;;  %v3218_v22 = vld [vmem:[#allocation2 + $0x128] sm:$0x1] }
 0x2c0   : > { %v5099_v23 = vsel %vm18002_vm11, %v18262_v3, %v21759_v28  ;;  %v5150_v3 = vrot.slane %v17960_v20, 5  ;;  %v13789_v51 = vcombine.low %v5115_v35, %v5118_v37  ;;  %v5160_v1 = vrot.slane %v17967_v27, 5  ;;  %v18519_v28 = vld [vmem:[#allocation2 + $0x120] sm:$0xf] }
 0x2c1   : > { %15201 = vmatmul.mubr.bf16.gmra.mrb[36].mxu1 %v13781_v43  ;;  %v18423_v43 = vld [vmem:[#allocation2 + $0xe8] sm:$0xf]  ;;  %v13786_v54 = vcombine.low %v5096_v58, %v5099_v23  ;;  %v5102_v44 = vsel %vm18002_vm11, %v18273_v8, %v21760_v61  ;;  %v3216_v8 = vld [vmem:[#allocation2 + $0x100] sm:$0x1]  ;;  %v5169_v36 = vrot.slane %v3217_v24, 5  ;;  %v13752_v55 = vrot.slane %v4952_v31, 9 }
 0x2c2   : > { %15204 = vmatprep.mubr.bf16.mxu1 %v13782_v60  ;;  %v5136_v60 = vrot.slane %v5134_v13, 4  ;;  %v5140_v39 = vrot.slane %v18423_v43, 5  ;;  %v5153_v43 = vrot.slane %v17962_v21, 5  ;;  %v21762_v21 = vrot.slane %v17945_v15, 5  ;;  %21765 = vst [vmem:[#allocation10_spill] sm:$0xff] %v18519_v28  ;;  %v16432_v24 = vld [vmem:[%s21659_s7 + $0x108] sm:$0xff]  }
 0x2c3   : > { %v5152_v48 = vrot.slane %v5150_v3, 4  ;;  %v5156_v50 = vrot.slane %v3216_v8, 5  ;;  %v5162_v59 = vrot.slane %v5160_v1, 4  ;;  %v18522_v23 = vld [vmem:[#allocation2 + $0x124] sm:$0xf]  ;;  %v16437_v31 = vld [vmem:[%s21659_s7 + $0x110] sm:$0xff]  }
 0x2c4   : > { %v5142_v20 = vrot.slane %v5140_v39, 4  ;;  %v5149_v7 = vrot.slane %v21762_v21, 4  ;;  %v5155_v47 = vrot.slane %v5153_v43, 4  ;;  %v5138_v27 = vsel %vm18002_vm11, %v5136_v60, %v5137_v14  ;;  %21766 = vst [vmem:[#allocation11_spill] sm:$0xff] %v18522_v23 }
 0x2c5   : > { %v5141_v18 = vsel %vm18002_vm11, %v5139_v40, %v5140_v39  ;;  %v5176_v39 = vrot.slane %v18519_v28, 5  ;;  %v5154_v15 = vsel %vm18002_vm11, %v5152_v48, %v5153_v43  ;;  %v5164_v61 = vsel %vm18002_vm11, %v5162_v59, %v5163_v6 }
 0x2c6   : > { %v5151_v14 = vsel %vm18002_vm11, %v5149_v7, %v5150_v3  ;;  %v5157_v34 = vsel %vm18002_vm11, %v5155_v47, %v5156_v50  ;;  %v5174_v7 = vsel %vm18002_vm11, %v13752_v55, %v5173_v16  ;;  %v3219_v50 = vld [vmem:[#allocation2 + $0x13c] sm:$0x1] }
 0x2c7   : > { %v5178_v3 = vrot.slane %v5176_v39, 4  ;;  %v5195_v47 = vrot.slane %v3219_v50, 5  ;;  %v16442_v55 = vld [vmem:[%s21659_s7 + $0x118] sm:$0xff]  }
 0x2c9   : > { %15205 = vmatmul.mubr.bf16.gmra.mrb[40].mxu1 %v13783_v57  ;;  %v21761_v57 = vrot.slane %v18255_v49, 5  ;;  %v5112_v49 = vsel %vm18002_vm11, %v18316_v46, %v5111_v30  ;;  %v5122_v46 = vsel %vm18002_vm11, %v13748_v42, %v5121_v19  ;;  %v5131_v19 = vsel %vm18002_vm11, %v5129_v12, %v5130_v32 }
 0x2ca   : > { %15208 = vmatprep.mubr.bf16.mxu1 %v13784_v10  ;;  %v13788_v10 = vcombine.low %v5109_v26, %v5112_v49  ;;  %v13790_v4 = vcombine.low %v5122_v46, %v5125_v9  ;;  %v5135_v42 = vsel %vm18002_vm11, %v13749_v0, %v5134_v13  ;;  %v13791_v53 = vcombine.low %v5128_v45, %v5131_v19  ;;  %v18536_v49 = vld [vmem:[#allocation2 + $0x134] sm:$0xf] }
 0x2cb   : > { %v5105_v2 = vsel %vm18002_vm11, %v18291_v33, %v21761_v57  ;;  %v4951_v33 = vld [vmem:[#allocation2 + $0x104] sm:$0xe]  ;;  %v13792_v29 = vcombine.low %v5135_v42, %v5138_v27  ;;  %v5144_v32 = vsel %vm18002_vm11, %v5142_v20, %v5143_v5  ;;  %v5168_v13 = vrot.slane %v5166_v41, 4  ;;  %21768 = vst [vmem:[#allocation13_spill] sm:$0xff] %v18536_v49  ;;  %v16589_v20 = vld [vmem:[#allocation2 + $0x138] sm:$0xf] }
 0x2cc   : > { %v13787_v62 = vcombine.low %v5102_v44, %v5105_v2  ;;  %v13751_v30 = vrot.slane %v4951_v33, 9  ;;  %v5175_v12 = vrot.slane %v5173_v16, 4  ;;  %v21764_v0 = vmov %v21762_v21  ;;  %v4953_v44 = vld [vmem:[#allocation2 + $0x12c] sm:$0xe]  ;;  %v16425_v16 = vld [vmem:[#allocation2 + $0x14] sm:$0xff]   ;;  %v16426_v42 = vld [vmem:[#allocation2 + $0x1c] sm:$0xff]  }
 0x2cd   : > { %v5148_v60 = vsel %vm18002_vm11, %v13750_v11, %v21764_v0  ;;  %v13793_v63 = vcombine.low %v5141_v18, %v5144_v32  ;;  %v5179_v5 = vrot.slane %v18522_v23, 5  ;;  %v13795_v57 = vcombine.low %v5154_v15, %v5157_v34  ;;  %v16428_v27 = vld [vmem:[#allocation2 + $0x28] sm:$0xff]   ;;  %v6418_v15 = vld [vmem:[#allocation2 + $0x14] sm:$0xf] }
 0x2ce   : > { %v13794_v58 = vcombine.low %v5148_v60, %v5151_v14  ;;  %v5161_v11 = vsel %vm18002_vm11, %v13751_v30, %v5160_v1  ;;  %v13753_v26 = vrot.slane %v4953_v44, 9  ;;  %v5189_v8 = vrot.slane %v18536_v49, 5  ;;  %v16431_v14 = vld [vmem:[#allocation2 + $0x44] sm:$0xff]  }
 0x2cf   : > { %v13796_v2 = vcombine.low %v5161_v11, %v5164_v61  ;;  %v5181_v43 = vrot.slane %v5179_v5, 4  ;;  %v5170_v33 = vsel %vm18002_vm11, %v5168_v13, %v5169_v36  ;;  %v5192_v21 = vrot.slane %v16589_v20, 5  ;;  %v16430_v36 = vld [vmem:[#allocation2 + $0x3c] sm:$0xff]   ;;  %v16591_v13 = vld [vmem:[#allocation2 + $0xf4] sm:$0xf] }
 0x2d0   : > { %v5177_v48 = vsel %vm18002_vm11, %v5175_v12, %v5176_v39  ;;  %v5180_v30 = vsel %vm18002_vm11, %v5178_v3, %v5179_v5  ;;  %v5191_v9 = vrot.slane %v5189_v8, 4  ;;  %v3761_v12 = vshll.u32 %v16591_v13, 16  ;;  %v16452_v5 = vld [vmem:[%s21659_s7 + $0x128] sm:$0xff]   ;;  %v18582_v61 = vld [vmem:[#allocation2 + $0xfc] sm:$0xf] }
 0x2d1   : > { %15209 = vmatmul.mubr.bf16.gmra.mrb[44].mxu1 %v13785_v38  ;;  %v5182_v38 = vrot.slane %v3218_v22, 5  ;;  %v13798_v37 = vcombine.low %v5174_v7, %v5177_v48  ;;  %v3765_v0 = vshrl.u32 %v16591_v13, 16  ;;  %21770 = vst [vmem:[#allocation15_spill] sm:$0xff] %v18582_v61  ;;  %v18587_v3 = vld [vmem:[#allocation2 + $0x108] sm:$0xf]  ;;  %v6499_v48 = vshrl.u32 %v6418_v15, 16 }
 0x2d2   : > { %15212 = vmatprep.mubr.bf16.mxu1 %v13786_v54  ;;  %v18529_v54 = vld [vmem:[#allocation2 + $0x130] sm:$0xf]  ;;  %v5193_v19 = vsel %vm18002_vm11, %v5191_v9, %v5192_v21  ;;  %v18575_v34 = vrot.slane %v3761_v12, 5  ;;  %21771 = vst [vmem:[#allocation16_spill] sm:$0xff] %v18587_v3  ;;  %v6502_v50 = vshll.u32 %v6418_v15, 16  ;;  %v16465_v15 = vld [vmem:[%s21659_s7 + $0x140] sm:$0xff]  }
 0x2d3   : > { %21767 = vst [vmem:[#allocation12_spill] sm:$0xff] %v18529_v54  ;;  %v5186_v40 = vrot.slane %v18529_v54, 5  ;;  %v5183_v46 = vsel %vm18002_vm11, %v5181_v43, %v5182_v38  ;;  %v18577_v38 = vrot.slane %v3765_v0, 4  ;;  %v6423_v9 = vld [vmem:[#allocation2 + $0x28] sm:$0xf]  ;;  %v16453_v54 = vld [vmem:[#allocation2 + $0xf0] sm:$0xff]  }
 0x2d4   : > { %v13799_v6 = vcombine.low %v5180_v30, %v5183_v46  ;;  %v6425_v12 = vld [vmem:[#allocation2 + $0x30] sm:$0xf]  ;;  %v6422_v0 = vld [vmem:[#allocation2 + $0x24] sm:$0x1] }
 0x2d9   : > { %15213 = vmatmul.mubr.bf16.gmra.mrb[48].mxu1 %v13787_v62  ;;  %v5167_v62 = vsel %vm18002_vm11, %v5165_v17, %v5166_v41  ;;  %v16429_v17 = vld [vmem:[#allocation2 + $0x30] sm:$0xff]  }
 0x2da   : > { %15216 = vmatprep.mubr.bf16.mxu1 %v13788_v10  ;;  %v5188_v10 = vrot.slane %v5186_v40, 4  ;;  %v13797_v35 = vcombine.low %v5167_v62, %v5170_v33  ;;  %v18593_v62 = vld [vmem:[#allocation2 + $0x118] sm:$0xf] }
 0x2db   : > { %v3840_v33 = vshrl.u32 %v18593_v62, 16 }
 0x2dc   : > { %v5190_v1 = vsel %vm18002_vm11, %v5188_v10, %v5189_v8  ;;  %v6420_v10 = vld [vmem:[#allocation2 + $0x1c] sm:$0xf] }
 0x2e1   : > { %15217 = vmatmul.mubr.bf16.gmra.mrb[52].mxu1 %v13789_v51  ;;  %v5194_v51 = vrot.slane %v5192_v21, 4  ;;  %v18598_v21 = vld [vmem:[#allocation2 + $0x110] sm:$0xf] }
 0x2e2   : > { %15220 = vmatprep.mubr.bf16.mxu1 %v13790_v4  ;;  %v5187_v4 = vsel %vm18002_vm11, %v13753_v26, %v5186_v40  ;;  %v18579_v40 = vld [vmem:[#allocation2 + $0xf8] sm:$0xf]  ;;  %v18590_v26 = vld [vmem:[#allocation2 + $0x10c] sm:$0xf]  ;;  %21774 = vst [vmem:[#allocation19_spill] sm:$0xff] %v18598_v21 }
 0x2e3   : > { %v13800_v45 = vcombine.low %v5187_v4, %v5190_v1  ;;  %v5196_v41 = vsel %vm18002_vm11, %v5194_v51, %v5195_v47  ;;  %21769 = vst [vmem:[#allocation14_spill] sm:$0xff] %v18579_v40  ;;  %21772 = vst [vmem:[#allocation17_spill] sm:$0xff] %v18590_v26  ;;  %v16457_v47 = vld [vmem:[%s21659_s7 + $0x130] sm:$0xff]   ;;  %v3843_v51 = vshll.u32 %v18593_v62, 16  ;;  %v18607_v4 = vld [vmem:[#allocation2 + $0x11c] sm:$0xf] }
 0x2e4   : > { %v13801_v25 = vcombine.low %v5193_v19, %v5196_v41  ;;  %21776 = vst [vmem:[#allocation21_spill] sm:$0xff] %v18607_v4  ;;  %v6424_v19 = vld [vmem:[#allocation2 + $0x2c] sm:$0xf]  ;;  %v18610_v41 = vrot.slane %v3840_v33, 4  ;;  %v16463_v40 = vld [vmem:[#allocation2 + $0x140] sm:$0xff]  }
 0x2e5   : > { %v11621_v62 = vld [vmem:[%s17094_s14 + $0x108] sm:$0xff] }
 0x2e6   : > { %21777 = vst [vmem:[#allocation22_spill] sm:$0xff] %v18610_v41 }
 0x2e9   : > { %15221 = vmatmul.mubr.bf16.gmra.mrb[56].mxu1 %v13791_v53  ;;  %v16590_v53 = vld [vmem:[#allocation2 + $0xf0] sm:$0xf] }
 0x2ea   : > { %15224 = vmatprep.mubr.bf16.mxu1 %v13792_v29  ;;  %v3752_v29 = vshrl.u32 %v16590_v53, 16  ;;  %v3755_v59 = vshll.u32 %v16590_v53, 16  ;;  %v6504_v53 = vrot.slane %v6502_v50, 5 }
 0x2ec   : > { %v3754_v18 = vrot.slane %v3752_v29, 4  ;;  %v3757_v32 = vrot.slane %v3755_v59, 5  ;;  %v6543_v29 = vshrl.u32 %v6423_v9, 16  ;;  %v6546_v59 = vshll.u32 %v6423_v9, 16 }
 0x2ee   : > { %v3758_v60 = vor.u32 %v3757_v32, %v3754_v18  ;;  %v6552_v18 = vshll.u32 %v6424_v19, 16  ;;  %v6556_v32 = vshrl.u32 %v6424_v19, 16  ;;  %v16438_v19 = vld [vmem:[#allocation2 + $0x78] sm:$0xff]  }
 0x2f0   : > { %v6558_v33 = vrot.slane %v6556_v32, 4 }
 0x2f1   : > { %15225 = vmatmul.mubr.bf16.gmra.mrb[60].mxu1 %v13793_v63  ;;  %v16592_v63 = vld [vmem:[#allocation2 + $0x104] sm:$0xf] }
 0x2f2   : > { %15228 = vmatprep.mubr.bf16.mxu1 %v13794_v58  ;;  %v3796_v22 = vshrl.u32 %v16592_v63, 16  ;;  %v16433_v58 = vld [vmem:[#allocation2 + $0x50] sm:$0xff]   ;;  %v3799_v39 = vshll.u32 %v16592_v63, 16 }
 0x2f3   : > { %v6426_v63 = vld [vmem:[#allocation2 + $0x34] sm:$0xf] }
 0x2f4   : > { %v18596_v20 = vrot.slane %v3796_v22, 4  ;;  %v6545_v22 = vrot.slane %v6543_v29, 4 }
 0x2f6   : > { %21773 = vst [vmem:[#allocation18_spill] sm:$0xff] %v18596_v20 }
 0x2f9   : > { %15229 = vmatmul.mubr.bf16.gmra.mrb[0].mxu1 %v13795_v57  ;;  %v6419_v57 = vld [vmem:[#allocation2 + $0x18] sm:$0xf] }
 0x2fa   : > { %15232 = vmatprep.mubr.bf16.mxu1 %v13796_v2  ;;  %v18585_v2 = vrot.slane %v3758_v60, 4  ;;  %v6508_v30 = vshll.u32 %v6419_v57, 16  ;;  %v6512_v46 = vshrl.u32 %v6419_v57, 16  ;;  %v18625_v57 = vrot.slane %v6552_v18, 5 }
 0x2fb   : > { %v18633_v18 = vrot.slane %v3843_v51, 5 }
 0x2fd   : > { %21778 = vst [vmem:[#allocation23_spill] sm:$0xff] %v18633_v18 }
 0x301   : > { %15233 = vmatmul.mubr.bf16.gmra.mrb[4].mxu1 %v13797_v35  ;;  %v6421_v35 = vld [vmem:[#allocation2 + $0x20] sm:$0xf] }
 0x302   : > { %15236 = vmatprep.mubr.bf16.mxu1 %v13798_v37  ;;  %v18601_v37 = vrot.slane %v3799_v39, 5  ;;  %v6428_v39 = vld [vmem:[#allocation2 + $0x3c] sm:$0xf] }
 0x303   : > { %v6590_v9 = vshll.u32 %v6428_v39, 16 }
 0x304   : > { %21775 = vst [vmem:[#allocation20_spill] sm:$0xff] %v18601_v37 }
 0x309   : > { %15237 = vmatmul.mubr.bf16.gmra.mrb[8].mxu1 %v13799_v6  ;;  %v6518_v6 = vshll.u32 %v6420_v10, 16 }
 0x30a   : > { %15240 = vmatprep.mubr.bf16.mxu1 %v13800_v45  ;;  %v6522_v45 = vshrl.u32 %v6420_v10, 16  ;;  %v6562_v10 = vshll.u32 %v6425_v12, 16 }
 0x30c   : > { %v6524_v13 = vrot.slane %v6522_v45, 4 }
 0x311   : > { %15241 = vmatmul.mubr.bf16.gmra.mrb[12].mxu1 %v13801_v25 }
 0x312   : > { %15260 = vmatprep.mubr.bf16.mxu1 %v16425_v16  ;;  %v16434_v16 = vld [vmem:[#allocation2 + $0x58] sm:$0xff]  }
 0x319   : > { %15261 = vmatmul.mubr.bf16.vlgmr.msra.gmra.mrb[16].mxu1 %v16426_v42  ;;  %v6528_v42 = vshll.u32 %v6421_v35, 16 }
 0x31a   : > { %15325 = vmatpush3.bf16.msra.mxu1 %v18333_v52  ;;  %15264 = vmatprep.mubr.bf16.mxu1 %v16428_v27  ;;  %v16447_v52 = vld [vmem:[%s21659_s7 + $0x120] sm:$0xff]   ;;  %v6532_v27 = vshrl.u32 %v6421_v35, 16  ;;  %v6572_v35 = vshll.u32 %v6426_v63, 16 }
 0x31b   : > { %15326 = vmatprep.subr.bf16.mxu1 %v16432_v24  ;;  %v18620_v60 = vrot.slane %v6528_v42, 5 }
 0x31e   : > { %15327 = vmatpush3.bf16.msra.mxu1 %v16432_v24  ;;  %v16435_v24 = vld [vmem:[#allocation2 + $0x64] sm:$0xff]  }
 0x31f   : > { %15328 = vmatprep.subr.bf16.mxu1 %v16437_v31 }
 0x321   : > { %15265 = vmatmul.mubr.bf16.gmra.mrb[20].mxu1 %v16429_v17  ;;  %v16462_v17 = vld [vmem:[%s21659_s7 + $0x138] sm:$0xff]  }
 0x322   : > { %15268 = vmatprep.mubr.bf16.mxu1 %v16430_v36  ;;  %15329 = vmatpush3.bf16.msra.mxu1 %v16437_v31  ;;  %v6501_v31 = vrot.slane %v6499_v48, 4  ;;  %v18616_v36 = vrot.slane %v6508_v30, 5  ;;  %v6566_v48 = vshrl.u32 %v6425_v12, 16  ;;  %v6576_v30 = vshrl.u32 %v6426_v63, 16  ;;  %v6427_v12 = vld [vmem:[#allocation2 + $0x38] sm:$0x1] }
 0x323   : > { %15330 = vmatprep.subr.bf16.mxu1 %v16442_v55 }
 0x324   : > { %v6505_v50 = vor.u32 %v6504_v53, %v6501_v31  ;;  %v6559_v31 = vor.u32 %v6558_v33, %v18625_v57  ;;  %v6564_v53 = vrot.slane %v6562_v10, 5 }
 0x326   : > { %15331 = vmatpush3.bf16.msra.mxu1 %v16442_v55  ;;  %v6514_v55 = vrot.slane %v6512_v46, 4  ;;  %v16436_v46 = vld [vmem:[#allocation2 + $0x6c] sm:$0xff]   ;;  %v6506_v32 = vrot.slane %v6505_v50, 4  ;;  %v6560_v33 = vrot.slane %v6559_v31, 4  ;;  %v6434_v50 = vld [vmem:[#allocation2 + $0x54] sm:$0xf] }
 0x327   : > { %15332 = vmatprep.subr.bf16.mxu1 %v16447_v52 }
 0x329   : > { %15269 = vmatmul.mubr.bf16.gmra.mrb[24].mxu1 %v16431_v14  ;;  %v6534_v14 = vrot.slane %v6532_v27, 4 }
 0x32a   : > { %15272 = vmatprep.mubr.bf16.mxu1 %v16433_v58  ;;  %15333 = vmatpush3.bf16.msra.mxu1 %v16447_v52  ;;  %v18618_v52 = vrot.slane %v6518_v6, 5  ;;  %v6548_v58 = vrot.slane %v6546_v59, 5  ;;  %v6568_v59 = vrot.slane %v6566_v48, 4  ;;  %v6582_v48 = vshll.u32 %v6427_v12, 16 }
 0x32b   : > { %15334 = vmatprep.subr.bf16.mxu1 %v16452_v5  ;;  %v6535_v27 = vor.u32 %v6534_v14, %v18620_v60  ;;  %v6592_v14 = vrot.slane %v6590_v9, 5 }
 0x32c   : > { %v6525_v42 = vor.u32 %v6524_v13, %v18618_v52  ;;  %v6549_v29 = vor.u32 %v6548_v58, %v6545_v22  ;;  %v6430_v13 = vld [vmem:[#allocation2 + $0x44] sm:$0xf]  ;;  %v6569_v10 = vor.u32 %v6568_v59, %v6564_v53 }
 0x32e   : > { %15335 = vmatpush3.bf16.msra.mxu1 %v16452_v5  ;;  %v6429_v5 = vld [vmem:[#allocation2 + $0x40] sm:$0xf]  ;;  %v6550_v51 = vrot.slane %v6549_v29, 4 }
 0x32f   : > { %15336 = vmatprep.subr.bf16.mxu1 %v16457_v47  ;;  %v6596_v6 = vshll.u32 %v6429_v5, 16  ;;  %v6600_v45 = vshrl.u32 %v6429_v5, 16  ;;  %v6536_v5 = vrot.slane %v6535_v27, 4  ;;  %v16440_v27 = vld [vmem:[#allocation2 + $0x8c] sm:$0xff]  }
 0x330   : > { %v6555_v12 = vsel %vm18641_vm14, %v6550_v51, %v18625_v57 }
 0x331   : > { %15273 = vmatmul.mubr.bf16.gmra.mrb[28].mxu1 %v16434_v16  ;;  %v6515_v16 = vor.u32 %v6514_v55, %v18616_v36  ;;  %v6578_v55 = vrot.slane %v6576_v30, 4  ;;  %v6602_v22 = vrot.slane %v6600_v45, 4  ;;  %v6606_v30 = vshll.u32 %v6430_v13, 16  ;;  %v16439_v45 = vld [vmem:[#allocation2 + $0x80] sm:$0xff]  }
 0x332   : > { %15276 = vmatprep.mubr.bf16.mxu1 %v16435_v24  ;;  %15337 = vmatpush3.bf16.msra.mxu1 %v16457_v47  ;;  %v6587_v47 = vshrl.u32 %v6428_v39, 16  ;;  %v6538_v24 = vshll.u32 %v6422_v0, 16  ;;  %v18637_v0 = vrot.slane %v6596_v6, 5  ;;  %v6526_v39 = vrot.slane %v6525_v42, 4  ;;  %v6431_v42 = vld [vmem:[#allocation2 + $0x48] sm:$0xf] }
 0x333   : > { %15338 = vmatprep.subr.bf16.mxu1 %v16462_v17  ;;  %v6516_v58 = vrot.slane %v6515_v16, 4 }
 0x334   : > { %v6589_v63 = vrot.slane %v6587_v47, 4  ;;  %v18647_v47 = vld [vmem:[#allocation2 + $0x12c] sm:$0xf]  ;;  %v6603_v16 = vor.u32 %v6602_v22, %v18637_v0  ;;  %v6531_v31 = vsel %vm18641_vm14, %v6526_v39, %v18620_v60 }
 0x335   : > { %21781 = vst [vmem:[#allocation24_spill] sm:$0xff] %v18647_v47  ;;  %v6521_v29 = vsel %vm18641_vm14, %v6516_v58, %v18618_v52  ;;  %v6432_v52 = vld [vmem:[#allocation2 + $0x4c] sm:$0x1]  ;;  %v6616_v58 = vshll.u32 %v6431_v42, 16 }
 0x336   : > { %15339 = vmatpush3.bf16.msra.mxu1 %v16462_v17  ;;  %v18635_v17 = vrot.slane %v6572_v35, 5  ;;  %v16460_v47 = vld [vmem:[#allocation2 + $0x12c] sm:$0xff]  }
 0x337   : > { %15404 = vmatprep.subr.bf16.mxu1 %v16465_v15  ;;  %v6540_v15 = vrot.slane %v6538_v24, 5  ;;  %v6511_v24 = vsel %vm18641_vm14, %v6506_v32, %v18616_v36  ;;  %v6584_v36 = vrot.slane %v6582_v48, 5  ;;  %v6433_v32 = vld [vmem:[#allocation2 + $0x50] sm:$0xf] }
 0x338   : > { %v6579_v35 = vor.u32 %v6578_v55, %v18635_v17  ;;  %v6565_v55 = vsel %vm18641_vm14, %v6560_v33, %v6564_v53  ;;  %v18670_v51 = vcombine.low %v6511_v24, %v6521_v29  ;;  %v6631_v53 = vshrl.u32 %v6433_v32, 16  ;;  %v6438_v24 = vld [vmem:[#allocation2 + $0x64] sm:$0xf]  ;;  %v16441_v29 = vld [vmem:[#allocation2 + $0x94] sm:$0xff]  }
 0x339   : > { %15277 = vmatmul.mubr.bf16.gmra.mrb[32].mxu1 %v16436_v46  ;;  %v6610_v46 = vshrl.u32 %v6430_v13, 16  ;;  %v6541_v59 = vsel %vm18641_vm14, %v6536_v5, %v6540_v15  ;;  %v6570_v13 = vrot.slane %v6569_v10, 4  ;;  %v6604_v5 = vrot.slane %v6603_v16, 4 }
 0x33a   : > { %15280 = vmatprep.mubr.bf16.mxu1 %v16438_v19  ;;  %v6593_v19 = vor.u32 %v6592_v14, %v6589_v63  ;;  %v6580_v63 = vrot.slane %v6579_v35, 4  ;;  %v6608_v14 = vrot.slane %v6606_v30, 5  ;;  %v6620_v15 = vshrl.u32 %v6431_v42, 16 }
 0x33b   : > { %v6612_v22 = vrot.slane %v6610_v46, 4  ;;  %v6634_v33 = vshll.u32 %v6433_v32, 16  ;;  %v18672_v10 = vcombine.low %v6531_v31, %v6541_v59  ;;  %v18674_v48 = vcombine.low %v6555_v12, %v6565_v55  ;;  %v6435_v46 = vld [vmem:[#allocation2 + $0x58] sm:$0xf]  ;;  %v16443_v31 = vld [vmem:[#allocation2 + $0xa0] sm:$0xff]  }
 0x33c   : > { %v6594_v39 = vrot.slane %v6593_v19, 4  ;;  %v6575_v35 = vsel %vm18641_vm14, %v6570_v13, %v18635_v17  ;;  %v6626_v30 = vshll.u32 %v6432_v52, 16  ;;  %v18681_v16 = vrot.slane %v6616_v58, 5  ;;  %v6439_v52 = vld [vmem:[#allocation2 + $0x68] sm:$0xf] }
 0x33d   : > { %v6613_v19 = vor.u32 %v6612_v22, %v6608_v14  ;;  %v6640_v42 = vshll.u32 %v6434_v50, 16  ;;  %v6609_v17 = vsel %vm18641_vm14, %v6604_v5, %v6608_v14  ;;  %v6622_v12 = vrot.slane %v6620_v15, 4 }
 0x33e   : > { %v6599_v59 = vsel %vm18641_vm14, %v6594_v39, %v18637_v0  ;;  %v6644_v55 = vshrl.u32 %v6434_v50, 16  ;;  %v6633_v13 = vrot.slane %v6631_v53, 4  ;;  %v6636_v32 = vrot.slane %v6634_v33, 5  ;;  %v6440_v39 = vld [vmem:[#allocation2 + $0x6c] sm:$0xf] }
 0x33f   : > { %v6675_v57 = vshrl.u32 %v6438_v24, 16  ;;  %v6678_v60 = vshll.u32 %v6438_v24, 16  ;;  %v18690_v1 = vrot.slane %v6613_v19, 4  ;;  %v18692_v6 = vrot.slane %v6626_v30, 5  ;;  %v6441_v53 = vld [vmem:[#allocation2 + $0x70] sm:$0xf] }
 0x340   : > { %v18694_v0 = vrot.slane %v6640_v42, 5  ;;  %v18696_v14 = vcombine.low %v6599_v59, %v6609_v17  ;;  %v6623_v50 = vor.u32 %v6622_v12, %v18681_v16  ;;  %v6684_v5 = vshll.u32 %v6439_v52, 16  ;;  %v6443_v19 = vld [vmem:[#allocation2 + $0x78] sm:$0xf]  ;;  %v6437_v59 = vld [vmem:[#allocation2 + $0x60] sm:$0x1] }
 0x341   : > { %15281 = vmatmul.mubr.bf16.gmra.mrb[36].mxu1 %v16439_v45  ;;  %v6585_v45 = vsel %vm18641_vm14, %v6580_v63, %v6584_v36  ;;  %v6650_v36 = vshll.u32 %v6435_v46, 16  ;;  %v6654_v63 = vshrl.u32 %v6435_v46, 16  ;;  %v6688_v15 = vshrl.u32 %v6439_v52, 16  ;;  %v16444_v52 = vld [vmem:[#allocation2 + $0xa8] sm:$0xff]  }
 0x342   : > { %15284 = vmatprep.mubr.bf16.mxu1 %v16440_v27  ;;  %v6436_v27 = vld [vmem:[#allocation2 + $0x5c] sm:$0xf]  ;;  %v18688_v25 = vcombine.low %v6575_v35, %v6585_v45  ;;  %v6637_v33 = vor.u32 %v6636_v32, %v6633_v13  ;;  %v6646_v46 = vrot.slane %v6644_v55, 4  ;;  %v6680_v24 = vrot.slane %v6678_v60, 5  ;;  %v16445_v32 = vld [vmem:[#allocation2 + $0xb4] sm:$0xff]  }
 0x343   : > { %v6660_v22 = vshll.u32 %v6436_v27, 16  ;;  %v6664_v58 = vshrl.u32 %v6436_v27, 16  ;;  %v18699_v35 = vrot.slane %v6650_v36, 5  ;;  %v6656_v45 = vrot.slane %v6654_v63, 4 }
 0x344   : > { %v6677_v27 = vrot.slane %v6675_v57, 4  ;;  %v6694_v17 = vshll.u32 %v6440_v39, 16  ;;  %v6698_v12 = vshrl.u32 %v6440_v39, 16  ;;  %v6704_v7 = vshll.u32 %v6441_v53, 16 }
 0x345   : > { %v18701_v30 = vrot.slane %v6660_v22, 5  ;;  %v6666_v42 = vrot.slane %v6664_v58, 4  ;;  %v6708_v8 = vshrl.u32 %v6441_v53, 16  ;;  %v18703_v43 = vrot.slane %v6684_v5, 5  ;;  %v6445_v53 = vld [vmem:[#allocation2 + $0x80] sm:$0xf] }
 0x346   : > { %v6719_v55 = vshrl.u32 %v6443_v19, 16  ;;  %v6722_v13 = vshll.u32 %v6443_v19, 16  ;;  %v18705_v36 = vrot.slane %v6623_v50, 4  ;;  %v6647_v63 = vor.u32 %v6646_v46, %v18694_v0  ;;  %v6442_v46 = vld [vmem:[#allocation2 + $0x74] sm:$0x1] }
 0x347   : > { %v6638_v60 = vrot.slane %v6637_v33, 4  ;;  %v6657_v58 = vor.u32 %v6656_v45, %v18699_v35  ;;  %v6667_v39 = vor.u32 %v6666_v42, %v18701_v30  ;;  %v6670_v9 = vshll.u32 %v6437_v59, 16 }
 0x348   : > { %v18710_v44 = vrot.slane %v6694_v17, 5  ;;  %v6700_v5 = vrot.slane %v6698_v12, 4  ;;  %v6710_v19 = vrot.slane %v6708_v8, 4  ;;  %v6681_v50 = vor.u32 %v6680_v24, %v6677_v27 }
 0x349   : > { %15285 = vmatmul.mubr.bf16.gmra.mrb[40].mxu1 %v16441_v29  ;;  %v6444_v29 = vld [vmem:[#allocation2 + $0x7c] sm:$0xf]  ;;  %v6721_v49 = vrot.slane %v6719_v55, 4  ;;  %v6738_v42 = vshll.u32 %v6445_v53, 16  ;;  %v6742_v59 = vshrl.u32 %v6445_v53, 16  ;;  %v6648_v17 = vrot.slane %v6647_v63, 4 }
 0x34a   : > { %15288 = vmatprep.mubr.bf16.mxu1 %v16443_v31  ;;  %v6690_v31 = vrot.slane %v6688_v15, 4  ;;  %v6728_v22 = vshll.u32 %v6444_v29, 16  ;;  %v6732_v57 = vshrl.u32 %v6444_v29, 16  ;;  %v18712_v15 = vrot.slane %v6704_v7, 5  ;;  %v6446_v55 = vld [vmem:[#allocation2 + $0x84] sm:$0xf] }
 0x34b   : > { %v6724_v29 = vrot.slane %v6722_v13, 5  ;;  %v6619_v7 = vsel %vm18641_vm14, %v18690_v1, %v18681_v16  ;;  %v6658_v8 = vrot.slane %v6657_v58, 4  ;;  %v6672_v12 = vrot.slane %v6670_v9, 5  ;;  %v16446_v13 = vld [vmem:[#allocation2 + $0xbc] sm:$0xff]   ;;  %v6447_v58 = vld [vmem:[#allocation2 + $0x88] sm:$0x1] }
 0x34c   : > { %v6691_v11 = vor.u32 %v6690_v31, %v18703_v43  ;;  %v18715_v33 = vrot.slane %v6728_v22, 5  ;;  %v6734_v45 = vrot.slane %v6732_v57, 4  ;;  %v6668_v27 = vrot.slane %v6667_v39, 4 }
 0x34d   : > { %v6701_v24 = vor.u32 %v6700_v5, %v18710_v44  ;;  %v6714_v31 = vshll.u32 %v6442_v46, 16  ;;  %v6629_v22 = vsel %vm18641_vm14, %v18705_v36, %v18692_v6  ;;  %v6682_v57 = vrot.slane %v6681_v50, 4  ;;  %v6448_v5 = vld [vmem:[#allocation2 + $0x8c] sm:$0xf] }
 0x34e   : > { %v6692_v53 = vrot.slane %v6691_v11, 4  ;;  %v6725_v1 = vor.u32 %v6724_v29, %v6721_v49  ;;  %v6643_v9 = vsel %vm18641_vm14, %v6638_v60, %v18694_v0  ;;  %v6735_v16 = vor.u32 %v6734_v45, %v18715_v33 }
 0x34f   : > { %v6740_v63 = vrot.slane %v6738_v42, 5  ;;  %v6744_v39 = vrot.slane %v6742_v59, 4  ;;  %v6663_v6 = vsel %vm18641_vm14, %v6658_v8, %v18701_v30  ;;  %v6748_v11 = vshll.u32 %v6446_v55, 16 }
 0x350   : > { %v6752_v49 = vshrl.u32 %v6446_v55, 16  ;;  %v6673_v36 = vsel %vm18641_vm14, %v6668_v27, %v6672_v12  ;;  %v6702_v0 = vrot.slane %v6701_v24, 4  ;;  %v6716_v50 = vrot.slane %v6714_v31, 5 }
 0x351   : > { %15289 = vmatmul.mubr.bf16.gmra.mrb[44].mxu1 %v16444_v52  ;;  %v6711_v52 = vor.u32 %v6710_v19, %v18712_v15  ;;  %v6653_v19 = vsel %vm18641_vm14, %v6648_v17, %v18699_v35  ;;  %v6687_v46 = vsel %vm18641_vm14, %v6682_v57, %v18703_v43  ;;  %v6726_v29 = vrot.slane %v6725_v1, 4  ;;  %v6449_v35 = vld [vmem:[#allocation2 + $0x90] sm:$0xf]  ;;  %v6451_v1 = vld [vmem:[#allocation2 + $0x98] sm:$0xf] }
 0x352   : > { %15292 = vmatprep.mubr.bf16.mxu1 %v16445_v32  ;;  %v16448_v32 = vld [vmem:[#allocation2 + $0xc8] sm:$0xff]   ;;  %v6758_v45 = vshll.u32 %v6447_v58, 16  ;;  %v6763_v42 = vshrl.u32 %v6448_v5, 16  ;;  %v6697_v30 = vsel %vm18641_vm14, %v6692_v53, %v18710_v44  ;;  %v6736_v59 = vrot.slane %v6735_v16, 4  ;;  %v16449_v43 = vld [vmem:[#allocation2 + $0xd0] sm:$0xff]   ;;  %v16450_v16 = vld [vmem:[#allocation2 + $0xdc] sm:$0xff]  }
 0x353   : > { %v6712_v60 = vrot.slane %v6711_v52, 4  ;;  %v6745_v17 = vor.u32 %v6744_v39, %v6740_v63  ;;  %v6766_v8 = vshll.u32 %v6448_v5, 16  ;;  %v18745_v12 = vcombine.low %v6619_v7, %v6629_v22 }
 0x354   : > { %v18747_v27 = vcombine.low %v6643_v9, %v6653_v19  ;;  %v18749_v24 = vrot.slane %v6748_v11, 5  ;;  %v6754_v52 = vrot.slane %v6752_v49, 4  ;;  %v18751_v31 = vcombine.low %v6663_v6, %v6673_v36  ;;  %v6453_v9 = vld [vmem:[#allocation2 + $0xa0] sm:$0xf]  ;;  %v6454_v19 = vld [vmem:[#allocation2 + $0xa4] sm:$0xf] }
 0x355   : > { %v6707_v55 = vsel %vm18641_vm14, %v6702_v0, %v18712_v15  ;;  %v6717_v44 = vsel %vm18641_vm14, %v6712_v60, %v6716_v50  ;;  %v18758_v57 = vcombine.low %v6687_v46, %v6697_v30  ;;  %v6731_v7 = vsel %vm18641_vm14, %v6726_v29, %v18715_v33  ;;  %v6455_v36 = vld [vmem:[#allocation2 + $0xa8] sm:$0xf]  ;;  %v6456_v0 = vld [vmem:[#allocation2 + $0xac] sm:$0xf] }
 0x356   : > { %v18763_v22 = vrot.slane %v6758_v45, 5  ;;  %v18765_v53 = vrot.slane %v6763_v42, 4  ;;  %v6741_v15 = vsel %vm18641_vm14, %v6736_v59, %v6740_v63  ;;  %v18769_v58 = vrot.slane %v6745_v17, 4 }
 0x357   : > { %v18771_v39 = vrot.slane %v6766_v8, 5  ;;  %v6776_v5 = vshrl.u32 %v6449_v35, 16  ;;  %v18773_v6 = vcombine.low %v6707_v55, %v6717_v44  ;;  %v6755_v33 = vor.u32 %v6754_v52, %v18749_v24  ;;  %v16451_v52 = vld [vmem:[#allocation2 + $0xe4] sm:$0xff]  }
 0x358   : > { %v6792_v60 = vshll.u32 %v6451_v1, 16  ;;  %v6796_v50 = vshrl.u32 %v6451_v1, 16  ;;  %v6807_v46 = vshrl.u32 %v6453_v9, 16  ;;  %v6810_v29 = vshll.u32 %v6453_v9, 16 }
 0x359   : > { %15293 = vmatmul.mubr.bf16.gmra.mrb[48].mxu1 %v16446_v13  ;;  %v6450_v13 = vld [vmem:[#allocation2 + $0x94] sm:$0xf]  ;;  %v18776_v63 = vcombine.low %v6731_v7, %v6741_v15  ;;  %v6816_v42 = vshll.u32 %v6454_v19, 16  ;;  %v6826_v30 = vshll.u32 %v6455_v36, 16  ;;  %v6830_v59 = vshrl.u32 %v6455_v36, 16 }
 0x35a   : > { %15296 = vmatprep.mubr.bf16.mxu1 %v16448_v32  ;;  %v6772_v32 = vshll.u32 %v6449_v35, 16  ;;  %v6782_v11 = vshll.u32 %v6450_v13, 16  ;;  %v6786_v49 = vshrl.u32 %v6450_v13, 16  ;;  %v6820_v35 = vshrl.u32 %v6454_v19, 16  ;;  %v6458_v15 = vld [vmem:[#allocation2 + $0xb4] sm:$0xf] }
 0x35b   : > { %v6836_v17 = vshll.u32 %v6456_v0, 16  ;;  %v6840_v8 = vshrl.u32 %v6456_v0, 16  ;;  %v6756_v55 = vrot.slane %v6755_v33, 4  ;;  %v6778_v44 = vrot.slane %v6776_v5, 4  ;;  %v6452_v33 = vld [vmem:[#allocation2 + $0x9c] sm:$0x1] }
 0x35c   : > { %v18778_v45 = vrot.slane %v6772_v32, 5  ;;  %v18780_v13 = vrot.slane %v6782_v11, 5  ;;  %v6788_v1 = vrot.slane %v6786_v49, 4  ;;  %v18782_v9 = vrot.slane %v6792_v60, 5  ;;  %v6457_v49 = vld [vmem:[#allocation2 + $0xb0] sm:$0x1] }
 0x35d   : > { %v6809_v7 = vrot.slane %v6807_v46, 4  ;;  %v6812_v32 = vrot.slane %v6810_v29, 5  ;;  %v6769_v19 = vor.u32 %v18771_v39, %v18765_v53  ;;  %v18790_v5 = vrot.slane %v6816_v42, 5  ;;  %v6459_v46 = vld [vmem:[#allocation2 + $0xb8] sm:$0xf] }
 0x35e   : > { %v6822_v11 = vrot.slane %v6820_v35, 4  ;;  %v18792_v36 = vrot.slane %v6826_v30, 5  ;;  %v6832_v0 = vrot.slane %v6830_v59, 4  ;;  %v18794_v60 = vrot.slane %v6836_v17, 5 }
 0x35f   : > { %v6761_v29 = vsel %vm18641_vm14, %v6756_v55, %v18763_v22  ;;  %v6851_v53 = vshrl.u32 %v6458_v15, 16  ;;  %v6854_v39 = vshll.u32 %v6458_v15, 16  ;;  %v6789_v42 = vor.u32 %v6788_v1, %v18780_v13 }
 0x360   : > { %v6802_v30 = vshll.u32 %v6452_v33, 16  ;;  %v6813_v23 = vor.u32 %v6812_v32, %v6809_v7  ;;  %v6823_v59 = vor.u32 %v6822_v11, %v18790_v5  ;;  %v6846_v17 = vshll.u32 %v6457_v49, 16  ;;  %v6461_v32 = vld [vmem:[#allocation2 + $0xc0] sm:$0xf]  ;;  %v16454_v11 = vld [vmem:[#allocation2 + $0xf8] sm:$0xff]   ;;  %v16455_v49 = vld [vmem:[#allocation2 + $0x104] sm:$0xff]  }
 0x361   : > { %15297 = vmatmul.mubr.bf16.gmra.mrb[52].mxu1 %v16449_v43  ;;  %v6798_v43 = vrot.slane %v6796_v50, 4  ;;  %v6842_v50 = vrot.slane %v6840_v8, 4  ;;  %v6860_v8 = vshll.u32 %v6459_v46, 16  ;;  %v6864_v28 = vshrl.u32 %v6459_v46, 16 }
 0x362   : > { %15300 = vmatprep.mubr.bf16.mxu1 %v16450_v16  ;;  %v6751_v16 = vsel %vm18641_vm14, %v18769_v58, %v18749_v24  ;;  %v6779_v24 = vor.u32 %v6778_v44, %v18778_v45  ;;  %v6460_v58 = vld [vmem:[#allocation2 + $0xbc] sm:$0xf]  ;;  %v6833_v22 = vor.u32 %v6832_v0, %v18792_v36  ;;  %v6770_v15 = vrot.slane %v6769_v19, 4  ;;  %v6462_v19 = vld [vmem:[#allocation2 + $0xc4] sm:$0x1] }
 0x363   : > { %v6799_v35 = vor.u32 %v6798_v43, %v18782_v9  ;;  %v6843_v55 = vor.u32 %v6842_v50, %v18794_v60  ;;  %v6870_v44 = vshll.u32 %v6460_v58, 16  ;;  %v6874_v4 = vshrl.u32 %v6460_v58, 16 }
 0x364   : > { %v6780_v18 = vrot.slane %v6779_v24, 4  ;;  %v6853_v1 = vrot.slane %v6851_v53, 4  ;;  %v6856_v41 = vrot.slane %v6854_v39, 5  ;;  %v6790_v43 = vrot.slane %v6789_v42, 4 }
 0x365   : > { %v6800_v33 = vrot.slane %v6799_v35, 4  ;;  %v6804_v7 = vrot.slane %v6802_v30, 5  ;;  %v6824_v21 = vrot.slane %v6823_v59, 4  ;;  %v6848_v46 = vrot.slane %v6846_v17, 5 }
 0x366   : > { %v6866_v0 = vrot.slane %v6864_v28, 4  ;;  %v6834_v26 = vrot.slane %v6833_v22, 4  ;;  %v6844_v50 = vrot.slane %v6843_v55, 4  ;;  %v18807_v3 = vrot.slane %v6870_v44, 5  ;;  %v6465_v55 = vld [vmem:[#allocation2 + $0xd0] sm:$0xf] }
 0x367   : > { %v6876_v24 = vrot.slane %v6874_v4, 4  ;;  %v18809_v58 = vcombine.low %v6751_v16, %v6761_v29  ;;  %v6857_v53 = vor.u32 %v6856_v41, %v6853_v1  ;;  %v6880_v39 = vshll.u32 %v6461_v32, 16  ;;  %v16456_v44 = vld [vmem:[#allocation2 + $0x10c] sm:$0xff]  }
 0x368   : > { %v6884_v42 = vshrl.u32 %v6461_v32, 16  ;;  %v6775_v35 = vsel %vm18641_vm14, %v6770_v15, %v18778_v45  ;;  %v6785_v28 = vsel %vm18641_vm14, %v6780_v18, %v18780_v13  ;;  %v6795_v30 = vsel %vm18641_vm14, %v6790_v43, %v18782_v9  ;;  %v6464_v18 = vld [vmem:[#allocation2 + $0xcc] sm:$0xf]  ;;  %v16471_v13 = vld [vmem:[%s21659_s7 + $0x40] sm:$0xff]   ;;  %v6466_v43 = vld [vmem:[#allocation2 + $0xd4] sm:$0xf] }
 0x369   : > { %15301 = vmatmul.mubr.bf16.gmra.mrb[56].mxu1 %v16451_v52  ;;  %v6814_v52 = vrot.slane %v6813_v23, 4  ;;  %v6463_v23 = vld [vmem:[#allocation2 + $0xc8] sm:$0xf]  ;;  %v6805_v4 = vsel %vm18641_vm14, %v6800_v33, %v6804_v7  ;;  %v6829_v45 = vsel %vm18641_vm14, %v6824_v21, %v18792_v36  ;;  %v6890_v29 = vshll.u32 %v6462_v19, 16  ;;  %15004 = vmatprep.subr.bf16.mxu0 %v16471_v13  ;;  %v16458_v33 = vld [vmem:[#allocation2 + $0x118] sm:$0xff]  }
 0x36a   : > { %15304 = vmatprep.mubr.bf16.mxu1 %v16453_v54  ;;  %v18805_v54 = vrot.slane %v6860_v8, 5  ;;  %v6839_v9 = vsel %vm18641_vm14, %v6834_v26, %v18794_v60  ;;  %v6877_v59 = vor.u32 %v6876_v24, %v18807_v3  ;;  %v6895_v17 = vshrl.u32 %v6463_v23, 16  ;;  %15005 = vmatpush3.bf16.msra.mxu0 %v16471_v13  ;;  %v6469_v24 = vld [vmem:[#allocation2 + $0xe0] sm:$0xf] }
 0x36b   : > { %v6819_v41 = vsel %vm18641_vm14, %v6814_v52, %v18790_v5  ;;  %v6849_v5 = vsel %vm18641_vm14, %v6844_v50, %v6848_v46  ;;  %v18838_v21 = vcombine.low %v6775_v35, %v6785_v28  ;;  %v18840_v36 = vrot.slane %v6857_v53, 4  ;;  %v6470_v35 = vld [vmem:[#allocation2 + $0xe4] sm:$0xf]  ;;  %v6471_v28 = vld [vmem:[#allocation2 + $0xe8] sm:$0xf] }
 0x36c   : > { %v6867_v16 = vor.u32 %v6866_v0, %v18805_v54  ;;  %v18842_v8 = vrot.slane %v6880_v39, 5  ;;  %v18844_v22 = vrot.slane %v6884_v42, 4  ;;  %v18846_v15 = vcombine.low %v6795_v30, %v6805_v4 }
 0x36d   : > { %v18848_v26 = vcombine.low %v6819_v41, %v6829_v45  ;;  %v6898_v60 = vshll.u32 %v6463_v23, 16  ;;  %v6904_v1 = vshll.u32 %v6464_v18, 16  ;;  %v18850_v7 = vcombine.low %v6839_v9, %v6849_v5  ;;  %v6473_v9 = vld [vmem:[#allocation2 + $0xf0] sm:$0xf] }
 0x36e   : > { %v18852_v52 = vrot.slane %v6867_v16, 4  ;;  %v18854_v32 = vrot.slane %v6890_v29, 5  ;;  %v18856_v46 = vrot.slane %v6877_v59, 4  ;;  %v18858_v0 = vrot.slane %v6895_v17, 4  ;;  %v16473_v16 = vld [vmem:[%s21659_s7 + $0x48] sm:$0xff]   ;;  %v16474_v5 = vld [vmem:[%s21659_s7 + $0x50] sm:$0xff]  }
 0x36f   : > { %v6914_v50 = vshll.u32 %v6465_v55, 16  ;;  %v6918_v19 = vshrl.u32 %v6465_v55, 16  ;;  %v6863_v53 = vsel %vm18641_vm14, %v18840_v36, %v18805_v54  ;;  %v6887_v39 = vor.u32 %v18844_v22, %v18842_v8  ;;  %v6474_v55 = vld [vmem:[#allocation2 + $0xf4] sm:$0xf]  ;;  %15006 = vmatprep.subr.bf16.mxu0 %v16473_v16 }
 0x370   : > { %v6924_v42 = vshll.u32 %v6466_v43, 16  ;;  %v6928_v23 = vshrl.u32 %v6466_v43, 16  ;;  %v18866_v30 = vrot.slane %v6898_v60, 5  ;;  %v18868_v4 = vrot.slane %v6904_v1, 5  ;;  %15007 = vmatpush3.bf16.msra.mxu0 %v16473_v16  ;;  %v6467_v43 = vld [vmem:[#allocation2 + $0xd8] sm:$0x1] }
 0x371   : > { %15305 = vmatmul.mubr.bf16.gmra.mrb[60].mxu1 %v16454_v11  ;;  %v6908_v11 = vshrl.u32 %v6464_v18, 16  ;;  %v6873_v54 = vsel %vm18641_vm14, %v18852_v52, %v18807_v3  ;;  %v6948_v18 = vshll.u32 %v6469_v24, 16  ;;  %v6952_v13 = vshrl.u32 %v6469_v24, 16  ;;  %15008 = vmatprep.subr.bf16.mxu0 %v16474_v5 }
 0x372   : > { %15308 = vmatprep.mubr.bf16.mxu1 %v16455_v49  ;;  %v6468_v49 = vld [vmem:[#allocation2 + $0xdc] sm:$0xf]  ;;  %v6958_v59 = vshll.u32 %v6470_v35, 16  ;;  %v6962_v17 = vshrl.u32 %v6470_v35, 16  ;;  %v6968_v36 = vshll.u32 %v6471_v28, 16  ;;  %v6972_v22 = vshrl.u32 %v6471_v28, 16 }
 0x373   : > { %v6939_v41 = vshrl.u32 %v6468_v49, 16  ;;  %v6942_v45 = vshll.u32 %v6468_v49, 16  ;;  %v6910_v29 = vrot.slane %v6908_v11, 4  ;;  %v6920_v60 = vrot.slane %v6918_v19, 4 }
 0x374   : > { %v18882_v1 = vrot.slane %v6924_v42, 5  ;;  %v6930_v3 = vrot.slane %v6928_v23, 4  ;;  %v6983_v49 = vshrl.u32 %v6473_v9, 16  ;;  %v6986_v24 = vshll.u32 %v6473_v9, 16  ;;  %15009 = vmatpush3.bf16.msra.mxu0 %v16474_v5  ;;  %v16476_v5 = vld [vmem:[%s21659_s7 + $0x60] sm:$0xff]  }
 0x375   : > { %v6941_v52 = vrot.slane %v6939_v41, 4  ;;  %v6944_v11 = vrot.slane %v6942_v45, 5  ;;  %v18884_v37 = vrot.slane %v6948_v18, 5  ;;  %v6954_v35 = vrot.slane %v6952_v13, 4  ;;  %v6472_v18 = vld [vmem:[#allocation2 + $0xec] sm:$0x1] }
 0x376   : > { %v6992_v28 = vshll.u32 %v6474_v55, 16  ;;  %v6996_v20 = vshrl.u32 %v6474_v55, 16  ;;  %v6964_v19 = vrot.slane %v6962_v17, 4  ;;  %v18888_v42 = vrot.slane %v6968_v36, 5  ;;  %v16475_v17 = vld [vmem:[%s21659_s7 + $0x58] sm:$0xff]  }
 0x377   : > { %v6974_v23 = vrot.slane %v6972_v22, 4  ;;  %v6901_v41 = vor.u32 %v18866_v30, %v18858_v0  ;;  %v6911_v45 = vor.u32 %v6910_v29, %v18868_v4  ;;  %v6934_v9 = vshll.u32 %v6467_v43, 16  ;;  %15010 = vmatprep.subr.bf16.mxu0 %v16475_v17 }
 0x378   : > { %v6931_v13 = vor.u32 %v6930_v3, %v18882_v1  ;;  %v6945_v55 = vor.u32 %v6944_v11, %v6941_v52  ;;  %v6985_v61 = vrot.slane %v6983_v49, 4  ;;  %v18898_v36 = vcombine.low %v6863_v53, %v6873_v54  ;;  %v6475_v52 = vld [vmem:[#allocation2 + $0xf8] sm:$0xf]  ;;  %15011 = vmatpush3.bf16.msra.mxu0 %v16475_v17 }
 0x379   : > { %15309 = vmatmul.mubr.bf16.gmra.mrb[0].mxu1 %v16456_v44  ;;  %v18880_v44 = vrot.slane %v6914_v50, 5  ;;  %v18886_v50 = vrot.slane %v6958_v59, 5  ;;  %v6988_v59 = vrot.slane %v6986_v24, 5  ;;  %v6955_v0 = vor.u32 %v6954_v35, %v18884_v37  ;;  %15012 = vmatprep.subr.bf16.mxu0 %v16476_v5  ;;  %v16461_v35 = vld [vmem:[#allocation2 + $0x134] sm:$0xff]  }
 0x37a   : > { %15312 = vmatprep.mubr.bf16.mxu1 %v16458_v33  ;;  %v16459_v33 = vld [vmem:[#allocation2 + $0x120] sm:$0xff]   ;;  %v18901_v30 = vrot.slane %v6992_v28, 5  ;;  %v6998_v29 = vrot.slane %v6996_v20, 4  ;;  %v6888_v22 = vrot.slane %v6887_v39, 4  ;;  %v6975_v3 = vor.u32 %v6974_v23, %v18888_v42 }
 0x37b   : > { %v6921_v16 = vor.u32 %v6920_v60, %v18880_v44  ;;  %v6965_v60 = vor.u32 %v6964_v19, %v18886_v50  ;;  %v6978_v43 = vshll.u32 %v6472_v18, 16  ;;  %v6883_v53 = vsel %vm18641_vm14, %v18856_v46, %v18842_v8 }
 0x37c   : > { %v6902_v54 = vrot.slane %v6901_v41, 4  ;;  %v6912_v20 = vrot.slane %v6911_v45, 4  ;;  %v6936_v11 = vrot.slane %v6934_v9, 5  ;;  %v6932_v24 = vrot.slane %v6931_v13, 4  ;;  %v6477_v9 = vld [vmem:[#allocation2 + $0x100] sm:$0x1]  ;;  %15013 = vmatpush3.bf16.msra.mxu0 %v16476_v5 }
 0x37d   : > { %v6922_v49 = vrot.slane %v6921_v16, 4  ;;  %v6989_v39 = vor.u32 %v6988_v59, %v6985_v61  ;;  %v6956_v28 = vrot.slane %v6955_v0, 4  ;;  %v6999_v19 = vor.u32 %v6998_v29, %v18901_v30  ;;  %v6478_v59 = vld [vmem:[#allocation2 + $0x104] sm:$0xf] }
 0x37e   : > { %v7002_v23 = vshll.u32 %v6475_v52, 16  ;;  %v7006_v18 = vshrl.u32 %v6475_v52, 16  ;;  %v6893_v8 = vsel %vm18641_vm14, %v6888_v22, %v18854_v32  ;;  %v6966_v46 = vrot.slane %v6965_v60, 4  ;;  %v16479_v60 = vld [vmem:[%s21659_s7 + $0x70] sm:$0xff]   ;;  %v6479_v52 = vld [vmem:[#allocation2 + $0x108] sm:$0xf] }
 0x37f   : > { %v6976_v41 = vrot.slane %v6975_v3, 4  ;;  %v6980_v45 = vrot.slane %v6978_v43, 5  ;;  %v6907_v61 = vsel %vm18641_vm14, %v6902_v54, %v18868_v4  ;;  %v6917_v16 = vsel %vm18641_vm14, %v6912_v20, %v18880_v44  ;;  %v16478_v44 = vld [vmem:[%s21659_s7 + $0x68] sm:$0xff]   ;;  %v3124_v20 = vld [vmem:[#allocation2] sm:$0xf] }
 0x380   : > { %v6927_v32 = vsel %vm18641_vm14, %v6922_v49, %v18882_v1  ;;  %v6937_v17 = vsel %vm18641_vm14, %v6932_v24, %v6936_v11  ;;  %v6990_v0 = vrot.slane %v6989_v39, 4  ;;  %v6961_v29 = vsel %vm18641_vm14, %v6956_v28, %v18886_v50  ;;  %15014 = vmatprep.subr.bf16.mxu0 %v16478_v44  ;;  %v16464_v39 = vld [vmem:[#allocation2 + $0x148] sm:$0xff]  }
 0x381   : > { %15313 = vmatmul.mubr.bf16.gmra.mrb[4].mxu1 %v16459_v33  ;;  %v6476_v33 = vld [vmem:[#allocation2 + $0xfc] sm:$0xf]  ;;  %v7000_v5 = vrot.slane %v6999_v19, 4  ;;  %v7004_v22 = vrot.slane %v7002_v23, 5  ;;  %v7008_v1 = vrot.slane %v7006_v18, 4  ;;  %v18939_v3 = vcombine.low %v6883_v53, %v6893_v8  ;;  %15015 = vmatpush3.bf16.msra.mxu0 %v16478_v44 }
 0x382   : > { %15316 = vmatprep.mubr.bf16.mxu1 %v16460_v47  ;;  %v6946_v47 = vrot.slane %v6945_v55, 4  ;;  %v7012_v13 = vshll.u32 %v6476_v33, 16  ;;  %v7016_v55 = vshrl.u32 %v6476_v33, 16  ;;  %v7022_v43 = vshll.u32 %v6477_v9, 16  ;;  %15016 = vmatprep.subr.bf16.mxu0 %v16479_v60 }
 0x383   : > { %v7027_v54 = vshrl.u32 %v6478_v59, 16  ;;  %v6981_v50 = vsel %vm18641_vm14, %v6976_v41, %v6980_v45  ;;  %v7030_v24 = vshll.u32 %v6478_v59, 16  ;;  %v18950_v53 = vcombine.low %v6927_v32, %v6937_v17  ;;  %v18964_v45 = vld [vmem:[#allocation2 + $0x10c] sm:$0xf]  ;;  %v16480_v59 = vld [vmem:[%s21659_s7 + $0x78] sm:$0xff]  }
 0x384   : > { %v6951_v4 = vsel %vm18641_vm14, %v6946_v47, %v18884_v37  ;;  %v6971_v37 = vsel %vm18641_vm14, %v6966_v46, %v18888_v42  ;;  %v18946_v11 = vrot.slane %v7012_v13, 5  ;;  %v7018_v49 = vrot.slane %v7016_v55, 4 }
 0x385   : > { %v18952_v47 = vcombine.low %v6951_v4, %v6961_v29  ;;  %v6995_v42 = vsel %vm18641_vm14, %v6990_v0, %v18901_v30  ;;  %v7005_v33 = vsel %vm18641_vm14, %v7000_v5, %v7004_v22  ;;  %v7036_v28 = vshll.u32 %v6479_v52, 16  ;;  %15017 = vmatpush3.bf16.msra.mxu0 %v16479_v60  ;;  %v16602_v29 = vld [vmem:[#allocation2 + $0x8] sm:$0xf] }
 0x386   : > { %v3224_v19 = vshrl.u32 %v3124_v20, 16  ;;  %v18959_v23 = vcombine.low %v6971_v37, %v6981_v50  ;;  %v18961_v18 = vrot.slane %v7022_v43, 5  ;;  %v7029_v8 = vrot.slane %v7027_v54, 4  ;;  %15018 = vmatprep.subr.bf16.mxu0 %v16480_v59  ;;  %v16603_v54 = vld [vmem:[#allocation2 + $0xc] sm:$0xf] }
 0x387   : > { %v3227_v46 = vshll.u32 %v3124_v20, 16  ;;  %v7019_v41 = vor.u32 %v7018_v49, %v18946_v11  ;;  %v18966_v13 = vcombine.low %v6995_v42, %v7005_v33  ;;  %v7040_v55 = vshrl.u32 %v6479_v52, 16 }
 0x388   : > { %v3226_v30 = vrot.slane %v3224_v19, 4  ;;  %v18971_v0 = vrot.slane %v7036_v28, 5  ;;  %v3243_v5 = vshll.u32 %v16602_v29, 16  ;;  %v3247_v37 = vshrl.u32 %v16602_v29, 16  ;;  %v3128_v29 = vld [vmem:[#allocation2 + $0x14] sm:$0xf] }
 0x389   : > { %15317 = vmatmul.mubr.bf16.gmra.mrb[8].mxu1 %v16461_v35  ;;  %v7009_v35 = vor.u32 %v7008_v1, %v7004_v22  ;;  %v3229_v32 = vrot.slane %v3227_v46, 5  ;;  %v7046_v22 = vshll.u32 %v18964_v45, 16  ;;  %v7020_v43 = vrot.slane %v7019_v41, 4  ;;  %15019 = vmatpush3.bf16.msra.mxu0 %v16480_v59  ;;  %v16605_v46 = vld [vmem:[#allocation2 + $0x10] sm:$0x1] }
 0x38a   : > { %15320 = vmatprep.mubr.bf16.mxu1 %v16463_v40  ;;  %v18948_v40 = vcombine.low %v6907_v61, %v6917_v16  ;;  %v7032_v61 = vrot.slane %v7030_v24, 5  ;;  %v16601_v16 = vld [vmem:[#allocation2 + $0x4] sm:$0xf]  ;;  %v3245_v52 = vrot.slane %v3243_v5, 5  ;;  %v3253_v20 = vshll.u32 %v16603_v54, 16 }
 0x38b   : > { %v3233_v9 = vshll.u32 %v16601_v16, 16  ;;  %v3237_v17 = vshrl.u32 %v16601_v16, 16  ;;  %v7010_v4 = vrot.slane %v7009_v35, 4  ;;  %v3230_v1 = vor.u32 %v3229_v32, %v3226_v30  ;;  %v6481_v24 = vld [vmem:[#allocation2 + $0x110] sm:$0xf] }
 0x38c   : > { %v3257_v50 = vshrl.u32 %v16603_v54, 16  ;;  %v7033_v49 = vor.u32 %v7032_v61, %v7029_v8  ;;  %v3249_v33 = vrot.slane %v3247_v37, 4  ;;  %v7042_v35 = vrot.slane %v7040_v55, 4 }
 0x38d   : > { %v3235_v44 = vrot.slane %v3233_v9, 5  ;;  %v3239_v60 = vrot.slane %v3237_v17, 4  ;;  %v3231_v42 = vrot.slane %v3230_v1, 4  ;;  %v3255_v28 = vrot.slane %v3253_v20, 5  ;;  %v16466_v9 = vld [vmem:[%s21659_s7 + $0x148] sm:$0xff]   ;;  %v16606_v20 = vld [vmem:[%s21659_s7 + $0x140] sm:$0xff]  }
 0x38e   : > { %v3259_v19 = vrot.slane %v3257_v50, 4  ;;  %v3263_v41 = vshll.u32 %v16605_v46, 16  ;;  %v7050_v30 = vshrl.u32 %v18964_v45, 16  ;;  %v3250_v16 = vor.u32 %v3249_v33, %v3245_v52 }
 0x38f   : > { %v3236_v8 = vsel %vm18641_vm14, %v3231_v42, %v3235_v44  ;;  %v7015_v59 = vsel %vm18641_vm14, %v7010_v4, %v18946_v11  ;;  %v7056_v55 = vshll.u32 %v6481_v24, 16  ;;  %v7025_v45 = vsel %vm18641_vm14, %v7020_v43, %v18961_v18  ;;  %v6482_v11 = vld [vmem:[#allocation2 + $0x114] sm:$0x1] }
 0x390   : > { %v3260_v32 = vor.u32 %v3259_v19, %v3255_v28  ;;  %v3265_v17 = vrot.slane %v3263_v41, 5  ;;  %v7060_v5 = vshrl.u32 %v6481_v24, 16  ;;  %v3251_v1 = vrot.slane %v3250_v16, 4  ;;  %v16607_v24 = vld [vmem:[#allocation2 + $0x18] sm:$0xf] }
 0x391   : > { %15321 = vmatmul.mubr.bf16.gmra.mrb[12].mxu1 %v16464_v39  ;;  %v3240_v39 = vor.u32 %v3239_v60, %v3235_v44  ;;  %v18996_v60 = vrot.slane %v7033_v49, 4  ;;  %v18998_v37 = vrot.slane %v7046_v22, 5  ;;  %v7043_v18 = vor.u32 %v7042_v35, %v18971_v0  ;;  %v16467_v22 = vld [vmem:[%s21659_s7 + $0x150] sm:$0xff]   ;;  %v16608_v16 = vld [vmem:[#allocation2 + $0x1c] sm:$0xf] }
 0x392   : > { %15340 = vmatprep.mubr.bf16.mxu1 %v18670_v51  ;;  %v18978_v51 = vld [vmem:[%s21659_s7] sm:$0xff]   ;;  %v3261_v54 = vrot.slane %v3260_v32, 4  ;;  %v19005_v43 = vrot.slane %v7050_v30, 4  ;;  %v19012_v50 = vcombine.low %v7015_v59, %v7025_v45  ;;  %v3277_v42 = vshll.u32 %v16607_v24, 16 }
 0x393   : > { %15084 = vmatprep.subr.bf16.mxu0 %v18978_v51  ;;  %v3241_v61 = vrot.slane %v3240_v39, 4  ;;  %v19016_v39 = vrot.slane %v7056_v55, 5  ;;  %v19018_v33 = vrot.slane %v7060_v5, 4  ;;  %v7066_v35 = vshll.u32 %v6482_v11, 16  ;;  %v16609_v32 = vld [vmem:[#allocation2 + $0x20] sm:$0xf] }
 0x394   : > { %v3266_v49 = vsel %vm18641_vm14, %v3261_v54, %v3265_v17  ;;  %v7039_v19 = vsel %vm18641_vm14, %v18996_v60, %v18971_v0  ;;  %v19024_v30 = vrot.slane %v3277_v42, 5  ;;  %v3287_v59 = vshll.u32 %v16608_v16, 16  ;;  %v16611_v54 = vld [vmem:[%s21659_s7 + $0x8] sm:$0xff]  }
 0x395   : > { %v3246_v44 = vsel %vm18641_vm14, %v3241_v61, %v3245_v52  ;;  %v3268_v52 = vshrl.u32 %v3128_v29, 16  ;;  %v3281_v61 = vshrl.u32 %v16607_v24, 16  ;;  %v3291_v55 = vshrl.u32 %v16608_v16, 16  ;;  %v16612_v16 = vld [vmem:[%s21659_s7 + $0x10] sm:$0xff]  }
 0x396   : > { %v13658_v4 = vcombine.low %v3236_v8, %v3246_v44  ;;  %v6483_v8 = vld [vmem:[#allocation2 + $0x118] sm:$0xf]  ;;  %v3297_v17 = vshll.u32 %v16609_v32, 16  ;;  %v7044_v45 = vrot.slane %v7043_v18, 4  ;;  %v3301_v5 = vshrl.u32 %v16609_v32, 16 }
 0x397   : > { %v3270_v46 = vrot.slane %v3268_v52, 4  ;;  %v16610_v44 = vld [vmem:[#allocation2 + $0x24] sm:$0x1]  ;;  %v3289_v60 = vrot.slane %v3287_v59, 5  ;;  %v3293_v11 = vrot.slane %v3291_v55, 4 }
 0x398   : > { %15020 = vmatprep.mubr.bf16.mxu0 %v13658_v4  ;;  %v3299_v4 = vrot.slane %v3297_v17, 5  ;;  %v19036_v18 = vld [vmem:[#allocation2 + $0x11c] sm:$0xf] }
 0x399   : > { %15341 = vmatmul.mubr.bf16.vlgmr.msra.gmra.mrb[16].mxu1 %v18672_v10  ;;  %v3256_v10 = vsel %vm18641_vm14, %v3251_v1, %v3255_v28  ;;  %v3307_v1 = vshll.u32 %v16610_v44, 16  ;;  %v3294_v42 = vor.u32 %v3293_v11, %v3289_v60  ;;  %v7084_v17 = vshrl.u32 %v19036_v18, 16  ;;  %v16613_v11 = vld [vmem:[#allocation2 + $0x2c] sm:$0xf] }
 0x39a   : > { %15405 = vmatpush3.bf16.msra.mxu1 %v16606_v20  ;;  %15344 = vmatprep.mubr.bf16.mxu1 %v18674_v48  ;;  %v3271_v48 = vshll.u32 %v3128_v29, 16  ;;  %v13659_v28 = vcombine.low %v3256_v10, %v3266_v49  ;;  %v16468_v29 = vld [vmem:[%s21659_s7 + $0x158] sm:$0xff]   ;;  %v7053_v20 = vor.u32 %v19005_v43, %v18998_v37  ;;  %v7071_v10 = vshrl.u32 %v6483_v8, 16  ;;  %v16469_v43 = vld [vmem:[%s21659_s7 + $0x160] sm:$0xff]  }
 0x39b   : > { %15406 = vmatprep.subr.bf16.mxu1 %v16466_v9  ;;  %v3303_v49 = vrot.slane %v3301_v5, 4 }
 0x39c   : > { %v3273_v41 = vrot.slane %v3271_v48, 5  ;;  %15021 = vmatmul.mubr.bf16.vlgmr.msra.gmra.mrb[144].mxu0 %v13659_v28  ;;  %v19041_v48 = vrot.slane %v7066_v35, 5  ;;  %v7049_v28 = vsel %vm18641_vm14, %v7044_v45, %v18998_v37  ;;  %v19057_v59 = vrot.slane %v7053_v20, 4 }
 0x39d   : > { %15085 = vmatpush3.bf16.msra.mxu0 %v18978_v51  ;;  %v7063_v51 = vor.u32 %v19018_v33, %v19016_v39  ;;  %v7080_v33 = vshll.u32 %v19036_v18, 16  ;;  %v19059_v37 = vrot.slane %v7071_v10, 4  ;;  %v19061_v32 = vcombine.low %v7039_v19, %v7049_v28  ;;  %v16615_v18 = vld [vmem:[#allocation2 + $0x30] sm:$0xf] }
 0x39e   : > { %15407 = vmatpush3.bf16.msra.mxu1 %v16466_v9  ;;  %v3274_v0 = vor.u32 %v3273_v41, %v3270_v46  ;;  %v3283_v9 = vrot.slane %v3281_v61, 4  ;;  %15086 = vmatprep.subr.bf16.mxu0 %v16611_v54  ;;  %v3309_v46 = vrot.slane %v3307_v1, 5  ;;  %v3295_v61 = vrot.slane %v3294_v42, 4 }
 0x39f   : > { %15408 = vmatprep.subr.bf16.mxu1 %v16467_v22  ;;  %v19071_v5 = vrot.slane %v7063_v51, 4  ;;  %v3325_v20 = vshrl.u32 %v16613_v11, 16  ;;  %v3331_v10 = vshll.u32 %v16615_v18, 16 }
 0x3a0   : > { %v3275_v52 = vrot.slane %v3274_v0, 4  ;;  %v3284_v24 = vor.u32 %v3283_v9, %v19024_v30  ;;  %v3300_v45 = vsel %vm18641_vm14, %v3295_v61, %v3299_v4  ;;  %v16470_v0 = vld [vmem:[%s21659_s7 + $0x168] sm:$0xff]  }
 0x3a1   : > { %15345 = vmatmul.mubr.bf16.gmra.mrb[20].mxu1 %v18688_v25  ;;  %v3132_v25 = vld [vmem:[#allocation2 + $0x28] sm:$0xf]  ;;  %15087 = vmatpush3.bf16.msra.mxu0 %v16611_v54  ;;  %v3321_v54 = vshll.u32 %v16613_v11, 16 }
 0x3a2   : > { %15348 = vmatprep.mubr.bf16.mxu1 %v18696_v14  ;;  %15409 = vmatpush3.bf16.msra.mxu1 %v16467_v22  ;;  %v7074_v14 = vshll.u32 %v6483_v8, 16  ;;  %v3304_v22 = vor.u32 %v3303_v49, %v3299_v4  ;;  %v3280_v35 = vsel %vm18641_vm14, %v3275_v52, %v19024_v30  ;;  %v3285_v41 = vrot.slane %v3284_v24, 4  ;;  %v16614_v4 = vld [vmem:[%s21659_s7 + $0x18] sm:$0xff]   ;;  %v16616_v49 = vld [vmem:[#allocation2 + $0x34] sm:$0xf] }
 0x3a3   : > { %15410 = vmatprep.subr.bf16.mxu1 %v16468_v29  ;;  %15088 = vmatprep.subr.bf16.mxu0 %v16612_v16  ;;  %v3312_v55 = vshrl.u32 %v3132_v25, 16  ;;  %v3335_v52 = vshrl.u32 %v16615_v18, 16  ;;  %v3341_v51 = vshll.u32 %v16616_v49, 16  ;;  %v6485_v24 = vld [vmem:[#allocation2 + $0x120] sm:$0xf]  ;;  %v3345_v28 = vshrl.u32 %v16616_v49, 16 }
 0x3a4   : > { %v3305_v8 = vrot.slane %v3304_v22, 4  ;;  %v3290_v30 = vsel %vm18641_vm14, %v3285_v41, %v3289_v60  ;;  %v19073_v44 = vrot.slane %v7074_v14, 5  ;;  %v3315_v60 = vshll.u32 %v3132_v25, 16  ;;  %v16617_v14 = vld [vmem:[#allocation2 + $0x38] sm:$0x1]  ;;  %v16619_v49 = vld [vmem:[%s21659_s7 + $0x28] sm:$0xff]  }
 0x3a5   : > { %15089 = vmatpush3.bf16.msra.mxu0 %v16612_v16  ;;  %v3314_v9 = vrot.slane %v3312_v55, 4  ;;  %v3323_v25 = vrot.slane %v3321_v54, 5  ;;  %v3351_v22 = vshll.u32 %v16617_v14, 16  ;;  %v3337_v41 = vrot.slane %v3335_v52, 4  ;;  %v16477_v54 = vld [vmem:[%s21659_s7 + $0x178] sm:$0xff]   ;;  %v19133_v14 = vld [vmem:[%s21659_s7 + $0x180] sm:$0xff]  }
 0x3a6   : > { %15411 = vmatpush3.bf16.msra.mxu1 %v16468_v29  ;;  %v13660_v29 = vcombine.low %v3280_v35, %v3290_v30  ;;  %v3310_v19 = vsel %vm18641_vm14, %v3305_v8, %v3309_v46  ;;  %15090 = vmatprep.subr.bf16.mxu0 %v16614_v4  ;;  %v3317_v42 = vrot.slane %v3315_v60, 5  ;;  %v3327_v46 = vrot.slane %v3325_v20, 4 }
 0x3a7   : > { %15412 = vmatprep.subr.bf16.mxu1 %v16469_v43  ;;  %v13661_v1 = vcombine.low %v3300_v45, %v3310_v19  ;;  %v3333_v35 = vrot.slane %v3331_v10, 5  ;;  %v3343_v61 = vrot.slane %v3341_v51, 5  ;;  %v3347_v8 = vrot.slane %v3345_v28, 4  ;;  %v19093_v45 = vld [vmem:[#allocation2 + $0x124] sm:$0xf] }
 0x3a8   : > { %15024 = vmatprep.mubr.bf16.mxu0 %v13660_v29  ;;  %v3318_v16 = vor.u32 %v3317_v42, %v3314_v9  ;;  %v19091_v55 = vrot.slane %v7084_v17, 4  ;;  %v7090_v30 = vshll.u32 %v6485_v24, 16  ;;  %v3328_v29 = vor.u32 %v3327_v46, %v3323_v25  ;;  %v3136_v9 = vld [vmem:[#allocation2 + $0x3c] sm:$0xf] }
 0x3a9   : > { %15349 = vmatmul.mubr.bf16.gmra.mrb[24].mxu1 %v18745_v12  ;;  %v16472_v12 = vld [vmem:[%s21659_s7 + $0x170] sm:$0xff]   ;;  %15025 = vmatmul.mubr.bf16.gmra.mrb[148].mxu0 %v13661_v1  ;;  %v3338_v19 = vor.u32 %v3337_v41, %v3333_v35  ;;  %v16618_v1 = vld [vmem:[%s21659_s7 + $0x20] sm:$0xff]   ;;  %v3353_v17 = vrot.slane %v3351_v22, 5  ;;  %v7077_v60 = vor.u32 %v19073_v44, %v19059_v37  ;;  %v7094_v11 = vshrl.u32 %v6485_v24, 16 }
 0x3aa   : > { %15352 = vmatprep.mubr.bf16.mxu1 %v18747_v27  ;;  %15413 = vmatpush3.bf16.msra.mxu1 %v16469_v43  ;;  %v7059_v27 = vsel %vm18641_vm14, %v19057_v59, %v19016_v39  ;;  %v19089_v43 = vrot.slane %v7080_v33, 5  ;;  %v7069_v39 = vsel %vm18641_vm14, %v19071_v5, %v19041_v48  ;;  %v3319_v33 = vrot.slane %v3318_v16, 4 }
 0x3ab   : > { %15414 = vmatprep.subr.bf16.mxu1 %v16470_v0  ;;  %15091 = vmatpush3.bf16.msra.mxu0 %v16614_v4  ;;  %v3348_v59 = vor.u32 %v3347_v8, %v3343_v61  ;;  %v3329_v4 = vrot.slane %v3328_v29, 4  ;;  %v7100_v20 = vshll.u32 %v19093_v45, 16  ;;  %v7104_v18 = vshrl.u32 %v19093_v45, 16  ;;  %v16623_v29 = vld [vmem:[%s21659_s7 + $0x30] sm:$0xff]  }
 0x3ac   : > { %15092 = vmatprep.subr.bf16.mxu0 %v16618_v1  ;;  %v3324_v48 = vsel %vm18641_vm14, %v3319_v33, %v3323_v25  ;;  %v19112_v10 = vcombine.low %v7059_v27, %v7069_v39  ;;  %v3356_v52 = vshrl.u32 %v3136_v9, 16  ;;  %v3359_v42 = vshll.u32 %v3136_v9, 16  ;;  %v16621_v27 = vld [vmem:[#allocation2 + $0x44] sm:$0xf]  ;;  %v16624_v33 = vld [vmem:[#allocation2 + $0x4c] sm:$0x1] }
 0x3ad   : > { %v3349_v5 = vrot.slane %v3348_v59, 4  ;;  %v3334_v37 = vsel %vm18641_vm14, %v3329_v4, %v3333_v35  ;;  %v19126_v25 = vrot.slane %v7090_v30, 5  ;;  %v19128_v28 = vrot.slane %v7094_v11, 4  ;;  %v16620_v35 = vld [vmem:[#allocation2 + $0x40] sm:$0xf] }
 0x3ae   : > { %15415 = vmatpush3.bf16.msra.mxu1 %v16470_v0  ;;  %v3339_v0 = vrot.slane %v3338_v19, 4  ;;  %v13662_v51 = vcombine.low %v3324_v48, %v3334_v37  ;;  %v3358_v22 = vrot.slane %v3356_v52, 4  ;;  %v3361_v46 = vrot.slane %v3359_v42, 5  ;;  %v16625_v42 = vld [vmem:[%s21659_s7 + $0x38] sm:$0xff]  }
 0x3af   : > { %15416 = vmatprep.subr.bf16.mxu1 %v16472_v12  ;;  %15093 = vmatpush3.bf16.msra.mxu0 %v16618_v1  ;;  %v3354_v24 = vsel %vm18641_vm14, %v3349_v5, %v3353_v17  ;;  %v3365_v41 = vshll.u32 %v16620_v35, 16  ;;  %v3375_v16 = vshll.u32 %v16621_v27, 16  ;;  %v3379_v8 = vshrl.u32 %v16621_v27, 16  ;;  %v6488_v17 = vld [vmem:[#allocation2 + $0x12c] sm:$0xf] }
 0x3b0   : > { %v3344_v44 = vsel %vm18641_vm14, %v3339_v0, %v3343_v61  ;;  %15094 = vmatprep.subr.bf16.mxu0 %v16619_v49  ;;  %15028 = vmatprep.mubr.bf16.mxu0 %v13662_v51  ;;  %v3369_v61 = vshrl.u32 %v16620_v35, 16  ;;  %v3362_v19 = vor.u32 %v3361_v46, %v3358_v22  ;;  %v3395_v59 = vshll.u32 %v16624_v33, 16  ;;  %v19141_v0 = vld [vmem:[#allocation2 + $0x128] sm:$0x1] }
 0x3b1   : > { %15353 = vmatmul.mubr.bf16.gmra.mrb[28].mxu1 %v18751_v31  ;;  %v7087_v31 = vor.u32 %v19091_v55, %v19089_v43  ;;  %v16622_v55 = vld [vmem:[#allocation2 + $0x48] sm:$0xf]  ;;  %v3367_v1 = vrot.slane %v3365_v41, 5  ;;  %v3377_v9 = vrot.slane %v3375_v16, 5  ;;  %v19143_v48 = vrot.slane %v7100_v20, 5 }
 0x3b2   : > { %15356 = vmatprep.mubr.bf16.mxu1 %v18758_v57  ;;  %15417 = vmatpush3.bf16.msra.mxu1 %v16472_v12  ;;  %v13663_v57 = vcombine.low %v3344_v44, %v3354_v24  ;;  %v19135_v12 = vrot.slane %v7077_v60, 4  ;;  %v3385_v30 = vshll.u32 %v16622_v55, 16  ;;  %v3389_v45 = vshrl.u32 %v16622_v55, 16  ;;  %v3140_v24 = vld [vmem:[#allocation2 + $0x50] sm:$0xf] }
 0x3b3   : > { %15418 = vmatprep.subr.bf16.mxu1 %v16477_v54  ;;  %15095 = vmatpush3.bf16.msra.mxu0 %v16619_v49  ;;  %v3371_v39 = vrot.slane %v3369_v61, 4  ;;  %v3381_v60 = vrot.slane %v3379_v8, 4  ;;  %v19145_v5 = vrot.slane %v7104_v18, 4  ;;  %v3363_v37 = vrot.slane %v3362_v19, 4  ;;  %v19154_v18 = vld [vmem:[#allocation2 + $0x130] sm:$0xf] }
 0x3b4   : > { %15029 = vmatmul.mubr.bf16.gmra.mrb[152].mxu0 %v13663_v57  ;;  %15096 = vmatprep.subr.bf16.mxu0 %v16623_v29  ;;  %v3387_v11 = vrot.slane %v3385_v30, 5  ;;  %v3391_v4 = vrot.slane %v3389_v45, 4  ;;  %v7088_v44 = vrot.slane %v7087_v31, 4  ;;  %v3397_v51 = vrot.slane %v3395_v59, 5  ;;  %v16626_v59 = vld [vmem:[#allocation2 + $0x54] sm:$0xf] }
 0x3b5   : > { %v3382_v52 = vor.u32 %v3381_v60, %v3377_v9  ;;  %v7097_v20 = vor.u32 %v19128_v28, %v19126_v25  ;;  %v7115_v57 = vshrl.u32 %v6488_v17, 16  ;;  %v7110_v22 = vshll.u32 %v19141_v0, 16  ;;  %v16627_v60 = vld [vmem:[#allocation2 + $0x58] sm:$0xf]  ;;  %v16628_v0 = vld [vmem:[#allocation2 + $0x5c] sm:$0xf] }
 0x3b6   : > { %15419 = vmatpush3.bf16.msra.mxu1 %v16477_v54  ;;  %v3372_v54 = vor.u32 %v3371_v39, %v3367_v1  ;;  %v3392_v49 = vor.u32 %v3391_v4, %v3387_v11  ;;  %v7118_v46 = vshll.u32 %v6488_v17, 16  ;;  %v7107_v28 = vor.u32 %v19145_v5, %v19143_v48 }
 0x3b7   : > { %15484 = vmatprep.subr.bf16.mxu1 %v19133_v14  ;;  %15097 = vmatpush3.bf16.msra.mxu0 %v16623_v29  ;;  %v3383_v35 = vrot.slane %v3382_v52, 4  ;;  %v3400_v27 = vshrl.u32 %v3140_v24, 16  ;;  %v7124_v16 = vshll.u32 %v19154_v18, 16  ;;  %v21782_v45 = vmov 0  }
 0x3b8   : > { %15098 = vmatprep.subr.bf16.mxu0 %v16625_v42  ;;  %v3373_v31 = vrot.slane %v3372_v54, 4  ;;  %v3393_v41 = vrot.slane %v3392_v49, 4  ;;  %v19178_v29 = vrot.slane %v7115_v57, 4  ;;  %v3403_v33 = vshll.u32 %v3140_v24, 16 }
 0x3b9   : > { %15357 = vmatmul.mubr.bf16.gmra.mrb[32].mxu1 %v18773_v6  ;;  %v3368_v6 = vsel %vm18641_vm14, %v3363_v37, %v3367_v1  ;;  %v3388_v55 = vsel %vm18641_vm14, %v3383_v35, %v3387_v11  ;;  %v7120_v1 = vrot.slane %v7118_v46, 5  ;;  %v3402_v39 = vrot.slane %v3400_v27, 4 }
 0x3ba   : > { %15360 = vmatprep.mubr.bf16.mxu1 %v18776_v63  ;;  %v7083_v63 = vsel %vm18641_vm14, %v19135_v12, %v19089_v43  ;;  %v3378_v61 = vsel %vm18641_vm14, %v3373_v31, %v3377_v9  ;;  %v3398_v30 = vsel %vm18641_vm14, %v3393_v41, %v3397_v51  ;;  %v7093_v43 = vsel %vm18641_vm14, %v7088_v44, %v19126_v25  ;;  %v16629_v44 = vld [vmem:[#allocation2 + $0x60] sm:$0x1] }
 0x3bb   : > { %15099 = vmatpush3.bf16.msra.mxu0 %v16625_v42  ;;  %v13664_v8 = vcombine.low %v3368_v6, %v3378_v61  ;;  %v19176_v12 = vrot.slane %v7097_v20, 4  ;;  %v13665_v19 = vcombine.low %v3388_v55, %v3398_v30  ;;  %v3409_v17 = vshll.u32 %v16626_v59, 16  ;;  %v3144_v30 = vld [vmem:[#allocation2 + $0x64] sm:$0xf] }
 0x3bc   : > { %12428 = vmatprep.subr.bf16.mxu0 %v21782_v45  ;;  %v3413_v9 = vshrl.u32 %v16626_v59, 16  ;;  %v3419_v11 = vshll.u32 %v16627_v60, 16  ;;  %v3423_v4 = vshrl.u32 %v16627_v60, 16  ;;  %v3429_v5 = vshll.u32 %v16628_v0, 16 }
 0x3bd   : > { %15032 = vmatprep.mubr.bf16.mxu0 %v13664_v8  ;;  %v3405_v25 = vrot.slane %v3403_v33, 5  ;;  %v3411_v37 = vrot.slane %v3409_v17, 5  ;;  %v3433_v54 = vshrl.u32 %v16628_v0, 16  ;;  %v3439_v52 = vshll.u32 %v16629_v44, 16  ;;  %v16630_v44 = vld [vmem:[#allocation2 + $0x68] sm:$0xf] }
 0x3be   : > { %15033 = vmatmul.mubr.bf16.gmra.mrb[156].mxu0 %v13665_v19  ;;  %v3415_v49 = vrot.slane %v3413_v9, 4  ;;  %v3421_v51 = vrot.slane %v3419_v11, 5  ;;  %v3425_v24 = vrot.slane %v3423_v4, 4  ;;  %v3431_v42 = vrot.slane %v3429_v5, 5 }
 0x3bf   : > { %v19182_v20 = vcombine.low %v7083_v63, %v7093_v43  ;;  %v19184_v57 = vrot.slane %v7110_v22, 5  ;;  %v3406_v6 = vor.u32 %v3405_v25, %v3402_v39  ;;  %v3435_v31 = vrot.slane %v3433_v54, 4 }
 0x3c0   : > { %v19186_v46 = vrot.slane %v7107_v28, 4  ;;  %v19188_v35 = vrot.slane %v7124_v16, 5  ;;  %v3416_v41 = vor.u32 %v3415_v49, %v3411_v37  ;;  %v3426_v61 = vor.u32 %v3425_v24, %v3421_v51  ;;  %v6491_v28 = vld [vmem:[#allocation2 + $0x138] sm:$0xf] }
 0x3c1   : > { %15361 = vmatmul.mubr.bf16.gmra.mrb[36].mxu1 %v18809_v58  ;;  %v6490_v58 = vld [vmem:[#allocation2 + $0x134] sm:$0xf]  ;;  %v7128_v27 = vshrl.u32 %v19154_v18, 16  ;;  %v3436_v8 = vor.u32 %v3435_v31, %v3431_v42  ;;  %v3441_v55 = vrot.slane %v3439_v52, 5  ;;  %v7103_v22 = vsel %vm18641_vm14, %v19176_v12, %v19143_v48 }
 0x3c2   : > { %15364 = vmatprep.mubr.bf16.mxu1 %v18838_v21  ;;  %v3407_v21 = vrot.slane %v3406_v6, 4  ;;  %v7121_v63 = vor.u32 %v7120_v1, %v19178_v29  ;;  %v3417_v43 = vrot.slane %v3416_v41, 4  ;;  %v3427_v19 = vrot.slane %v3426_v61, 4  ;;  %v16632_v6 = vld [vmem:[#allocation2 + $0x70] sm:$0xf] }
 0x3c3   : > { %v7134_v16 = vshll.u32 %v6490_v58, 16  ;;  %v7138_v39 = vshrl.u32 %v6490_v58, 16  ;;  %v3437_v18 = vrot.slane %v3436_v8, 4  ;;  %v7113_v59 = vsel %vm18641_vm14, %v19186_v46, %v19184_v57  ;;  %v6492_v8 = vld [vmem:[#allocation2 + $0x13c] sm:$0x1] }
 0x3c4   : > { %v3412_v33 = vsel %vm18641_vm14, %v3407_v21, %v3411_v37  ;;  %v3422_v17 = vsel %vm18641_vm14, %v3417_v43, %v3421_v51  ;;  %v3432_v29 = vsel %vm18641_vm14, %v3427_v19, %v3431_v42  ;;  %v3444_v1 = vshrl.u32 %v3144_v30, 16  ;;  %v16631_v51 = vld [vmem:[#allocation2 + $0x6c] sm:$0xf] }
 0x3c5   : > { %v7130_v9 = vrot.slane %v7128_v27, 4  ;;  %v7144_v60 = vshll.u32 %v6491_v28, 16  ;;  %v13666_v11 = vcombine.low %v3412_v33, %v3422_v17  ;;  %v3442_v4 = vsel %vm18641_vm14, %v3437_v18, %v3441_v55  ;;  %v16633_v27 = vld [vmem:[#allocation2 + $0x74] sm:$0x1]  ;;  %v6493_v17 = vld [vmem:[#allocation2 + $0x140] sm:$0xf] }
 0x3c6   : > { %v7148_v0 = vshrl.u32 %v6491_v28, 16  ;;  %v13667_v5 = vcombine.low %v3432_v29, %v3442_v4  ;;  %v3446_v25 = vrot.slane %v3444_v1, 4  ;;  %v3447_v37 = vshll.u32 %v3144_v30, 16 }
 0x3c7   : > { %v19210_v54 = vrot.slane %v7121_v63, 4  ;;  %15036 = vmatprep.mubr.bf16.mxu0 %v13666_v11  ;;  %v3453_v52 = vshll.u32 %v16630_v44, 16  ;;  %v3457_v49 = vshrl.u32 %v16630_v44, 16  ;;  %v3467_v42 = vshrl.u32 %v16631_v51, 16 }
 0x3c8   : > { %15037 = vmatmul.mubr.bf16.gmra.mrb[160].mxu0 %v13667_v5  ;;  %v3449_v24 = vrot.slane %v3447_v37, 5  ;;  %v3473_v31 = vshll.u32 %v16632_v6, 16  ;;  %v3477_v58 = vshrl.u32 %v16632_v6, 16  ;;  %v3483_v21 = vshll.u32 %v16633_v27, 16 }
 0x3c9   : > { %15365 = vmatmul.mubr.bf16.gmra.mrb[40].mxu1 %v18846_v15  ;;  %v3463_v15 = vshll.u32 %v16631_v51, 16  ;;  %v3455_v41 = vrot.slane %v3453_v52, 5  ;;  %v3469_v30 = vrot.slane %v3467_v42, 4  ;;  %v7131_v43 = vor.u32 %v7130_v9, %v19188_v35 }
 0x3ca   : > { %15368 = vmatprep.mubr.bf16.mxu1 %v18848_v26  ;;  %v3459_v26 = vrot.slane %v3457_v49, 4  ;;  %v3450_v55 = vor.u32 %v3449_v24, %v3446_v25  ;;  %v3475_v63 = vrot.slane %v3473_v31, 5  ;;  %v3479_v28 = vrot.slane %v3477_v58, 4  ;;  %v3148_v49 = vld [vmem:[#allocation2 + $0x78] sm:$0xf] }
 0x3cb   : > { %v3465_v61 = vrot.slane %v3463_v15, 5  ;;  %v19213_v19 = vrot.slane %v7134_v16, 5  ;;  %v19215_v33 = vrot.slane %v7138_v39, 4  ;;  %v3485_v4 = vrot.slane %v3483_v21, 5 }
 0x3cc   : > { %v3460_v18 = vor.u32 %v3459_v26, %v3455_v41  ;;  %v3451_v29 = vrot.slane %v3450_v55, 4  ;;  %v3480_v11 = vor.u32 %v3479_v28, %v3475_v63  ;;  %v19218_v5 = vrot.slane %v7144_v60, 5  ;;  %v6494_v60 = vld [vmem:[#allocation2 + $0x144] sm:$0xf]  ;;  %v16635_v28 = vld [vmem:[#allocation2 + $0x80] sm:$0xf] }
 0x3cd   : > { %v3470_v1 = vor.u32 %v3469_v30, %v3465_v61  ;;  %v7150_v25 = vrot.slane %v7148_v0, 4  ;;  %v7154_v37 = vshll.u32 %v6492_v8, 16  ;;  %v7127_v16 = vsel %vm18641_vm14, %v19210_v54, %v19188_v35  ;;  %v16634_v8 = vld [vmem:[#allocation2 + $0x7c] sm:$0xf] }
 0x3ce   : > { %v3461_v44 = vrot.slane %v3460_v18, 4  ;;  %v3456_v39 = vsel %vm18641_vm14, %v3451_v29, %v3455_v41  ;;  %v3481_v52 = vrot.slane %v3480_v11, 4  ;;  %v7159_v0 = vshrl.u32 %v6493_v17, 16 }
 0x3cf   : > { %v3471_v9 = vrot.slane %v3470_v1, 4  ;;  %v7162_v51 = vshll.u32 %v6493_v17, 16  ;;  %v19231_v15 = vrot.slane %v7131_v43, 4  ;;  %v7151_v31 = vor.u32 %v7150_v25, %v19218_v5  ;;  %v19240_v17 = vld [vmem:[#allocation2 + $0x148] sm:$0xf] }
 0x3d0   : > { %v3486_v6 = vsel %vm18641_vm14, %v3481_v52, %v3485_v4  ;;  %v19238_v58 = vrot.slane %v7154_v37, 5  ;;  %v3488_v26 = vshrl.u32 %v3148_v49, 16  ;;  %v7168_v27 = vshll.u32 %v6494_v60, 16 }
 0x3d1   : > { %15369 = vmatmul.mubr.bf16.gmra.mrb[44].mxu1 %v18850_v7  ;;  %v7141_v7 = vor.u32 %v19215_v33, %v19213_v19  ;;  %v3476_v42 = vsel %vm18641_vm14, %v3471_v9, %v3475_v63  ;;  %v3491_v21 = vshll.u32 %v3148_v49, 16  ;;  %v3501_v55 = vshrl.u32 %v16634_v8, 16  ;;  %v16636_v33 = vld [vmem:[#allocation2 + $0x84] sm:$0xf] }
 0x3d2   : > { %15372 = vmatprep.mubr.bf16.mxu1 %v18898_v36  ;;  %v3466_v36 = vsel %vm18641_vm14, %v3461_v44, %v3465_v61  ;;  %v13669_v41 = vcombine.low %v3476_v42, %v3486_v6  ;;  %v3497_v61 = vshll.u32 %v16634_v8, 16  ;;  %v3490_v30 = vrot.slane %v3488_v26, 4 }
 0x3d3   : > { %v13668_v24 = vcombine.low %v3456_v39, %v3466_v36  ;;  %v3507_v43 = vshll.u32 %v16635_v28, 16  ;;  %v3511_v63 = vshrl.u32 %v16635_v28, 16  ;;  %v3517_v18 = vshll.u32 %v16636_v33, 16  ;;  %v16637_v39 = vld [vmem:[#allocation2 + $0x88] sm:$0x1] }
 0x3d4   : > { %v3493_v29 = vrot.slane %v3491_v21, 5  ;;  %v3499_v1 = vrot.slane %v3497_v61, 5  ;;  %v3503_v11 = vrot.slane %v3501_v55, 4  ;;  %v3521_v4 = vshrl.u32 %v16636_v33, 16 }
 0x3d5   : > { %15040 = vmatprep.mubr.bf16.mxu0 %v13668_v24  ;;  %v3509_v25 = vrot.slane %v3507_v43, 5  ;;  %v3513_v37 = vrot.slane %v3511_v63, 4  ;;  %v3519_v44 = vrot.slane %v3517_v18, 5  ;;  %v3527_v9 = vshll.u32 %v16637_v39, 16  ;;  %v16638_v39 = vld [vmem:[#allocation2 + $0x90] sm:$0xf] }
 0x3d6   : > { %15041 = vmatmul.mubr.bf16.gmra.mrb[164].mxu0 %v13669_v41  ;;  %v7161_v52 = vrot.slane %v7159_v0, 4  ;;  %v3494_v49 = vor.u32 %v3493_v29, %v3490_v30  ;;  %v3504_v36 = vor.u32 %v3503_v11, %v3499_v1  ;;  %v3523_v24 = vrot.slane %v3521_v4, 4  ;;  %v3152_v30 = vld [vmem:[#allocation2 + $0x8c] sm:$0xf] }
 0x3d7   : > { %v7164_v42 = vrot.slane %v7162_v51, 5  ;;  %v7172_v6 = vshrl.u32 %v6494_v60, 16  ;;  %v7178_v41 = vshll.u32 %v19240_v17, 16  ;;  %v3514_v26 = vor.u32 %v3513_v37, %v3509_v25  ;;  %v6496_v29 = vld [vmem:[#allocation2 + $0x14c] sm:$0xf] }
 0x3d8   : > { %v3495_v21 = vrot.slane %v3494_v49, 4  ;;  %v3505_v8 = vrot.slane %v3504_v36, 4  ;;  %v3524_v61 = vor.u32 %v3523_v24, %v3519_v44  ;;  %v7137_v55 = vsel %vm18641_vm14, %v19231_v15, %v19213_v19  ;;  %v16639_v36 = vld [vmem:[#allocation2 + $0x94] sm:$0xf] }
 0x3d9   : > { %15373 = vmatmul.mubr.bf16.gmra.mrb[48].mxu1 %v18939_v3  ;;  %v3529_v3 = vrot.slane %v3527_v9, 5  ;;  %v19249_v28 = vrot.slane %v7141_v7, 4  ;;  %v3515_v0 = vrot.slane %v3514_v26, 4  ;;  %v19253_v51 = vrot.slane %v7168_v27, 5 }
 0x3da   : > { %15376 = vmatprep.mubr.bf16.mxu1 %v18948_v40  ;;  %v19251_v40 = vrot.slane %v7151_v31, 4  ;;  %v3500_v60 = vsel %vm18641_vm14, %v3495_v21, %v3499_v1  ;;  %v3510_v43 = vsel %vm18641_vm14, %v3505_v8, %v3509_v25  ;;  %v3525_v63 = vrot.slane %v3524_v61, 4  ;;  %v16640_v61 = vld [vmem:[#allocation2 + $0x98] sm:$0xf] }
 0x3db   : > { %v7165_v33 = vor.u32 %v7164_v42, %v7161_v52  ;;  %v7174_v18 = vrot.slane %v7172_v6, 4  ;;  %v13670_v11 = vcombine.low %v3500_v60, %v3510_v43  ;;  %v3520_v7 = vsel %vm18641_vm14, %v3515_v0, %v3519_v44  ;;  %v16641_v43 = vld [vmem:[#allocation2 + $0x9c] sm:$0x1] }
 0x3dc   : > { %v19261_v31 = vrot.slane %v7178_v41, 5  ;;  %v7182_v4 = vshrl.u32 %v19240_v17, 16  ;;  %v3530_v27 = vsel %vm18641_vm14, %v3525_v63, %v3529_v3  ;;  %v3532_v37 = vshrl.u32 %v3152_v30, 16 }
 0x3dd   : > { %15044 = vmatprep.mubr.bf16.mxu0 %v13670_v11  ;;  %v13671_v1 = vcombine.low %v3520_v7, %v3530_v27  ;;  %v3535_v25 = vshll.u32 %v3152_v30, 16  ;;  %v3541_v9 = vshll.u32 %v16638_v39, 16  ;;  %v3545_v52 = vshrl.u32 %v16638_v39, 16 }
 0x3de   : > { %v7188_v49 = vshll.u32 %v6496_v29, 16  ;;  %v3534_v44 = vrot.slane %v3532_v37, 4  ;;  %v3551_v24 = vshll.u32 %v16639_v36, 16  ;;  %v3555_v42 = vshrl.u32 %v16639_v36, 16 }
 0x3df   : > { %v19268_v17 = vrot.slane %v7165_v33, 4  ;;  %15045 = vmatmul.mubr.bf16.gmra.mrb[168].mxu0 %v13671_v1  ;;  %v3537_v6 = vrot.slane %v3535_v25, 5  ;;  %v3543_v41 = vrot.slane %v3541_v9, 5  ;;  %v3547_v26 = vrot.slane %v3545_v52, 4 }
 0x3e0   : > { %v3553_v21 = vrot.slane %v3551_v24, 5  ;;  %v3557_v8 = vrot.slane %v3555_v42, 4  ;;  %v3561_v3 = vshll.u32 %v16640_v61, 16  ;;  %v3565_v0 = vshrl.u32 %v16640_v61, 16  ;;  %v3156_v42 = vld [vmem:[#allocation2 + $0xa0] sm:$0xf] }
 0x3e1   : > { %15377 = vmatmul.mubr.bf16.gmra.mrb[52].mxu1 %v18950_v53  ;;  %v6497_v53 = vld [vmem:[#allocation2 + $0x150] sm:$0x1]  ;;  %v7192_v30 = vshrl.u32 %v6496_v29, 16  ;;  %v3538_v60 = vor.u32 %v3537_v6, %v3534_v44  ;;  %v3571_v63 = vshll.u32 %v16641_v43, 16  ;;  %v7175_v11 = vor.u32 %v7174_v18, %v19253_v51  ;;  %v16642_v61 = vld [vmem:[#allocation2 + $0xa4] sm:$0xf] }
 0x3e2   : > { %15380 = vmatprep.mubr.bf16.mxu1 %v18952_v47  ;;  %v3548_v47 = vor.u32 %v3547_v26, %v3543_v41  ;;  %v3558_v7 = vor.u32 %v3557_v8, %v3553_v21  ;;  %v3563_v33 = vrot.slane %v3561_v3, 5  ;;  %v3567_v27 = vrot.slane %v3565_v0, 4 }
 0x3e3   : > { %v7184_v37 = vrot.slane %v7182_v4, 4  ;;  %v7198_v1 = vshll.u32 %v6497_v53, 16  ;;  %v3539_v25 = vrot.slane %v3538_v60, 4  ;;  %v7147_v9 = vsel %vm18641_vm14, %v19249_v28, %v19218_v5 }
 0x3e4   : > { %v3549_v39 = vrot.slane %v3548_v47, 4  ;;  %v3559_v52 = vrot.slane %v3558_v7, 4  ;;  %v3568_v29 = vor.u32 %v3567_v27, %v3563_v33  ;;  %v3573_v44 = vrot.slane %v3571_v63, 5 }
 0x3e5   : > { %v19276_v36 = vrot.slane %v7188_v49, 5  ;;  %v7194_v18 = vrot.slane %v7192_v30, 4  ;;  %v3544_v24 = vsel %vm18641_vm14, %v3539_v25, %v3543_v41  ;;  %v7176_v6 = vrot.slane %v7175_v11, 4  ;;  %v16643_v30 = vld [vmem:[#allocation2 + $0xa8] sm:$0xf] }
 0x3e6   : > { %v3554_v4 = vsel %vm18641_vm14, %v3549_v39, %v3553_v21  ;;  %v3564_v5 = vsel %vm18641_vm14, %v3559_v52, %v3563_v33  ;;  %v3569_v28 = vrot.slane %v3568_v29, 4  ;;  %v7171_v49 = vsel %vm18641_vm14, %v19268_v17, %v19253_v51  ;;  %v16644_v33 = vld [vmem:[#allocation2 + $0xac] sm:$0xf]  ;;  %v16645_v39 = vld [vmem:[#allocation2 + $0xb0] sm:$0x1] }
 0x3e7   : > { %v13672_v26 = vcombine.low %v3544_v24, %v3554_v4  ;;  %v7185_v41 = vor.u32 %v7184_v37, %v19261_v31  ;;  %v19294_v53 = vrot.slane %v7198_v1, 5  ;;  %v3576_v21 = vshrl.u32 %v3156_v42, 16 }
 0x3e8   : > { %v3579_v8 = vshll.u32 %v3156_v42, 16  ;;  %v3585_v3 = vshll.u32 %v16642_v61, 16  ;;  %v7195_v0 = vor.u32 %v7194_v18, %v19276_v36  ;;  %v3595_v60 = vshll.u32 %v16643_v30, 16 }
 0x3e9   : > { %15381 = vmatmul.mubr.bf16.gmra.mrb[56].mxu1 %v18959_v23  ;;  %v7157_v23 = vsel %vm18641_vm14, %v19251_v40, %v19238_v58  ;;  %15048 = vmatprep.mubr.bf16.mxu0 %v13672_v26  ;;  %v3589_v40 = vshrl.u32 %v16642_v61, 16  ;;  %v7181_v51 = vsel %vm18641_vm14, %v7176_v6, %v19261_v31  ;;  %v3578_v17 = vrot.slane %v3576_v21, 4  ;;  %v16646_v6 = vld [vmem:[#allocation2 + $0x18] sm:$0xf] }
 0x3ea   : > { %15384 = vmatprep.mubr.bf16.mxu1 %v18966_v13  ;;  %v3574_v13 = vsel %vm18641_vm14, %v3569_v28, %v3573_v44  ;;  %v3581_v47 = vrot.slane %v3579_v8, 5  ;;  %v3587_v43 = vrot.slane %v3585_v3, 5  ;;  %v3597_v11 = vrot.slane %v3595_v60, 5 }
 0x3eb   : > { %v13673_v58 = vcombine.low %v3564_v5, %v3574_v13  ;;  %v3591_v63 = vrot.slane %v3589_v40, 4  ;;  %v3599_v7 = vshrl.u32 %v16643_v30, 16  ;;  %v3605_v27 = vshll.u32 %v16644_v33, 16  ;;  %v16647_v5 = vld [vmem:[#allocation2 + $0x1c] sm:$0xf] }
 0x3ec   : > { %v19302_v37 = vrot.slane %v7185_v41, 4  ;;  %v3582_v1 = vor.u32 %v3581_v47, %v3578_v17  ;;  %v3609_v25 = vshrl.u32 %v16644_v33, 16  ;;  %v3615_v52 = vshll.u32 %v16645_v39, 16  ;;  %v16648_v41 = vld [vmem:[#allocation2 + $0x20] sm:$0xf] }
 0x3ed   : > { %15049 = vmatmul.mubr.bf16.gmra.mrb[172].mxu0 %v13673_v58  ;;  %v19305_v29 = vrot.slane %v7195_v0, 4  ;;  %v3592_v31 = vor.u32 %v3591_v63, %v3587_v43  ;;  %v3601_v44 = vrot.slane %v3599_v7, 4  ;;  %v3607_v18 = vrot.slane %v3605_v27, 5  ;;  %v16649_v0 = vld [vmem:[#allocation2 + $0xb8] sm:$0xf] }
 0x3ee   : > { %v19318_v24 = vcombine.low %v7103_v22, %v7113_v59  ;;  %v3583_v57 = vrot.slane %v3582_v1, 4  ;;  %v3611_v46 = vrot.slane %v3609_v25, 4  ;;  %v19332_v4 = vcombine.low %v7147_v9, %v7157_v23  ;;  %v16650_v30 = vld [vmem:[#allocation2 + $0xbc] sm:$0xf]  ;;  %v16652_v39 = vld [vmem:[#allocation2 + $0xc0] sm:$0xf] }
 0x3ef   : > { %v19334_v48 = vcombine.low %v7171_v49, %v7181_v51  ;;  %v3593_v12 = vrot.slane %v3592_v31, 4  ;;  %v3602_v22 = vor.u32 %v3601_v44, %v3597_v11  ;;  %v7191_v59 = vsel %vm18641_vm14, %v19302_v37, %v19276_v36  ;;  %v16651_v51 = vld [vmem:[#allocation2 + $0x24] sm:$0x1] }
 0x3f0   : > { %v3588_v19 = vsel %vm18641_vm14, %v3583_v57, %v3587_v43  ;;  %v3612_v35 = vor.u32 %v3611_v46, %v3607_v18  ;;  %v3617_v54 = vrot.slane %v3615_v52, 5  ;;  %v7201_v15 = vsel %vm18641_vm14, %v19305_v29, %v19294_v53 }
 0x3f1   : > { %15385 = vmatmul.mubr.bf16.gmra.mrb[60].mxu1 %v19012_v50  ;;  %v19330_v50 = vcombine.low %v7127_v16, %v7137_v55  ;;  %v3160_v16 = vld [vmem:[#allocation2 + $0xb4] sm:$0xf]  ;;  %v3598_v9 = vsel %vm18641_vm14, %v3593_v12, %v3597_v11  ;;  %v3603_v42 = vrot.slane %v3602_v22, 4  ;;  %v7846_v26 = vrot.slane %v16646_v6, 5  ;;  %v7749_v6 = vld [vmem:[#allocation2 + $0x28] sm:$0xe] }
 0x3f2   : > { %15388 = vmatprep.mubr.bf16.mxu1 %v19061_v32  ;;  %v7748_v32 = vld [vmem:[#allocation2 + $0x14] sm:$0xe]  ;;  %v7849_v28 = vrot.slane %v16647_v5, 5  ;;  %v13674_v23 = vcombine.low %v3588_v19, %v3598_v9  ;;  %v3613_v49 = vrot.slane %v3612_v35, 4  ;;  %v7852_v13 = vrot.slane %v16648_v41, 5 }
 0x3f3   : > { %v13922_v55 = vrot.slane %v7748_v32, 9  ;;  %v3608_v21 = vsel %vm18641_vm14, %v3603_v42, %v3607_v18  ;;  %v3620_v8 = vshrl.u32 %v3160_v16, 16  ;;  %v3623_v61 = vshll.u32 %v3160_v16, 16  ;;  %v16653_v32 = vld [vmem:[#allocation2 + $0xc4] sm:$0x1] }
 0x3f4   : > { %15052 = vmatprep.mubr.bf16.mxu0 %v13674_v23  ;;  %v3618_v3 = vsel %vm18641_vm14, %v3613_v49, %v3617_v54  ;;  %v3629_v58 = vshll.u32 %v16649_v0, 16  ;;  %v3633_v40 = vshrl.u32 %v16649_v0, 16  ;;  %v3639_v60 = vshll.u32 %v16650_v30, 16  ;;  %v3164_v19 = vld [vmem:[#allocation2 + $0xc8] sm:$0xf] }
 0x3f5   : > { %v7855_v17 = vrot.slane %v16651_v51, 5  ;;  %v13675_v47 = vcombine.low %v3608_v21, %v3618_v3  ;;  %v3622_v43 = vrot.slane %v3620_v8, 4  ;;  %v3625_v63 = vrot.slane %v3623_v61, 5  ;;  %v16654_v16 = vld [vmem:[#allocation2 + $0x2c] sm:$0xf] }
 0x3f6   : > { %v7848_v11 = vrot.slane %v7846_v26, 4  ;;  %v3631_v7 = vrot.slane %v3629_v58, 5  ;;  %v3635_v33 = vrot.slane %v3633_v40, 4  ;;  %v3641_v27 = vrot.slane %v3639_v60, 5  ;;  %v16655_v49 = vld [vmem:[#allocation2 + $0x30] sm:$0xf] }
 0x3f7   : > { %15053 = vmatmul.mubr.bf16.gmra.mrb[176].mxu0 %v13675_v47  ;;  %v3626_v1 = vor.u32 %v3625_v63, %v3622_v43  ;;  %v3643_v25 = vshrl.u32 %v16650_v30, 16  ;;  %v3649_v52 = vshll.u32 %v16652_v39, 16  ;;  %v3653_v31 = vshrl.u32 %v16652_v39, 16  ;;  %v16656_v21 = vld [vmem:[#allocation2 + $0x34] sm:$0xf] }
 0x3f8   : > { %v7851_v44 = vrot.slane %v7849_v28, 4  ;;  %v3636_v18 = vor.u32 %v3635_v33, %v3631_v7  ;;  %v3659_v57 = vshll.u32 %v16653_v32, 16  ;;  %v19360_v35 = vsel %vm18002_vm11, %v7848_v11, %v7849_v28  ;;  %v19380_v63 = vld [vmem:[#allocation2 + $0xcc] sm:$0xf]  ;;  %v19388_v32 = vld [vmem:[#allocation2 + $0xd4] sm:$0xf] }
 0x3f9   : > { %15389 = vmatmul.mubr.bf16.gmra.mrb[0].mxu1 %v19112_v10  ;;  %v19356_v10 = vsel %vm18002_vm11, %v13922_v55, %v7846_v26  ;;  %v3627_v46 = vrot.slane %v3626_v1, 4  ;;  %v3651_v12 = vrot.slane %v3649_v52, 5  ;;  %v3655_v22 = vrot.slane %v3653_v31, 4  ;;  %v19384_v52 = vld [vmem:[#allocation2 + $0xd0] sm:$0xf] }
 0x3fa   : > { %15392 = vmatprep.mubr.bf16.mxu1 %v19182_v20  ;;  %v3645_v20 = vrot.slane %v3643_v25, 4  ;;  %v7854_v54 = vrot.slane %v7852_v13, 4  ;;  %v7859_v9 = vrot.slane %v16654_v16, 5  ;;  %v3637_v42 = vrot.slane %v3636_v18, 4 }
 0x3fb   : > { %v3632_v55 = vsel %vm18641_vm14, %v3627_v46, %v3631_v7  ;;  %v3656_v5 = vor.u32 %v3655_v22, %v3651_v12  ;;  %v3661_v23 = vrot.slane %v3659_v57, 5  ;;  %v7862_v41 = vrot.slane %v16655_v49, 5  ;;  %v7750_v49 = vld [vmem:[#allocation2 + $0x3c] sm:$0xe] }
 0x3fc   : > { %v3646_v26 = vor.u32 %v3645_v20, %v3641_v27  ;;  %v7865_v8 = vrot.slane %v16656_v21, 5  ;;  %v3642_v61 = vsel %vm18641_vm14, %v3637_v42, %v3641_v27  ;;  %v3664_v28 = vshrl.u32 %v3164_v19, 16  ;;  %v16658_v27 = vld [vmem:[#allocation2 + $0x38] sm:$0x1] }
 0x3fd   : > { %v19369_v3 = vsel %vm18002_vm11, %v7851_v44, %v7852_v13  ;;  %v13676_v0 = vcombine.low %v3632_v55, %v3642_v61  ;;  %v3657_v40 = vrot.slane %v3656_v5, 4  ;;  %v19374_v30 = vsel %vm18002_vm11, %v7854_v54, %v7855_v17 }
 0x3fe   : > { %v3647_v58 = vrot.slane %v3646_v26, 4  ;;  %v13923_v60 = vrot.slane %v7749_v6, 9  ;;  %v7861_v51 = vrot.slane %v7859_v9, 4  ;;  %v3666_v47 = vrot.slane %v3664_v28, 4 }
 0x3ff   : > { %15056 = vmatprep.mubr.bf16.mxu0 %v13676_v0  ;;  %v3662_v13 = vsel %vm18641_vm14, %v3657_v40, %v3661_v23  ;;  %v3667_v43 = vshll.u32 %v3164_v19, 16  ;;  %v3673_v11 = vshll.u32 %v19380_v63, 16  ;;  %v7867_v7 = vrot.slane %v7865_v8, 4  ;;  %v16661_v19 = vld [vmem:[#allocation2 + $0xd8] sm:$0x1] }
 0x400   : > { %v3677_v17 = vshrl.u32 %v19380_v63, 16  ;;  %v7868_v1 = vrot.slane %v16658_v27, 5  ;;  %v3683_v31 = vshll.u32 %v19384_v52, 16  ;;  %v3687_v18 = vshrl.u32 %v19384_v52, 16  ;;  %v16666_v27 = vld [vmem:[#allocation2 + $0x4c] sm:$0x1] }
 0x401   : > { %15393 = vmatmul.mubr.bf16.gmra.mrb[4].mxu1 %v19318_v24  ;;  %v3652_v24 = vsel %vm18641_vm14, %v3647_v58, %v3651_v12  ;;  %v3669_v25 = vrot.slane %v3667_v43, 5  ;;  %v3675_v39 = vrot.slane %v3673_v11, 5  ;;  %v3693_v57 = vshll.u32 %v19388_v32, 16  ;;  %v19426_v58 = vld [vmem:[#allocation2 + $0xdc] sm:$0xf] }
 0x402   : > { %15396 = vmatprep.mubr.bf16.mxu1 %v19330_v50  ;;  %v7864_v50 = vrot.slane %v7862_v41, 4  ;;  %v13677_v33 = vcombine.low %v3652_v24, %v3662_v13  ;;  %v3679_v44 = vrot.slane %v3677_v17, 4  ;;  %v3697_v46 = vshrl.u32 %v19388_v32, 16  ;;  %v16664_v43 = vld [vmem:[#allocation2 + $0x48] sm:$0xf] }
 0x403   : > { %v19394_v20 = vsel %vm18002_vm11, %v13923_v60, %v7859_v9  ;;  %v3670_v12 = vor.u32 %v3669_v25, %v3666_v47  ;;  %v3685_v22 = vrot.slane %v3683_v31, 5  ;;  %v3703_v54 = vshll.u32 %v16661_v19, 16  ;;  %v16663_v60 = vld [vmem:[#allocation2 + $0x44] sm:$0xf] }
 0x404   : > { %15057 = vmatmul.mubr.bf16.gmra.mrb[180].mxu0 %v13677_v33  ;;  %v3680_v16 = vor.u32 %v3679_v44, %v3675_v39  ;;  %v3689_v42 = vrot.slane %v3687_v18, 4  ;;  %v3695_v6 = vrot.slane %v3693_v57, 5  ;;  %v3699_v55 = vrot.slane %v3697_v46, 4  ;;  %v19440_v33 = vld [vmem:[#allocation2 + $0xe0] sm:$0xf] }
 0x405   : > { %v19399_v26 = vsel %vm18002_vm11, %v7861_v51, %v7862_v41  ;;  %v19403_v5 = vsel %vm18002_vm11, %v7864_v50, %v7865_v8  ;;  %v19407_v9 = vsel %vm18002_vm11, %v7867_v7, %v7868_v1  ;;  %v3671_v23 = vrot.slane %v3670_v12, 4  ;;  %v19444_v31 = vld [vmem:[#allocation2 + $0xe4] sm:$0xf]  ;;  %v19448_v12 = vld [vmem:[#allocation2 + $0xe8] sm:$0xf] }
 0x406   : > { %v3681_v21 = vrot.slane %v3680_v16, 4  ;;  %v3690_v61 = vor.u32 %v3689_v42, %v3685_v22  ;;  %v3700_v28 = vor.u32 %v3699_v55, %v3695_v6  ;;  %v13913_v41 = vcombine.low %v7191_v59, %v7201_v15  ;;  %v16662_v15 = vld [vmem:[#allocation2 + $0x40] sm:$0xf]  ;;  %v16669_v42 = vld [vmem:[#allocation2 + $0xec] sm:$0x1] }
 0x407   : > { %v13954_v8 = vcombine.low %v19356_v10, %v19360_v35  ;;  %v3676_v0 = vsel %vm18641_vm14, %v3671_v23, %v3675_v39  ;;  %v13956_v53 = vcombine.low %v19394_v20, %v19399_v26  ;;  %v13957_v37 = vcombine.low %v19403_v5, %v19407_v9  ;;  %v7751_v55 = vld [vmem:[#allocation2 + $0x50] sm:$0xe]  ;;  %v16670_v23 = vld [vmem:[#allocation2 + $0x54] sm:$0xf] }
 0x408   : > { %v3686_v29 = vsel %vm18641_vm14, %v3681_v21, %v3685_v22  ;;  %v3691_v40 = vrot.slane %v3690_v61, 4  ;;  %v3701_v36 = vrot.slane %v3700_v28, 4  ;;  %v13924_v59 = vrot.slane %v7750_v49, 9  ;;  %v16483_v20 = vld [vmem:[%s21659_s7 + $0x190] sm:$0xff]  }
 0x409   : > { %15397 = vmatmul.mubr.bf16.gmra.mrb[8].mxu1 %v19332_v4  ;;  %v3705_v4 = vrot.slane %v3703_v54, 5  ;;  %v7872_v10 = vrot.slane %v16662_v15, 5  ;;  %v13678_v35 = vcombine.low %v3676_v0, %v3686_v29  ;;  %v7875_v51 = vrot.slane %v16663_v60, 5 }
 0x40a   : > { %15400 = vmatprep.mubr.bf16.mxu1 %v19334_v48  ;;  %v13955_v48 = vcombine.low %v19369_v3, %v19374_v30  ;;  %v3696_v47 = vsel %vm18641_vm14, %v3691_v40, %v3695_v6  ;;  %v3708_v13 = vshrl.u32 %v19426_v58, 16  ;;  %v7878_v11 = vrot.slane %v16664_v43, 5 }
 0x40b   : > { %v3706_v24 = vsel %vm18641_vm14, %v3701_v36, %v3705_v4  ;;  %15060 = vmatprep.mubr.bf16.mxu0 %v13678_v35  ;;  %v3711_v7 = vshll.u32 %v19426_v58, 16  ;;  %v3717_v17 = vshll.u32 %v19440_v33, 16  ;;  %v7881_v1 = vrot.slane %v16666_v27, 5 }
 0x40c   : > { %v13679_v50 = vcombine.low %v3696_v47, %v3706_v24  ;;  %v3710_v25 = vrot.slane %v3708_v13, 4  ;;  %v3721_v39 = vshrl.u32 %v19440_v33, 16  ;;  %v3727_v44 = vshll.u32 %v19444_v31, 16  ;;  %v16482_v13 = vld [vmem:[%s21659_s7 + $0x188] sm:$0xff]  }
 0x40d   : > { %v3713_v18 = vrot.slane %v3711_v7, 5  ;;  %v3719_v57 = vrot.slane %v3717_v17, 5  ;;  %v3731_v46 = vshrl.u32 %v19444_v31, 16  ;;  %v3737_v22 = vshll.u32 %v19448_v12, 16 }
 0x40e   : > { %15061 = vmatmul.mubr.bf16.gmra.mrb[184].mxu0 %v13679_v50  ;;  %v3723_v19 = vrot.slane %v3721_v39, 4  ;;  %v3729_v54 = vrot.slane %v3727_v44, 5  ;;  %v3741_v16 = vshrl.u32 %v19448_v12, 16  ;;  %v3747_v6 = vshll.u32 %v16669_v42, 16  ;;  %v16671_v50 = vld [vmem:[#allocation2 + $0x58] sm:$0xf] }
 0x40f   : > { %v7885_v49 = vrot.slane %v16670_v23, 5  ;;  %v3714_v21 = vor.u32 %v3713_v18, %v3710_v25  ;;  %v3733_v61 = vrot.slane %v3731_v46, 4  ;;  %v3739_v28 = vrot.slane %v3737_v22, 5  ;;  %v16672_v18 = vld [vmem:[#allocation2 + $0x5c] sm:$0xf] }
 0x410   : > { %v7874_v4 = vrot.slane %v7872_v10, 4  ;;  %v3724_v0 = vor.u32 %v3723_v19, %v3719_v57  ;;  %v3743_v29 = vrot.slane %v3741_v16, 4  ;;  %v19454_v40 = vsel %vm18002_vm11, %v13924_v59, %v7872_v10  ;;  %v21783_v22 = vld [vmem:[#allocation14_spill] sm:$0xff] }
 0x411   : > { %15401 = vmatmul.mubr.bf16.gmra.mrb[12].mxu1 %v13913_v41  ;;  %v7877_v41 = vrot.slane %v7875_v51, 4  ;;  %v3715_v36 = vrot.slane %v3714_v21, 4  ;;  %v3734_v15 = vor.u32 %v3733_v61, %v3729_v54  ;;  %v13925_v35 = vrot.slane %v7751_v55, 9  ;;  %v16674_v16 = vld [vmem:[#allocation2 + $0xfc] sm:$0xf] }
 0x412   : > { %15420 = vmatprep.mubr.bf16.mxu1 %v13954_v8  ;;  %v7880_v8 = vrot.slane %v7878_v11, 4  ;;  %v3725_v60 = vrot.slane %v3724_v0, 4  ;;  %v3744_v47 = vor.u32 %v3743_v29, %v3739_v28  ;;  %v3749_v24 = vrot.slane %v3747_v6, 5  ;;  %v21785_v6 = vld [vmem:[#allocation15_spill] sm:$0xff]  ;;  %v21787_v29 = vld [vmem:[#allocation24_spill] sm:$0xff] }
 0x413   : > { %v7887_v43 = vrot.slane %v7885_v49, 4  ;;  %v7888_v7 = vrot.slane %v16671_v50, 5  ;;  %v3720_v17 = vsel %vm18641_vm14, %v3715_v36, %v3719_v57  ;;  %v3735_v27 = vrot.slane %v3734_v15, 4  ;;  %v7752_v36 = vld [vmem:[#allocation2 + $0x64] sm:$0xe]  ;;  %v16484_v50 = vld [vmem:[%s21659_s7 + $0x198] sm:$0xff]  }
 0x414   : > { %v7876_v59 = vsel %vm18002_vm11, %v7874_v4, %v7875_v51  ;;  %v19465_v10 = vsel %vm18002_vm11, %v7877_v41, %v7878_v11  ;;  %v3730_v25 = vsel %vm18641_vm14, %v3725_v60, %v3729_v54  ;;  %v3745_v39 = vrot.slane %v3744_v47, 4  ;;  %v16673_v11 = vld [vmem:[#allocation2 + $0xf8] sm:$0xf]  ;;  %v16676_v4 = vld [vmem:[#allocation2 + $0x60] sm:$0x1] }
 0x415   : > { %v19474_v44 = vsel %vm18002_vm11, %v7880_v8, %v7881_v1  ;;  %v7891_v57 = vrot.slane %v16672_v18, 5  ;;  %v13680_v46 = vcombine.low %v3720_v17, %v3730_v25  ;;  %v3740_v51 = vsel %vm18641_vm14, %v3735_v27, %v3739_v28 }
 0x416   : > { %v19484_v3 = vsel %vm18002_vm11, %v13925_v35, %v7885_v49  ;;  %v3750_v30 = vsel %vm18641_vm14, %v3745_v39, %v3749_v24  ;;  %v3771_v1 = vshll.u32 %v16673_v11, 16  ;;  %v21784_v19 = vshrl.u32 %v21783_v22, 16  ;;  %v16675_v49 = vld [vmem:[#allocation2 + $0x100] sm:$0x1]  ;;  %v16677_v24 = vld [vmem:[#allocation2 + $0x68] sm:$0xf] }
 0x417   : > { %15064 = vmatprep.mubr.bf16.mxu0 %v13680_v46  ;;  %v13681_v26 = vcombine.low %v3740_v51, %v3750_v30  ;;  %v3781_v42 = vshll.u32 %v16674_v16, 16  ;;  %v21786_v55 = vshrl.u32 %v21785_v6, 16  ;;  %v3791_v21 = vshll.u32 %v16675_v49, 16  ;;  %v21789_v39 = vld [vmem:[#allocation18_spill] sm:$0xff]  ;;  %v16678_v46 = vld [vmem:[#allocation2 + $0x6c] sm:$0xf] }
 0x418   : > { %v3777_v54 = vrot.slane %v21784_v19, 4  ;;  %v7890_v61 = vrot.slane %v7888_v7, 4  ;;  %v7893_v28 = vrot.slane %v7891_v57, 4  ;;  %v7894_v41 = vrot.slane %v16676_v4, 5  ;;  %v16681_v19 = vld [vmem:[#allocation2 + $0x10c] sm:$0xf] }
 0x419   : > { %15421 = vmatmul.mubr.bf16.vlgmr.msra.gmra.mrb[16].mxu1 %v13955_v48  ;;  %v3764_v48 = vsel %vm18641_vm14, %v18585_v2, %v18575_v34  ;;  %v3773_v2 = vrot.slane %v3771_v1, 5  ;;  %v3787_v23 = vrot.slane %v21786_v55, 4  ;;  %15065 = vmatmul.mubr.bf16.gmra.mrb[188].mxu0 %v13681_v26  ;;  %v21788_v8 = vshrl.u32 %v21787_v29, 16  ;;  %v16485_v1 = vld [vmem:[%s21659_s7 + $0x1a0] sm:$0xff]   ;;  %v21791_v26 = vld [vmem:[#allocation16_spill] sm:$0xff] }
 0x41a   : > { %15485 = vmatpush3.bf16.msra.mxu1 %v19133_v14  ;;  %15424 = vmatprep.mubr.bf16.mxu1 %v13956_v53  ;;  %v19494_v14 = vsel %vm18002_vm11, %v7887_v43, %v7888_v7  ;;  %v3768_v53 = vor.u32 %v18577_v38, %v18575_v34  ;;  %v13958_v38 = vcombine.low %v19454_v40, %v7876_v59  ;;  %v3783_v35 = vrot.slane %v3781_v42, 5  ;;  %v21793_v42 = vld [vmem:[#allocation17_spill] sm:$0xff] }
 0x41b   : > { %15486 = vmatprep.subr.bf16.mxu1 %v16482_v13  ;;  %v19507_v34 = vrot.slane %v21788_v8, 4  ;;  %v3778_v15 = vor.u32 %v3777_v54, %v3773_v2  ;;  %v13959_v60 = vcombine.low %v19465_v10, %v19474_v44  ;;  %v13960_v47 = vcombine.low %v19484_v3, %v19494_v14  ;;  %v21790_v44 = vld [vmem:[#allocation20_spill] sm:$0xff]  ;;  %v16683_v8 = vld [vmem:[#allocation2 + $0x74] sm:$0x1] }
 0x41c   : > { %v3769_v0 = vrot.slane %v3768_v53, 4  ;;  %v7898_v43 = vrot.slane %v16677_v24, 5  ;;  %v3788_v17 = vor.u32 %v3787_v23, %v3783_v35  ;;  %v3793_v27 = vrot.slane %v3791_v21, 5  ;;  %v16682_v21 = vld [vmem:[#allocation2 + $0x110] sm:$0xf] }
 0x41d   : > { %v3779_v7 = vrot.slane %v3778_v15, 4  ;;  %v19524_v59 = vsel %vm18002_vm11, %v7890_v61, %v7891_v57  ;;  %v19528_v10 = vsel %vm18002_vm11, %v7893_v28, %v7894_v41  ;;  %v13926_v25 = vrot.slane %v7752_v36, 9  ;;  %v21795_v28 = vld [vmem:[#allocation19_spill] sm:$0xff]  ;;  %v16684_v15 = vld [vmem:[#allocation2 + $0x114] sm:$0x1] }
 0x41e   : > { %15487 = vmatpush3.bf16.msra.mxu1 %v16482_v13  ;;  %v3774_v40 = vsel %vm18641_vm14, %v3769_v0, %v3773_v2  ;;  %v3802_v18 = vor.u32 %v21790_v44, %v21789_v39  ;;  %v7901_v51 = vrot.slane %v16678_v46, 5  ;;  %v3789_v9 = vrot.slane %v3788_v17, 4 }
 0x41f   : > { %15488 = vmatprep.subr.bf16.mxu1 %v16483_v20  ;;  %v13682_v13 = vcombine.low %v3764_v48, %v3774_v40  ;;  %v3784_v5 = vsel %vm18641_vm14, %v3779_v7, %v3783_v35  ;;  %v7900_v57 = vrot.slane %v7898_v43, 4  ;;  %v16680_v48 = vld [vmem:[#allocation2 + $0x70] sm:$0xf]  ;;  %v21792_v53 = vshrl.u32 %v21791_v26, 16 }
 0x420   : > { %v7904_v11 = vrot.slane %v16680_v48, 5  ;;  %v3794_v54 = vsel %vm18641_vm14, %v3789_v9, %v3793_v27  ;;  %v3803_v2 = vrot.slane %v3802_v18, 4  ;;  %v21794_v6 = vshrl.u32 %v21793_v42, 16  ;;  %v16685_v27 = vld [vmem:[#allocation2 + $0x7c] sm:$0xf]  ;;  %v21800_v42 = vld [vmem:[#allocation21_spill] sm:$0xff] }
 0x421   : > { %15425 = vmatmul.mubr.bf16.gmra.mrb[20].mxu1 %v13957_v37  ;;  %v16679_v37 = vld [vmem:[#allocation2 + $0x108] sm:$0xf]  ;;  %15068 = vmatprep.mubr.bf16.mxu0 %v13682_v13  ;;  %v3811_v22 = vrot.slane %v21792_v53, 4  ;;  %v13683_v23 = vcombine.low %v3784_v5, %v3794_v54  ;;  %v3825_v61 = vshll.u32 %v16682_v21, 16  ;;  %v21796_v4 = vshrl.u32 %v21795_v28, 16 }
 0x422   : > { %15428 = vmatprep.mubr.bf16.mxu1 %v13958_v38  ;;  %15489 = vmatpush3.bf16.msra.mxu1 %v16483_v20  ;;  %v3805_v30 = vshll.u32 %v16679_v37, 16  ;;  %v3815_v20 = vshll.u32 %v16681_v19, 16  ;;  %v3821_v55 = vrot.slane %v21794_v6, 4  ;;  %v7903_v0 = vrot.slane %v7901_v51, 4  ;;  %v16486_v13 = vld [vmem:[%s21659_s7 + $0x1a8] sm:$0xff]  }
 0x423   : > { %15490 = vmatprep.subr.bf16.mxu1 %v16484_v50  ;;  %v3831_v41 = vrot.slane %v21796_v4, 4  ;;  %v7907_v38 = vrot.slane %v16683_v8, 5  ;;  %v3835_v35 = vshll.u32 %v16684_v15, 16  ;;  %v19547_v24 = vsel %vm18002_vm11, %v13926_v25, %v7898_v43  ;;  %15069 = vmatmul.mubr.bf16.gmra.mrb[192].mxu0 %v13683_v23  ;;  %v7753_v18 = vld [vmem:[#allocation2 + $0x78] sm:$0xe] }
 0x424   : > { %v3807_v16 = vrot.slane %v3805_v30, 5  ;;  %v3817_v49 = vrot.slane %v3815_v20, 5  ;;  %v19551_v40 = vsel %vm18002_vm11, %v7900_v57, %v7901_v51  ;;  %v3827_v17 = vrot.slane %v3825_v61, 5  ;;  %v21799_v57 = vld [vmem:[#allocation23_spill] sm:$0xff]  ;;  %v21802_v61 = vld [vmem:[#allocation10_spill] sm:$0xff] }
 0x425   : > { %v7911_v39 = vrot.slane %v16685_v27, 5  ;;  %v13961_v25 = vcombine.low %v19524_v59, %v19528_v10  ;;  %v3837_v5 = vrot.slane %v3835_v35, 5  ;;  %v21797_v9 = vshll.u32 %v21787_v29, 16  ;;  %v16487_v29 = vld [vmem:[%s21659_s7 + $0x1b0] sm:$0xff]   ;;  %v16686_v53 = vld [vmem:[#allocation2 + $0x80] sm:$0xf] }
 0x426   : > { %15491 = vmatpush3.bf16.msra.mxu1 %v16484_v50  ;;  %v3812_v36 = vor.u32 %v3811_v22, %v3807_v16  ;;  %v3822_v7 = vor.u32 %v3821_v55, %v3817_v49  ;;  %v7906_v50 = vrot.slane %v7904_v11, 4  ;;  %v3808_v44 = vsel %vm18641_vm14, %v3803_v2, %v3807_v16  ;;  %v16687_v19 = vld [vmem:[#allocation2 + $0x84] sm:$0xf]  ;;  %v16688_v2 = vld [vmem:[#allocation2 + $0x11c] sm:$0xf] }
 0x427   : > { %15492 = vmatprep.subr.bf16.mxu1 %v16485_v1  ;;  %v3832_v51 = vor.u32 %v3831_v41, %v3827_v17  ;;  %v19562_v37 = vrot.slane %v21797_v9, 5  ;;  %v13962_v30 = vcombine.low %v19547_v24, %v19551_v40  ;;  %v7913_v26 = vrot.slane %v7911_v39, 4  ;;  %v16690_v41 = vld [vmem:[#allocation2 + $0x124] sm:$0xf]  ;;  %v16691_v24 = vld [vmem:[#allocation2 + $0x128] sm:$0x1] }
 0x428   : > { %v3813_v43 = vrot.slane %v3812_v36, 4  ;;  %v3823_v46 = vrot.slane %v3822_v7, 4  ;;  %v7914_v22 = vrot.slane %v16686_v53, 5  ;;  %v7917_v20 = vrot.slane %v16687_v19, 5  ;;  %v21804_v36 = vld [vmem:[#allocation11_spill] sm:$0xff] }
 0x429   : > { %15429 = vmatmul.mubr.bf16.gmra.mrb[24].mxu1 %v13959_v60  ;;  %v19571_v60 = vsel %vm18002_vm11, %v7903_v0, %v7904_v11  ;;  %v3833_v14 = vrot.slane %v3832_v51, 4  ;;  %v19584_v11 = vsel %vm18002_vm11, %v7906_v50, %v7907_v38  ;;  %v3849_v16 = vshll.u32 %v16688_v2, 16 }
 0x42a   : > { %15432 = vmatprep.mubr.bf16.mxu1 %v13960_v47  ;;  %15493 = vmatpush3.bf16.msra.mxu1 %v16485_v1  ;;  %v3818_v59 = vsel %vm18641_vm14, %v3813_v43, %v3817_v49  ;;  %v3828_v3 = vsel %vm18641_vm14, %v3823_v46, %v3827_v17  ;;  %v21798_v47 = vld [vmem:[#allocation22_spill] sm:$0xff]  ;;  %v13927_v1 = vrot.slane %v7753_v18, 9  ;;  %v21801_v6 = vshrl.u32 %v21800_v42, 16  ;;  %v16689_v49 = vld [vmem:[#allocation2 + $0x120] sm:$0xf] }
 0x42b   : > { %15494 = vmatprep.subr.bf16.mxu1 %v16486_v13  ;;  %v13684_v10 = vcombine.low %v3808_v44, %v3818_v59  ;;  %v3846_v48 = vor.u32 %v21799_v57, %v21798_v47  ;;  %v3838_v54 = vsel %vm18641_vm14, %v3833_v14, %v3837_v5  ;;  %v3859_v21 = vshll.u32 %v16689_v49, 16  ;;  %v16692_v18 = vld [vmem:[#allocation2 + $0x88] sm:$0x1]  ;;  %v16693_v5 = vld [vmem:[#allocation2 + $0x138] sm:$0xf] }
 0x42c   : > { %v3855_v55 = vrot.slane %v21801_v6, 4  ;;  %v13685_v23 = vcombine.low %v3828_v3, %v3838_v54  ;;  %v21803_v28 = vshrl.u32 %v21802_v61, 16  ;;  %v3869_v0 = vshll.u32 %v16690_v41, 16  ;;  %v7754_v59 = vld [vmem:[#allocation2 + $0x8c] sm:$0xe] }
 0x42d   : > { %15072 = vmatprep.mubr.bf16.mxu0 %v13684_v10  ;;  %v3847_v8 = vrot.slane %v3846_v48, 4  ;;  %v3851_v38 = vrot.slane %v3849_v16, 5  ;;  %v21805_v15 = vshrl.u32 %v21804_v36, 16  ;;  %v3879_v40 = vshll.u32 %v16691_v24, 16  ;;  %v16694_v47 = vld [vmem:[#allocation2 + $0x90] sm:$0xf] }
 0x42e   : > { %15495 = vmatpush3.bf16.msra.mxu1 %v16486_v13  ;;  %v3865_v4 = vrot.slane %v21803_v28, 4  ;;  %v16488_v13 = vld [vmem:[%s21659_s7 + $0x1b8] sm:$0xff]   ;;  %v7912_v7 = vsel %vm18002_vm11, %v13927_v1, %v7911_v39  ;;  %v7916_v17 = vrot.slane %v7914_v22, 4  ;;  %15073 = vmatmul.mubr.bf16.gmra.mrb[196].mxu0 %v13685_v23  ;;  %v3861_v50 = vrot.slane %v3859_v21, 5  ;;  %v19608_v1 = vld [vmem:[%s21659_s7 + $0x1c0] sm:$0xff]   ;;  %v21806_v21 = vld [vmem:[#allocation12_spill] sm:$0xff] }
 0x42f   : > { %15496 = vmatprep.subr.bf16.mxu1 %v16487_v29  ;;  %v3875_v35 = vrot.slane %v21805_v15, 4  ;;  %v3871_v27 = vrot.slane %v3869_v0, 5  ;;  %v7915_v44 = vsel %vm18002_vm11, %v7913_v26, %v7914_v22  ;;  %v7919_v43 = vrot.slane %v7917_v20, 4  ;;  %v16695_v54 = vld [vmem:[#allocation2 + $0x94] sm:$0xf] }
 0x430   : > { %v7920_v46 = vrot.slane %v16692_v18, 5  ;;  %v3856_v51 = vor.u32 %v3855_v55, %v3851_v38  ;;  %v3917_v9 = vshrl.u32 %v16693_v5, 16  ;;  %v3866_v10 = vor.u32 %v3865_v4, %v3861_v50  ;;  %v16696_v23 = vld [vmem:[#allocation2 + $0x130] sm:$0xf]  ;;  %v16698_v36 = vld [vmem:[#allocation2 + $0x98] sm:$0xf] }
 0x431   : > { %15433 = vmatmul.mubr.bf16.gmra.mrb[28].mxu1 %v13961_v25  ;;  %v3876_v3 = vor.u32 %v3875_v35, %v3871_v27  ;;  %v3881_v39 = vrot.slane %v3879_v40, 5  ;;  %v13963_v14 = vcombine.low %v19571_v60, %v19584_v11  ;;  %v7924_v25 = vrot.slane %v16694_v47, 5  ;;  %v21808_v4 = vld [vmem:[#allocation13_spill] sm:$0xff]  ;;  %v16699_v40 = vld [vmem:[#allocation2 + $0x13c] sm:$0x1] }
 0x432   : > { %15436 = vmatprep.mubr.bf16.mxu1 %v13962_v30  ;;  %15497 = vmatpush3.bf16.msra.mxu1 %v16487_v29  ;;  %v3852_v57 = vsel %vm18641_vm14, %v3847_v8, %v3851_v38  ;;  %v3857_v48 = vrot.slane %v3856_v51, 4  ;;  %v13964_v30 = vcombine.low %v7912_v7, %v7915_v44  ;;  %v19612_v29 = vsel %vm18002_vm11, %v7916_v17, %v7917_v20  ;;  %v16700_v44 = vld [vmem:[#allocation2 + $0xa4] sm:$0xf]  ;;  %v7755_v51 = vld [vmem:[#allocation2 + $0xa0] sm:$0xe] }
 0x433   : > { %15498 = vmatprep.subr.bf16.mxu1 %v16488_v13  ;;  %v3867_v26 = vrot.slane %v3866_v10, 4  ;;  %v3877_v53 = vrot.slane %v3876_v3, 4  ;;  %v19616_v60 = vsel %vm18002_vm11, %v7919_v43, %v7920_v46  ;;  %v13928_v11 = vrot.slane %v7754_v59, 9 }
 0x434   : > { %v3862_v22 = vsel %vm18641_vm14, %v3857_v48, %v3861_v50  ;;  %v3890_v19 = vor.u32 %v19562_v37, %v19507_v34  ;;  %v7927_v2 = vrot.slane %v16695_v54, 5  ;;  %v7926_v6 = vrot.slane %v7924_v25, 4  ;;  %v16697_v34 = vld [vmem:[#allocation2 + $0x134] sm:$0xf] }
 0x435   : > { %v13686_v16 = vcombine.low %v3852_v57, %v3862_v22  ;;  %v3872_v20 = vsel %vm18641_vm14, %v3867_v26, %v3871_v27  ;;  %v3882_v42 = vsel %vm18641_vm14, %v3877_v53, %v3881_v39  ;;  %v3893_v49 = vshll.u32 %v16696_v23, 16  ;;  %v16705_v23 = vld [vmem:[#allocation2 + $0xac] sm:$0xf] }
 0x436   : > { %15499 = vmatpush3.bf16.msra.mxu1 %v16488_v13  ;;  %v13687_v55 = vcombine.low %v3872_v20, %v3882_v42  ;;  %v21807_v61 = vshrl.u32 %v21806_v21, 16  ;;  %v3903_v37 = vshll.u32 %v16697_v34, 16  ;;  %v21809_v41 = vshrl.u32 %v21808_v4, 16 }
 0x437   : > { %15564 = vmatprep.subr.bf16.mxu1 %v19608_v1  ;;  %15076 = vmatprep.mubr.bf16.mxu0 %v13686_v16  ;;  %v3913_v8 = vshll.u32 %v16693_v5, 16  ;;  %v3919_v38 = vrot.slane %v3917_v9, 4  ;;  %v7930_v15 = vrot.slane %v16698_v36, 5  ;;  %v3891_v35 = vrot.slane %v3890_v19, 4  ;;  %v16704_v16 = vld [vmem:[#allocation2] sm:$0xf] }
 0x438   : > { %v3899_v28 = vrot.slane %v21807_v61, 4  ;;  %v3909_v0 = vrot.slane %v21809_v41, 4  ;;  %15077 = vmatmul.mubr.bf16.gmra.mrb[200].mxu0 %v13687_v55  ;;  %v3895_v24 = vrot.slane %v3893_v49, 5  ;;  %v3923_v13 = vshll.u32 %v16699_v40, 16 }
 0x439   : > { %15437 = vmatmul.mubr.bf16.gmra.mrb[32].mxu1 %v13963_v14  ;;  %v3905_v7 = vrot.slane %v3903_v37, 5  ;;  %v3915_v17 = vrot.slane %v3913_v8, 5  ;;  %v7925_v50 = vsel %vm18002_vm11, %v13928_v11, %v7924_v25  ;;  %v7928_v27 = vsel %vm18002_vm11, %v7926_v6, %v7927_v2  ;;  %v16701_v25 = vld [vmem:[#allocation2 + $0x9c] sm:$0x1]  ;;  %v16702_v11 = vld [vmem:[#allocation2 + $0xa8] sm:$0xf] }
 0x43a   : > { %15440 = vmatprep.mubr.bf16.mxu1 %v13964_v30  ;;  %v7937_v43 = vrot.slane %v16700_v44, 5  ;;  %v3900_v18 = vor.u32 %v3899_v28, %v3895_v24  ;;  %v13965_v46 = vcombine.low %v19612_v29, %v19616_v60  ;;  %v3925_v59 = vrot.slane %v3923_v13, 5  ;;  %v16706_v28 = vld [vmem:[#allocation2 + $0xb8] sm:$0xf]  ;;  %v7756_v37 = vld [vmem:[#allocation2 + $0xb4] sm:$0xe] }
 0x43b   : > { %v3910_v5 = vor.u32 %v3909_v0, %v3905_v7  ;;  %v3920_v9 = vor.u32 %v3919_v38, %v3915_v17  ;;  %v7929_v10 = vrot.slane %v7927_v2, 4  ;;  %v7932_v3 = vrot.slane %v7930_v15, 4  ;;  %v16703_v2 = vld [vmem:[#allocation2 + $0x4] sm:$0xf]  ;;  %v16707_v38 = vld [vmem:[#allocation2 + $0xb0] sm:$0x1] }
 0x43c   : > { %v3896_v39 = vsel %vm18641_vm14, %v3891_v35, %v3895_v24  ;;  %v3901_v14 = vrot.slane %v3900_v18, 4  ;;  %v13966_v47 = vcombine.low %v7925_v50, %v7928_v27  ;;  %v7933_v57 = vrot.slane %v16701_v25, 5  ;;  %v16708_v24 = vld [vmem:[#allocation2 + $0xbc] sm:$0xf]  ;;  %v16709_v13 = vld [vmem:[#allocation2 + $0x8] sm:$0xf] }
 0x43d   : > { %v3911_v48 = vrot.slane %v3910_v5, 4  ;;  %v3921_v30 = vrot.slane %v3920_v9, 4  ;;  %v13929_v26 = vrot.slane %v7755_v51, 9  ;;  %v7939_v53 = vrot.slane %v7937_v43, 4  ;;  %v16711_v50 = vld [vmem:[#allocation2 + $0x18] sm:$0xf] }
 0x43e   : > { %v7940_v22 = vrot.slane %v16702_v11, 5  ;;  %v3906_v29 = vsel %vm18641_vm14, %v3901_v14, %v3905_v7  ;;  %v13698_v20 = vcombine.low %v16704_v16, %v16703_v2  ;;  %v7931_v6 = vsel %vm18002_vm11, %v7929_v10, %v7930_v15  ;;  %v16710_v7 = vld [vmem:[#allocation2 + $0xc] sm:$0xf]  ;;  %v16712_v27 = vld [vmem:[#allocation2 + $0x14] sm:$0xf] }
 0x43f   : > { %v13688_v60 = vcombine.low %v3896_v39, %v3906_v29  ;;  %v3916_v19 = vsel %vm18641_vm14, %v3911_v48, %v3915_v17  ;;  %v3926_v54 = vsel %vm18641_vm14, %v3921_v30, %v3925_v59  ;;  %v7934_v55 = vsel %vm18002_vm11, %v7932_v3, %v7933_v57  ;;  %v16714_v59 = vld [vmem:[#allocation2 + $0xcc] sm:$0xf]  ;;  %v7757_v3 = vld [vmem:[#allocation2 + $0xc8] sm:$0xe]  ;;  %v16715_v57 = vld [vmem:[#allocation2 + $0xc4] sm:$0x1] }
 0x440   : > { %v13689_v42 = vcombine.low %v3916_v19, %v3926_v54  ;;  %v7943_v49 = vrot.slane %v16705_v23, 5  ;;  %v7938_v21 = vsel %vm18002_vm11, %v13929_v26, %v7937_v43  ;;  %v7941_v61 = vsel %vm18002_vm11, %v7939_v53, %v7940_v22  ;;  %v16716_v53 = vld [vmem:[#allocation2 + $0xd0] sm:$0xf]  ;;  %v16718_v29 = vld [vmem:[#allocation2 + $0x20] sm:$0xf] }
 0x441   : > { %15441 = vmatmul.mubr.bf16.gmra.mrb[36].mxu1 %v13965_v46  ;;  %15080 = vmatprep.mubr.bf16.mxu0 %v13688_v60  ;;  %v7950_v34 = vrot.slane %v16706_v28, 5  ;;  %v13967_v4 = vcombine.low %v7931_v6, %v7934_v55  ;;  %v13968_v41 = vcombine.low %v7938_v21, %v7941_v61  ;;  %v7942_v0 = vrot.slane %v7940_v22, 4  ;;  %v16713_v46 = vld [vmem:[#allocation2 + $0xc0] sm:$0xf]  ;;  %v16717_v22 = vld [vmem:[#allocation2 + $0x1c] sm:$0xf] }
 0x442   : > { %15444 = vmatprep.mubr.bf16.mxu1 %v13966_v47  ;;  %15081 = vmatmul.mubr.bf16.gmra.mrb[204].mxu0 %v13689_v42  ;;  %v7945_v8 = vrot.slane %v7943_v49, 4  ;;  %v7946_v36 = vrot.slane %v16707_v38, 5  ;;  %v13930_v15 = vrot.slane %v7756_v37, 9  ;;  %v7953_v40 = vrot.slane %v16708_v24, 5  ;;  %v16719_v19 = vld [vmem:[#allocation2 + $0x2c] sm:$0xf] }
 0x443   : > { %15100 = vmatprep.mubr.bf16.mxu0 %v13698_v20  ;;  %v7952_v35 = vrot.slane %v7950_v34, 4  ;;  %v13699_v17 = vcombine.low %v16709_v13, %v16710_v7  ;;  %v13700_v44 = vcombine.low %v16712_v27, %v16711_v50  ;;  %v7944_v43 = vsel %vm18002_vm11, %v7942_v0, %v7943_v49  ;;  %v16720_v54 = vld [vmem:[#allocation2 + $0x28] sm:$0xf]  ;;  %v16721_v42 = vld [vmem:[#allocation2 + $0xd4] sm:$0xf] }
 0x444   : > { %v7947_v18 = vsel %vm18002_vm11, %v7945_v8, %v7946_v36  ;;  %v7956_v51 = vrot.slane %v16713_v46, 5  ;;  %v7951_v5 = vsel %vm18002_vm11, %v13930_v15, %v7950_v34  ;;  %v7963_v10 = vrot.slane %v16714_v59, 5  ;;  %v16722_v49 = vld [vmem:[#allocation2 + $0xe0] sm:$0xf]  ;;  %v7758_v61 = vld [vmem:[#allocation2 + $0xdc] sm:$0xe] }
 0x445   : > { %v7954_v9 = vsel %vm18002_vm11, %v7952_v35, %v7953_v40  ;;  %v13969_v39 = vcombine.low %v7944_v43, %v7947_v18  ;;  %v7955_v47 = vrot.slane %v7953_v40, 4  ;;  %v7959_v48 = vrot.slane %v16715_v57, 5  ;;  %v16724_v36 = vld [vmem:[#allocation2 + $0xe4] sm:$0xf]  ;;  %v16725_v35 = vld [vmem:[#allocation2 + $0x30] sm:$0xf] }
 0x446   : > { %v13970_v14 = vcombine.low %v7951_v5, %v7954_v9  ;;  %v7958_v25 = vrot.slane %v7956_v51, 4  ;;  %v13931_v30 = vrot.slane %v7757_v3, 9  ;;  %v7965_v26 = vrot.slane %v7963_v10, 4  ;;  %v16726_v24 = vld [vmem:[#allocation2 + $0x34] sm:$0xf] }
 0x447   : > { %v7966_v11 = vrot.slane %v16716_v53, 5  ;;  %v13701_v60 = vcombine.low %v16717_v22, %v16718_v29  ;;  %v13702_v2 = vcombine.low %v16720_v54, %v16719_v19  ;;  %v7957_v16 = vsel %vm18002_vm11, %v7955_v47, %v7956_v51  ;;  %v16727_v13 = vld [vmem:[#allocation2 + $0x40] sm:$0xf]  ;;  %v16728_v7 = vld [vmem:[#allocation2 + $0x3c] sm:$0xf] }
 0x448   : > { %v7960_v20 = vsel %vm18002_vm11, %v7958_v25, %v7959_v48  ;;  %v7969_v6 = vrot.slane %v16721_v42, 5  ;;  %v7964_v55 = vsel %vm18002_vm11, %v13931_v30, %v7963_v10  ;;  %v7976_v21 = vrot.slane %v16722_v49, 5  ;;  %v16730_v51 = vld [vmem:[#allocation2 + $0xf4] sm:$0xf]  ;;  %v7759_v9 = vld [vmem:[#allocation2 + $0xf0] sm:$0xe] }
 0x449   : > { %15445 = vmatmul.mubr.bf16.gmra.mrb[40].mxu1 %v13967_v4  ;;  %v7967_v23 = vsel %vm18002_vm11, %v7965_v26, %v7966_v11  ;;  %v13971_v28 = vcombine.low %v7957_v16, %v7960_v20  ;;  %v7968_v37 = vrot.slane %v7966_v11, 4  ;;  %v13932_v8 = vrot.slane %v7758_v61, 9  ;;  %v16732_v48 = vld [vmem:[#allocation2 + $0xf8] sm:$0xf]  ;;  %v16733_v26 = vld [vmem:[#allocation2 + $0x44] sm:$0xf] }
 0x44a   : > { %15448 = vmatprep.mubr.bf16.mxu1 %v13968_v41  ;;  %15101 = vmatmul.mubr.bf16.vlgmr.msra.gmra.mrb[144].mxu0 %v13699_v17  ;;  %v13972_v34 = vcombine.low %v7964_v55, %v7967_v23  ;;  %v7971_v4 = vrot.slane %v7969_v6, 4  ;;  %v16723_v41 = vld [vmem:[#allocation2 + $0xd8] sm:$0x1]  ;;  %v7978_v38 = vrot.slane %v7976_v21, 4  ;;  %v7979_v15 = vrot.slane %v16724_v36, 5 }
 0x44b   : > { %15104 = vmatprep.mubr.bf16.mxu0 %v13700_v44  ;;  %v7972_v0 = vrot.slane %v16723_v41, 5  ;;  %v13703_v40 = vcombine.low %v16725_v35, %v16726_v24  ;;  %v13704_v17 = vcombine.low %v16728_v7, %v16727_v13  ;;  %v7970_v50 = vsel %vm18002_vm11, %v7968_v37, %v7969_v6  ;;  %v16729_v44 = vld [vmem:[#allocation2 + $0xe8] sm:$0xf]  ;;  %v16735_v22 = vld [vmem:[#allocation2 + $0x54] sm:$0xf] }
 0x44c   : > { %v7982_v43 = vrot.slane %v16729_v44, 5  ;;  %v7977_v18 = vsel %vm18002_vm11, %v13932_v8, %v7976_v21  ;;  %v7980_v46 = vsel %vm18002_vm11, %v7978_v38, %v7979_v15  ;;  %v7989_v5 = vrot.slane %v16730_v51, 5  ;;  %v16734_v53 = vld [vmem:[#allocation2 + $0x48] sm:$0xf]  ;;  %v16736_v29 = vld [vmem:[#allocation2 + $0x50] sm:$0xf] }
 0x44d   : > { %v7973_v27 = vsel %vm18002_vm11, %v7971_v4, %v7972_v0  ;;  %v13974_v10 = vcombine.low %v7977_v18, %v7980_v46  ;;  %v7981_v3 = vrot.slane %v7979_v15, 4  ;;  %v13933_v25 = vrot.slane %v7759_v9, 9  ;;  %v16738_v6 = vld [vmem:[#allocation2 + $0x108] sm:$0xf]  ;;  %v7760_v23 = vld [vmem:[#allocation2 + $0x104] sm:$0xe] }
 0x44e   : > { %v13973_v59 = vcombine.low %v7970_v50, %v7973_v27  ;;  %v7991_v57 = vrot.slane %v7989_v5, 4  ;;  %v7992_v30 = vrot.slane %v16732_v48, 5  ;;  %v13705_v11 = vcombine.low %v16733_v26, %v16734_v53  ;;  %v16740_v0 = vld [vmem:[#allocation2 + $0x10c] sm:$0xf]  ;;  %v16741_v38 = vld [vmem:[#allocation2 + $0x58] sm:$0xf] }
 0x44f   : > { %v7983_v19 = vsel %vm18002_vm11, %v7981_v3, %v7982_v43  ;;  %v7990_v20 = vsel %vm18002_vm11, %v13933_v25, %v7989_v5  ;;  %v8002_v55 = vrot.slane %v16738_v6, 5  ;;  %v13934_v4 = vrot.slane %v7760_v23, 9  ;;  %v16742_v36 = vld [vmem:[#allocation2 + $0x5c] sm:$0xf]  ;;  %v16743_v35 = vld [vmem:[#allocation2 + $0x68] sm:$0xf] }
 0x450   : > { %v7993_v42 = vsel %vm18002_vm11, %v7991_v57, %v7992_v30  ;;  %v7994_v61 = vrot.slane %v7992_v30, 4  ;;  %v8005_v8 = vrot.slane %v16740_v0, 5  ;;  %v13707_v15 = vcombine.low %v16741_v38, %v16742_v36  ;;  %v16744_v24 = vld [vmem:[#allocation2 + $0x64] sm:$0xf]  ;;  %v7761_v46 = vld [vmem:[#allocation2 + $0x118] sm:$0xe] }
 0x451   : > { %15449 = vmatmul.mubr.bf16.gmra.mrb[44].mxu1 %v13969_v39  ;;  %v7984_v39 = vrot.slane %v7982_v43, 4  ;;  %v13976_v21 = vcombine.low %v7990_v20, %v7993_v42  ;;  %v8004_v41 = vrot.slane %v8002_v55, 4  ;;  %v8003_v27 = vsel %vm18002_vm11, %v13934_v4, %v8002_v55  ;;  %v16746_v43 = vld [vmem:[#allocation2 + $0x11c] sm:$0xf]  ;;  %v16749_v57 = vld [vmem:[#allocation2 + $0x6c] sm:$0xf] }
 0x452   : > { %15452 = vmatprep.mubr.bf16.mxu1 %v13970_v14  ;;  %15105 = vmatmul.mubr.bf16.gmra.mrb[148].mxu0 %v13701_v60  ;;  %v16731_v14 = vld [vmem:[#allocation2 + $0xec] sm:$0x1]  ;;  %v13706_v60 = vcombine.low %v16736_v29, %v16735_v22  ;;  %v8015_v18 = vrot.slane %v16746_v43, 5  ;;  %v8007_v9 = vrot.slane %v8005_v8, 4  ;;  %v16750_v48 = vld [vmem:[#allocation2 + $0x70] sm:$0xf] }
 0x453   : > { %15108 = vmatprep.mubr.bf16.mxu0 %v13702_v2  ;;  %v7985_v47 = vrot.slane %v16731_v14, 5  ;;  %v16737_v2 = vld [vmem:[#allocation2 + $0xfc] sm:$0xf]  ;;  %v8006_v44 = vsel %vm18002_vm11, %v8004_v41, %v8005_v8  ;;  %v13709_v30 = vcombine.low %v16749_v57, %v16750_v48  ;;  %v16752_v53 = vld [vmem:[#allocation2 + $0x78] sm:$0xf] }
 0x454   : > { %v7995_v16 = vrot.slane %v16737_v2, 5  ;;  %v13978_v5 = vcombine.low %v8003_v27, %v8006_v44  ;;  %v8017_v14 = vrot.slane %v8015_v18, 4  ;;  %v16751_v26 = vld [vmem:[#allocation2 + $0x7c] sm:$0xf]  ;;  %v7762_v42 = vld [vmem:[#allocation2 + $0x12c] sm:$0xe] }
 0x455   : > { %v7986_v54 = vsel %vm18002_vm11, %v7984_v39, %v7985_v47  ;;  %v13935_v39 = vrot.slane %v7761_v46, 9  ;;  %v16748_v47 = vld [vmem:[#allocation2 + $0x120] sm:$0xf]  ;;  %v16758_v0 = vld [vmem:[#allocation2 + $0x84] sm:$0xf] }
 0x456   : > { %v13975_v49 = vcombine.low %v7983_v19, %v7986_v54  ;;  %v7996_v13 = vsel %vm18002_vm11, %v7994_v61, %v7995_v16  ;;  %v8018_v25 = vrot.slane %v16748_v47, 5  ;;  %v16757_v41 = vld [vmem:[#allocation2 + $0x80] sm:$0xf]  ;;  %v16759_v38 = vld [vmem:[#allocation2 + $0x90] sm:$0xf] }
 0x457   : > { %v8016_v54 = vsel %vm18002_vm11, %v13935_v39, %v8015_v18  ;;  %v13711_v8 = vcombine.low %v16757_v41, %v16758_v0  ;;  %v16760_v36 = vld [vmem:[#allocation2 + $0x8c] sm:$0xf]  ;;  %v7763_v44 = vld [vmem:[#allocation2 + $0x140] sm:$0xe]  ;;  %v16766_v47 = vld [vmem:[#allocation2 + $0x98] sm:$0xf] }
 0x458   : > { %v8019_v2 = vsel %vm18002_vm11, %v8017_v14, %v8018_v25  ;;  %v8020_v23 = vrot.slane %v8018_v25, 4  ;;  %v16765_v14 = vld [vmem:[#allocation2 + $0x94] sm:$0xf]  ;;  %v16767_v57 = vld [vmem:[#allocation2 + $0xa4] sm:$0xf] }
 0x459   : > { %15453 = vmatmul.mubr.bf16.gmra.mrb[48].mxu1 %v13971_v28  ;;  %v7997_v28 = vrot.slane %v7995_v16, 4  ;;  %v16754_v16 = vld [vmem:[#allocation2 + $0x130] sm:$0xf]  ;;  %v13980_v55 = vcombine.low %v8016_v54, %v8019_v2  ;;  %v13713_v25 = vcombine.low %v16765_v14, %v16766_v47  ;;  %v16768_v48 = vld [vmem:[#allocation2 + $0xa0] sm:$0xf] }
 0x45a   : > { %15456 = vmatprep.mubr.bf16.mxu1 %v13972_v34  ;;  %15109 = vmatmul.mubr.bf16.gmra.mrb[152].mxu0 %v13703_v40  ;;  %v16739_v34 = vld [vmem:[#allocation2 + $0x100] sm:$0x1]  ;;  %v13708_v40 = vcombine.low %v16744_v24, %v16743_v35  ;;  %v8028_v20 = vrot.slane %v16754_v16, 5  ;;  %v16775_v41 = vld [vmem:[#allocation2 + $0xbc] sm:$0xf] }
 0x45b   : > { %15112 = vmatprep.mubr.bf16.mxu0 %v13704_v17  ;;  %v7998_v37 = vrot.slane %v16739_v34, 5  ;;  %v16745_v17 = vld [vmem:[#allocation2 + $0x110] sm:$0xf]  ;;  %v16776_v0 = vld [vmem:[#allocation2 + $0xc0] sm:$0xf] }
 0x45c   : > { %v8008_v50 = vrot.slane %v16745_v17, 5  ;;  %v8030_v34 = vrot.slane %v8028_v20, 4  ;;  %v9276_v47 = vld [vmem:[#allocation2 + $0x34] sm:$0xf] }
 0x45d   : > { %v7999_v7 = vsel %vm18002_vm11, %v7997_v28, %v7998_v37  ;;  %v13936_v28 = vrot.slane %v7762_v42, 9  ;;  %v16756_v37 = vld [vmem:[#allocation2 + $0x134] sm:$0xf] }
 0x45e   : > { %v13977_v51 = vcombine.low %v7996_v13, %v7999_v7  ;;  %v8009_v22 = vsel %vm18002_vm11, %v8007_v9, %v8008_v50  ;;  %v8031_v4 = vrot.slane %v16756_v37, 5 }
 0x45f   : > { %v8029_v7 = vsel %vm18002_vm11, %v13936_v28, %v8028_v20  ;;  %v16770_v20 = vld [vmem:[#allocation2 + $0x150] sm:$0x1] }
 0x460   : > { %v8032_v17 = vsel %vm18002_vm11, %v8030_v34, %v8031_v4  ;;  %v8033_v46 = vrot.slane %v8031_v4, 4  ;;  %v8050_v42 = vrot.slane %v16770_v20, 5  ;;  %v16491_v4 = vld [vmem:[#allocation2 + $0x28] sm:$0xff]   ;;  %v9278_v20 = vld [vmem:[#allocation2 + $0x3c] sm:$0xf] }
 0x461   : > { %15457 = vmatmul.mubr.bf16.gmra.mrb[52].mxu1 %v13973_v59  ;;  %v8010_v59 = vrot.slane %v8008_v50, 4  ;;  %v16762_v50 = vld [vmem:[#allocation2 + $0x144] sm:$0xf]  ;;  %v13982_v18 = vcombine.low %v8029_v7, %v8032_v17  ;;  %v16511_v7 = vld [vmem:[%s21659_s7 + $0x1d0] sm:$0xff]  }
 0x462   : > { %15460 = vmatprep.mubr.bf16.mxu1 %v13974_v10  ;;  %15113 = vmatmul.mubr.bf16.gmra.mrb[156].mxu0 %v13705_v11  ;;  %v16747_v10 = vld [vmem:[#allocation2 + $0x114] sm:$0x1]  ;;  %v13710_v11 = vcombine.low %v16752_v53, %v16751_v26  ;;  %v8041_v27 = vrot.slane %v16762_v50, 5  ;;  %v16529_v50 = vld [vmem:[%s21659_s7 + $0x1e0] sm:$0xff]  }
 0x463   : > { %15116 = vmatprep.mubr.bf16.mxu0 %v13706_v60  ;;  %v8011_v3 = vrot.slane %v16747_v10, 5  ;;  %v16753_v60 = vld [vmem:[#allocation2 + $0x124] sm:$0xf]  ;;  %v16556_v17 = vld [vmem:[%s21664_s12 + $0x10] sm:$0xff]  }
 0x464   : > { %v8021_v19 = vrot.slane %v16753_v60, 5  ;;  %v8043_v10 = vrot.slane %v8041_v27, 4 }
 0x465   : > { %v8012_v29 = vsel %vm18002_vm11, %v8010_v59, %v8011_v3  ;;  %v13937_v59 = vrot.slane %v7763_v44, 9  ;;  %v16764_v3 = vld [vmem:[#allocation2 + $0x148] sm:$0xf]  ;;  %v16558_v44 = vld [vmem:[%s21664_s12 + $0x18] sm:$0xff]  }
 0x466   : > { %v13979_v6 = vcombine.low %v8009_v22, %v8012_v29  ;;  %v8022_v35 = vsel %vm18002_vm11, %v8020_v23, %v8021_v19  ;;  %v8044_v39 = vrot.slane %v16764_v3, 5  ;;  %v16550_v3 = vld [vmem:[%s21659_s7 + $0x1f8] sm:$0xff]  }
 0x467   : > { %v8042_v29 = vsel %vm18002_vm11, %v13937_v59, %v8041_v27  ;;  %v16501_v27 = vld [vmem:[#allocation2 + $0x58] sm:$0xff]  }
 0x468   : > { %v8045_v60 = vsel %vm18002_vm11, %v8043_v10, %v8044_v39  ;;  %v8046_v2 = vrot.slane %v8044_v39, 4 }
 0x469   : > { %15461 = vmatmul.mubr.bf16.gmra.mrb[56].mxu1 %v13975_v49  ;;  %v8023_v49 = vrot.slane %v8021_v19, 4  ;;  %v13984_v54 = vcombine.low %v8042_v29, %v8045_v60  ;;  %v9387_v29 = vshrl.u32 %v9276_v47, 16  ;;  %v16553_v60 = vld [vmem:[%s21659_s7 + $0x200] sm:$0xff]  }
 0x46a   : > { %15464 = vmatprep.mubr.bf16.mxu1 %v13976_v21  ;;  %15117 = vmatmul.mubr.bf16.gmra.mrb[160].mxu0 %v13707_v15  ;;  %v16755_v21 = vld [vmem:[#allocation2 + $0x128] sm:$0x1]  ;;  %v13712_v15 = vcombine.low %v16760_v36, %v16759_v38 }
 0x46b   : > { %15120 = vmatprep.mubr.bf16.mxu0 %v13708_v40  ;;  %v8024_v61 = vrot.slane %v16755_v21, 5  ;;  %v16761_v40 = vld [vmem:[#allocation2 + $0x138] sm:$0xf]  ;;  %v16774_v21 = vld [vmem:[#allocation2 + $0xb4] sm:$0xf] }
 0x46c   : > { %v8034_v13 = vrot.slane %v16761_v40, 5  ;;  %v16777_v38 = vld [vmem:[#allocation2 + $0xc8] sm:$0xf]  ;;  %v13719_v40 = vcombine.low %v19384_v52, %v19388_v32 }
 0x46d   : > { %v8025_v24 = vsel %vm18002_vm11, %v8023_v49, %v8024_v61  ;;  %v16773_v49 = vld [vmem:[#allocation2 + $0xb8] sm:$0xf]  ;;  %v13718_v36 = vcombine.low %v16777_v38, %v19380_v63  ;;  %v16554_v63 = vld [vmem:[%s21664_s12] sm:$0xff]   ;;  %v16555_v52 = vld [vmem:[%s21664_s12 + $0x8] sm:$0xff]  }
 0x46e   : > { %v13981_v43 = vcombine.low %v8022_v35, %v8025_v24  ;;  %v8035_v26 = vsel %vm18002_vm11, %v8033_v46, %v8034_v13  ;;  %v13716_v61 = vcombine.low %v16774_v21, %v16773_v49  ;;  %v16496_v35 = vld [vmem:[#allocation2 + $0x3c] sm:$0xff]   ;;  %v16502_v24 = vld [vmem:[%s21659_s7 + $0x1c8] sm:$0xff]   ;;  %12429 = vmatpush1.bf16.msra.mxu0 %v16554_v63  ;;  %v9389_v21 = vrot.slane %v9387_v29, 4 }
 0x46f   : > { %v16497_v32 = vld [vmem:[#allocation2 + $0x44] sm:$0xff]   ;;  %12430 = vmatprep.subr.bf16.mxu0 %v21782_v45  ;;  %v9274_v46 = vld [vmem:[#allocation2 + $0x2c] sm:$0xf] }
 0x470   : > { %v9363_v39 = vshll.u32 %v9274_v46, 16  ;;  %v9367_v14 = vshrl.u32 %v9274_v46, 16  ;;  %v9281_v38 = vld [vmem:[#allocation2 + $0x48] sm:$0xf] }
 0x471   : > { %15465 = vmatmul.mubr.bf16.gmra.mrb[60].mxu1 %v13977_v51  ;;  %v8036_v51 = vrot.slane %v8034_v13, 4  ;;  %v13720_v13 = vcombine.low %v19426_v58, %v19440_v33  ;;  %v16500_v58 = vld [vmem:[#allocation2 + $0x50] sm:$0xff]   ;;  %v16520_v33 = vld [vmem:[%s21659_s7 + $0x1d8] sm:$0xff]  }
 0x472   : > { %15468 = vmatprep.mubr.bf16.mxu1 %v13978_v5  ;;  %15121 = vmatmul.mubr.bf16.gmra.mrb[164].mxu0 %v13709_v30  ;;  %v16763_v5 = vld [vmem:[#allocation2 + $0x13c] sm:$0x1]  ;;  %v13714_v30 = vcombine.low %v16768_v48, %v16767_v57  ;;  %v16559_v48 = vld [vmem:[%s21664_s12 + $0x20] sm:$0xff]  }
 0x473   : > { %15124 = vmatprep.mubr.bf16.mxu0 %v13710_v11  ;;  %v8037_v9 = vrot.slane %v16763_v5, 5  ;;  %v16769_v11 = vld [vmem:[#allocation2 + $0x14c] sm:$0xf]  ;;  %12431 = vmatpush1.bf16.msra.mxu0 %v16555_v52  ;;  %v16509_v5 = vld [vmem:[#allocation2 + $0x78] sm:$0xff]  }
 0x474   : > { %v8047_v22 = vrot.slane %v16769_v11, 5  ;;  %12432 = vmatprep.subr.bf16.mxu0 %v21782_v45  ;;  %v9369_v11 = vrot.slane %v9367_v14, 4 }
 0x475   : > { %v8038_v53 = vsel %vm18002_vm11, %v8036_v51, %v8037_v9  ;;  %v16506_v51 = vld [vmem:[#allocation2 + $0x6c] sm:$0xff]  }
 0x476   : > { %v13983_v19 = vcombine.low %v8035_v26, %v8038_v53  ;;  %v8049_v16 = vrot.slane %v8047_v22, 4  ;;  %v8048_v28 = vsel %vm18002_vm11, %v8046_v2, %v8047_v22  ;;  %v9275_v9 = vld [vmem:[#allocation2 + $0x30] sm:$0xf]  ;;  %v19769_v53 = vrot.slane %v9363_v39, 5  ;;  %v9282_v39 = vld [vmem:[#allocation2 + $0x4c] sm:$0x1] }
 0x477   : > { %12433 = vmatpush1.bf16.msra.mxu0 %v16556_v17  ;;  %v9377_v57 = vshrl.u32 %v9275_v9, 16  ;;  %v9383_v22 = vshll.u32 %v9276_v47, 16  ;;  %v9431_v17 = vshrl.u32 %v9281_v38, 16 }
 0x478   : > { %v8051_v34 = vsel %vm18002_vm11, %v8049_v16, %v8050_v42  ;;  %12434 = vmatprep.subr.bf16.mxu0 %v21782_v45  ;;  %v16514_v42 = vld [vmem:[#allocation2 + $0x8c] sm:$0xff]  }
 0x479   : > { %15469 = vmatmul.mubr.bf16.gmra.mrb[0].mxu1 %v13979_v6  ;;  %v16771_v6 = vld [vmem:[#allocation2 + $0xa8] sm:$0xf]  ;;  %v13985_v37 = vcombine.low %v8048_v28, %v8051_v34  ;;  %v9379_v16 = vrot.slane %v9377_v57, 4  ;;  %v19781_v49 = vrot.slane %v9383_v22, 5  ;;  %v9398_v28 = vshrl.u32 %v9278_v20, 16  ;;  %v16563_v57 = vld [vmem:[%s21664_s12 + $0x38] sm:$0xff]  }
 0x47a   : > { %15472 = vmatprep.mubr.bf16.mxu1 %v13980_v55  ;;  %15125 = vmatmul.mubr.bf16.gmra.mrb[168].mxu0 %v13711_v8  ;;  %v16772_v55 = vld [vmem:[#allocation2 + $0xac] sm:$0xf]  ;;  %v13717_v8 = vcombine.low %v16775_v41, %v16776_v0  ;;  %v9401_v34 = vshll.u32 %v9278_v20, 16  ;;  %v16562_v41 = vld [vmem:[%s21664_s12 + $0x30] sm:$0xff]  }
 0x47b   : > { %15128 = vmatprep.mubr.bf16.mxu0 %v13712_v15  ;;  %v13715_v23 = vcombine.low %v16771_v6, %v16772_v55  ;;  %v16492_v15 = vld [vmem:[#allocation2 + $0x30] sm:$0xff]   ;;  %12435 = vmatpush1.bf16.msra.mxu0 %v16558_v44  ;;  %v9370_v55 = vor.u32 %v9369_v11, %v19769_v53  ;;  %v9286_v11 = vld [vmem:[#allocation2 + $0x5c] sm:$0xf] }
 0x47c   : > { %12436 = vmatprep.subr.bf16.mxu0 %v21782_v45  ;;  %v9403_v63 = vrot.slane %v9401_v34, 5  ;;  %v16523_v34 = vld [vmem:[#allocation2 + $0xb4] sm:$0xff]  }
 0x47f   : > { %12437 = vmatpush1.bf16.msra.mxu0 %v16559_v48 }
 0x480   : > { %12438 = vmatprep.subr.bf16.mxu0 %v21782_v45 }
 0x481   : > { %15473 = vmatmul.mubr.bf16.gmra.mrb[4].mxu1 %v13981_v43  ;;  %v16545_v43 = vld [vmem:[%s21659_s7 + $0x1f0] sm:$0xff]  }
 0x482   : > { %15476 = vmatprep.mubr.bf16.mxu1 %v13982_v18  ;;  %15129 = vmatmul.mubr.bf16.gmra.mrb[172].mxu0 %v13713_v25  ;;  %v9273_v18 = vld [vmem:[#allocation2 + $0x28] sm:$0xf]  ;;  %v9373_v25 = vshll.u32 %v9275_v9, 16 }
 0x483   : > { %15132 = vmatprep.mubr.bf16.mxu0 %v13714_v30  ;;  %v9354_v59 = vshrl.u32 %v9273_v18, 16  ;;  %v9357_v10 = vshll.u32 %v9273_v18, 16 }
 0x484   : > { %v19778_v2 = vrot.slane %v9373_v25, 5  ;;  %v9433_v25 = vrot.slane %v9431_v17, 4 }
 0x485   : > { %v9356_v30 = vrot.slane %v9354_v59, 4  ;;  %v9359_v26 = vrot.slane %v9357_v10, 5 }
 0x487   : > { %v9360_v6 = vor.u32 %v9359_v26, %v9356_v30 }
 0x489   : > { %15477 = vmatmul.mubr.bf16.gmra.mrb[8].mxu1 %v13983_v19  ;;  %v16560_v19 = vld [vmem:[%s21664_s12 + $0x28] sm:$0xff]   ;;  %v9361_v0 = vrot.slane %v9360_v6, 4  ;;  %v9437_v6 = vshll.u32 %v9282_v39, 16 }
 0x48a   : > { %15480 = vmatprep.mubr.bf16.mxu1 %v13984_v54  ;;  %15133 = vmatmul.mubr.bf16.gmra.mrb[176].mxu0 %v13715_v23  ;;  %v16510_v54 = vld [vmem:[#allocation2 + $0x80] sm:$0xff]   ;;  %v9277_v23 = vld [vmem:[#allocation2 + $0x38] sm:$0x1] }
 0x48b   : > { %15136 = vmatprep.mubr.bf16.mxu0 %v13716_v61  ;;  %12439 = vmatpush1.bf16.msra.mxu0 %v16560_v19  ;;  %v9279_v61 = vld [vmem:[#allocation2 + $0x40] sm:$0xf] }
 0x48c   : > { %12440 = vmatprep.subr.bf16.mxu0 %v21782_v45 }
 0x48f   : > { %12441 = vmatpush1.bf16.msra.mxu0 %v16562_v41 }
 0x490   : > { %12442 = vmatprep.subr.bf16.mxu0 %v21782_v45 }
 0x491   : > { %15481 = vmatmul.mubr.bf16.gmra.mrb[12].mxu1 %v13985_v37  ;;  %v9380_v37 = vor.u32 %v9379_v16, %v19778_v2 }
 0x492   : > { %15500 = vmatprep.mubr.bf16.mxu1 %v16491_v4  ;;  %15137 = vmatmul.mubr.bf16.gmra.mrb[180].mxu0 %v13717_v8  ;;  %v9280_v4 = vld [vmem:[#allocation2 + $0x44] sm:$0xf]  ;;  %v9393_v8 = vshll.u32 %v9277_v23, 16 }
 0x493   : > { %15140 = vmatprep.mubr.bf16.mxu0 %v13718_v36  ;;  %v9371_v36 = vrot.slane %v9370_v55, 4  ;;  %v9417_v52 = vshll.u32 %v9280_v4, 16  ;;  %12443 = vmatpush1.bf16.msra.mxu0 %v16563_v57  ;;  %v16519_v55 = vld [vmem:[#allocation2 + $0xa8] sm:$0xff]  }
 0x494   : > { %12444 = vmatprep.subr.bf16.mxu0 %v21782_v45 }
 0x495   : > { %v9376_v18 = vsel %vm18641_vm14, %v9371_v36, %v19778_v2  ;;  %v9289_v2 = vld [vmem:[#allocation2 + $0x68] sm:$0xf] }
 0x496   : > { %v9495_v41 = vshll.u32 %v9289_v2, 16 }
 0x499   : > { %15501 = vmatmul.mubr.bf16.vlgmr.msra.gmra.mrb[16].mxu1 %v16492_v15  ;;  %v9390_v15 = vor.u32 %v9389_v21, %v19781_v49  ;;  %v9471_v21 = vshll.u32 %v9286_v11, 16 }
 0x49a   : > { %15565 = vmatpush3.bf16.msra.mxu1 %v19608_v1  ;;  %15504 = vmatprep.mubr.bf16.mxu1 %v16496_v35  ;;  %v13721_v1 = vcombine.low %v19444_v31, %v19448_v12  ;;  %v16505_v31 = vld [vmem:[#allocation2 + $0x64] sm:$0xff]   ;;  %v9407_v35 = vshll.u32 %v9279_v61, 16 }
 0x49b   : > { %15566 = vmatprep.subr.bf16.mxu1 %v16502_v24  ;;  %15141 = vmatmul.mubr.bf16.gmra.mrb[184].mxu0 %v13719_v40  ;;  %v16538_v12 = vld [vmem:[%s21659_s7 + $0x1e8] sm:$0xff]   ;;  %v9284_v40 = vld [vmem:[#allocation2 + $0x54] sm:$0xf]  ;;  %v9391_v46 = vrot.slane %v9390_v15, 4 }
 0x49c   : > { %15144 = vmatprep.mubr.bf16.mxu0 %v13720_v13  ;;  %v9400_v13 = vrot.slane %v9398_v28, 4  ;;  %v9451_v44 = vshll.u32 %v9284_v40, 16  ;;  %v19798_v59 = vrot.slane %v9407_v35, 5  ;;  %v9290_v28 = vld [vmem:[#allocation2 + $0x6c] sm:$0xf] }
 0x49e   : > { %15567 = vmatpush3.bf16.msra.mxu1 %v16502_v24  ;;  %v9283_v24 = vld [vmem:[#allocation2 + $0x50] sm:$0xf]  ;;  %v9404_v9 = vor.u32 %v9403_v63, %v9400_v13  ;;  %v19807_v26 = vrot.slane %v9451_v44, 5  ;;  %v9509_v13 = vshrl.u32 %v9290_v28, 16 }
 0x49f   : > { %15568 = vmatprep.subr.bf16.mxu1 %v16511_v7 }
 0x4a0   : > { %v19817_v20 = vrot.slane %v9404_v9, 4  ;;  %v9511_v9 = vrot.slane %v9509_v13, 4 }
 0x4a1   : > { %15505 = vmatmul.mubr.bf16.gmra.mrb[20].mxu1 %v16497_v32  ;;  %v16515_v32 = vld [vmem:[#allocation2 + $0x94] sm:$0xff]  }
 0x4a2   : > { %15508 = vmatprep.mubr.bf16.mxu1 %v16500_v58  ;;  %15569 = vmatpush3.bf16.msra.mxu1 %v16511_v7  ;;  %v9411_v7 = vshrl.u32 %v9279_v61, 16  ;;  %v19790_v58 = vrot.slane %v9380_v37, 4  ;;  %v9475_v61 = vshrl.u32 %v9286_v11, 16  ;;  %v9410_v57 = vsel %vm18641_vm14, %v19817_v20, %v19798_v59  ;;  %v16527_v11 = vld [vmem:[#allocation2 + $0xc8] sm:$0xff]  }
 0x4a3   : > { %15570 = vmatprep.subr.bf16.mxu1 %v16520_v33  ;;  %15145 = vmatmul.mubr.bf16.gmra.mrb[188].mxu0 %v13721_v1  ;;  %v9427_v1 = vshll.u32 %v9281_v38, 16 }
 0x4a4   : > { %v9413_v10 = vrot.slane %v9411_v7, 4  ;;  %v9386_v29 = vsel %vm18641_vm14, %v19790_v58, %v19781_v49  ;;  %v9291_v58 = vld [vmem:[#allocation2 + $0x70] sm:$0xf] }
 0x4a5   : > { %v19802_v47 = vrot.slane %v9427_v1, 5  ;;  %v9287_v1 = vld [vmem:[#allocation2 + $0x60] sm:$0x1]  ;;  %v9519_v39 = vshrl.u32 %v9291_v58, 16 }
 0x4a6   : > { %15571 = vmatpush3.bf16.msra.mxu1 %v16520_v33  ;;  %v9421_v33 = vshrl.u32 %v9280_v4, 16 }
 0x4a7   : > { %15572 = vmatprep.subr.bf16.mxu1 %v16529_v50  ;;  %v9434_v49 = vor.u32 %v9433_v25, %v19802_v47  ;;  %v16524_v25 = vld [vmem:[#allocation2 + $0xbc] sm:$0xff]  }
 0x4a8   : > { %v9423_v14 = vrot.slane %v9421_v33, 4  ;;  %v16565_v33 = vld [vmem:[%s21664_s12 + $0x40] sm:$0xff]  }
 0x4a9   : > { %15509 = vmatmul.mubr.bf16.gmra.mrb[24].mxu1 %v16501_v27  ;;  %v9395_v27 = vrot.slane %v9393_v8, 5  ;;  %12445 = vmatpush1.bf16.msra.mxu0 %v16565_v33  ;;  %v9301_v33 = vld [vmem:[#allocation2 + $0x98] sm:$0xf] }
 0x4aa   : > { %15512 = vmatprep.mubr.bf16.mxu1 %v16505_v31  ;;  %15573 = vmatpush3.bf16.msra.mxu1 %v16529_v50  ;;  %v16518_v50 = vld [vmem:[#allocation2 + $0xa0] sm:$0xff]   ;;  %v9442_v31 = vshrl.u32 %v9283_v24, 16 }
 0x4ab   : > { %15574 = vmatprep.subr.bf16.mxu1 %v16538_v12  ;;  %v9396_v16 = vsel %vm18641_vm14, %v9391_v46, %v9395_v27  ;;  %v19835_v27 = vrot.slane %v9495_v41, 5  ;;  %v9292_v46 = vld [vmem:[#allocation2 + $0x74] sm:$0x1]  ;;  %12446 = vmatprep.subr.bf16.mxu0 %v21782_v45 }
 0x4ac   : > { %v9444_v48 = vrot.slane %v9442_v31, 4  ;;  %v19828_v63 = vcombine.low %v9386_v29, %v9396_v16  ;;  %v9294_v16 = vld [vmem:[#allocation2 + $0x7c] sm:$0xf] }
 0x4ad   : > { %v9539_v41 = vshll.u32 %v9294_v16, 16 }
 0x4ae   : > { %15575 = vmatpush3.bf16.msra.mxu1 %v16538_v12  ;;  %v9445_v12 = vshll.u32 %v9283_v24, 16  ;;  %v19826_v24 = vrot.slane %v9437_v6, 5 }
 0x4af   : > { %15576 = vmatprep.subr.bf16.mxu1 %v16545_v43 }
 0x4b0   : > { %v9447_v30 = vrot.slane %v9445_v12, 5  ;;  %v9435_v12 = vrot.slane %v9434_v49, 4 }
 0x4b1   : > { %15513 = vmatmul.mubr.bf16.gmra.mrb[28].mxu1 %v16506_v51  ;;  %v9285_v51 = vld [vmem:[#allocation2 + $0x58] sm:$0xf] }
 0x4b2   : > { %15516 = vmatprep.mubr.bf16.mxu1 %v16509_v5  ;;  %15577 = vmatpush3.bf16.msra.mxu1 %v16545_v43  ;;  %v9366_v43 = vsel %vm18641_vm14, %v9361_v0, %v19769_v53  ;;  %v9455_v5 = vshrl.u32 %v9284_v40, 16  ;;  %v9461_v53 = vshll.u32 %v9285_v51, 16  ;;  %v9465_v19 = vshrl.u32 %v9285_v51, 16  ;;  %v16566_v51 = vld [vmem:[%s21664_s12 + $0x48] sm:$0xff]  }
 0x4b3   : > { %15578 = vmatprep.subr.bf16.mxu1 %v16550_v3  ;;  %v19809_v22 = vcombine.low %v9366_v43, %v9376_v18  ;;  %v9499_v0 = vshrl.u32 %v9289_v2, 16  ;;  %v9448_v8 = vor.u32 %v9447_v30, %v9444_v48  ;;  %v9505_v40 = vshll.u32 %v9290_v28, 16  ;;  %12447 = vmatpush1.bf16.msra.mxu0 %v16566_v51  ;;  %v16567_v28 = vld [vmem:[%s21664_s12 + $0x50] sm:$0xff]  }
 0x4b4   : > { %v19824_v36 = vrot.slane %v9461_v53, 5  ;;  %v9467_v15 = vrot.slane %v9465_v19, 4  ;;  %v9481_v53 = vshll.u32 %v9287_v1, 16  ;;  %12448 = vmatprep.subr.bf16.mxu0 %v21782_v45  ;;  %v16528_v1 = vld [vmem:[#allocation2 + $0xd0] sm:$0xff]  }
 0x4b5   : > { %v9501_v31 = vrot.slane %v9499_v0, 4  ;;  %v9449_v44 = vrot.slane %v9448_v8, 4  ;;  %v9296_v0 = vld [vmem:[#allocation2 + $0x84] sm:$0xf] }
 0x4b6   : > { %15579 = vmatpush3.bf16.msra.mxu1 %v16550_v3  ;;  %v19800_v3 = vrot.slane %v9417_v52, 5  ;;  %v19830_v52 = vrot.slane %v9471_v21, 5  ;;  %v9468_v18 = vor.u32 %v9467_v15, %v19824_v36  ;;  %v19875_v49 = vrot.slane %v9481_v53, 5  ;;  %v9295_v21 = vld [vmem:[#allocation2 + $0x80] sm:$0xf] }
 0x4b7   : > { %15644 = vmatprep.subr.bf16.mxu1 %v16553_v60  ;;  %v9457_v60 = vrot.slane %v9455_v5, 4  ;;  %v19841_v5 = vrot.slane %v9505_v40, 5  ;;  %v9502_v19 = vor.u32 %v9501_v31, %v19835_v27  ;;  %v9543_v15 = vshrl.u32 %v9294_v16, 16  ;;  %12449 = vmatpush1.bf16.msra.mxu0 %v16567_v28  ;;  %v9302_v28 = vld [vmem:[#allocation2 + $0x9c] sm:$0x1] }
 0x4b8   : > { %v9424_v23 = vor.u32 %v9423_v14, %v19800_v3  ;;  %v9293_v14 = vld [vmem:[#allocation2 + $0x78] sm:$0xf]  ;;  %12450 = vmatprep.subr.bf16.mxu0 %v21782_v45  ;;  %v9559_v31 = vshll.u32 %v9296_v0, 16 }
 0x4b9   : > { %15517 = vmatmul.mubr.bf16.gmra.mrb[32].mxu1 %v16510_v54  ;;  %v9288_v54 = vld [vmem:[#allocation2 + $0x64] sm:$0xf]  ;;  %v9458_v38 = vor.u32 %v9457_v60, %v19807_v26  ;;  %v9530_v20 = vshrl.u32 %v9293_v14, 16 }
 0x4ba   : > { %15520 = vmatprep.mubr.bf16.mxu1 %v16514_v42  ;;  %v9414_v42 = vor.u32 %v9413_v10, %v19798_v59  ;;  %v9486_v37 = vshrl.u32 %v9288_v54, 16  ;;  %v9489_v4 = vshll.u32 %v9288_v54, 16  ;;  %v9425_v7 = vrot.slane %v9424_v23, 4 }
 0x4bb   : > { %v9459_v43 = vrot.slane %v9458_v38, 4  ;;  %v9515_v10 = vshll.u32 %v9291_v58, 16  ;;  %v9525_v54 = vshll.u32 %v9292_v46, 16  ;;  %v9440_v59 = vsel %vm18641_vm14, %v9435_v12, %v19826_v24  ;;  %v9299_v24 = vld [vmem:[#allocation2 + $0x90] sm:$0xf] }
 0x4bc   : > { %v9415_v35 = vrot.slane %v9414_v42, 4  ;;  %v9488_v17 = vrot.slane %v9486_v37, 4  ;;  %v9430_v29 = vsel %vm18641_vm14, %v9425_v7, %v19802_v47  ;;  %v19865_v47 = vrot.slane %v9468_v18, 4  ;;  %v9300_v58 = vld [vmem:[#allocation2 + $0x94] sm:$0xf] }
 0x4bd   : > { %v9464_v2 = vsel %vm18641_vm14, %v9459_v43, %v19824_v36  ;;  %v9512_v42 = vor.u32 %v9511_v9, %v19841_v5  ;;  %v19868_v6 = vrot.slane %v9515_v10, 5  ;;  %v19882_v37 = vrot.slane %v9502_v19, 4  ;;  %v9303_v19 = vld [vmem:[#allocation2 + $0xa0] sm:$0xf] }
 0x4be   : > { %v9420_v48 = vsel %vm18641_vm14, %v9415_v35, %v19800_v3  ;;  %v9454_v3 = vsel %vm18641_vm14, %v9449_v44, %v19807_v26  ;;  %v19886_v8 = vcombine.low %v9430_v29, %v9440_v59  ;;  %v19890_v36 = vrot.slane %v9530_v20, 4  ;;  %v9298_v35 = vld [vmem:[#allocation2 + $0x8c] sm:$0xf]  ;;  %v16532_v44 = vld [vmem:[#allocation2 + $0xdc] sm:$0xff]   ;;  %v9297_v20 = vld [vmem:[#allocation2 + $0x88] sm:$0x1] }
 0x4bf   : > { %v19871_v23 = vcombine.low %v9410_v57, %v9420_v48  ;;  %v19888_v38 = vcombine.low %v9454_v3, %v9464_v2  ;;  %v9474_v40 = vsel %vm18641_vm14, %v19865_v47, %v19830_v52  ;;  %v19896_v13 = vrot.slane %v9512_v42, 4 }
 0x4c0   : > { %v9563_v12 = vshrl.u32 %v9296_v0, 16  ;;  %v9574_v43 = vshrl.u32 %v9298_v35, 16  ;;  %v9577_v18 = vshll.u32 %v9298_v35, 16  ;;  %v9583_v46 = vshll.u32 %v9299_v24, 16 }
 0x4c1   : > { %15521 = vmatmul.mubr.bf16.gmra.mrb[36].mxu1 %v16515_v32  ;;  %v9477_v32 = vrot.slane %v9475_v61, 4  ;;  %v9533_v61 = vshll.u32 %v9293_v14, 16  ;;  %v9587_v51 = vshrl.u32 %v9299_v24, 16  ;;  %v9593_v9 = vshll.u32 %v9300_v58, 16  ;;  %v16536_v24 = vld [vmem:[#allocation2 + $0xf0] sm:$0xff]  }
 0x4c2   : > { %15524 = vmatprep.mubr.bf16.mxu1 %v16518_v50  ;;  %v9491_v50 = vrot.slane %v9489_v4, 5  ;;  %v19884_v4 = vrot.slane %v9525_v54, 5  ;;  %v9597_v10 = vshrl.u32 %v9300_v58, 16  ;;  %v9607_v14 = vshrl.u32 %v9301_v33, 16  ;;  %v16569_v54 = vld [vmem:[%s21664_s12 + $0x58] sm:$0xff]  }
 0x4c3   : > { %v9478_v30 = vor.u32 %v9477_v32, %v19830_v52  ;;  %v9549_v32 = vshll.u32 %v9295_v21, 16  ;;  %v19902_v57 = vrot.slane %v9539_v41, 5  ;;  %v9545_v48 = vrot.slane %v9543_v15, 4  ;;  %12451 = vmatpush1.bf16.msra.mxu0 %v16569_v54  ;;  %v16533_v15 = vld [vmem:[#allocation2 + $0xe4] sm:$0xff]  }
 0x4c4   : > { %v9492_v60 = vor.u32 %v9491_v50, %v9488_v17  ;;  %v9535_v17 = vrot.slane %v9533_v61, 5  ;;  %v9553_v50 = vshrl.u32 %v9295_v21, 16  ;;  %v19910_v29 = vrot.slane %v9559_v31, 5  ;;  %12452 = vmatprep.subr.bf16.mxu0 %v21782_v45  ;;  %v16571_v54 = vld [vmem:[%s21664_s12 + $0x68] sm:$0xff]  }
 0x4c5   : > { %v19873_v26 = vrot.slane %v9478_v30, 4  ;;  %v19904_v30 = vrot.slane %v9549_v32, 5  ;;  %v9576_v59 = vrot.slane %v9574_v43, 4  ;;  %v9579_v3 = vrot.slane %v9577_v18, 5  ;;  %v16541_v52 = vld [vmem:[#allocation2 + $0x104] sm:$0xff]  }
 0x4c6   : > { %v19915_v2 = vrot.slane %v9583_v46, 5  ;;  %v9589_v16 = vrot.slane %v9587_v51, 4  ;;  %v19917_v42 = vrot.slane %v9593_v9, 5  ;;  %v9508_v61 = vsel %vm18641_vm14, %v19882_v37, %v19841_v5  ;;  %v9304_v37 = vld [vmem:[#allocation2 + $0xa4] sm:$0xf] }
 0x4c7   : > { %v9484_v53 = vsel %vm18641_vm14, %v19873_v26, %v19875_v49  ;;  %v9609_v49 = vrot.slane %v9607_v14, 4  ;;  %v9618_v41 = vshrl.u32 %v9303_v19, 16  ;;  %v9621_v0 = vshll.u32 %v9303_v19, 16  ;;  %v16570_v51 = vld [vmem:[%s21664_s12 + $0x60] sm:$0xff]   ;;  %v9306_v19 = vld [vmem:[#allocation2 + $0xac] sm:$0xf] }
 0x4c8   : > { %v9518_v35 = vsel %vm18641_vm14, %v19896_v13, %v19868_v6  ;;  %v9546_v5 = vor.u32 %v9545_v48, %v19902_v57  ;;  %v9569_v58 = vshll.u32 %v9297_v20, 16  ;;  %12453 = vmatpush1.bf16.msra.mxu0 %v16570_v51 }
 0x4c9   : > { %15525 = vmatmul.mubr.bf16.gmra.mrb[40].mxu1 %v16519_v55  ;;  %v9521_v55 = vrot.slane %v9519_v39, 4  ;;  %v9603_v39 = vshll.u32 %v9301_v33, 16  ;;  %v9580_v33 = vor.u32 %v9579_v3, %v9576_v59  ;;  %v9620_v31 = vrot.slane %v9618_v41, 4  ;;  %12454 = vmatprep.subr.bf16.mxu0 %v21782_v45 }
 0x4ca   : > { %15528 = vmatprep.mubr.bf16.mxu1 %v16523_v34  ;;  %v19880_v34 = vrot.slane %v9492_v60, 4  ;;  %v9565_v60 = vrot.slane %v9563_v12, 4  ;;  %v9631_v12 = vshrl.u32 %v9304_v37, 16  ;;  %v9547_v43 = vrot.slane %v9546_v5, 4  ;;  %v9308_v5 = vld [vmem:[#allocation2 + $0xb4] sm:$0xf] }
 0x4cb   : > { %v9522_v7 = vor.u32 %v9521_v55, %v19868_v6  ;;  %v9599_v55 = vrot.slane %v9597_v10, 4  ;;  %v19919_v26 = vrot.slane %v9603_v39, 5  ;;  %v9590_v6 = vor.u32 %v9589_v16, %v19915_v2 }
 0x4cc   : > { %v9498_v21 = vsel %vm18641_vm14, %v19880_v34, %v19835_v27  ;;  %v9536_v34 = vor.u32 %v9535_v17, %v19890_v36  ;;  %v9566_v32 = vor.u32 %v9565_v60, %v19910_v29  ;;  %v9623_v36 = vrot.slane %v9621_v0, 5  ;;  %v9307_v0 = vld [vmem:[#allocation2 + $0xb0] sm:$0x1]  ;;  %12455 = vmatpush1.bf16.msra.mxu0 %v16571_v54 }
 0x4cd   : > { %v9600_v13 = vor.u32 %v9599_v55, %v19917_v42  ;;  %v9627_v17 = vshll.u32 %v9304_v37, 16  ;;  %v9571_v39 = vrot.slane %v9569_v58, 5  ;;  %v9581_v14 = vrot.slane %v9580_v33, 4  ;;  %v16537_v55 = vld [vmem:[#allocation2 + $0xf8] sm:$0xff]   ;;  %12456 = vmatprep.subr.bf16.mxu0 %v21782_v45 }
 0x4ce   : > { %v9567_v10 = vrot.slane %v9566_v32, 4  ;;  %v9591_v48 = vrot.slane %v9590_v6, 4  ;;  %v9624_v3 = vor.u32 %v9623_v36, %v9620_v31  ;;  %v9633_v20 = vrot.slane %v9631_v12, 4  ;;  %v9310_v32 = vld [vmem:[#allocation2 + $0xbc] sm:$0xf]  ;;  %v11588_v12 = vld [vmem:[%s17094_s14] sm:$0xff] }
 0x4cf   : > { %v19958_v16 = vrot.slane %v9627_v17, 5  ;;  %v19961_v47 = vcombine.low %v9498_v21, %v9508_v61  ;;  %v9552_v41 = vsel %vm18641_vm14, %v9547_v43, %v19904_v30  ;;  %v9662_v58 = vshrl.u32 %v9308_v5, 16 }
 0x4d0   : > { %v9572_v61 = vsel %vm18641_vm14, %v9567_v10, %v9571_v39  ;;  %v9685_v51 = vshrl.u32 %v9310_v32, 16 }
 0x4d1   : > { %15529 = vmatmul.mubr.bf16.gmra.mrb[44].mxu1 %v16524_v25  ;;  %v19900_v25 = vrot.slane %v9522_v7, 4  ;;  %v9634_v37 = vor.u32 %v9633_v20, %v19958_v16 }
 0x4d2   : > { %15532 = vmatprep.mubr.bf16.mxu1 %v16527_v11  ;;  %v9555_v11 = vrot.slane %v9553_v50, 4  ;;  %v9610_v50 = vor.u32 %v9609_v49, %v19919_v26 }
 0x4d3   : > { %v9528_v27 = vsel %vm18641_vm14, %v19900_v25, %v19884_v4  ;;  %v9613_v4 = vshll.u32 %v9302_v28, 16  ;;  %v19953_v25 = vcombine.low %v9474_v40, %v9484_v53 }
 0x4d4   : > { %v9556_v7 = vor.u32 %v9555_v11, %v19904_v30  ;;  %v9601_v11 = vrot.slane %v9600_v13, 4  ;;  %v9611_v59 = vrot.slane %v9610_v50, 4  ;;  %v19963_v40 = vcombine.low %v9518_v35, %v9528_v27  ;;  %v9311_v50 = vld [vmem:[#allocation2 + $0xc0] sm:$0xf] }
 0x4d5   : > { %v9615_v60 = vrot.slane %v9613_v4, 5  ;;  %v9586_v35 = vsel %vm18641_vm14, %v9581_v14, %v19915_v2  ;;  %v9665_v13 = vshll.u32 %v9308_v5, 16  ;;  %v9664_v14 = vrot.slane %v9662_v58, 4 }
 0x4d6   : > { %v9557_v9 = vrot.slane %v9556_v7, 4  ;;  %v9606_v30 = vsel %vm18641_vm14, %v9601_v11, %v19919_v26  ;;  %v9657_v7 = vshll.u32 %v9307_v0, 16  ;;  %v16573_v26 = vld [vmem:[%s21664_s12 + $0x70] sm:$0xff]   ;;  %v11780_v11 = vld [vmem:[%s21661_s9] sm:$0x3] }
 0x4d7   : > { %v9616_v27 = vsel %vm18641_vm14, %v9611_v59, %v9615_v60  ;;  %12457 = vmatpush1.bf16.msra.mxu0 %v16573_v26  ;;  %v16543_v60 = vld [vmem:[#allocation2 + $0x118] sm:$0xff]   ;;  %v9667_v54 = vrot.slane %v9665_v13, 5  ;;  %v9695_v59 = vshrl.u32 %v9311_v50, 16 }
 0x4d8   : > { %v9562_v21 = vsel %vm18641_vm14, %v9557_v9, %v19910_v29  ;;  %v19989_v29 = vrot.slane %v9624_v3, 4  ;;  %v20005_v31 = vcombine.low %v9606_v30, %v9616_v27  ;;  %12458 = vmatprep.subr.bf16.mxu0 %v21782_v45  ;;  %v11589_v9 = vld [vmem:[%s17094_s14 + $0x8] sm:$0xff]  ;;  %v20018_v39 = vrot.slane %v9657_v7, 5  ;;  %v11920_v45 = vld [vmem:[%s21810_s25] sm:$0x3] }
 0x4d9   : > { %15533 = vmatmul.mubr.bf16.gmra.mrb[48].mxu1 %v16528_v1  ;;  %v9305_v1 = vld [vmem:[#allocation2 + $0xa8] sm:$0xf]  ;;  %v19999_v33 = vcombine.low %v9562_v21, %v9572_v61  ;;  %v11652_v3 = vunpack.c.l.bf16 %v11588_v12  ;;  %v11655_v0 = vunpack.c.h.bf16 %v11589_v9  ;;  %v16574_v61 = vld [vmem:[%s21664_s12 + $0x78] sm:$0xff]   ;;  %v9312_v27 = vld [vmem:[#allocation2 + $0xc4] sm:$0x1] }
 0x4da   : > { %15536 = vmatprep.mubr.bf16.mxu1 %v16532_v44  ;;  %v9537_v44 = vrot.slane %v9536_v34, 4  ;;  %v9637_v18 = vshll.u32 %v9305_v1, 16  ;;  %v9641_v46 = vshrl.u32 %v9305_v1, 16  ;;  %v9651_v34 = vshrl.u32 %v9306_v19, 16 }
 0x4db   : > { %v9630_v43 = vsel %vm18641_vm14, %v19989_v29, %v19958_v16  ;;  %12459 = vmatpush1.bf16.msra.mxu0 %v16574_v61 }
 0x4dc   : > { %v19965_v53 = vrot.slane %v9637_v18, 5  ;;  %v9643_v49 = vrot.slane %v9641_v46, 4  ;;  %v9542_v28 = vsel %vm18641_vm14, %v9537_v44, %v19902_v57  ;;  %v9596_v57 = vsel %vm18641_vm14, %v9591_v48, %v19917_v42  ;;  %v16542_v44 = vld [vmem:[#allocation2 + $0x10c] sm:$0xff]  }
 0x4dd   : > { %v19993_v2 = vcombine.low %v9542_v28, %v9552_v41  ;;  %v9653_v6 = vrot.slane %v9651_v34, 4  ;;  %v20003_v4 = vcombine.low %v9586_v35, %v9596_v57  ;;  %v20012_v18 = vrot.slane %v9634_v37, 4  ;;  %v21812_v35 = vld [vmem:[#allocation8_spill] sm:$0xff] }
 0x4de   : > { %v9644_v42 = vor.u32 %v9643_v49, %v19965_v53  ;;  %v9681_v46 = vshll.u32 %v9310_v32, 16  ;;  %v9691_v48 = vshll.u32 %v9311_v50, 16  ;;  %v11654_v49 = vunpack.c.l.bf16 %v11589_v9 }
 0x4df   : > { %v9687_v41 = vrot.slane %v9685_v51, 4  ;;  %v9640_v5 = vsel %vm18641_vm14, %v20012_v18, %v19965_v53  ;;  %v20044_v57 = vrot.slane %v11780_v11, %v21812_v35  ;;  %v9697_v37 = vrot.slane %v9695_v59, 4  ;;  %v9314_v18 = vld [vmem:[#allocation2 + $0xcc] sm:$0xf] }
 0x4e0   : > { %v20016_v10 = vrot.slane %v9644_v42, 4  ;;  %v20029_v28 = vrot.slane %v9681_v46, 5  ;;  %v20038_v21 = vrot.slane %v9691_v48, 5  ;;  %v20052_v7 = vrot.slane %v11920_v45, %v21812_v35 }
 0x4e1   : > { %15537 = vmatmul.mubr.bf16.gmra.mrb[52].mxu1 %v16533_v15  ;;  %v9647_v15 = vshll.u32 %v9306_v19, 16  ;;  %v9668_v32 = vor.u32 %v9667_v54, %v9664_v14  ;;  %v16546_v14 = vld [vmem:[#allocation2 + $0x12c] sm:$0xff]   ;;  %v20078_v61 = vcombine.low %v9630_v43, %v9640_v5 }
 0x4e2   : > { %15540 = vmatprep.mubr.bf16.mxu1 %v16536_v24  ;;  %v9309_v24 = vld [vmem:[#allocation2 + $0xb8] sm:$0xf]  ;;  %v9688_v50 = vor.u32 %v9687_v41, %v20029_v28  ;;  %v9698_v48 = vor.u32 %v9697_v37, %v20038_v21  ;;  %v9315_v37 = vld [vmem:[#allocation2 + $0xd0] sm:$0xf] }
 0x4e3   : > { %v20001_v1 = vrot.slane %v9647_v15, 5  ;;  %v9671_v36 = vshll.u32 %v9309_v24, 16  ;;  %v9675_v17 = vshrl.u32 %v9309_v24, 16  ;;  %v21811_v15 = vld [vmem:[#allocation9_spill] sm:$0xff]  ;;  %v9313_v24 = vld [vmem:[#allocation2 + $0xc8] sm:$0xf] }
 0x4e4   : > { %v20032_v34 = vrot.slane %v11780_v11, %v21811_v15  ;;  %v20047_v30 = vrot.slane %v11920_v45, %v21811_v15  ;;  %v9706_v46 = vshrl.u32 %v9313_v24, 16  ;;  %v9709_v11 = vshll.u32 %v9313_v24, 16  ;;  %v11591_v15 = vld [vmem:[%s17094_s14 + $0x18] sm:$0xff] }
 0x4e5   : > { %v9654_v19 = vor.u32 %v9653_v6, %v20001_v1  ;;  %v20027_v20 = vrot.slane %v9671_v36, 5  ;;  %v11795_v6 = vmul.f32 %v20044_v57, %v11655_v0  ;;  %v20065_v54 = vrot.slane %v9668_v32, 4  ;;  %v11590_v0 = vld [vmem:[%s17094_s14 + $0x10] sm:$0xff] }
 0x4e6   : > { %v11792_v42 = vmul.f32 %v20032_v34, %v11652_v3  ;;  %v11794_v53 = vmul.f32 %v20032_v34, %v11654_v49  ;;  %v9719_v49 = vshrl.u32 %v9314_v18, 16  ;;  %v9650_v35 = vsel %vm18641_vm14, %v20016_v10, %v20001_v1 }
 0x4e7   : > { %v20057_v13 = vrot.slane %v9654_v19, 4  ;;  %v11935_v9 = vadd.f32 %v20052_v7, %v11795_v6  ;;  %v20091_v16 = vrot.slane %v9698_v48, 4  ;;  %v9708_v43 = vrot.slane %v9706_v46, 4  ;;  %v9318_v46 = vld [vmem:[#allocation2 + $0xdc] sm:$0xf] }
 0x4e8   : > { %v11932_v36 = vadd.f32 %v20047_v30, %v11792_v42  ;;  %v16576_v42 = vld [vmem:[%s21813_s28] sm:$0xff]   ;;  %v9711_v5 = vrot.slane %v9709_v11, 5  ;;  %v9674_v32 = vsel %vm18641_vm14, %v20065_v54, %v20027_v20  ;;  %v11656_v11 = vunpack.c.l.bf16 %v11590_v0 }
 0x4e9   : > { %15541 = vmatmul.mubr.bf16.gmra.mrb[56].mxu1 %v16537_v55  ;;  %v9677_v55 = vrot.slane %v9675_v17, 4  ;;  %v11934_v17 = vadd.f32 %v20047_v30, %v11794_v53  ;;  %v12063_v45 = vmax.f32 %v11935_v9, 0.0  ;;  %15724 = vmatprep.subr.bf16.mxu0 %v16576_v42 }
 0x4ea   : > { %15544 = vmatprep.mubr.bf16.mxu1 %v16541_v52  ;;  %v11653_v52 = vunpack.c.h.bf16 %v11588_v12  ;;  %v16544_v12 = vld [vmem:[#allocation2 + $0x120] sm:$0xff]  }
 0x4eb   : > { %v9678_v58 = vor.u32 %v9677_v55, %v20027_v20  ;;  %v12062_v19 = vmax.f32 %v11934_v17, 0.0  ;;  %v20069_v55 = vrot.slane %v9688_v50, 4  ;;  %v11657_v50 = vunpack.c.h.bf16 %v11590_v0 }
 0x4ec   : > { %v11793_v26 = vmul.f32 %v20044_v57, %v11653_v52  ;;  %v9715_v52 = vshll.u32 %v9314_v18, 16  ;;  %v9721_v20 = vrot.slane %v9719_v49, 4  ;;  %v11796_v0 = vmul.f32 %v20032_v34, %v11656_v11 }
 0x4ed   : > { %v20067_v59 = vrot.slane %v9678_v58, 4  ;;  %v9694_v17 = vsel %vm18641_vm14, %v20069_v55, %v20038_v21 }
 0x4ee   : > { %v11933_v51 = vadd.f32 %v20052_v7, %v11793_v26  ;;  %v9316_v26 = vld [vmem:[#allocation2 + $0xd4] sm:$0xf] }
 0x4ef   : > { %v9684_v58 = vsel %vm18641_vm14, %v20067_v59, %v20029_v28  ;;  %v16547_v28 = vld [vmem:[#allocation2 + $0x134] sm:$0xff]   ;;  %v9735_v54 = vshll.u32 %v9316_v26, 16  ;;  %v11658_v59 = vunpack.c.l.bf16 %v11591_v15 }
 0x4f0   : > { %v12061_v3 = vmax.f32 %v11933_v51, 0.0  ;;  %v9729_v51 = vshrl.u32 %v9315_v37, 16 }
 0x4f1   : > { %15545 = vmatmul.mubr.bf16.gmra.mrb[60].mxu1 %v16542_v44  ;;  %v9701_v44 = vshll.u32 %v9312_v27, 16  ;;  %v9660_v27 = vsel %vm18641_vm14, %v20057_v13, %v20018_v39  ;;  %v9321_v13 = vld [vmem:[#allocation2 + $0xe8] sm:$0xf] }
 0x4f2   : > { %15548 = vmatprep.mubr.bf16.mxu1 %v16543_v60  ;;  %v12060_v60 = vmax.f32 %v11932_v36, 0.0  ;;  %v12237_v24 = vpack.c.bf16 %v12063_v45, %v12061_v3  ;;  %v11659_v36 = vunpack.c.h.bf16 %v11591_v15  ;;  %v9739_v3 = vshrl.u32 %v9316_v26, 16 }
 0x4f3   : > { %v20093_v29 = vrot.slane %v9701_v44, 5  ;;  %v9725_v44 = vshll.u32 %v9315_v37, 16  ;;  %v9750_v45 = vshrl.u32 %v9318_v46, 16  ;;  %v9753_v37 = vshll.u32 %v9318_v46, 16 }
 0x4f4   : > { %v12236_v41 = vpack.c.bf16 %v12062_v19, %v12060_v60  ;;  %12460 = vmatprep.mubr.bf16.mxu0 %v12237_v24  ;;  %v11799_v48 = vmul.f32 %v20044_v57, %v11659_v36  ;;  %v16548_v60 = vld [vmem:[#allocation2 + $0x140] sm:$0xff]   ;;  %v9712_v19 = vor.u32 %v9711_v5, %v9708_v43  ;;  %v11798_v24 = vmul.f32 %v20032_v34, %v11658_v59  ;;  %v9317_v5 = vld [vmem:[#allocation2 + $0xd8] sm:$0x1] }
 0x4f5   : > { %v9704_v21 = vsel %vm18641_vm14, %v20091_v16, %v20093_v29  ;;  %v9731_v16 = vrot.slane %v9729_v51, 4  ;;  %v20132_v26 = vrot.slane %v9735_v54, 5  ;;  %v9755_v11 = vrot.slane %v9753_v37, 5  ;;  %v11592_v54 = vld [vmem:[%s17094_s14 + $0x20] sm:$0xff] }
 0x4f6   : > { %v20095_v53 = vpop.f32.mrb[192].mxu0  ;;  %12461 = vmatmul.mubr.bf16.vlgmr.msra.gmra.mrb[208].mxu0 %v12236_v41  ;;  %v9319_v41 = vld [vmem:[#allocation2 + $0xe0] sm:$0xf]  ;;  %v20130_v43 = vrot.slane %v9712_v19, 4  ;;  %v11938_v36 = vadd.f32 %v20047_v30, %v11798_v24  ;;  %v9745_v37 = vshll.u32 %v9317_v5, 16  ;;  %v11593_v24 = vld [vmem:[%s17094_s14 + $0x28] sm:$0xff] }
 0x4f7   : > { %21815 = vst [vmem:[#allocation14_spill] sm:$0xff] %v20095_v53  ;;  %v20105_v6 = vpop.f32.mrb[193].mxu0  ;;  %15725 = vmatpush3.bf16.msra.mxu0 %v16576_v42  ;;  %v20128_v42 = vrot.slane %v9725_v44, 5  ;;  %v9752_v44 = vrot.slane %v9750_v45, 4  ;;  %v20153_v45 = vcombine.low %v9674_v32, %v9684_v58  ;;  %v9783_v5 = vshrl.u32 %v9321_v13, 16 }
 0x4f8   : > { %21816 = vst [vmem:[#allocation15_spill] sm:$0xff] %v20105_v6  ;;  %v20113_v18 = vpop.f32.mrb[194].mxu0  ;;  %v12066_v59 = vmax.f32 %v11938_v36, 0.0 }
 0x4f9   : > { %15549 = vmatmul.mubr.bf16.gmra.mrb[0].mxu1 %v16544_v12  ;;  %v20111_v12 = vrot.slane %v9715_v52, 5  ;;  %21817 = vst [vmem:[#allocation24_spill] sm:$0xff] %v20113_v18  ;;  %v20115_v9 = vpop.f32.mrb[195].mxu0  ;;  %v11939_v52 = vadd.f32 %v20052_v7, %v11799_v48  ;;  %v9732_v10 = vor.u32 %v9731_v16, %v20128_v42  ;;  %v9756_v32 = vor.u32 %v9755_v11, %v9752_v44 }
 0x4fa   : > { %15552 = vmatprep.mubr.bf16.mxu1 %v16546_v14  ;;  %21818 = vst [vmem:[#allocation18_spill] sm:$0xff] %v20115_v9  ;;  %v11797_v14 = vmul.f32 %v20044_v57, %v11657_v50  ;;  %v11936_v50 = vadd.f32 %v20047_v30, %v11796_v0  ;;  %v20178_v44 = vrot.slane %v9745_v37, 5 }
 0x4fb   : > { %v9722_v49 = vor.u32 %v9721_v20, %v20111_v12  ;;  %v12067_v15 = vmax.f32 %v11939_v52, 0.0  ;;  %v9741_v20 = vrot.slane %v9739_v3, 4  ;;  %v16551_v52 = vld [vmem:[#allocation2 + $0x154] sm:$0xff]   ;;  %v20151_v3 = vcombine.low %v9650_v35, %v9660_v27 }
 0x4fc   : > { %v11937_v55 = vadd.f32 %v20052_v7, %v11797_v14  ;;  %v9759_v14 = vshll.u32 %v9319_v41, 16  ;;  %v12064_v19 = vmax.f32 %v11936_v50, 0.0  ;;  %v11661_v27 = vunpack.c.h.bf16 %v11592_v54 }
 0x4fd   : > { %v9742_v35 = vor.u32 %v9741_v20, %v20132_v26  ;;  %v11662_v20 = vunpack.c.l.bf16 %v11593_v24  ;;  %v20176_v1 = vrot.slane %v9732_v10, 4  ;;  %v9324_v10 = vld [vmem:[#allocation2 + $0xf4] sm:$0xf] }
 0x4fe   : > { %v12065_v29 = vmax.f32 %v11937_v55, 0.0  ;;  %v16549_v55 = vld [vmem:[#allocation2 + $0x148] sm:$0xff]   ;;  %v12238_v36 = vpack.c.bf16 %v12066_v59, %v12064_v19  ;;  %v20170_v58 = vrot.slane %v9759_v14, 5 }
 0x4ff   : > { %v9322_v14 = vld [vmem:[#allocation2 + $0xec] sm:$0x1] }
 0x500   : > { %v12239_v51 = vpack.c.bf16 %v12067_v15, %v12065_v29  ;;  %v20160_v29 = vrot.slane %v9722_v49, 4  ;;  %v9779_v49 = vshll.u32 %v9321_v13, 16  ;;  %v20184_v13 = vrot.slane %v9756_v32, 4 }
 0x501   : > { %15553 = vmatmul.mubr.bf16.gmra.mrb[4].mxu1 %v16547_v28  ;;  %v20136_v46 = vpop.f32.mrb[196].mxu0  ;;  %v9320_v28 = vld [vmem:[#allocation2 + $0xe4] sm:$0xf] }
 0x502   : > { %15556 = vmatprep.mubr.bf16.mxu1 %v16548_v60  ;;  %21819 = vst [vmem:[#allocation20_spill] sm:$0xff] %v20136_v46  ;;  %v20138_v48 = vpop.f32.mrb[197].mxu0  ;;  %v9763_v60 = vshrl.u32 %v9319_v41, 16  ;;  %v20155_v41 = vcombine.low %v9694_v17, %v9704_v21  ;;  %12468 = vmatprep.mubr.bf16.mxu0 %v12239_v51  ;;  %v9769_v15 = vshll.u32 %v9320_v28, 16  ;;  %v9773_v50 = vshrl.u32 %v9320_v28, 16 }
 0x503   : > { %21820 = vst [vmem:[#allocation16_spill] sm:$0xff] %v20138_v48  ;;  %v20157_v0 = vpop.f32.mrb[198].mxu0  ;;  %12469 = vmatmul.mubr.bf16.gmra.mrb[212].mxu0 %v12238_v36  ;;  %v11663_v21 = vunpack.c.h.bf16 %v11593_v24  ;;  %v11801_v28 = vmul.f32 %v20044_v57, %v11661_v27  ;;  %v11660_v51 = vunpack.c.l.bf16 %v11592_v54  ;;  %v20190_v36 = vrot.slane %v9779_v49, 5 }
 0x504   : > { %21821 = vst [vmem:[#allocation17_spill] sm:$0xff] %v20157_v0  ;;  %v20162_v39 = vpop.f32.mrb[199].mxu0  ;;  %v9765_v17 = vrot.slane %v9763_v60, 4  ;;  %v20173_v19 = vrot.slane %v9769_v15, 5  ;;  %v9775_v59 = vrot.slane %v9773_v50, 4  ;;  %v16552_v50 = vld [vmem:[#allocation2 + $0x15c] sm:$0xff]  }
 0x505   : > { %21822 = vst [vmem:[#allocation19_spill] sm:$0xff] %v20162_v39  ;;  %v11803_v16 = vmul.f32 %v20044_v57, %v11663_v21  ;;  %v11941_v11 = vadd.f32 %v20052_v7, %v11801_v28  ;;  %v11800_v60 = vmul.f32 %v20032_v34, %v11660_v51  ;;  %v9323_v15 = vld [vmem:[#allocation2 + $0xf0] sm:$0xf]  ;;  %v11802_v21 = vmul.f32 %v20032_v34, %v11662_v20 }
 0x506   : > { %v9766_v54 = vor.u32 %v9765_v17, %v20170_v58  ;;  %v9776_v32 = vor.u32 %v9775_v59, %v20173_v19  ;;  %v9785_v28 = vrot.slane %v9783_v5, 4  ;;  %v9789_v17 = vshll.u32 %v9322_v14, 16 }
 0x507   : > { %v11943_v24 = vadd.f32 %v20052_v7, %v11803_v16  ;;  %v12069_v27 = vmax.f32 %v11941_v11, 0.0  ;;  %v9794_v49 = vshrl.u32 %v9323_v15, 16  ;;  %v9797_v39 = vshll.u32 %v9323_v15, 16  ;;  %v9325_v11 = vld [vmem:[#allocation2 + $0xf8] sm:$0xf] }
 0x508   : > { %v9803_v59 = vshll.u32 %v9324_v10, 16  ;;  %v9807_v5 = vshrl.u32 %v9324_v10, 16  ;;  %v9786_v10 = vor.u32 %v9785_v28, %v20190_v36  ;;  %v11595_v15 = vld [vmem:[%s17094_s14 + $0x38] sm:$0xff]  ;;  %v9817_v46 = vshrl.u32 %v9325_v11, 16 }
 0x509   : > { %15557 = vmatmul.mubr.bf16.gmra.mrb[8].mxu1 %v16549_v55  ;;  %v20182_v55 = vrot.slane %v9742_v35, 4  ;;  %v11940_v35 = vadd.f32 %v20047_v30, %v11800_v60  ;;  %v9326_v60 = vld [vmem:[#allocation2 + $0xfc] sm:$0xf]  ;;  %v9796_v20 = vrot.slane %v9794_v49, 4 }
 0x50a   : > { %15560 = vmatprep.mubr.bf16.mxu1 %v16551_v52  ;;  %v9827_v9 = vshrl.u32 %v9326_v60, 16 }
 0x50b   : > { %v20187_v52 = vpop.f32.mrb[200].mxu0  ;;  %v12068_v0 = vmax.f32 %v11940_v35, 0.0  ;;  %v11594_v35 = vld [vmem:[%s17094_s14 + $0x30] sm:$0xff] }
 0x50c   : > { %21823 = vst [vmem:[#allocation22_spill] sm:$0xff] %v20187_v52  ;;  %v20192_v37 = vpop.f32.mrb[201].mxu0  ;;  %v12071_v52 = vmax.f32 %v11943_v24, 0.0  ;;  %v20228_v24 = vrot.slane %v9803_v59, 5  ;;  %v11664_v18 = vunpack.c.l.bf16 %v11594_v35 }
 0x50d   : > { %21824 = vst [vmem:[#allocation23_spill] sm:$0xff] %v20192_v37  ;;  %v20197_v51 = vpop.f32.mrb[202].mxu0  ;;  %v11942_v37 = vadd.f32 %v20047_v30, %v11802_v21 }
 0x50e   : > { %21825 = vst [vmem:[#allocation21_spill] sm:$0xff] %v20197_v51  ;;  %v20199_v16 = vpop.f32.mrb[203].mxu0  ;;  %v12241_v14 = vpack.c.bf16 %v12071_v52, %v12069_v27  ;;  %v20220_v52 = vrot.slane %v9766_v54, 4  ;;  %v20225_v27 = vrot.slane %v9789_v17, 5  ;;  %v9813_v51 = vshll.u32 %v9325_v11, 16  ;;  %v16557_v11 = vld [vmem:[%s21659_s7 + $0x208] sm:$0xff]  }
 0x50f   : > { %21826 = vst [vmem:[#allocation10_spill] sm:$0xff] %v20199_v16  ;;  %v12070_v21 = vmax.f32 %v11942_v37, 0.0  ;;  %v9799_v16 = vrot.slane %v9797_v39, 5  ;;  %v9809_v37 = vrot.slane %v9807_v5, 4  ;;  %v9823_v54 = vshll.u32 %v9326_v60, 16 }
 0x510   : > { %12476 = vmatprep.mubr.bf16.mxu0 %v12241_v14  ;;  %v9772_v28 = vsel %vm18641_vm14, %v20220_v52, %v20173_v19  ;;  %v9787_v17 = vrot.slane %v9786_v10, 4  ;;  %v11666_v39 = vunpack.c.l.bf16 %v11595_v15  ;;  %v20242_v5 = vrot.slane %v9813_v51, 5  ;;  %v9328_v14 = vld [vmem:[#allocation2 + $0x104] sm:$0xf]  ;;  %v9327_v51 = vld [vmem:[#allocation2 + $0x100] sm:$0x1] }
 0x511   : > { %15561 = vmatmul.mubr.bf16.gmra.mrb[12].mxu1 %v16552_v50  ;;  %v20222_v50 = vrot.slane %v9776_v32, 4  ;;  %v12240_v48 = vpack.c.bf16 %v12070_v21, %v12068_v0  ;;  %v11667_v32 = vunpack.c.h.bf16 %v11595_v15  ;;  %v11804_v19 = vmul.f32 %v20032_v34, %v11664_v18 }
 0x512   : > { %15580 = vmatprep.mubr.bf16.mxu1 %v19809_v22  ;;  %v11665_v22 = vunpack.c.h.bf16 %v11594_v35  ;;  %v9810_v35 = vor.u32 %v9809_v37, %v20228_v24  ;;  %v9819_v52 = vrot.slane %v9817_v46, 4  ;;  %v11806_v10 = vmul.f32 %v20032_v34, %v11666_v39  ;;  %v16578_v46 = vld [vmem:[%s21814_s19 + $0x8] sm:$0xff]   ;;  %v16778_v37 = vld [vmem:[%s21659_s7 + $0x200] sm:$0xff]   ;;  %v16561_v39 = vld [vmem:[%s21659_s7 + $0x210] sm:$0xff]  }
 0x513   : > { %12477 = vmatmul.mubr.bf16.gmra.mrb[216].mxu0 %v12240_v48  ;;  %v9800_v48 = vor.u32 %v9799_v16, %v9796_v20  ;;  %v11807_v60 = vmul.f32 %v20044_v57, %v11667_v32  ;;  %v20254_v16 = vrot.slane %v9823_v54, 5  ;;  %v9829_v20 = vrot.slane %v9827_v9, 4  ;;  %15726 = vmatprep.subr.bf16.mxu0 %v16578_v46 }
 0x514   : > { %v11805_v0 = vmul.f32 %v20044_v57, %v11665_v22  ;;  %v11944_v18 = vadd.f32 %v20047_v30, %v11804_v19  ;;  %v11946_v9 = vadd.f32 %v20047_v30, %v11806_v10  ;;  %v9329_v19 = vld [vmem:[#allocation2 + $0x108] sm:$0xf]  ;;  %15727 = vmatpush3.bf16.msra.mxu0 %v16578_v46 }
 0x515   : > { %v20234_v49 = vpop.f32.mrb[204].mxu0  ;;  %v11947_v32 = vadd.f32 %v20052_v7, %v11807_v60  ;;  %v9782_v60 = vsel %vm18641_vm14, %v20222_v50, %v20190_v36  ;;  %v9801_v10 = vrot.slane %v9800_v48, 4  ;;  %v21832_v36 = vsel %vm18641_vm14, %v20130_v43, %v20111_v12  ;;  %v16564_v12 = vld [vmem:[%s21659_s7 + $0x218] sm:$0xff]  }
 0x516   : > { %21827 = vst [vmem:[#allocation11_spill] sm:$0xff] %v20234_v49  ;;  %v20240_v59 = vpop.f32.mrb[205].mxu0  ;;  %v11945_v15 = vadd.f32 %v20052_v7, %v11805_v0  ;;  %v9841_v0 = vshll.u32 %v9328_v14, 16  ;;  %v9847_v46 = vshll.u32 %v9329_v19, 16  ;;  %v21833_v43 = vsel %vm18641_vm14, %v20182_v55, %v20178_v44 }
 0x517   : > { %21828 = vst [vmem:[#allocation12_spill] sm:$0xff] %v20240_v59  ;;  %v20246_v21 = vpop.f32.mrb[206].mxu0  ;;  %v21831_v59 = vsel %vm18641_vm14, %v20160_v29, %v20128_v42  ;;  %v11597_v29 = vld [vmem:[%s17094_s14 + $0x48] sm:$0xff]  ;;  %v9851_v44 = vshrl.u32 %v9329_v19, 16 }
 0x518   : > { %21829 = vst [vmem:[#allocation13_spill] sm:$0xff] %v20246_v21  ;;  %v20252_v22 = vpop.f32.mrb[207].mxu0  ;;  %v12073_v54 = vmax.f32 %v11945_v15, 0.0  ;;  %v12072_v15 = vmax.f32 %v11944_v18, 0.0  ;;  %v12074_v21 = vmax.f32 %v11946_v9, 0.0  ;;  %v20286_v50 = vcombine.low %v21832_v36, %v21831_v59 }
 0x519   : > { %15581 = vmatmul.mubr.bf16.vlgmr.msra.gmra.mrb[16].mxu1 %v19828_v63  ;;  %21830 = vst [vmem:[#allocation9_spill] sm:$0xff] %v20252_v22  ;;  %v9838_v63 = vshrl.u32 %v9328_v14, 16  ;;  %v12075_v14 = vmax.f32 %v11947_v32, 0.0  ;;  %v9833_v22 = vshll.u32 %v9327_v51, 16  ;;  %v9843_v18 = vrot.slane %v9841_v0, 5 }
 0x51a   : > { %15645 = vmatpush3.bf16.msra.mxu1 %v16778_v37  ;;  %15584 = vmatprep.mubr.bf16.mxu1 %v19871_v23  ;;  %v9792_v23 = vsel %vm18641_vm14, %v9787_v17, %v20225_v27  ;;  %v9811_v37 = vrot.slane %v9810_v35, 4  ;;  %v9820_v27 = vor.u32 %v9819_v52, %v20242_v5  ;;  %v9830_v17 = vor.u32 %v9829_v20, %v20254_v16  ;;  %v11596_v35 = vld [vmem:[%s17094_s14 + $0x40] sm:$0xff]  ;;  %v9330_v0 = vld [vmem:[#allocation2 + $0x10c] sm:$0xf] }
 0x51b   : > { %15646 = vmatprep.subr.bf16.mxu1 %v16557_v11  ;;  %v12243_v48 = vpack.c.bf16 %v12075_v14, %v12073_v54  ;;  %v9840_v32 = vrot.slane %v9838_v63, 4  ;;  %v12242_v42 = vpack.c.bf16 %v12074_v21, %v12072_v15  ;;  %v21835_v21 = vsel %vm18641_vm14, %v20184_v13, %v20170_v58 }
 0x51c   : > { %v20314_v52 = vcombine.low %v21835_v21, %v9772_v28  ;;  %v20316_v20 = vcombine.low %v9782_v60, %v9792_v23  ;;  %v9835_v55 = vrot.slane %v9833_v22, 5  ;;  %v11669_v58 = vunpack.c.h.bf16 %v11596_v35  ;;  %v9331_v60 = vld [vmem:[#allocation2 + $0x110] sm:$0xf] }
 0x51d   : > { %v20291_v51 = vpop.f32.mrb[144].mxu0  ;;  %12484 = vmatprep.mubr.bf16.mxu0 %v12243_v48  ;;  %v9821_v13 = vrot.slane %v9820_v27, 4  ;;  %v9831_v28 = vrot.slane %v9830_v17, 4  ;;  %v11671_v23 = vunpack.c.h.bf16 %v11597_v29  ;;  %v11668_v19 = vunpack.c.l.bf16 %v11596_v35 }
 0x51e   : > { %15647 = vmatpush3.bf16.msra.mxu1 %v16557_v11  ;;  %v21834_v11 = vsel %vm18641_vm14, %v20176_v1, %v20132_v26  ;;  %v20318_v63 = vpop.f32.mrb[145].mxu0  ;;  %v9806_v26 = vsel %vm18641_vm14, %v9801_v10, %v20228_v24  ;;  %v9816_v1 = vsel %vm18641_vm14, %v9811_v37, %v20242_v5  ;;  %12485 = vmatmul.mubr.bf16.gmra.mrb[220].mxu0 %v12242_v42  ;;  %v20332_v14 = vrot.slane %v9847_v46, 5  ;;  %v16572_v42 = vld [vmem:[%s21659_s7 + $0x228] sm:$0xff]  }
 0x51f   : > { %15648 = vmatprep.subr.bf16.mxu1 %v16561_v39  ;;  %v20307_v59 = vcombine.low %v21834_v11, %v21833_v43  ;;  %v20326_v54 = vpop.f32.mrb[146].mxu0  ;;  %v9844_v24 = vor.u32 %v9843_v18, %v9840_v32  ;;  %v9857_v5 = vshll.u32 %v9330_v0, 16  ;;  %v11809_v22 = vmul.f32 %v20044_v57, %v11669_v58  ;;  %v20348_v32 = vld [vmem:[#allocation2 + $0x114] sm:$0x1] }
 0x520   : > { %v20329_v9 = vpop.f32.mrb[147].mxu0  ;;  %v9853_v15 = vrot.slane %v9851_v44, 4  ;;  %v9861_v10 = vshrl.u32 %v9330_v0, 16  ;;  %v11811_v37 = vmul.f32 %v20044_v57, %v11671_v23  ;;  %v11670_v36 = vunpack.c.l.bf16 %v11597_v29  ;;  %v11598_v58 = vld [vmem:[%s17094_s14 + $0x50] sm:$0xff] }
 0x521   : > { %15585 = vmatmul.mubr.bf16.gmra.mrb[20].mxu1 %v19886_v8  ;;  %v16568_v8 = vld [vmem:[%s21659_s7 + $0x220] sm:$0xff]   ;;  %v20339_v27 = vcombine.low %v9806_v26, %v9816_v1  ;;  %v11808_v17 = vmul.f32 %v20032_v34, %v11668_v19  ;;  %v9826_v48 = vsel %vm18641_vm14, %v9821_v13, %v20254_v16  ;;  %v9836_v35 = vsel %vm18641_vm14, %v9831_v28, %v9835_v55  ;;  %v9333_v16 = vld [vmem:[#allocation2 + $0x118] sm:$0xf] }
 0x522   : > { %15588 = vmatprep.mubr.bf16.mxu1 %v19888_v38  ;;  %15649 = vmatpush3.bf16.msra.mxu1 %v16561_v39  ;;  %v9867_v38 = vshll.u32 %v9331_v60, 16  ;;  %v11949_v39 = vadd.f32 %v20052_v7, %v11809_v22  ;;  %v9871_v18 = vshrl.u32 %v9331_v60, 16  ;;  %v11951_v46 = vadd.f32 %v20052_v7, %v11811_v37  ;;  %v11599_v13 = vld [vmem:[%s17094_s14 + $0x58] sm:$0xff] }
 0x523   : > { %15650 = vmatprep.subr.bf16.mxu1 %v16564_v12  ;;  %v20354_v29 = vrot.slane %v9857_v5, 5  ;;  %v11810_v21 = vmul.f32 %v20032_v34, %v11670_v36  ;;  %v11948_v0 = vadd.f32 %v20047_v30, %v11808_v17  ;;  %v20360_v44 = vrot.slane %v9844_v24, 4 }
 0x524   : > { %v12077_v11 = vmax.f32 %v11949_v39, 0.0  ;;  %v9854_v26 = vor.u32 %v9853_v15, %v20332_v14  ;;  %v12079_v55 = vmax.f32 %v11951_v46, 0.0  ;;  %v20367_v28 = vcombine.low %v9826_v48, %v9836_v35 }
 0x525   : > { %v20356_v43 = vpop.f32.mrb[148].mxu0  ;;  %v20369_v60 = vrot.slane %v9867_v38, 5  ;;  %v11950_v19 = vadd.f32 %v20047_v30, %v11810_v21  ;;  %v12076_v5 = vmax.f32 %v11948_v0, 0.0  ;;  %v20375_v24 = vrot.slane %v9871_v18, 4 }
 0x526   : > { %15651 = vmatpush3.bf16.msra.mxu1 %v16564_v12  ;;  %v9863_v12 = vrot.slane %v9861_v10, 4  ;;  %v20363_v1 = vpop.f32.mrb[149].mxu0  ;;  %v9877_v22 = vshll.u32 %v20348_v32, 16  ;;  %v9334_v10 = vld [vmem:[#allocation2 + $0x11c] sm:$0xf]  ;;  %v9882_v37 = vshrl.u32 %v9333_v16, 16  ;;  %v12245_v36 = vpack.c.bf16 %v12079_v55, %v12077_v11 }
 0x527   : > { %15652 = vmatprep.subr.bf16.mxu1 %v16568_v8  ;;  %v20371_v23 = vpop.f32.mrb[150].mxu0  ;;  %v9885_v38 = vshll.u32 %v9333_v16, 16  ;;  %v12078_v39 = vmax.f32 %v11950_v19, 0.0  ;;  %v11673_v17 = vunpack.c.h.bf16 %v11598_v58  ;;  %v11675_v48 = vunpack.c.h.bf16 %v11599_v13  ;;  %v16575_v32 = vld [vmem:[%s21659_s7 + $0x230] sm:$0xff]  }
 0x528   : > { %21836 = vst [vmem:[#allocation8_spill] sm:$0xff] %v20371_v23  ;;  %v20378_v15 = vpop.f32.mrb[151].mxu0  ;;  %v9855_v35 = vrot.slane %v9854_v26, 4  ;;  %12492 = vmatprep.mubr.bf16.mxu0 %v12245_v36  ;;  %v11672_v18 = vunpack.c.l.bf16 %v11598_v58  ;;  %v11674_v46 = vunpack.c.l.bf16 %v11599_v13  ;;  %v9895_v21 = vshrl.u32 %v9334_v10, 16 }
 0x529   : > { %15589 = vmatmul.mubr.bf16.gmra.mrb[24].mxu1 %v19953_v25  ;;  %21837 = vst [vmem:[#allocation25_spill] sm:$0xff] %v20378_v15  ;;  %v9850_v25 = vsel %vm18641_vm14, %v20360_v44, %v20332_v14  ;;  %v12244_v16 = vpack.c.bf16 %v12078_v39, %v12076_v5  ;;  %v11813_v11 = vmul.f32 %v20044_v57, %v11673_v17  ;;  %v9884_v26 = vrot.slane %v9882_v37, 4  ;;  %v9335_v5 = vld [vmem:[#allocation2 + $0x120] sm:$0xf] }
 0x52a   : > { %15592 = vmatprep.mubr.bf16.mxu1 %v19961_v47  ;;  %15653 = vmatpush3.bf16.msra.mxu1 %v16568_v8  ;;  %v9864_v47 = vor.u32 %v9863_v12, %v20354_v29  ;;  %v9891_v8 = vshll.u32 %v9334_v10, 16  ;;  %v11815_v0 = vmul.f32 %v20044_v57, %v11675_v48  ;;  %v11812_v55 = vmul.f32 %v20032_v34, %v11672_v18  ;;  %v11601_v18 = vld [vmem:[%s17094_s14 + $0x68] sm:$0xff] }
 0x52b   : > { %15654 = vmatprep.subr.bf16.mxu1 %v16572_v42  ;;  %v11814_v14 = vmul.f32 %v20032_v34, %v11674_v46  ;;  %v9874_v44 = vor.u32 %v20375_v24, %v20369_v60  ;;  %v9887_v58 = vrot.slane %v9885_v38, 5  ;;  %12493 = vmatmul.mubr.bf16.gmra.mrb[224].mxu0 %v12244_v16  ;;  %v11953_v12 = vadd.f32 %v20052_v7, %v11813_v11  ;;  %v11600_v38 = vld [vmem:[%s17094_s14 + $0x60] sm:$0xff] }
 0x52c   : > { %v9860_v19 = vsel %vm18641_vm14, %v9855_v35, %v20354_v29  ;;  %v11955_v24 = vadd.f32 %v20052_v7, %v11815_v0  ;;  %v11952_v37 = vadd.f32 %v20047_v30, %v11812_v55  ;;  %v20410_v39 = vrot.slane %v9864_v47, 4 }
 0x52d   : > { %v20395_v13 = vpop.f32.mrb[152].mxu0  ;;  %v11954_v36 = vadd.f32 %v20047_v30, %v11814_v14  ;;  %v20412_v17 = vrot.slane %v9877_v22, 5  ;;  %v20414_v29 = vrot.slane %v9891_v8, 5  ;;  %v12081_v35 = vmax.f32 %v11953_v12, 0.0  ;;  %v9336_v8 = vld [vmem:[#allocation2 + $0x124] sm:$0xf] }
 0x52e   : > { %15655 = vmatpush3.bf16.msra.mxu1 %v16572_v42  ;;  %21838 = vst [vmem:[#allocation26_spill] sm:$0xff] %v20395_v13  ;;  %v20401_v10 = vpop.f32.mrb[153].mxu0  ;;  %v16577_v42 = vld [vmem:[%s21659_s7 + $0x238] sm:$0xff]   ;;  %v9897_v46 = vrot.slane %v9895_v21, 4  ;;  %v12083_v11 = vmax.f32 %v11955_v24, 0.0  ;;  %v12080_v0 = vmax.f32 %v11952_v37, 0.0  ;;  %v20423_v47 = vcombine.low %v9850_v25, %v9860_v19 }
 0x52f   : > { %15656 = vmatprep.subr.bf16.mxu1 %v16575_v32  ;;  %21839 = vst [vmem:[#allocation27_spill] sm:$0xff] %v20401_v10  ;;  %v20416_v48 = vpop.f32.mrb[154].mxu0  ;;  %v12082_v55 = vmax.f32 %v11954_v36, 0.0  ;;  %v9888_v22 = vor.u32 %v9887_v58, %v9884_v26  ;;  %v9901_v14 = vshll.u32 %v9335_v5, 16  ;;  %v11677_v49 = vunpack.c.h.bf16 %v11600_v38  ;;  %v9337_v58 = vld [vmem:[#allocation2 + $0x128] sm:$0x1] }
 0x530   : > { %21840 = vst [vmem:[#allocation28_spill] sm:$0xff] %v20416_v48  ;;  %v20420_v16 = vpop.f32.mrb[155].mxu0  ;;  %v9905_v6 = vshrl.u32 %v9335_v5, 16  ;;  %v12247_v12 = vpack.c.bf16 %v12083_v11, %v12081_v35  ;;  %v20425_v21 = vrot.slane %v9874_v44, 4  ;;  %v11676_v37 = vunpack.c.l.bf16 %v11600_v38  ;;  %v16579_v35 = vld [vmem:[%s21814_s19 + $0x10] sm:$0xff]  }
 0x531   : > { %15593 = vmatmul.mubr.bf16.gmra.mrb[28].mxu1 %v19963_v40  ;;  %21841 = vst [vmem:[#allocation29_spill] sm:$0xff] %v20420_v16  ;;  %v12246_v53 = vpack.c.bf16 %v12082_v55, %v12080_v0  ;;  %v11679_v40 = vunpack.c.h.bf16 %v11601_v18  ;;  %v11817_v24 = vmul.f32 %v20044_v57, %v11677_v49  ;;  %v11678_v36 = vunpack.c.l.bf16 %v11601_v18  ;;  %v9338_v0 = vld [vmem:[#allocation2 + $0x12c] sm:$0xf]  ;;  %15728 = vmatprep.subr.bf16.mxu0 %v16579_v35 }
 0x532   : > { %15596 = vmatprep.mubr.bf16.mxu1 %v19993_v2  ;;  %15657 = vmatpush3.bf16.msra.mxu1 %v16575_v32  ;;  %v9898_v2 = vor.u32 %v9897_v46, %v20414_v29  ;;  %v9911_v25 = vshll.u32 %v9336_v8, 16  ;;  %v9915_v19 = vshrl.u32 %v9336_v8, 16  ;;  %v20430_v32 = vrot.slane %v9888_v22, 4 }
 0x533   : > { %15658 = vmatprep.subr.bf16.mxu1 %v16577_v42  ;;  %12500 = vmatprep.mubr.bf16.mxu0 %v12247_v12  ;;  %v11819_v26 = vmul.f32 %v20044_v57, %v11679_v40  ;;  %v11957_v49 = vadd.f32 %v20052_v7, %v11817_v24  ;;  %v11816_v44 = vmul.f32 %v20032_v34, %v11676_v37  ;;  %v20441_v18 = vrot.slane %v9901_v14, 5  ;;  %v11602_v14 = vld [vmem:[%s17094_s14 + $0x70] sm:$0xff]  ;;  %v11603_v40 = vld [vmem:[%s17094_s14 + $0x78] sm:$0xff] }
 0x534   : > { %12501 = vmatmul.mubr.bf16.gmra.mrb[228].mxu0 %v12246_v53  ;;  %v11818_v38 = vmul.f32 %v20032_v34, %v11678_v36  ;;  %v9907_v46 = vrot.slane %v9905_v6, 4  ;;  %v20457_v6 = vrot.slane %v9911_v25, 5  ;;  %v9917_v24 = vrot.slane %v9915_v19, 4 }
 0x535   : > { %v20432_v5 = vpop.f32.mrb[156].mxu0  ;;  %v12085_v22 = vmax.f32 %v11957_v49, 0.0  ;;  %v11956_v8 = vadd.f32 %v20047_v30, %v11816_v44  ;;  %v9921_v37 = vshll.u32 %v9337_v58, 16  ;;  %v20469_v44 = vrot.slane %v9898_v2, 4  ;;  %v9339_v58 = vld [vmem:[#allocation2 + $0x130] sm:$0xf]  ;;  %15729 = vmatpush3.bf16.msra.mxu0 %v16579_v35 }
 0x536   : > { %21842 = vst [vmem:[#allocation30_spill] sm:$0xff] %v20432_v5  ;;  %15659 = vmatpush3.bf16.msra.mxu1 %v16577_v42  ;;  %v20443_v11 = vpop.f32.mrb[157].mxu0  ;;  %v11959_v42 = vadd.f32 %v20052_v7, %v11819_v26  ;;  %v11958_v12 = vadd.f32 %v20047_v30, %v11818_v38  ;;  %v9908_v19 = vor.u32 %v9907_v46, %v20441_v18  ;;  %v11683_v53 = vunpack.c.h.bf16 %v11603_v40 }
 0x537   : > { %21843 = vst [vmem:[#allocation31_spill] sm:$0xff] %v20443_v11  ;;  %v20450_v55 = vpop.f32.mrb[158].mxu0  ;;  %v11680_v11 = vunpack.c.l.bf16 %v11602_v14  ;;  %v20472_v5 = vrot.slane %v9921_v37, 5  ;;  %v9929_v16 = vshll.u32 %v9338_v0, 16  ;;  %v9918_v46 = vor.u32 %v9917_v24, %v20457_v6 }
 0x538   : > { %21844 = vst [vmem:[#allocation32_spill] sm:$0xff] %v20450_v55  ;;  %v20459_v36 = vpop.f32.mrb[159].mxu0  ;;  %v12087_v26 = vmax.f32 %v11959_v42, 0.0  ;;  %v12086_v25 = vmax.f32 %v11958_v12, 0.0  ;;  %v11681_v42 = vunpack.c.h.bf16 %v11602_v14  ;;  %v9340_v12 = vld [vmem:[#allocation2 + $0x134] sm:$0xf] }
 0x539   : > { %15597 = vmatmul.mubr.bf16.gmra.mrb[32].mxu1 %v19999_v33  ;;  %21845 = vst [vmem:[#allocation33_spill] sm:$0xff] %v20459_v36  ;;  %v12084_v33 = vmax.f32 %v11956_v8, 0.0  ;;  %v9926_v36 = vshrl.u32 %v9338_v0, 16  ;;  %v11823_v8 = vmul.f32 %v20044_v57, %v11683_v53  ;;  %v11820_v14 = vmul.f32 %v20032_v34, %v11680_v11 }
 0x53a   : > { %15600 = vmatprep.mubr.bf16.mxu1 %v20003_v4  ;;  %v12249_v38 = vpack.c.bf16 %v12087_v26, %v12085_v22  ;;  %v11682_v4 = vunpack.c.l.bf16 %v11603_v40  ;;  %v11821_v2 = vmul.f32 %v20044_v57, %v11681_v42  ;;  %v9935_v22 = vshll.u32 %v9339_v58, 16  ;;  %v11604_v42 = vld [vmem:[%s17094_s14 + $0x80] sm:$0xff] }
 0x53b   : > { %v12248_v55 = vpack.c.bf16 %v12086_v25, %v12084_v33  ;;  %v9939_v40 = vshrl.u32 %v9339_v58, 16  ;;  %v11963_v37 = vadd.f32 %v20052_v7, %v11823_v8  ;;  %v20489_v33 = vrot.slane %v9908_v19, 4 }
 0x53c   : > { %12508 = vmatprep.mubr.bf16.mxu0 %v12249_v38  ;;  %v11822_v35 = vmul.f32 %v20032_v34, %v11682_v4  ;;  %v11961_v24 = vadd.f32 %v20052_v7, %v11821_v2  ;;  %v9928_v25 = vrot.slane %v9926_v36, 4  ;;  %v11960_v11 = vadd.f32 %v20047_v30, %v11820_v14  ;;  %v11605_v4 = vld [vmem:[%s17094_s14 + $0x88] sm:$0xff] }
 0x53d   : > { %v20477_v26 = vpop.f32.mrb[160].mxu0  ;;  %12509 = vmatmul.mubr.bf16.gmra.mrb[232].mxu0 %v12248_v55  ;;  %v9931_v58 = vrot.slane %v9929_v16, 5  ;;  %v9945_v49 = vshll.u32 %v9340_v12, 16  ;;  %v20501_v19 = vrot.slane %v9935_v22, 5  ;;  %v9949_v36 = vshrl.u32 %v9340_v12, 16 }
 0x53e   : > { %21846 = vst [vmem:[#allocation34_spill] sm:$0xff] %v20477_v26  ;;  %v20485_v53 = vpop.f32.mrb[161].mxu0  ;;  %v11962_v38 = vadd.f32 %v20047_v30, %v11822_v35  ;;  %v12089_v2 = vmax.f32 %v11961_v24, 0.0  ;;  %v12088_v8 = vmax.f32 %v11960_v11, 0.0  ;;  %v9941_v14 = vrot.slane %v9939_v40, 4 }
 0x53f   : > { %21847 = vst [vmem:[#allocation35_spill] sm:$0xff] %v20485_v53  ;;  %v20491_v55 = vpop.f32.mrb[162].mxu0  ;;  %v12091_v53 = vmax.f32 %v11963_v37, 0.0  ;;  %v9341_v26 = vld [vmem:[#allocation2 + $0x138] sm:$0xf]  ;;  %v11685_v48 = vunpack.c.h.bf16 %v11604_v42  ;;  %v11687_v10 = vunpack.c.h.bf16 %v11605_v4  ;;  %v9919_v13 = vrot.slane %v9918_v46, 4 }
 0x540   : > { %21848 = vst [vmem:[#allocation36_spill] sm:$0xff] %v20491_v55  ;;  %v20498_v0 = vpop.f32.mrb[163].mxu0  ;;  %v12090_v55 = vmax.f32 %v11962_v38, 0.0  ;;  %v11684_v16 = vunpack.c.l.bf16 %v11604_v42  ;;  %v11686_v15 = vunpack.c.l.bf16 %v11605_v4  ;;  %v9932_v23 = vor.u32 %v9931_v58, %v9928_v25  ;;  %v9342_v12 = vld [vmem:[#allocation2 + $0x13c] sm:$0x1] }
 0x541   : > { %15601 = vmatmul.mubr.bf16.gmra.mrb[36].mxu1 %v20005_v31  ;;  %21849 = vst [vmem:[#allocation37_spill] sm:$0xff] %v20498_v0  ;;  %v12251_v35 = vpack.c.bf16 %v12091_v53, %v12089_v2  ;;  %v20503_v0 = vrot.slane %v9945_v49, 5  ;;  %v11827_v22 = vmul.f32 %v20044_v57, %v11687_v10  ;;  %v9951_v24 = vrot.slane %v9949_v36, 4 }
 0x542   : > { %15604 = vmatprep.mubr.bf16.mxu1 %v20078_v61  ;;  %v12250_v31 = vpack.c.bf16 %v12090_v55, %v12088_v8  ;;  %v11825_v61 = vmul.f32 %v20044_v57, %v11685_v48  ;;  %v9955_v40 = vshll.u32 %v9341_v26, 16  ;;  %v11824_v46 = vmul.f32 %v20032_v34, %v11684_v16 }
 0x543   : > { %12516 = vmatprep.mubr.bf16.mxu0 %v12251_v35  ;;  %v11826_v37 = vmul.f32 %v20032_v34, %v11686_v15  ;;  %v9914_v49 = vsel %vm18641_vm14, %v20489_v33, %v20457_v6  ;;  %v9942_v48 = vor.u32 %v9941_v14, %v20501_v19  ;;  %v11967_v55 = vadd.f32 %v20052_v7, %v11827_v22  ;;  %v11606_v6 = vld [vmem:[%s17094_s14 + $0x90] sm:$0xff]  ;;  %v11607_v33 = vld [vmem:[%s17094_s14 + $0x98] sm:$0xff] }
 0x544   : > { %v11965_v25 = vadd.f32 %v20052_v7, %v11825_v61  ;;  %v9924_v11 = vsel %vm18641_vm14, %v9919_v13, %v20472_v5  ;;  %v9959_v38 = vshrl.u32 %v9341_v26, 16  ;;  %v11964_v15 = vadd.f32 %v20047_v30, %v11824_v46 }
 0x545   : > { %v20507_v53 = vpop.f32.mrb[164].mxu0  ;;  %12517 = vmatmul.mubr.bf16.gmra.mrb[236].mxu0 %v12250_v31  ;;  %v11966_v4 = vadd.f32 %v20047_v30, %v11826_v37  ;;  %v9933_v58 = vrot.slane %v9932_v23, 4  ;;  %v9965_v2 = vshll.u32 %v9342_v12, 16  ;;  %v12095_v14 = vmax.f32 %v11967_v55, 0.0  ;;  %v9343_v55 = vld [vmem:[#allocation2 + $0x140] sm:$0xf] }
 0x546   : > { %v20516_v10 = vpop.f32.mrb[165].mxu0  ;;  %v12093_v8 = vmax.f32 %v11965_v25, 0.0  ;;  %v9952_v13 = vor.u32 %v9951_v24, %v20503_v0  ;;  %v20534_v5 = vrot.slane %v9955_v40, 5  ;;  %v12092_v26 = vmax.f32 %v11964_v15, 0.0 }
 0x547   : > { %v20523_v42 = vpop.f32.mrb[166].mxu0  ;;  %v12094_v35 = vmax.f32 %v11966_v4, 0.0  ;;  %v9943_v31 = vrot.slane %v9942_v48, 4  ;;  %v11689_v61 = vunpack.c.h.bf16 %v11606_v6  ;;  %v11691_v22 = vunpack.c.h.bf16 %v11607_v33 }
 0x548   : > { %v20530_v36 = vpop.f32.mrb[167].mxu0  ;;  %v12253_v16 = vpack.c.bf16 %v12095_v14, %v12093_v8  ;;  %v9961_v46 = vrot.slane %v9959_v38, 4  ;;  %v11688_v23 = vunpack.c.l.bf16 %v11606_v6  ;;  %v11690_v12 = vunpack.c.l.bf16 %v11607_v33  ;;  %v11609_v14 = vld [vmem:[%s17094_s14 + $0xa8] sm:$0xff] }
 0x549   : > { %15605 = vmatmul.mubr.bf16.gmra.mrb[40].mxu1 %v20151_v3  ;;  %v12252_v3 = vpack.c.bf16 %v12094_v35, %v12092_v26  ;;  %v21850_v37 = vsel %vm18641_vm14, %v20425_v21, %v20412_v17  ;;  %v21852_v40 = vsel %vm18641_vm14, %v20469_v44, %v20441_v18  ;;  %v21853_v48 = vsel %vm18641_vm14, %v20430_v32, %v20414_v29 }
 0x54a   : > { %15608 = vmatprep.mubr.bf16.mxu1 %v20153_v45  ;;  %v21851_v45 = vsel %vm18641_vm14, %v20410_v39, %v20369_v60  ;;  %v20558_v25 = vcombine.low %v21853_v48, %v21852_v40  ;;  %12524 = vmatprep.mubr.bf16.mxu0 %v12253_v16  ;;  %v11829_v17 = vmul.f32 %v20044_v57, %v11689_v61  ;;  %v20564_v39 = vrot.slane %v9965_v2, 5 }
 0x54b   : > { %v20546_v24 = vcombine.low %v21851_v45, %v21850_v37  ;;  %v11831_v21 = vmul.f32 %v20044_v57, %v11691_v22  ;;  %v20562_v60 = vcombine.low %v9914_v49, %v9924_v11  ;;  %v11828_v18 = vmul.f32 %v20032_v34, %v11688_v23  ;;  %v9344_v49 = vld [vmem:[#allocation2 + $0x144] sm:$0xf] }
 0x54c   : > { %v11830_v29 = vmul.f32 %v20032_v34, %v11690_v12  ;;  %v9938_v32 = vsel %vm18641_vm14, %v9933_v58, %v20501_v19  ;;  %v9948_v44 = vsel %vm18641_vm14, %v9943_v31, %v20503_v0  ;;  %v11969_v15 = vadd.f32 %v20052_v7, %v11829_v17  ;;  %v11608_v58 = vld [vmem:[%s17094_s14 + $0xa0] sm:$0xff] }
 0x54d   : > { %v20566_v38 = vpop.f32.mrb[168].mxu0  ;;  %12525 = vmatmul.mubr.bf16.gmra.mrb[240].mxu0 %v12252_v3  ;;  %v11971_v4 = vadd.f32 %v20052_v7, %v11831_v21  ;;  %v20580_v6 = vrot.slane %v9952_v13, 4  ;;  %v9962_v33 = vor.u32 %v9961_v46, %v20534_v5  ;;  %v11968_v8 = vadd.f32 %v20047_v30, %v11828_v18  ;;  %v9345_v3 = vld [vmem:[#allocation2 + $0x148] sm:$0xf] }
 0x54e   : > { %v20576_v11 = vpop.f32.mrb[169].mxu0  ;;  %v11970_v19 = vadd.f32 %v20047_v30, %v11830_v29  ;;  %v9970_v0 = vshrl.u32 %v9343_v55, 16  ;;  %v9973_v26 = vshll.u32 %v9343_v55, 16  ;;  %v12097_v31 = vmax.f32 %v11969_v15, 0.0 }
 0x54f   : > { %v20583_v2 = vpop.f32.mrb[170].mxu0  ;;  %v12099_v16 = vmax.f32 %v11971_v4, 0.0  ;;  %v20593_v13 = vcombine.low %v9938_v32, %v9948_v44  ;;  %v9979_v61 = vshll.u32 %v9344_v49, 16  ;;  %v12096_v22 = vmax.f32 %v11968_v8, 0.0  ;;  %v9346_v44 = vld [vmem:[#allocation2 + $0x14c] sm:$0xf] }
 0x550   : > { %v20590_v35 = vpop.f32.mrb[171].mxu0  ;;  %v12098_v46 = vmax.f32 %v11970_v19, 0.0  ;;  %v9983_v23 = vshrl.u32 %v9344_v49, 16  ;;  %v11693_v37 = vunpack.c.h.bf16 %v11608_v58  ;;  %v11695_v45 = vunpack.c.h.bf16 %v11609_v14 }
 0x551   : > { %15609 = vmatmul.mubr.bf16.gmra.mrb[44].mxu1 %v20155_v41  ;;  %v12255_v12 = vpack.c.bf16 %v12099_v16, %v12097_v31  ;;  %v20595_v40 = vrot.slane %v9962_v33, 4  ;;  %v11692_v48 = vunpack.c.l.bf16 %v11608_v58  ;;  %v11694_v17 = vunpack.c.l.bf16 %v11609_v14  ;;  %v9347_v14 = vld [vmem:[#allocation2 + $0x150] sm:$0x1] }
 0x552   : > { %15612 = vmatprep.mubr.bf16.mxu1 %v20286_v50  ;;  %v12254_v41 = vpack.c.bf16 %v12098_v46, %v12096_v22  ;;  %v9972_v21 = vrot.slane %v9970_v0, 4  ;;  %v9975_v55 = vrot.slane %v9973_v26, 5  ;;  %v11833_v50 = vmul.f32 %v20044_v57, %v11693_v37  ;;  %v11611_v22 = vld [vmem:[%s17094_s14 + $0xb8] sm:$0xff] }
 0x553   : > { %12532 = vmatprep.mubr.bf16.mxu0 %v12255_v12  ;;  %v11835_v18 = vmul.f32 %v20044_v57, %v11695_v45  ;;  %v9958_v29 = vsel %vm18641_vm14, %v20580_v6, %v20534_v5  ;;  %v9989_v32 = vshll.u32 %v9345_v3, 16  ;;  %v11832_v15 = vmul.f32 %v20032_v34, %v11692_v48 }
 0x554   : > { %v11834_v4 = vmul.f32 %v20032_v34, %v11694_v17  ;;  %v20607_v33 = vrot.slane %v9979_v61, 5  ;;  %v9985_v8 = vrot.slane %v9983_v23, 4  ;;  %v11973_v58 = vadd.f32 %v20052_v7, %v11833_v50  ;;  %v11610_v61 = vld [vmem:[%s17094_s14 + $0xb0] sm:$0xff] }
 0x555   : > { %v20603_v49 = vpop.f32.mrb[172].mxu0  ;;  %12533 = vmatmul.mubr.bf16.gmra.mrb[244].mxu0 %v12254_v41  ;;  %v11975_v5 = vadd.f32 %v20052_v7, %v11835_v18  ;;  %v9968_v6 = vsel %vm18641_vm14, %v20595_v40, %v20564_v39  ;;  %v9993_v0 = vshrl.u32 %v9345_v3, 16  ;;  %v11972_v31 = vadd.f32 %v20047_v30, %v11832_v15  ;;  %v16580_v39 = vld [vmem:[%s21814_s19 + $0x18] sm:$0xff]  }
 0x556   : > { %v20609_v19 = vpop.f32.mrb[173].mxu0  ;;  %v11974_v16 = vadd.f32 %v20047_v30, %v11834_v4  ;;  %v9976_v46 = vor.u32 %v9975_v55, %v9972_v21  ;;  %v9999_v23 = vshll.u32 %v9346_v44, 16  ;;  %v12101_v37 = vmax.f32 %v11973_v58, 0.0  ;;  %15730 = vmatprep.subr.bf16.mxu0 %v16580_v39 }
 0x557   : > { %21854 = vst [vmem:[#allocation38_spill] sm:$0xff] %v20609_v19  ;;  %v20617_v26 = vpop.f32.mrb[174].mxu0  ;;  %v12103_v45 = vmax.f32 %v11975_v5, 0.0  ;;  %v20630_v3 = vrot.slane %v9989_v32, 5  ;;  %v10003_v40 = vshrl.u32 %v9346_v44, 16  ;;  %v12100_v41 = vmax.f32 %v11972_v31, 0.0  ;;  %15731 = vmatpush3.bf16.msra.mxu0 %v16580_v39 }
 0x558   : > { %21855 = vst [vmem:[#allocation39_spill] sm:$0xff] %v20617_v26  ;;  %v20624_v12 = vpop.f32.mrb[175].mxu0  ;;  %v12102_v48 = vmax.f32 %v11974_v16, 0.0  ;;  %v9986_v17 = vor.u32 %v9985_v8, %v20607_v33  ;;  %v11697_v21 = vunpack.c.h.bf16 %v11610_v61  ;;  %v11699_v55 = vunpack.c.h.bf16 %v11611_v22 }
 0x559   : > { %15613 = vmatmul.mubr.bf16.gmra.mrb[48].mxu1 %v20307_v59  ;;  %21856 = vst [vmem:[#allocation40_spill] sm:$0xff] %v20624_v12  ;;  %v12257_v59 = vpack.c.bf16 %v12103_v45, %v12101_v37  ;;  %v10009_v50 = vshll.u32 %v9347_v14, 16  ;;  %v11696_v15 = vunpack.c.l.bf16 %v11610_v61  ;;  %v11698_v4 = vunpack.c.l.bf16 %v11611_v22 }
 0x55a   : > { %15616 = vmatprep.mubr.bf16.mxu1 %v20314_v52  ;;  %v12256_v18 = vpack.c.bf16 %v12102_v48, %v12100_v41  ;;  %v9995_v58 = vrot.slane %v9993_v0, 4  ;;  %v20633_v5 = vrot.slane %v9999_v23, 5  ;;  %v9348_v52 = vld [vmem:[#allocation2 + $0x154] sm:$0xf]  ;;  %v11837_v32 = vmul.f32 %v20044_v57, %v11697_v21 }
 0x55b   : > { %12540 = vmatprep.mubr.bf16.mxu0 %v12257_v59  ;;  %v11839_v44 = vmul.f32 %v20044_v57, %v11699_v55  ;;  %v20637_v31 = vrot.slane %v9976_v46, 4  ;;  %v10005_v8 = vrot.slane %v10003_v40, 4  ;;  %v11836_v14 = vmul.f32 %v20032_v34, %v11696_v15  ;;  %v11612_v59 = vld [vmem:[%s17094_s14 + $0xc0] sm:$0xff] }
 0x55c   : > { %v11838_v0 = vmul.f32 %v20032_v34, %v11698_v4  ;;  %v20643_v61 = vcombine.low %v9958_v29, %v9968_v6  ;;  %v20645_v22 = vrot.slane %v9986_v17, 4  ;;  %v11977_v37 = vadd.f32 %v20052_v7, %v11837_v32  ;;  %v11613_v29 = vld [vmem:[%s17094_s14 + $0xc8] sm:$0xff]  ;;  %v9349_v4 = vld [vmem:[#allocation2 + $0x158] sm:$0xf] }
 0x55d   : > { %v20639_v16 = vpop.f32.mrb[176].mxu0  ;;  %12541 = vmatmul.mubr.bf16.gmra.mrb[248].mxu0 %v12256_v18  ;;  %v11979_v46 = vadd.f32 %v20052_v7, %v11839_v44  ;;  %v20651_v45 = vrot.slane %v10009_v50, 5  ;;  %v10014_v39 = vshrl.u32 %v9348_v52, 16  ;;  %v11976_v41 = vadd.f32 %v20047_v30, %v11836_v14 }
 0x55e   : > { %21857 = vst [vmem:[#allocation41_spill] sm:$0xff] %v20639_v16  ;;  %v20647_v23 = vpop.f32.mrb[177].mxu0  ;;  %v11978_v48 = vadd.f32 %v20047_v30, %v11838_v0  ;;  %v9996_v6 = vor.u32 %v9995_v58, %v20630_v3  ;;  %v10017_v17 = vshll.u32 %v9348_v52, 16  ;;  %v12105_v55 = vmax.f32 %v11977_v37, 0.0  ;;  %v9350_v58 = vld [vmem:[#allocation2 + $0x15c] sm:$0xf] }
 0x55f   : > { %21858 = vst [vmem:[#allocation42_spill] sm:$0xff] %v20647_v23  ;;  %v20653_v40 = vpop.f32.mrb[178].mxu0  ;;  %v12107_v18 = vmax.f32 %v11979_v46, 0.0  ;;  %v10006_v15 = vor.u32 %v10005_v8, %v20633_v5  ;;  %v12104_v32 = vmax.f32 %v11976_v41, 0.0  ;;  %v11701_v14 = vunpack.c.h.bf16 %v11612_v59  ;;  %v9351_v23 = vld [vmem:[#allocation2 + $0x160] sm:$0xf] }
 0x560   : > { %21859 = vst [vmem:[#allocation43_spill] sm:$0xff] %v20653_v40  ;;  %v20661_v21 = vpop.f32.mrb[179].mxu0  ;;  %v12106_v44 = vmax.f32 %v11978_v48, 0.0  ;;  %v11703_v0 = vunpack.c.h.bf16 %v11613_v29  ;;  %v11700_v46 = vunpack.c.l.bf16 %v11612_v59  ;;  %v10019_v40 = vrot.slane %v10017_v17, 5 }
 0x561   : > { %15617 = vmatmul.mubr.bf16.gmra.mrb[52].mxu1 %v20316_v20  ;;  %21860 = vst [vmem:[#allocation44_spill] sm:$0xff] %v20661_v21  ;;  %v12259_v52 = vpack.c.bf16 %v12107_v18, %v12105_v55  ;;  %v11702_v21 = vunpack.c.l.bf16 %v11613_v29  ;;  %v10023_v50 = vshll.u32 %v9349_v4, 16  ;;  %v11841_v8 = vmul.f32 %v20044_v57, %v11701_v14 }
 0x562   : > { %15620 = vmatprep.mubr.bf16.mxu1 %v20339_v27  ;;  %v10016_v27 = vrot.slane %v10014_v39, 4  ;;  %v12258_v37 = vpack.c.bf16 %v12106_v44, %v12104_v32  ;;  %v11843_v41 = vmul.f32 %v20044_v57, %v11703_v0  ;;  %v10027_v48 = vshrl.u32 %v9349_v4, 16 }
 0x563   : > { %12548 = vmatprep.mubr.bf16.mxu0 %v12259_v52  ;;  %v10033_v16 = vshll.u32 %v9350_v58, 16  ;;  %v11840_v39 = vmul.f32 %v20032_v34, %v11700_v46  ;;  %v11842_v59 = vmul.f32 %v20032_v34, %v11702_v21  ;;  %v9997_v29 = vrot.slane %v9996_v6, 4  ;;  %v11615_v46 = vld [vmem:[%s17094_s14 + $0xd8] sm:$0xff] }
 0x564   : > { %v10007_v17 = vrot.slane %v10006_v15, 4  ;;  %v11981_v18 = vadd.f32 %v20052_v7, %v11841_v8  ;;  %v11983_v32 = vadd.f32 %v20052_v7, %v11843_v41  ;;  %v10037_v44 = vshrl.u32 %v9350_v58, 16 }
 0x565   : > { %v20675_v20 = vpop.f32.mrb[180].mxu0  ;;  %12549 = vmatmul.mubr.bf16.gmra.mrb[252].mxu0 %v12258_v37  ;;  %v10043_v4 = vshll.u32 %v9351_v23, 16  ;;  %v11980_v14 = vadd.f32 %v20047_v30, %v11840_v39  ;;  %v11982_v0 = vadd.f32 %v20047_v30, %v11842_v59  ;;  %v11614_v37 = vld [vmem:[%s17094_s14 + $0xd0] sm:$0xff]  ;;  %v10020_v6 = vor.u32 %v10019_v40, %v10016_v27 }
 0x566   : > { %21861 = vst [vmem:[#allocation45_spill] sm:$0xff] %v20675_v20  ;;  %v20679_v55 = vpop.f32.mrb[181].mxu0  ;;  %v20690_v21 = vrot.slane %v10023_v50, 5  ;;  %v12109_v8 = vmax.f32 %v11981_v18, 0.0  ;;  %v10029_v58 = vrot.slane %v10027_v48, 4  ;;  %v20695_v41 = vrot.slane %v10033_v16, 5 }
 0x567   : > { %21862 = vst [vmem:[#allocation46_spill] sm:$0xff] %v20679_v55  ;;  %v20683_v52 = vpop.f32.mrb[182].mxu0  ;;  %v12111_v55 = vmax.f32 %v11983_v32, 0.0  ;;  %v12110_v39 = vmax.f32 %v11982_v0, 0.0  ;;  %v10047_v20 = vshrl.u32 %v9351_v23, 16  ;;  %v11705_v12 = vunpack.c.h.bf16 %v11614_v37 }
 0x568   : > { %21863 = vst [vmem:[#allocation47_spill] sm:$0xff] %v20683_v52  ;;  %v20692_v15 = vpop.f32.mrb[183].mxu0  ;;  %v12108_v52 = vmax.f32 %v11980_v14, 0.0  ;;  %v11707_v26 = vunpack.c.h.bf16 %v11615_v46  ;;  %v10039_v19 = vrot.slane %v10037_v44, 4  ;;  %v11704_v40 = vunpack.c.l.bf16 %v11614_v37  ;;  %v9352_v18 = vld [vmem:[#allocation2 + $0x164] sm:$0x1] }
 0x569   : > { %15621 = vmatmul.mubr.bf16.gmra.mrb[56].mxu1 %v20367_v28  ;;  %v12261_v59 = vpack.c.bf16 %v12111_v55, %v12109_v8  ;;  %v11706_v50 = vunpack.c.l.bf16 %v11615_v46  ;;  %v10002_v27 = vsel %vm18641_vm14, %v9997_v29, %v20633_v5  ;;  %v11845_v16 = vmul.f32 %v20044_v57, %v11705_v12  ;;  %v11617_v8 = vld [vmem:[%s17094_s14 + $0xe8] sm:$0xff] }
 0x56a   : > { %15624 = vmatprep.mubr.bf16.mxu1 %v20423_v47  ;;  %v12260_v28 = vpack.c.bf16 %v12110_v39, %v12108_v52  ;;  %v10012_v47 = vsel %vm18641_vm14, %v10007_v17, %v20651_v45  ;;  %v11847_v23 = vmul.f32 %v20044_v57, %v11707_v26  ;;  %v20705_v48 = vrot.slane %v10020_v6, 4  ;;  %v11616_v6 = vld [vmem:[%s17094_s14 + $0xe0] sm:$0xff] }
 0x56b   : > { %12556 = vmatprep.mubr.bf16.mxu0 %v12261_v59  ;;  %v10030_v55 = vor.u32 %v10029_v58, %v20690_v21  ;;  %v11844_v5 = vmul.f32 %v20032_v34, %v11704_v40  ;;  %v11846_v29 = vmul.f32 %v20032_v34, %v11706_v50  ;;  %v20712_v45 = vrot.slane %v10043_v4, 5 }
 0x56c   : > { %v10049_v17 = vrot.slane %v10047_v20, 4  ;;  %v11985_v26 = vadd.f32 %v20052_v7, %v11845_v16  ;;  %v11987_v44 = vadd.f32 %v20052_v7, %v11847_v23  ;;  %v21864_v52 = vsel %vm18641_vm14, %v20645_v22, %v20630_v3 }
 0x56d   : > { %12557 = vmatmul.mubr.bf16.gmra.mrb[0].mxu0 %v12260_v28  ;;  %v21865_v14 = vsel %vm18641_vm14, %v20637_v31, %v20607_v33  ;;  %v10040_v20 = vor.u32 %v10039_v19, %v20695_v41  ;;  %v11984_v37 = vadd.f32 %v20047_v30, %v11844_v5  ;;  %v11986_v46 = vadd.f32 %v20047_v30, %v11846_v29  ;;  %v16779_v5 = vld [vmem:[#allocation2 + $0x2c] sm:$0xf] }
 0x56e   : > { %v20708_v32 = vpop.f32.mrb[184].mxu0  ;;  %v20728_v0 = vcombine.low %v21865_v14, %v21864_v52  ;;  %v20738_v3 = vcombine.low %v10002_v27, %v10012_v47  ;;  %v10053_v22 = vshll.u32 %v9352_v18, 16  ;;  %v12113_v33 = vmax.f32 %v11985_v26, 0.0  ;;  %v16780_v26 = vld [vmem:[#allocation2 + $0x30] sm:$0xf] }
 0x56f   : > { %v20714_v12 = vpop.f32.mrb[185].mxu0  ;;  %v12115_v31 = vmax.f32 %v11987_v44, 0.0  ;;  %v20747_v39 = vrot.slane %v10030_v55, 4  ;;  %v12112_v59 = vmax.f32 %v11984_v37, 0.0  ;;  %v12114_v28 = vmax.f32 %v11986_v46, 0.0 }
 0x570   : > { %v20731_v4 = vpop.f32.mrb[186].mxu0  ;;  %v11709_v50 = vunpack.c.h.bf16 %v11616_v6  ;;  %v11711_v27 = vunpack.c.h.bf16 %v11617_v8  ;;  %v20750_v47 = vrot.slane %v10040_v20, 4  ;;  %v11708_v23 = vunpack.c.l.bf16 %v11616_v6 }
 0x571   : > { %15625 = vmatmul.mubr.bf16.gmra.mrb[60].mxu1 %v20546_v24  ;;  %v20740_v58 = vpop.f32.mrb[187].mxu0  ;;  %v10050_v24 = vor.u32 %v10049_v17, %v20712_v45  ;;  %v12263_v40 = vpack.c.bf16 %v12115_v31, %v12113_v33  ;;  %v12262_v16 = vpack.c.bf16 %v12114_v28, %v12112_v59  ;;  %v11710_v18 = vunpack.c.l.bf16 %v11617_v8  ;;  %v16781_v17 = vld [vmem:[#allocation2 + $0x34] sm:$0xf] }
 0x572   : > { %15628 = vmatprep.mubr.bf16.mxu1 %v20558_v25  ;;  %v10603_v25 = vld [vmem:[#allocation2 + $0x28] sm:$0xe]  ;;  %v10701_v29 = vrot.slane %v16779_v5, 5  ;;  %v10704_v44 = vrot.slane %v16780_v26, 5  ;;  %v11849_v55 = vmul.f32 %v20044_v57, %v11709_v50  ;;  %v11851_v52 = vmul.f32 %v20044_v57, %v11711_v27 }
 0x573   : > { %12564 = vmatprep.mubr.bf16.mxu0 %v12263_v40  ;;  %v10055_v14 = vrot.slane %v10053_v22, 5  ;;  %v10707_v37 = vrot.slane %v16781_v17, 5  ;;  %v11848_v46 = vmul.f32 %v20032_v34, %v11708_v23  ;;  %v11850_v6 = vmul.f32 %v20032_v34, %v11710_v18 }
 0x574   : > { %v10036_v8 = vsel %vm18641_vm14, %v20747_v39, %v20695_v41  ;;  %v10051_v33 = vrot.slane %v10050_v24, 4  ;;  %v11989_v22 = vadd.f32 %v20052_v7, %v11849_v55  ;;  %v11991_v59 = vadd.f32 %v20052_v7, %v11851_v52  ;;  %v11618_v41 = vld [vmem:[%s17094_s14 + $0xf0] sm:$0xff]  ;;  %v11619_v39 = vld [vmem:[%s17094_s14 + $0xf8] sm:$0xff] }
 0x575   : > { %12565 = vmatmul.mubr.bf16.gmra.mrb[4].mxu0 %v12262_v16  ;;  %v10046_v28 = vsel %vm18641_vm14, %v20750_v47, %v20712_v45  ;;  %v14106_v40 = vrot.slane %v10603_v25, 9  ;;  %v11988_v27 = vadd.f32 %v20047_v30, %v11848_v46  ;;  %v11990_v16 = vadd.f32 %v20047_v30, %v11850_v6  ;;  %v16581_v45 = vld [vmem:[%s21814_s19 + $0x20] sm:$0xff]   ;;  %v16782_v25 = vld [vmem:[#allocation2 + $0x38] sm:$0x1]  ;;  %v10604_v46 = vld [vmem:[#allocation2 + $0x3c] sm:$0xe] }
 0x576   : > { %v20754_v20 = vpop.f32.mrb[188].mxu0  ;;  %v10703_v24 = vrot.slane %v10701_v29, 4  ;;  %v10706_v23 = vrot.slane %v10704_v44, 4  ;;  %v12117_v5 = vmax.f32 %v11989_v22, 0.0  ;;  %v12119_v26 = vmax.f32 %v11991_v59, 0.0  ;;  %15732 = vmatprep.subr.bf16.mxu0 %v16581_v45 }
 0x577   : > { %21866 = vst [vmem:[#allocation48_spill] sm:$0xff] %v20754_v20  ;;  %v20762_v31 = vpop.f32.mrb[189].mxu0  ;;  %v10709_v47 = vrot.slane %v10707_v37, 4  ;;  %v10710_v55 = vrot.slane %v16782_v25, 5  ;;  %v12116_v52 = vmax.f32 %v11988_v27, 0.0  ;;  %v12118_v17 = vmax.f32 %v11990_v16, 0.0  ;;  %15733 = vmatpush3.bf16.msra.mxu0 %v16581_v45 }
 0x578   : > { %21867 = vst [vmem:[#allocation49_spill] sm:$0xff] %v20762_v31  ;;  %v20770_v50 = vpop.f32.mrb[190].mxu0  ;;  %v12265_v6 = vpack.c.bf16 %v12119_v26, %v12117_v5  ;;  %v11713_v19 = vunpack.c.h.bf16 %v11618_v41  ;;  %v20787_v22 = vsel %vm18002_vm11, %v14106_v40, %v10701_v29  ;;  %v20791_v27 = vsel %vm18002_vm11, %v10703_v24, %v10704_v44  ;;  %v16784_v26 = vld [vmem:[#allocation2 + $0x44] sm:$0xf] }
 0x579   : > { %21868 = vst [vmem:[#allocation50_spill] sm:$0xff] %v20770_v50  ;;  %15629 = vmatmul.mubr.bf16.gmra.mrb[0].mxu1 %v20562_v60  ;;  %v20777_v18 = vpop.f32.mrb[191].mxu0  ;;  %v10056_v60 = vsel %vm18641_vm14, %v10051_v33, %v10055_v14  ;;  %v12264_v59 = vpack.c.bf16 %v12118_v17, %v12116_v52  ;;  %v11712_v50 = vunpack.c.l.bf16 %v11618_v41  ;;  %v20795_v14 = vsel %vm18002_vm11, %v10706_v23, %v10707_v37  ;;  %v11620_v25 = vld [vmem:[%s17094_s14 + $0x100] sm:$0xff]  ;;  %v16785_v52 = vld [vmem:[#allocation2 + $0x48] sm:$0xf] }
 0x57a   : > { %21869 = vst [vmem:[#allocation51_spill] sm:$0xff] %v20777_v18  ;;  %15632 = vmatprep.mubr.bf16.mxu1 %v20593_v13  ;;  %v11715_v18 = vunpack.c.h.bf16 %v11619_v39  ;;  %v11714_v13 = vunpack.c.l.bf16 %v11619_v39  ;;  %12572 = vmatprep.mubr.bf16.mxu0 %v12265_v6  ;;  %v11853_v33 = vmul.f32 %v20044_v57, %v11713_v19  ;;  %v20801_v29 = vsel %vm18002_vm11, %v10709_v47, %v10710_v55  ;;  %v16783_v39 = vld [vmem:[#allocation2 + $0x40] sm:$0xf] }
 0x57b   : > { %v14107_v40 = vrot.slane %v10604_v46, 9  ;;  %v11852_v44 = vmul.f32 %v20032_v34, %v11712_v50  ;;  %v21870_v37 = vsel %vm18641_vm14, %v20705_v48, %v20690_v21  ;;  %v10714_v24 = vrot.slane %v16783_v39, 5  ;;  %v16786_v39 = vld [vmem:[#allocation2 + $0x54] sm:$0xf] }
 0x57c   : > { %v11855_v16 = vmul.f32 %v20044_v57, %v11715_v18  ;;  %v11854_v41 = vmul.f32 %v20032_v34, %v11714_v13  ;;  %v14096_v19 = vcombine.low %v21870_v37, %v10036_v8  ;;  %v11993_v23 = vadd.f32 %v20052_v7, %v11853_v33  ;;  %v10605_v37 = vld [vmem:[#allocation2 + $0x50] sm:$0xe] }
 0x57d   : > { %12573 = vmatmul.mubr.bf16.gmra.mrb[8].mxu0 %v12264_v59  ;;  %v20812_v5 = vcombine.low %v10046_v28, %v10056_v60  ;;  %v10717_v45 = vrot.slane %v16784_v26, 5  ;;  %v11992_v50 = vadd.f32 %v20047_v30, %v11852_v44  ;;  %v14138_v21 = vcombine.low %v20787_v22, %v20791_v27  ;;  %v16583_v22 = vld [vmem:[%s21814_s19 + $0x30] sm:$0xff]   ;;  %v10607_v27 = vld [vmem:[#allocation2 + $0x78] sm:$0xe] }
 0x57e   : > { %v11995_v18 = vadd.f32 %v20052_v7, %v11855_v16  ;;  %v11994_v47 = vadd.f32 %v20047_v30, %v11854_v41  ;;  %v12121_v8 = vmax.f32 %v11993_v23, 0.0  ;;  %v20826_v28 = vsel %vm18002_vm11, %v14107_v40, %v10714_v24 }
 0x57f   : > { %v10720_v17 = vrot.slane %v16785_v52, 5  ;;  %v12120_v60 = vmax.f32 %v11992_v50, 0.0  ;;  %v10716_v6 = vrot.slane %v10714_v24, 4  ;;  %v11717_v59 = vunpack.c.h.bf16 %v11620_v25  ;;  %v16788_v24 = vld [vmem:[#allocation2 + $0x5c] sm:$0xf] }
 0x580   : > { %v12123_v55 = vmax.f32 %v11995_v18, 0.0  ;;  %v12122_v46 = vmax.f32 %v11994_v47, 0.0  ;;  %v11719_v13 = vunpack.c.h.bf16 %v11621_v62  ;;  %v10719_v33 = vrot.slane %v10717_v45, 4 }
 0x581   : > { %15633 = vmatmul.mubr.bf16.gmra.mrb[4].mxu1 %v20643_v61  ;;  %v11716_v44 = vunpack.c.l.bf16 %v11620_v25  ;;  %v11718_v41 = vunpack.c.l.bf16 %v11621_v62  ;;  %v10727_v23 = vrot.slane %v16786_v39, 5  ;;  %v11857_v40 = vmul.f32 %v20044_v57, %v11717_v59 }
 0x582   : > { %15636 = vmatprep.mubr.bf16.mxu1 %v20728_v0  ;;  %v12267_v61 = vpack.c.bf16 %v12123_v55, %v12121_v8  ;;  %v12266_v16 = vpack.c.bf16 %v12122_v46, %v12120_v60  ;;  %v16787_v0 = vld [vmem:[#allocation2 + $0x58] sm:$0xf]  ;;  %v11859_v26 = vmul.f32 %v20044_v57, %v11719_v13  ;;  %v10722_v50 = vrot.slane %v10720_v17, 4  ;;  %v16789_v55 = vld [vmem:[#allocation2 + $0x4c] sm:$0x1] }
 0x583   : > { %v10730_v18 = vrot.slane %v16787_v0, 5  ;;  %v10733_v47 = vrot.slane %v16788_v24, 5  ;;  %v11856_v8 = vmul.f32 %v20032_v34, %v11716_v44  ;;  %v11858_v25 = vmul.f32 %v20032_v34, %v11718_v41  ;;  %v11622_v44 = vld [vmem:[%s17094_s14 + $0x110] sm:$0xff]  ;;  %v11623_v41 = vld [vmem:[%s17094_s14 + $0x118] sm:$0xff] }
 0x584   : > { %12580 = vmatprep.mubr.bf16.mxu0 %v12267_v61  ;;  %v20834_v62 = vsel %vm18002_vm11, %v10716_v6, %v10717_v45  ;;  %v10723_v52 = vrot.slane %v16789_v55, 5  ;;  %v11997_v60 = vadd.f32 %v20052_v7, %v11857_v40  ;;  %v11999_v46 = vadd.f32 %v20052_v7, %v11859_v26  ;;  %v16790_v26 = vld [vmem:[#allocation2 + $0x60] sm:$0x1] }
 0x585   : > { %12581 = vmatmul.mubr.bf16.gmra.mrb[12].mxu0 %v12266_v16  ;;  %v20840_v61 = vsel %vm18002_vm11, %v10719_v33, %v10720_v17  ;;  %v14108_v59 = vrot.slane %v10605_v37, 9  ;;  %v11996_v13 = vadd.f32 %v20047_v30, %v11856_v8  ;;  %v11998_v16 = vadd.f32 %v20047_v30, %v11858_v25  ;;  %v10606_v37 = vld [vmem:[#allocation2 + $0x64] sm:$0xe] }
 0x586   : > { %v10729_v45 = vrot.slane %v10727_v23, 4  ;;  %v10732_v6 = vrot.slane %v10730_v18, 4  ;;  %v12125_v39 = vmax.f32 %v11997_v60, 0.0  ;;  %v12127_v0 = vmax.f32 %v11999_v46, 0.0 }
 0x587   : > { %v10735_v40 = vrot.slane %v10733_v47, 4  ;;  %v10736_v24 = vrot.slane %v16790_v26, 5  ;;  %v12124_v55 = vmax.f32 %v11996_v13, 0.0  ;;  %v12126_v17 = vmax.f32 %v11998_v16, 0.0 }
 0x588   : > { %v20849_v33 = vsel %vm18002_vm11, %v10722_v50, %v10723_v52  ;;  %v12269_v8 = vpack.c.bf16 %v12127_v0, %v12125_v39  ;;  %v11721_v25 = vunpack.c.h.bf16 %v11622_v44  ;;  %v11723_v48 = vunpack.c.h.bf16 %v11623_v41  ;;  %v16792_v39 = vld [vmem:[#allocation2 + $0x6c] sm:$0xf] }
 0x589   : > { %15637 = vmatmul.mubr.bf16.gmra.mrb[8].mxu1 %v20738_v3  ;;  %v20853_v3 = vsel %vm18002_vm11, %v14108_v59, %v10727_v23  ;;  %v12268_v60 = vpack.c.bf16 %v12126_v17, %v12124_v55  ;;  %v11720_v46 = vunpack.c.l.bf16 %v11622_v44  ;;  %v20857_v26 = vsel %vm18002_vm11, %v10729_v45, %v10730_v18  ;;  %v16791_v44 = vld [vmem:[#allocation2 + $0x68] sm:$0xf]  ;;  %v11624_v55 = vld [vmem:[%s17094_s14 + $0x120] sm:$0xff] }
 0x58a   : > { %15640 = vmatprep.mubr.bf16.mxu1 %v14096_v19  ;;  %v11722_v19 = vunpack.c.l.bf16 %v11623_v41  ;;  %v20861_v13 = vsel %vm18002_vm11, %v10732_v6, %v10733_v47  ;;  %12588 = vmatprep.mubr.bf16.mxu0 %v12269_v8  ;;  %v11861_v50 = vmul.f32 %v20044_v57, %v11721_v25  ;;  %v11863_v52 = vmul.f32 %v20044_v57, %v11723_v48  ;;  %v11625_v17 = vld [vmem:[%s17094_s14 + $0x128] sm:$0xff] }
 0x58b   : > { %v20867_v23 = vsel %vm18002_vm11, %v10735_v40, %v10736_v24  ;;  %v14109_v59 = vrot.slane %v10606_v37, 9  ;;  %v11860_v18 = vmul.f32 %v20032_v34, %v11720_v46  ;;  %v10740_v41 = vrot.slane %v16791_v44, 5  ;;  %v16582_v46 = vld [vmem:[%s21814_s19 + $0x28] sm:$0xff]  }
 0x58c   : > { %v11862_v16 = vmul.f32 %v20032_v34, %v11722_v19  ;;  %v12001_v45 = vadd.f32 %v20052_v7, %v11861_v50  ;;  %v12003_v48 = vadd.f32 %v20052_v7, %v11863_v52  ;;  %v10743_v0 = vrot.slane %v16792_v39, 5  ;;  %15734 = vmatprep.subr.bf16.mxu0 %v16582_v46 }
 0x58d   : > { %12589 = vmatmul.mubr.bf16.gmra.mrb[16].mxu0 %v12268_v60  ;;  %v12000_v40 = vadd.f32 %v20047_v30, %v11860_v18  ;;  %v20894_v19 = vsel %vm18002_vm11, %v14109_v59, %v10740_v41  ;;  %v11724_v37 = vunpack.c.l.bf16 %v11624_v55  ;;  %v11726_v6 = vunpack.c.l.bf16 %v11625_v17 }
 0x58e   : > { %v12002_v24 = vadd.f32 %v20047_v30, %v11862_v16  ;;  %v12129_v25 = vmax.f32 %v12001_v45, 0.0  ;;  %v12131_v60 = vmax.f32 %v12003_v48, 0.0  ;;  %v10742_v16 = vrot.slane %v10740_v41, 4  ;;  %15735 = vmatpush3.bf16.msra.mxu0 %v16582_v46 }
 0x58f   : > { %v12128_v52 = vmax.f32 %v12000_v40, 0.0  ;;  %v11725_v45 = vunpack.c.h.bf16 %v11624_v55  ;;  %v11727_v48 = vunpack.c.h.bf16 %v11625_v17  ;;  %v10745_v39 = vrot.slane %v10743_v0, 4  ;;  %15736 = vmatprep.subr.bf16.mxu0 %v16583_v22 }
 0x590   : > { %v12130_v18 = vmax.f32 %v12002_v24, 0.0  ;;  %v12271_v44 = vpack.c.bf16 %v12131_v60, %v12129_v25  ;;  %v16796_v60 = vld [vmem:[#allocation2 + $0x84] sm:$0xf]  ;;  %v11864_v17 = vmul.f32 %v20032_v34, %v11724_v37  ;;  %v11866_v46 = vmul.f32 %v20032_v34, %v11726_v6 }
 0x591   : > { %15641 = vmatmul.mubr.bf16.gmra.mrb[12].mxu1 %v20812_v5  ;;  %v16793_v5 = vld [vmem:[#allocation2 + $0x70] sm:$0xf]  ;;  %v11865_v41 = vmul.f32 %v20044_v57, %v11725_v45  ;;  %v11867_v24 = vmul.f32 %v20044_v57, %v11727_v48  ;;  %v10759_v55 = vrot.slane %v16796_v60, 5  ;;  %v14110_v6 = vrot.slane %v10607_v27, 9  ;;  %v16798_v27 = vld [vmem:[#allocation2 + $0x88] sm:$0x1] }
 0x592   : > { %15660 = vmatprep.mubr.bf16.mxu1 %v14138_v21  ;;  %v10746_v50 = vrot.slane %v16793_v5, 5  ;;  %v12270_v8 = vpack.c.bf16 %v12130_v18, %v12128_v52  ;;  %v16794_v21 = vld [vmem:[#allocation2 + $0x7c] sm:$0xf]  ;;  %v16795_v5 = vld [vmem:[#allocation2 + $0x80] sm:$0xf]  ;;  %12596 = vmatprep.mubr.bf16.mxu0 %v12271_v44  ;;  %v20905_v52 = vsel %vm18002_vm11, %v10742_v16, %v10743_v0  ;;  %v12006_v0 = vadd.f32 %v20047_v30, %v11866_v46  ;;  %v11626_v16 = vld [vmem:[%s17094_s14 + $0x130] sm:$0xff] }
 0x593   : > { %v10753_v59 = vrot.slane %v16794_v21, 5  ;;  %v10756_v40 = vrot.slane %v16795_v5, 5  ;;  %v16797_v18 = vld [vmem:[#allocation2 + $0x74] sm:$0x1]  ;;  %v12005_v45 = vadd.f32 %v20052_v7, %v11865_v41  ;;  %v12007_v48 = vadd.f32 %v20052_v7, %v11867_v24  ;;  %v16584_v21 = vld [vmem:[%s21814_s19 + $0x38] sm:$0xff]   ;;  %15737 = vmatpush3.bf16.msra.mxu0 %v16583_v22 }
 0x594   : > { %v10748_v25 = vrot.slane %v10746_v50, 4  ;;  %v10749_v44 = vrot.slane %v16797_v18, 5  ;;  %v20914_v37 = vsel %vm18002_vm11, %v10745_v39, %v10746_v50  ;;  %v11627_v5 = vld [vmem:[%s17094_s14 + $0x138] sm:$0xff]  ;;  %v21871_v41 = vcombine.low %v20795_v14, %v20801_v29  ;;  %15738 = vmatprep.subr.bf16.mxu0 %v16584_v21  ;;  %v10608_v14 = vld [vmem:[#allocation2 + $0x8c] sm:$0xe] }
 0x595   : > { %12597 = vmatmul.mubr.bf16.gmra.mrb[20].mxu0 %v12270_v8  ;;  %v12004_v8 = vadd.f32 %v20047_v30, %v11864_v17  ;;  %v10755_v24 = vrot.slane %v10753_v59, 4  ;;  %v10758_v60 = vrot.slane %v10756_v40, 4  ;;  %v12133_v18 = vmax.f32 %v12005_v45, 0.0 }
 0x596   : > { %v12135_v47 = vmax.f32 %v12007_v48, 0.0  ;;  %v21872_v50 = vcombine.low %v20826_v28, %v20834_v62  ;;  %v10761_v39 = vrot.slane %v10759_v55, 4  ;;  %v10762_v17 = vrot.slane %v16798_v27, 5  ;;  %v11635_v27 = vld [vmem:[%s17094_s14 + $0x178] sm:$0xff] }
 0x597   : > { %v12132_v46 = vmax.f32 %v12004_v8, 0.0  ;;  %v12134_v31 = vmax.f32 %v12006_v0, 0.0  ;;  %v20928_v22 = vsel %vm18002_vm11, %v10748_v25, %v10749_v44  ;;  %v11731_v20 = vunpack.c.h.bf16 %v11627_v5  ;;  %15739 = vmatpush3.bf16.msra.mxu0 %v16584_v21 }
 0x598   : > { %v12273_v29 = vpack.c.bf16 %v12135_v47, %v12133_v18  ;;  %v20932_v45 = vsel %vm18002_vm11, %v14110_v6, %v10753_v59  ;;  %v11728_v28 = vunpack.c.l.bf16 %v11626_v16  ;;  %v11730_v62 = vunpack.c.l.bf16 %v11627_v5  ;;  %v16799_v6 = vld [vmem:[#allocation2 + $0x90] sm:$0xf] }
 0x599   : > { %15661 = vmatmul.mubr.bf16.vlgmr.msra.gmra.mrb[16].mxu1 %v21871_v41  ;;  %v11729_v41 = vunpack.c.h.bf16 %v11626_v16  ;;  %v12272_v48 = vpack.c.bf16 %v12134_v31, %v12132_v46  ;;  %v20936_v8 = vsel %vm18002_vm11, %v10755_v24, %v10756_v40  ;;  %v20940_v25 = vsel %vm18002_vm11, %v10758_v60, %v10759_v55  ;;  %v20956_v24 = vld [vmem:[#allocation2 + $0x94] sm:$0xf] }
 0x59a   : > { %15664 = vmatprep.mubr.bf16.mxu1 %v21872_v50  ;;  %12604 = vmatprep.mubr.bf16.mxu0 %v12273_v29  ;;  %v11871_v44 = vmul.f32 %v20044_v57, %v11731_v20  ;;  %v20946_v31 = vsel %vm18002_vm11, %v10761_v39, %v10762_v17  ;;  %v14111_v59 = vrot.slane %v10608_v14, 9  ;;  %v11868_v40 = vmul.f32 %v20032_v34, %v11728_v28 }
 0x59b   : > { %v11869_v47 = vmul.f32 %v20044_v57, %v11729_v41  ;;  %v11870_v21 = vmul.f32 %v20032_v34, %v11730_v62  ;;  %v14144_v55 = vcombine.low %v20894_v19, %v20905_v52  ;;  %v10766_v0 = vrot.slane %v16799_v6, 5  ;;  %v11628_v19 = vld [vmem:[%s17094_s14 + $0x140] sm:$0xff]  ;;  %v11629_v52 = vld [vmem:[%s17094_s14 + $0x148] sm:$0xff]  ;;  %v11630_v62 = vld [vmem:[%s17094_s14 + $0x150] sm:$0xff] }
 0x59c   : > { %v12011_v20 = vadd.f32 %v20052_v7, %v11871_v44  ;;  %v14145_v5 = vcombine.low %v20914_v37, %v20928_v22  ;;  %v10769_v60 = vrot.slane %v20956_v24, 5  ;;  %v12008_v18 = vadd.f32 %v20047_v30, %v11868_v40 }
 0x59d   : > { %12605 = vmatmul.mubr.bf16.gmra.mrb[24].mxu0 %v12272_v48  ;;  %v12009_v16 = vadd.f32 %v20052_v7, %v11869_v47  ;;  %v12010_v50 = vadd.f32 %v20047_v30, %v11870_v21  ;;  %v21873_v39 = vcombine.low %v20840_v61, %v20849_v33  ;;  %v21874_v29 = vcombine.low %v20853_v3, %v20857_v26  ;;  %v20977_v48 = vld [vmem:[#allocation2 + $0x98] sm:$0xf] }
 0x59e   : > { %v12139_v14 = vmax.f32 %v12011_v20, 0.0  ;;  %v20975_v41 = vsel %vm18002_vm11, %v14111_v59, %v10766_v0  ;;  %v10772_v61 = vrot.slane %v20977_v48, 5  ;;  %v12136_v33 = vmax.f32 %v12008_v18, 0.0  ;;  %v11631_v47 = vld [vmem:[%s17094_s14 + $0x158] sm:$0xff] }
 0x59f   : > { %v12137_v46 = vmax.f32 %v12009_v16, 0.0  ;;  %v12138_v28 = vmax.f32 %v12010_v50, 0.0  ;;  %v10768_v44 = vrot.slane %v10766_v0, 4  ;;  %v11733_v21 = vunpack.c.h.bf16 %v11628_v19 }
 0x5a0   : > { %v11735_v6 = vunpack.c.h.bf16 %v11629_v52  ;;  %v20984_v3 = vrot.slane %v10769_v60, 4  ;;  %v11732_v16 = vunpack.c.l.bf16 %v11628_v19  ;;  %v11734_v59 = vunpack.c.l.bf16 %v11629_v52 }
 0x5a1   : > { %15665 = vmatmul.mubr.bf16.gmra.mrb[20].mxu1 %v21873_v39  ;;  %v12275_v40 = vpack.c.bf16 %v12139_v14, %v12137_v46  ;;  %v12274_v26 = vpack.c.bf16 %v12138_v28, %v12136_v33  ;;  %v11873_v20 = vmul.f32 %v20044_v57, %v11733_v21  ;;  %v11737_v18 = vunpack.c.h.bf16 %v11630_v62 }
 0x5a2   : > { %15668 = vmatprep.mubr.bf16.mxu1 %v21874_v29  ;;  %v11875_v39 = vmul.f32 %v20044_v57, %v11735_v6  ;;  %v11739_v50 = vunpack.c.h.bf16 %v11631_v47  ;;  %v11872_v0 = vmul.f32 %v20032_v34, %v11732_v16  ;;  %v11874_v46 = vmul.f32 %v20032_v34, %v11734_v59  ;;  %v11632_v16 = vld [vmem:[%s17094_s14 + $0x160] sm:$0xff] }
 0x5a3   : > { %12612 = vmatprep.mubr.bf16.mxu0 %v12275_v40  ;;  %v11736_v14 = vunpack.c.l.bf16 %v11630_v62  ;;  %v11738_v29 = vunpack.c.l.bf16 %v11631_v47  ;;  %v12013_v33 = vadd.f32 %v20052_v7, %v11873_v20  ;;  %v11877_v52 = vmul.f32 %v20044_v57, %v11737_v18  ;;  %v11633_v18 = vld [vmem:[%s17094_s14 + $0x168] sm:$0xff] }
 0x5a4   : > { %v12015_v19 = vadd.f32 %v20052_v7, %v11875_v39  ;;  %v11879_v28 = vmul.f32 %v20044_v57, %v11739_v50  ;;  %v12012_v40 = vadd.f32 %v20047_v30, %v11872_v0  ;;  %v12014_v21 = vadd.f32 %v20047_v30, %v11874_v46 }
 0x5a5   : > { %12613 = vmatmul.mubr.bf16.gmra.mrb[28].mxu0 %v12274_v26  ;;  %v11876_v6 = vmul.f32 %v20032_v34, %v11736_v14  ;;  %v11878_v26 = vmul.f32 %v20032_v34, %v11738_v29  ;;  %v21875_v62 = vcombine.low %v20861_v13, %v20867_v23  ;;  %v12141_v47 = vmax.f32 %v12013_v33, 0.0 }
 0x5a6   : > { %v12143_v59 = vmax.f32 %v12015_v19, 0.0  ;;  %v12017_v20 = vadd.f32 %v20052_v7, %v11877_v52  ;;  %v12019_v39 = vadd.f32 %v20052_v7, %v11879_v28  ;;  %v12140_v50 = vmax.f32 %v12012_v40, 0.0 }
 0x5a7   : > { %v12142_v0 = vmax.f32 %v12014_v21, 0.0  ;;  %v12016_v46 = vadd.f32 %v20047_v30, %v11876_v6  ;;  %v12018_v14 = vadd.f32 %v20047_v30, %v11878_v26  ;;  %v11741_v23 = vunpack.c.h.bf16 %v11632_v16 }
 0x5a8   : > { %v12277_v29 = vpack.c.bf16 %v12143_v59, %v12141_v47  ;;  %v12145_v17 = vmax.f32 %v12017_v20, 0.0  ;;  %v12147_v13 = vmax.f32 %v12019_v39, 0.0  ;;  %v10774_v33 = vrot.slane %v10772_v61, 4 }
 0x5a9   : > { %15669 = vmatmul.mubr.bf16.gmra.mrb[24].mxu1 %v21875_v62  ;;  %v11634_v62 = vld [vmem:[%s17094_s14 + $0x170] sm:$0xff]  ;;  %v12276_v19 = vpack.c.bf16 %v12142_v0, %v12140_v50  ;;  %v12144_v52 = vmax.f32 %v12016_v46, 0.0  ;;  %v11743_v28 = vunpack.c.h.bf16 %v11633_v18  ;;  %v11881_v40 = vmul.f32 %v20044_v57, %v11741_v23  ;;  %v16802_v0 = vld [vmem:[#allocation2 + $0xa4] sm:$0xf] }
 0x5aa   : > { %15672 = vmatprep.mubr.bf16.mxu1 %v14144_v55  ;;  %12620 = vmatprep.mubr.bf16.mxu0 %v12277_v29  ;;  %v12279_v55 = vpack.c.bf16 %v12147_v13, %v12145_v17  ;;  %v11740_v21 = vunpack.c.l.bf16 %v11632_v16  ;;  %v11742_v6 = vunpack.c.l.bf16 %v11633_v18  ;;  %v12146_v26 = vmax.f32 %v12018_v14, 0.0  ;;  %v10609_v18 = vld [vmem:[#allocation2 + $0xa0] sm:$0xe] }
 0x5ab   : > { %v11883_v47 = vmul.f32 %v20044_v57, %v11743_v28  ;;  %v11745_v59 = vunpack.c.h.bf16 %v11634_v62  ;;  %v11747_v20 = vunpack.c.h.bf16 %v11635_v27  ;;  %v10770_v39 = vsel %vm18002_vm11, %v10768_v44, %v10769_v60  ;;  %v21024_v13 = vld [vmem:[%s17094_s14 + $0x180] sm:$0xff]  ;;  %v16803_v60 = vld [vmem:[#allocation2 + $0x9c] sm:$0x1] }
 0x5ac   : > { %v12021_v50 = vadd.f32 %v20052_v7, %v11881_v40  ;;  %v11880_v17 = vmul.f32 %v20032_v34, %v11740_v21  ;;  %v11882_v16 = vmul.f32 %v20032_v34, %v11742_v6  ;;  %v10779_v46 = vrot.slane %v16802_v0, 5  ;;  %v16805_v0 = vld [vmem:[#allocation2 + $0xac] sm:$0xf] }
 0x5ad   : > { %12621 = vmatmul.mubr.bf16.gmra.mrb[32].mxu0 %v12276_v19  ;;  %v12023_v14 = vadd.f32 %v20052_v7, %v11883_v47  ;;  %v11885_v29 = vmul.f32 %v20044_v57, %v11745_v59  ;;  %v11887_v24 = vmul.f32 %v20044_v57, %v11747_v20  ;;  %v10775_v44 = vrot.slane %v16803_v60, 5  ;;  %v11637_v59 = vld [vmem:[%s17094_s14 + $0x188] sm:$0xff] }
 0x5ae   : > { %12628 = vmatprep.mubr.bf16.mxu0 %v12279_v55  ;;  %v12149_v23 = vmax.f32 %v12021_v50, 0.0  ;;  %v11744_v19 = vunpack.c.l.bf16 %v11634_v62  ;;  %v11746_v28 = vunpack.c.l.bf16 %v11635_v27  ;;  %v21876_v55 = vcombine.low %v20932_v45, %v20936_v8  ;;  %v16804_v27 = vld [vmem:[#allocation2 + $0xa8] sm:$0xf] }
 0x5af   : > { %v12278_v40 = vpack.c.bf16 %v12146_v26, %v12144_v52  ;;  %v12151_v21 = vmax.f32 %v12023_v14, 0.0  ;;  %v12020_v6 = vadd.f32 %v20047_v30, %v11880_v17  ;;  %v12022_v47 = vadd.f32 %v20047_v30, %v11882_v16 }
 0x5b0   : > { %v14112_v20 = vrot.slane %v10609_v18, 9  ;;  %v12025_v37 = vadd.f32 %v20052_v7, %v11885_v29  ;;  %v12027_v22 = vadd.f32 %v20052_v7, %v11887_v24  ;;  %v10781_v62 = vrot.slane %v10779_v46, 4 }
 0x5b1   : > { %15673 = vmatmul.mubr.bf16.gmra.mrb[28].mxu1 %v14145_v5  ;;  %v11749_v5 = vunpack.c.h.bf16 %v21024_v13  ;;  %v10782_v50 = vrot.slane %v16804_v27, 5  ;;  %v10785_v45 = vrot.slane %v16805_v0, 5  ;;  %v12281_v8 = vpack.c.bf16 %v12151_v21, %v12149_v23  ;;  %v10610_v21 = vld [vmem:[#allocation2 + $0xb4] sm:$0xe] }
 0x5b2   : > { %15676 = vmatprep.mubr.bf16.mxu1 %v21876_v55  ;;  %v14148_v52 = vcombine.low %v20975_v41, %v10770_v39  ;;  %v11884_v26 = vmul.f32 %v20032_v34, %v11744_v19  ;;  %v11886_v17 = vmul.f32 %v20032_v34, %v11746_v28  ;;  %v11751_v16 = vunpack.c.h.bf16 %v11637_v59  ;;  %v21051_v19 = vld [vmem:[%s17094_s14 + $0x190] sm:$0xff] }
 0x5b3   : > { %v10773_v18 = vsel %vm18002_vm11, %v20984_v3, %v10772_v61  ;;  %v10776_v14 = vsel %vm18002_vm11, %v10774_v33, %v10775_v44  ;;  %v12148_v29 = vmax.f32 %v12020_v6, 0.0  ;;  %v12150_v24 = vmax.f32 %v12022_v47, 0.0  ;;  %v21058_v44 = vld [vmem:[%s17094_s14 + $0x198] sm:$0xff]  ;;  %v16806_v55 = vld [vmem:[#allocation2 + $0xb0] sm:$0x1] }
 0x5b4   : > { %v12153_v41 = vmax.f32 %v12025_v37, 0.0  ;;  %v12155_v39 = vmax.f32 %v12027_v22, 0.0  ;;  %v11889_v60 = vmul.f32 %v20044_v57, %v11749_v5  ;;  %v11891_v23 = vmul.f32 %v20044_v57, %v11751_v16  ;;  %v16807_v6 = vld [vmem:[#allocation2 + $0xb8] sm:$0xf]  ;;  %v16808_v16 = vld [vmem:[#allocation2 + $0xbc] sm:$0xf] }
 0x5b5   : > { %12629 = vmatmul.mubr.bf16.gmra.mrb[36].mxu0 %v12278_v40  ;;  %v10780_v48 = vsel %vm18002_vm11, %v14112_v20, %v10779_v46  ;;  %v10783_v61 = vsel %vm18002_vm11, %v10781_v62, %v10782_v50  ;;  %v10784_v3 = vrot.slane %v10782_v50, 4  ;;  %v10787_v33 = vrot.slane %v10785_v45, 4 }
 0x5b6   : > { %12636 = vmatprep.mubr.bf16.mxu0 %v12281_v8  ;;  %v21877_v28 = vcombine.low %v20940_v25, %v20946_v31  ;;  %v10788_v40 = vrot.slane %v16806_v55, 5  ;;  %v10792_v47 = vrot.slane %v16807_v6, 5  ;;  %v12024_v37 = vadd.f32 %v20047_v30, %v11884_v26  ;;  %v16810_v55 = vld [vmem:[#allocation2 + $0xcc] sm:$0xf]  ;;  %v21081_v6 = vld [vmem:[%s17094_s14 + $0x1a0] sm:$0xff] }
 0x5b7   : > { %v12026_v46 = vadd.f32 %v20047_v30, %v11886_v17  ;;  %v12280_v20 = vpack.c.bf16 %v12150_v24, %v12148_v29  ;;  %v11748_v22 = vunpack.c.l.bf16 %v21024_v13  ;;  %v11750_v5 = vunpack.c.l.bf16 %v11637_v59 }
 0x5b8   : > { %v11753_v62 = vunpack.c.h.bf16 %v21051_v19  ;;  %v12283_v27 = vpack.c.bf16 %v12155_v39, %v12153_v41  ;;  %v12029_v25 = vadd.f32 %v20052_v7, %v11889_v60  ;;  %v12031_v31 = vadd.f32 %v20052_v7, %v11891_v23 }
 0x5b9   : > { %15677 = vmatmul.mubr.bf16.gmra.mrb[32].mxu1 %v21877_v28  ;;  %v11755_v50 = vunpack.c.h.bf16 %v21058_v44  ;;  %v14149_v0 = vcombine.low %v10773_v18, %v10776_v14  ;;  %v14113_v8 = vrot.slane %v10610_v21, 9  ;;  %v10795_v26 = vrot.slane %v16808_v16, 5  ;;  %v16809_v28 = vld [vmem:[#allocation2 + $0xc0] sm:$0xf] }
 0x5ba   : > { %15680 = vmatprep.mubr.bf16.mxu1 %v14148_v52  ;;  %v10798_v17 = vrot.slane %v16809_v28, 5  ;;  %v14150_v52 = vcombine.low %v10780_v48, %v10783_v61  ;;  %v10794_v29 = vrot.slane %v10792_v47, 4  ;;  %v12152_v24 = vmax.f32 %v12024_v37, 0.0  ;;  %v21084_v37 = vld [vmem:[%s17094_s14 + $0x1a8] sm:$0xff]  ;;  %v16812_v28 = vld [vmem:[#allocation2 + $0xd0] sm:$0xf] }
 0x5bb   : > { %v12154_v13 = vmax.f32 %v12026_v46, 0.0  ;;  %v10786_v59 = vsel %vm18002_vm11, %v10784_v3, %v10785_v45  ;;  %v11888_v41 = vmul.f32 %v20032_v34, %v11748_v22  ;;  %v11890_v39 = vmul.f32 %v20032_v34, %v11750_v5 }
 0x5bc   : > { %v11893_v18 = vmul.f32 %v20044_v57, %v11753_v62  ;;  %v10789_v14 = vsel %vm18002_vm11, %v10787_v33, %v10788_v40  ;;  %v12157_v60 = vmax.f32 %v12029_v25, 0.0  ;;  %v12159_v23 = vmax.f32 %v12031_v31, 0.0  ;;  %v16811_v40 = vld [vmem:[#allocation2 + $0xc4] sm:$0x1] }
 0x5bd   : > { %12637 = vmatmul.mubr.bf16.gmra.mrb[40].mxu0 %v12280_v20  ;;  %v11895_v48 = vmul.f32 %v20044_v57, %v11755_v50  ;;  %v10793_v61 = vsel %vm18002_vm11, %v14113_v8, %v10792_v47  ;;  %v10797_v45 = vrot.slane %v10795_v26, 4  ;;  %v10800_v3 = vrot.slane %v10798_v17, 4  ;;  %v10611_v20 = vld [vmem:[#allocation2 + $0xc8] sm:$0xe] }
 0x5be   : > { %12644 = vmatprep.mubr.bf16.mxu0 %v12283_v27  ;;  %v10805_v21 = vrot.slane %v16810_v55, 5  ;;  %v10796_v33 = vsel %vm18002_vm11, %v10794_v29, %v10795_v26  ;;  %v10801_v46 = vrot.slane %v16811_v40, 5  ;;  %v12282_v22 = vpack.c.bf16 %v12154_v13, %v12152_v24 }
 0x5bf   : > { %v11752_v5 = vunpack.c.l.bf16 %v21051_v19  ;;  %v12028_v47 = vadd.f32 %v20047_v30, %v11888_v41  ;;  %v12030_v62 = vadd.f32 %v20047_v30, %v11890_v39  ;;  %v12033_v27 = vadd.f32 %v20052_v7, %v11893_v18 }
 0x5c0   : > { %v11754_v25 = vunpack.c.l.bf16 %v21058_v44  ;;  %v12285_v31 = vpack.c.bf16 %v12159_v23, %v12157_v60  ;;  %v12035_v50 = vadd.f32 %v20052_v7, %v11895_v48  ;;  %v11759_v8 = vunpack.c.h.bf16 %v21084_v37 }
 0x5c1   : > { %15681 = vmatmul.mubr.bf16.gmra.mrb[36].mxu1 %v14149_v0  ;;  %v11757_v0 = vunpack.c.h.bf16 %v21081_v6  ;;  %v14114_v16 = vrot.slane %v10611_v20, 9  ;;  %v10807_v26 = vrot.slane %v10805_v21, 4  ;;  %v10808_v19 = vrot.slane %v16812_v28, 5  ;;  %v16814_v20 = vld [vmem:[#allocation2 + $0xe0] sm:$0xf] }
 0x5c2   : > { %15684 = vmatprep.mubr.bf16.mxu1 %v14150_v52  ;;  %v16813_v52 = vld [vmem:[#allocation2 + $0xd4] sm:$0xf]  ;;  %v14151_v24 = vcombine.low %v10786_v59, %v10789_v14  ;;  %v14152_v13 = vcombine.low %v10793_v61, %v10796_v33  ;;  %v21098_v44 = vsel %vm18002_vm11, %v10797_v45, %v10798_v17  ;;  %v11892_v41 = vmul.f32 %v20032_v34, %v11752_v5  ;;  %v21110_v17 = vld [vmem:[%s17094_s14 + $0x1b8] sm:$0xff] }
 0x5c3   : > { %v10811_v29 = vrot.slane %v16813_v52, 5  ;;  %v10802_v39 = vsel %vm18002_vm11, %v10800_v3, %v10801_v46  ;;  %v12156_v18 = vmax.f32 %v12028_v47, 0.0  ;;  %v12158_v60 = vmax.f32 %v12030_v62, 0.0  ;;  %v21107_v61 = vld [vmem:[%s17094_s14 + $0x1b0] sm:$0xff]  ;;  %v10612_v46 = vld [vmem:[#allocation2 + $0xdc] sm:$0xe] }
 0x5c4   : > { %v11894_v23 = vmul.f32 %v20032_v34, %v11754_v25  ;;  %v12161_v48 = vmax.f32 %v12033_v27, 0.0  ;;  %v12163_v55 = vmax.f32 %v12035_v50, 0.0  ;;  %v11897_v59 = vmul.f32 %v20044_v57, %v11757_v0  ;;  %v16815_v50 = vld [vmem:[#allocation2 + $0xd8] sm:$0x1]  ;;  %v16817_v52 = vld [vmem:[#allocation2 + $0xe8] sm:$0xf] }
 0x5c5   : > { %12645 = vmatmul.mubr.bf16.gmra.mrb[44].mxu0 %v12282_v22  ;;  %v11899_v14 = vmul.f32 %v20044_v57, %v11759_v8  ;;  %v10806_v45 = vsel %vm18002_vm11, %v14114_v16, %v10805_v21  ;;  %v10809_v3 = vsel %vm18002_vm11, %v10807_v26, %v10808_v19  ;;  %v10810_v33 = vrot.slane %v10808_v19, 4  ;;  %v16816_v19 = vld [vmem:[#allocation2 + $0xe4] sm:$0xf] }
 0x5c6   : > { %12652 = vmatprep.mubr.bf16.mxu0 %v12285_v31  ;;  %v10813_v40 = vrot.slane %v10811_v29, 4  ;;  %v10818_v22 = vrot.slane %v16814_v20, 5  ;;  %v12032_v5 = vadd.f32 %v20047_v30, %v11892_v41  ;;  %v11756_v47 = vunpack.c.l.bf16 %v21081_v6 }
 0x5c7   : > { %v11758_v62 = vunpack.c.l.bf16 %v21084_v37  ;;  %v12284_v27 = vpack.c.bf16 %v12158_v60, %v12156_v18  ;;  %v12034_v25 = vadd.f32 %v20047_v30, %v11894_v23  ;;  %v11761_v21 = vunpack.c.h.bf16 %v21107_v61 }
 0x5c8   : > { %v11763_v31 = vunpack.c.h.bf16 %v21110_v17  ;;  %v10814_v0 = vrot.slane %v16815_v50, 5  ;;  %v12287_v8 = vpack.c.bf16 %v12163_v55, %v12161_v48  ;;  %v12037_v16 = vadd.f32 %v20052_v7, %v11897_v59 }
 0x5c9   : > { %15685 = vmatmul.mubr.bf16.gmra.mrb[40].mxu1 %v14151_v24  ;;  %v12039_v26 = vadd.f32 %v20052_v7, %v11899_v14  ;;  %v14153_v28 = vcombine.low %v21098_v44, %v10802_v39  ;;  %v14115_v6 = vrot.slane %v10612_v46, 9  ;;  %v10821_v37 = vrot.slane %v16816_v19, 5 }
 0x5ca   : > { %15688 = vmatprep.mubr.bf16.mxu1 %v14152_v13  ;;  %v10824_v24 = vrot.slane %v16817_v52, 5  ;;  %v14154_v13 = vcombine.low %v10806_v45, %v10809_v3  ;;  %v10820_v41 = vrot.slane %v10818_v22, 4  ;;  %v11896_v18 = vmul.f32 %v20032_v34, %v11756_v47  ;;  %v21133_v3 = vpop.f32.mrb[208].mxu0  ;;  %v16818_v47 = vld [vmem:[#allocation2 + $0xf4] sm:$0xf] }
 0x5cb   : > { %v11898_v60 = vmul.f32 %v20032_v34, %v11758_v62  ;;  %v12160_v23 = vmax.f32 %v12032_v5, 0.0  ;;  %v12162_v48 = vmax.f32 %v12034_v25, 0.0  ;;  %v11901_v55 = vmul.f32 %v20044_v57, %v11761_v21  ;;  %v21138_v25 = vld [vmem:[%s17094_s14 + $0x1c0] sm:$0xff]  ;;  %v21141_v21 = vld [vmem:[%s17094_s14 + $0x1c8] sm:$0xff] }
 0x5cc   : > { %v11903_v44 = vmul.f32 %v20044_v57, %v11763_v31  ;;  %v10812_v39 = vsel %vm18002_vm11, %v10810_v33, %v10811_v29  ;;  %v10815_v59 = vsel %vm18002_vm11, %v10813_v40, %v10814_v0  ;;  %v12165_v14 = vmax.f32 %v12037_v16, 0.0  ;;  %v10613_v33 = vld [vmem:[#allocation2 + $0xf0] sm:$0xe] }
 0x5cd   : > { %12653 = vmatmul.mubr.bf16.gmra.mrb[48].mxu0 %v12284_v27  ;;  %v12167_v45 = vmax.f32 %v12039_v26, 0.0  ;;  %v10819_v46 = vsel %vm18002_vm11, %v14115_v6, %v10818_v22  ;;  %v10823_v20 = vrot.slane %v10821_v37, 4  ;;  %v10826_v5 = vrot.slane %v10824_v24, 4  ;;  %v12464_v27 = vpop.f32.mrb[209].mxu0  ;;  %v16819_v6 = vld [vmem:[#allocation2 + $0xec] sm:$0x1] }
 0x5ce   : > { %12660 = vmatprep.mubr.bf16.mxu0 %v12287_v8  ;;  %v10831_v62 = vrot.slane %v16818_v47, 5  ;;  %v10822_v29 = vsel %vm18002_vm11, %v10820_v41, %v10821_v37  ;;  %v12036_v40 = vadd.f32 %v20047_v30, %v11896_v18  ;;  %v12038_v31 = vadd.f32 %v20047_v30, %v11898_v60  ;;  %v21147_v50 = vpop.f32.mrb[210].mxu0  ;;  %v16820_v47 = vld [vmem:[#allocation2 + $0xf8] sm:$0xf] }
 0x5cf   : > { %v11760_v22 = vunpack.c.l.bf16 %v21107_v61  ;;  %v12286_v0 = vpack.c.bf16 %v12162_v48, %v12160_v23  ;;  %v12467_v8 = vpop.f32.mrb[211].mxu0  ;;  %v12041_v16 = vadd.f32 %v20052_v7, %v11901_v55  ;;  %v12043_v26 = vadd.f32 %v20052_v7, %v11903_v44 }
 0x5d0   : > { %v10827_v19 = vrot.slane %v16819_v6, 5  ;;  %v12289_v37 = vpack.c.bf16 %v12167_v45, %v12165_v14  ;;  %v11765_v52 = vunpack.c.h.bf16 %v21138_v25  ;;  %v11767_v41 = vunpack.c.h.bf16 %v21141_v21 }
 0x5d1   : > { %15689 = vmatmul.mubr.bf16.gmra.mrb[44].mxu1 %v14153_v28  ;;  %v11762_v28 = vunpack.c.l.bf16 %v21110_v17  ;;  %v14116_v18 = vrot.slane %v10613_v33, 9  ;;  %v10833_v60 = vrot.slane %v10831_v62, 4  ;;  %v10834_v61 = vrot.slane %v16820_v47, 5 }
 0x5d2   : > { %15692 = vmatprep.mubr.bf16.mxu1 %v14154_v13  ;;  %v16821_v13 = vld [vmem:[#allocation2 + $0xfc] sm:$0xf]  ;;  %v14155_v48 = vcombine.low %v10812_v39, %v10815_v59  ;;  %v12164_v27 = vmax.f32 %v12036_v40, 0.0  ;;  %v12166_v55 = vmax.f32 %v12038_v31, 0.0  ;;  %v11900_v44 = vmul.f32 %v20032_v34, %v11760_v22  ;;  %v21168_v22 = vld [vmem:[%s17094_s14 + $0x1d0] sm:$0xff] }
 0x5d3   : > { %v10837_v23 = vrot.slane %v16821_v13, 5  ;;  %v14156_v17 = vcombine.low %v10819_v46, %v10822_v29  ;;  %v12169_v14 = vmax.f32 %v12041_v16, 0.0  ;;  %v12171_v45 = vmax.f32 %v12043_v26, 0.0  ;;  %v16823_v16 = vld [vmem:[#allocation2 + $0x108] sm:$0xf] }
 0x5d4   : > { %v11902_v8 = vmul.f32 %v20032_v34, %v11762_v28  ;;  %v10825_v33 = vsel %vm18002_vm11, %v10823_v20, %v10824_v24  ;;  %v10828_v6 = vsel %vm18002_vm11, %v10826_v5, %v10827_v19  ;;  %v11905_v39 = vmul.f32 %v20044_v57, %v11765_v52  ;;  %v16822_v24 = vld [vmem:[#allocation2 + $0x100] sm:$0x1]  ;;  %v10614_v5 = vld [vmem:[#allocation2 + $0x104] sm:$0xe] }
 0x5d5   : > { %12661 = vmatmul.mubr.bf16.gmra.mrb[52].mxu0 %v12286_v0  ;;  %v11907_v59 = vmul.f32 %v20044_v57, %v11767_v41  ;;  %v10832_v40 = vsel %vm18002_vm11, %v14116_v18, %v10831_v62  ;;  %v10835_v46 = vsel %vm18002_vm11, %v10833_v60, %v10834_v61  ;;  %v10836_v29 = vrot.slane %v10834_v61, 4  ;;  %v21171_v0 = vld [vmem:[%s17094_s14 + $0x1d8] sm:$0xff] }
 0x5d6   : > { %12668 = vmatprep.mubr.bf16.mxu0 %v12289_v37  ;;  %v10839_v31 = vrot.slane %v10837_v23, 4  ;;  %v10840_v20 = vrot.slane %v16822_v24, 5  ;;  %v10844_v26 = vrot.slane %v16823_v16, 5  ;;  %v12288_v28 = vpack.c.bf16 %v12166_v55, %v12164_v27  ;;  %v21177_v18 = vpop.f32.mrb[212].mxu0  ;;  %v16824_v55 = vld [vmem:[#allocation2 + $0x10c] sm:$0xf] }
 0x5d7   : > { %v12040_v19 = vadd.f32 %v20047_v30, %v11900_v44  ;;  %v12291_v62 = vpack.c.bf16 %v12171_v45, %v12169_v14  ;;  %v12042_v37 = vadd.f32 %v20047_v30, %v11902_v8  ;;  %v11764_v52 = vunpack.c.l.bf16 %v21138_v25  ;;  %v12472_v45 = vpop.f32.mrb[213].mxu0 }
 0x5d8   : > { %v11766_v41 = vunpack.c.l.bf16 %v21141_v21  ;;  %v12045_v60 = vadd.f32 %v20052_v7, %v11905_v39  ;;  %v12047_v47 = vadd.f32 %v20052_v7, %v11907_v59  ;;  %v11769_v61 = vunpack.c.h.bf16 %v21168_v22  ;;  %v21189_v59 = vpop.f32.mrb[214].mxu0 }
 0x5d9   : > { %15693 = vmatmul.mubr.bf16.gmra.mrb[48].mxu1 %v14155_v48  ;;  %v11771_v13 = vunpack.c.h.bf16 %v21171_v0  ;;  %v14157_v48 = vcombine.low %v10825_v33, %v10828_v6  ;;  %v14117_v27 = vrot.slane %v10614_v5, 9  ;;  %v10847_v44 = vrot.slane %v16824_v55, 5  ;;  %v12475_v24 = vpop.f32.mrb[215].mxu0 }
 0x5da   : > { %15696 = vmatprep.mubr.bf16.mxu1 %v14156_v17  ;;  %v16825_v17 = vld [vmem:[#allocation2 + $0x110] sm:$0xf]  ;;  %v14158_v25 = vcombine.low %v10832_v40, %v10835_v46  ;;  %v21185_v21 = vsel %vm18002_vm11, %v10836_v29, %v10837_v23  ;;  %v10841_v8 = vsel %vm18002_vm11, %v10839_v31, %v10840_v20  ;;  %v10846_v39 = vrot.slane %v10844_v26, 4  ;;  %v21196_v31 = vld [vmem:[%s17094_s14 + $0x1e0] sm:$0xff] }
 0x5db   : > { %v10850_v14 = vrot.slane %v16825_v17, 5  ;;  %v12168_v33 = vmax.f32 %v12040_v19, 0.0  ;;  %v12170_v6 = vmax.f32 %v12042_v37, 0.0  ;;  %v11904_v5 = vmul.f32 %v20032_v34, %v11764_v52  ;;  %v16826_v37 = vld [vmem:[#allocation2 + $0x114] sm:$0x1]  ;;  %v21201_v17 = vld [vmem:[%s17094_s14 + $0x1e8] sm:$0xff] }
 0x5dc   : > { %v11906_v40 = vmul.f32 %v20032_v34, %v11766_v41  ;;  %v12173_v46 = vmax.f32 %v12045_v60, 0.0  ;;  %v12175_v16 = vmax.f32 %v12047_v47, 0.0  ;;  %v11909_v23 = vmul.f32 %v20044_v57, %v11769_v61  ;;  %v10615_v52 = vld [vmem:[#allocation2 + $0x118] sm:$0xe]  ;;  %v16827_v41 = vld [vmem:[#allocation2 + $0x11c] sm:$0xf] }
 0x5dd   : > { %12669 = vmatmul.mubr.bf16.gmra.mrb[56].mxu0 %v12288_v28  ;;  %v11911_v29 = vmul.f32 %v20044_v57, %v11771_v13  ;;  %v10845_v20 = vsel %vm18002_vm11, %v14117_v27, %v10844_v26  ;;  %v10849_v28 = vrot.slane %v10847_v44, 4  ;;  %v10852_v19 = vrot.slane %v10850_v14, 4 }
 0x5de   : > { %12676 = vmatprep.mubr.bf16.mxu0 %v12291_v62  ;;  %v10853_v55 = vrot.slane %v16826_v37, 5  ;;  %v10848_v62 = vsel %vm18002_vm11, %v10846_v39, %v10847_v44  ;;  %v10857_v60 = vrot.slane %v16827_v41, 5  ;;  %v11768_v47 = vunpack.c.l.bf16 %v21168_v22 }
 0x5df   : > { %v11770_v61 = vunpack.c.l.bf16 %v21171_v0  ;;  %v12290_v13 = vpack.c.bf16 %v12170_v6, %v12168_v33  ;;  %v12044_v26 = vadd.f32 %v20047_v30, %v11904_v5  ;;  %v12046_v27 = vadd.f32 %v20047_v30, %v11906_v40  ;;  %v16828_v6 = vld [vmem:[#allocation2 + $0x120] sm:$0xf] }
 0x5e0   : > { %v11773_v45 = vunpack.c.h.bf16 %v21196_v31  ;;  %v12293_v24 = vpack.c.bf16 %v12175_v16, %v12173_v46  ;;  %v12051_v44 = vadd.f32 %v20052_v7, %v11911_v29  ;;  %v11775_v39 = vunpack.c.h.bf16 %v21201_v17 }
 0x5e1   : > { %15697 = vmatmul.mubr.bf16.gmra.mrb[52].mxu1 %v14157_v48  ;;  %v12049_v48 = vadd.f32 %v20052_v7, %v11909_v23  ;;  %v14159_v37 = vcombine.low %v21185_v21, %v10841_v8  ;;  %v21216_v22 = vsel %vm18002_vm11, %v10849_v28, %v10850_v14  ;;  %v21220_v0 = vsel %vm18002_vm11, %v10852_v19, %v10853_v55 }
 0x5e2   : > { %15700 = vmatprep.mubr.bf16.mxu1 %v14158_v25  ;;  %v14118_v25 = vrot.slane %v10615_v52, 9  ;;  %v10859_v33 = vrot.slane %v10857_v60, 4  ;;  %v10860_v5 = vrot.slane %v16828_v6, 5  ;;  %v11908_v40 = vmul.f32 %v20032_v34, %v11768_v47  ;;  %v16829_v52 = vld [vmem:[#allocation2 + $0x124] sm:$0xf] }
 0x5e3   : > { %v11910_v46 = vmul.f32 %v20032_v34, %v11770_v61  ;;  %v14160_v16 = vcombine.low %v10845_v20, %v10848_v62  ;;  %v12172_v21 = vmax.f32 %v12044_v26, 0.0  ;;  %v12174_v8 = vmax.f32 %v12046_v27, 0.0  ;;  %v21233_v20 = vld [vmem:[%s17094_s14 + $0x1f0] sm:$0xff]  ;;  %v21236_v62 = vld [vmem:[%s17094_s14 + $0x1f8] sm:$0xff] }
 0x5e4   : > { %v11913_v14 = vmul.f32 %v20044_v57, %v11773_v45  ;;  %v12177_v23 = vmax.f32 %v12049_v48, 0.0  ;;  %v12179_v29 = vmax.f32 %v12051_v44, 0.0  ;;  %v11915_v28 = vmul.f32 %v20044_v57, %v11775_v39  ;;  %v16830_v26 = vld [vmem:[#allocation2 + $0x130] sm:$0xf] }
 0x5e5   : > { %12677 = vmatmul.mubr.bf16.gmra.mrb[60].mxu0 %v12290_v13  ;;  %v14161_v19 = vcombine.low %v21216_v22, %v21220_v0  ;;  %v10858_v55 = vsel %vm18002_vm11, %v14118_v25, %v10857_v60  ;;  %v10863_v41 = vrot.slane %v16829_v52, 5  ;;  %v10861_v61 = vsel %vm18002_vm11, %v10859_v33, %v10860_v5  ;;  %v10616_v13 = vld [vmem:[#allocation2 + $0x12c] sm:$0xe] }
 0x5e6   : > { %12684 = vmatprep.mubr.bf16.mxu0 %v12293_v24  ;;  %v21230_v47 = vpop.f32.mrb[216].mxu0  ;;  %v10870_v27 = vrot.slane %v16830_v26, 5  ;;  %v12048_v24 = vadd.f32 %v20047_v30, %v11908_v40  ;;  %v12050_v60 = vadd.f32 %v20047_v30, %v11910_v46  ;;  %v12292_v48 = vpack.c.bf16 %v12174_v8, %v12172_v21 }
 0x5e7   : > { %21878 = vst [vmem:[#allocation52_spill] sm:$0xff] %v21230_v47  ;;  %v12480_v45 = vpop.f32.mrb[217].mxu0  ;;  %v12053_v39 = vadd.f32 %v20052_v7, %v11913_v14  ;;  %v11772_v22 = vunpack.c.l.bf16 %v21196_v31  ;;  %v12295_v25 = vpack.c.bf16 %v12179_v29, %v12177_v23  ;;  %v12055_v33 = vadd.f32 %v20052_v7, %v11915_v28 }
 0x5e8   : > { %v21242_v44 = vpop.f32.mrb[218].mxu0  ;;  %v11777_v6 = vunpack.c.h.bf16 %v21233_v20  ;;  %v11779_v40 = vunpack.c.h.bf16 %v21236_v62  ;;  %v10862_v52 = vrot.slane %v10860_v5, 4  ;;  %v10865_v46 = vrot.slane %v10863_v41, 4  ;;  %v16832_v45 = vld [vmem:[#allocation2 + $0x134] sm:$0xf] }
 0x5e9   : > { %15701 = vmatmul.mubr.bf16.gmra.mrb[56].mxu1 %v14159_v37  ;;  %21879 = vst [vmem:[#allocation53_spill] sm:$0xff] %v21242_v44  ;;  %v11774_v37 = vunpack.c.l.bf16 %v21201_v17  ;;  %v12483_v0 = vpop.f32.mrb[219].mxu0  ;;  %v14119_v8 = vrot.slane %v10616_v13, 9  ;;  %v10872_v26 = vrot.slane %v10870_v27, 4  ;;  %v10873_v14 = vrot.slane %v16832_v45, 5 }
 0x5ea   : > { %15704 = vmatprep.mubr.bf16.mxu1 %v14160_v16  ;;  %v16831_v16 = vld [vmem:[#allocation2 + $0x128] sm:$0x1]  ;;  %v12176_v44 = vmax.f32 %v12048_v24, 0.0  ;;  %v12178_v31 = vmax.f32 %v12050_v60, 0.0  ;;  %v14162_v47 = vcombine.low %v10858_v55, %v10861_v61  ;;  %v11912_v17 = vmul.f32 %v20032_v34, %v11772_v22  ;;  %v16833_v60 = vld [vmem:[#allocation2 + $0x138] sm:$0xf] }
 0x5eb   : > { %v10866_v21 = vrot.slane %v16831_v16, 5  ;;  %v11914_v23 = vmul.f32 %v20032_v34, %v11774_v37  ;;  %v12181_v29 = vmax.f32 %v12053_v39, 0.0  ;;  %v12183_v28 = vmax.f32 %v12055_v33, 0.0  ;;  %v10617_v22 = vld [vmem:[#allocation2 + $0x140] sm:$0xe] }
 0x5ec   : > { %v11917_v5 = vmul.f32 %v20044_v57, %v11777_v6  ;;  %v11919_v0 = vmul.f32 %v20044_v57, %v11779_v40  ;;  %v10864_v13 = vsel %vm18002_vm11, %v10862_v52, %v10863_v41  ;;  %v10871_v55 = vsel %vm18002_vm11, %v14119_v8, %v10870_v27  ;;  %v16835_v8 = vld [vmem:[#allocation2 + $0x13c] sm:$0x1] }
 0x5ed   : > { %12685 = vmatmul.mubr.bf16.gmra.mrb[64].mxu0 %v12292_v48  ;;  %v10867_v24 = vsel %vm18002_vm11, %v10865_v46, %v10866_v21  ;;  %v10874_v61 = vsel %vm18002_vm11, %v10872_v26, %v10873_v14  ;;  %v10876_v48 = vrot.slane %v16833_v60, 5  ;;  %v12294_v39 = vpack.c.bf16 %v12178_v31, %v12176_v44 }
 0x5ee   : > { %12692 = vmatprep.mubr.bf16.mxu0 %v12295_v25  ;;  %v12052_v57 = vadd.f32 %v20047_v30, %v11912_v17  ;;  %v12054_v37 = vadd.f32 %v20047_v30, %v11914_v23  ;;  %v11776_v41 = vunpack.c.l.bf16 %v21233_v20  ;;  %v11778_v25 = vunpack.c.l.bf16 %v21236_v62 }
 0x5ef   : > { %v12297_v27 = vpack.c.bf16 %v12183_v28, %v12181_v29  ;;  %v12057_v40 = vadd.f32 %v20052_v7, %v11917_v5  ;;  %v12059_v52 = vadd.f32 %v20052_v7, %v11919_v0  ;;  %v14163_v44 = vcombine.low %v10864_v13, %v10867_v24  ;;  %v16836_v7 = vld [vmem:[#allocation2 + $0x148] sm:$0xf]  ;;  %v16837_v24 = vld [vmem:[#allocation2 + $0x14c] sm:$0xf] }
 0x5f0   : > { %v14164_v16 = vcombine.low %v10871_v55, %v10874_v61  ;;  %v10878_v21 = vrot.slane %v10876_v48, 4  ;;  %v10879_v26 = vrot.slane %v16835_v8, 5  ;;  %v14120_v45 = vrot.slane %v10617_v22, 9  ;;  %v16840_v8 = vld [vmem:[#allocation2 + $0x15c] sm:$0xf] }
 0x5f1   : > { %15705 = vmatmul.mubr.bf16.gmra.mrb[60].mxu1 %v14161_v19  ;;  %v16834_v19 = vld [vmem:[#allocation2 + $0x144] sm:$0xf]  ;;  %v21266_v6 = vpop.f32.mrb[220].mxu0  ;;  %v12180_v31 = vmax.f32 %v12052_v57, 0.0  ;;  %v12182_v17 = vmax.f32 %v12054_v37, 0.0  ;;  %v11916_v23 = vmul.f32 %v20032_v34, %v11776_v41  ;;  %v11918_v29 = vmul.f32 %v20032_v34, %v11778_v25 }
 0x5f2   : > { %15708 = vmatprep.mubr.bf16.mxu1 %v14162_v47  ;;  %v10883_v33 = vrot.slane %v16834_v19, 5  ;;  %v10875_v47 = vrot.slane %v10873_v14, 4  ;;  %v12488_v46 = vpop.f32.mrb[221].mxu0  ;;  %v10886_v5 = vrot.slane %v16836_v7, 5  ;;  %v12185_v14 = vmax.f32 %v12057_v40, 0.0 }
 0x5f3   : > { %v21270_v20 = vpop.f32.mrb[222].mxu0  ;;  %v12187_v0 = vmax.f32 %v12059_v52, 0.0  ;;  %v10889_v55 = vrot.slane %v16837_v24, 5  ;;  %v10880_v61 = vsel %vm18002_vm11, %v10878_v21, %v10879_v26  ;;  %v12296_v60 = vpack.c.bf16 %v12182_v17, %v12180_v31  ;;  %v16838_v37 = vld [vmem:[#allocation2 + $0x158] sm:$0xf] }
 0x5f4   : > { %v12491_v62 = vpop.f32.mrb[223].mxu0  ;;  %v10885_v28 = vrot.slane %v10883_v33, 4  ;;  %v10877_v13 = vsel %vm18002_vm11, %v10875_v47, %v10876_v48  ;;  %v12058_v34 = vadd.f32 %v20047_v30, %v11918_v29  ;;  %v10884_v22 = vsel %vm18002_vm11, %v14120_v45, %v10883_v33  ;;  %v10618_v25 = vld [vmem:[#allocation2 + $0x154] sm:$0xe]  ;;  %v16841_v31 = vld [vmem:[#allocation2 + $0x160] sm:$0xf] }
 0x5f5   : > { %12693 = vmatmul.mubr.bf16.gmra.mrb[68].mxu0 %v12294_v39  ;;  %v12056_v39 = vadd.f32 %v20047_v30, %v11916_v23  ;;  %v10896_v41 = vrot.slane %v16838_v37, 5  ;;  %v12299_v48 = vpack.c.bf16 %v12187_v0, %v12185_v14  ;;  %v14165_v19 = vcombine.low %v10877_v13, %v10880_v61  ;;  %v16842_v61 = vld [vmem:[#allocation2 + $0x164] sm:$0x1] }
 0x5f6   : > { %12700 = vmatprep.mubr.bf16.mxu0 %v12297_v27  ;;  %v10887_v57 = vsel %vm18002_vm11, %v10885_v28, %v10886_v5  ;;  %v10888_v27 = vrot.slane %v10886_v5, 4  ;;  %v10891_v40 = vrot.slane %v10889_v55, 4  ;;  %v14121_v30 = vrot.slane %v10618_v25, 9 }
 0x5f7   : > { %v14166_v52 = vcombine.low %v10884_v22, %v10887_v57  ;;  %v12184_v46 = vmax.f32 %v12056_v39, 0.0  ;;  %v10898_v21 = vrot.slane %v10896_v41, 4  ;;  %v10899_v33 = vrot.slane %v16840_v8, 5 }
 0x5f8   : > { %v10890_v45 = vsel %vm18002_vm11, %v10888_v27, %v10889_v55  ;;  %v10902_v17 = vrot.slane %v16841_v31, 5  ;;  %v10897_v28 = vsel %vm18002_vm11, %v14121_v30, %v10896_v41 }
 0x5f9   : > { %15709 = vmatmul.mubr.bf16.gmra.mrb[0].mxu1 %v14163_v44  ;;  %v16839_v44 = vld [vmem:[#allocation2 + $0x150] sm:$0x1]  ;;  %v10900_v7 = vsel %vm18002_vm11, %v10898_v21, %v10899_v33  ;;  %v10901_v24 = vrot.slane %v10899_v33, 4 }
 0x5fa   : > { %15712 = vmatprep.mubr.bf16.mxu1 %v14164_v16  ;;  %v10892_v47 = vrot.slane %v16839_v44, 5  ;;  %v12186_v16 = vmax.f32 %v12058_v34, 0.0  ;;  %v14168_v13 = vcombine.low %v10897_v28, %v10900_v7  ;;  %v10904_v55 = vrot.slane %v10902_v17, 4 }
 0x5fb   : > { %v10903_v34 = vsel %vm18002_vm11, %v10901_v24, %v10902_v17 }
 0x5fc   : > { %v10893_v62 = vsel %vm18002_vm11, %v10891_v40, %v10892_v47  ;;  %v12298_v29 = vpack.c.bf16 %v12186_v16, %v12184_v46 }
 0x5fd   : > { %12701 = vmatmul.mubr.bf16.gmra.mrb[72].mxu0 %v12296_v60  ;;  %v14167_v0 = vcombine.low %v10890_v45, %v10893_v62  ;;  %v10905_v60 = vrot.slane %v16842_v61, 5 }
 0x5fe   : > { %12708 = vmatprep.mubr.bf16.mxu0 %v12299_v48  ;;  %v21284_v26 = vpop.f32.mrb[224].mxu0 }
 0x5ff   : > { %v12496_v23 = vpop.f32.mrb[225].mxu0  ;;  %v10906_v22 = vsel %vm18002_vm11, %v10904_v55, %v10905_v60 }
 0x600   : > { %v21294_v5 = vpop.f32.mrb[226].mxu0  ;;  %v14169_v48 = vcombine.low %v10903_v34, %v10906_v22 }
 0x601   : > { %15713 = vmatmul.mubr.bf16.gmra.mrb[4].mxu1 %v14165_v19  ;;  %v12499_v14 = vpop.f32.mrb[227].mxu0 }
 0x602   : > { %15716 = vmatprep.mubr.bf16.mxu1 %v14166_v52 }
 0x605   : > { %12709 = vmatmul.mubr.bf16.gmra.mrb[76].mxu0 %v12298_v29 }
 0x607   : > { %v21296_v39 = vpop.f32.mrb[228].mxu0 }
 0x608   : > { %v12504_v57 = vpop.f32.mrb[229].mxu0 }
 0x609   : > { %15717 = vmatmul.mubr.bf16.gmra.mrb[8].mxu1 %v14167_v0  ;;  %v21302_v37 = vpop.f32.mrb[230].mxu0 }
 0x60a   : > { %15720 = vmatprep.mubr.bf16.mxu1 %v14168_v13  ;;  %v12507_v41 = vpop.f32.mrb[231].mxu0 }
 0x610   : > { %v21304_v25 = vpop.f32.mrb[232].mxu0 }
 0x611   : > { %15721 = vmatmul.mubr.bf16.gmra.mrb[12].mxu1 %v14169_v48  ;;  %v12512_v19 = vpop.f32.mrb[233].mxu0 }
 0x612   : > { %v21306_v27 = vpop.f32.mrb[234].mxu0 }
 0x613   : > { %v12515_v40 = vpop.f32.mrb[235].mxu0 }
 0x618   : > { %v21308_v52 = vpop.f32.mrb[236].mxu0 }
 0x619   : > { %v12520_v44 = vpop.f32.mrb[237].mxu0 }
 0x61a   : > { %v21310_v47 = vpop.f32.mrb[238].mxu0 }
 0x61b   : > { %v12523_v46 = vpop.f32.mrb[239].mxu0 }
 0x620   : > { %v21312_v56 = vpop.f32.mrb[240].mxu0 }
 0x621   : > { %v12528_v16 = vpop.f32.mrb[241].mxu0 }
 0x622   : > { %v21314_v30 = vpop.f32.mrb[242].mxu0 }
 0x623   : > { %v12531_v21 = vpop.f32.mrb[243].mxu0 }
 0x628   : > { %v21316_v8 = vpop.f32.mrb[244].mxu0 }
 0x629   : > { %v12536_v33 = vpop.f32.mrb[245].mxu0 }
 0x62a   : > { %v21318_v45 = vpop.f32.mrb[246].mxu0 }
 0x62b   : > { %v12539_v62 = vpop.f32.mrb[247].mxu0 }
 0x630   : > { %v21320_v31 = vpop.f32.mrb[248].mxu0 }
 0x631   : > { %v12544_v17 = vpop.f32.mrb[249].mxu0 }
 0x632   : > { %v21322_v23 = vpop.f32.mrb[250].mxu0 }
 0x633   : > { %v12547_v29 = vpop.f32.mrb[251].mxu0 }
 0x638   : > { %v21324_v28 = vpop.f32.mrb[252].mxu0 }
 0x639   : > { %v12552_v7 = vpop.f32.mrb[253].mxu0 }
 0x63a   : > { %v21326_v14 = vpop.f32.mrb[254].mxu0 }
 0x63b   : > { %v12555_v0 = vpop.f32.mrb[255].mxu0 }
 0x640   : > { %v21328_v13 = vpop.f32.mrb[0].mxu0 }
 0x641   : > { %v12560_v24 = vpop.f32.mrb[1].mxu0 }
 0x642   : > { %v21330_v55 = vpop.f32.mrb[2].mxu0 }
 0x643   : > { %v12563_v61 = vpop.f32.mrb[3].mxu0 }
 0x648   : > { %v21332_v60 = vpop.f32.mrb[4].mxu0 }
 0x649   : > { %v12568_v34 = vpop.f32.mrb[5].mxu0 }
 0x64a   : > { %v21334_v22 = vpop.f32.mrb[6].mxu0  ;;  %v21355_v34 = vld [vmem:[%s21887_s22] ss:$0 sm:$0xff] }
 0x64b   : > { %v12571_v57 = vpop.f32.mrb[7].mxu0 }
 0x650   : > { %v21336_v41 = vpop.f32.mrb[8].mxu0 }
 0x651   : > { %21880 = vst [vmem:[#allocation54_spill] sm:$0xff] %v21336_v41  ;;  %v12576_v48 = vpop.f32.mrb[9].mxu0 }
 0x652   : > { %v21338_v19 = vpop.f32.mrb[10].mxu0 }
 0x653   : > { %21881 = vst [vmem:[#allocation55_spill] sm:$0xff] %v21338_v19  ;;  %v12579_v40 = vpop.f32.mrb[11].mxu0 }
 0x658   : > { %v21340_v44 = vpop.f32.mrb[12].mxu0 }
 0x659   : > { %v12584_v46 = vpop.f32.mrb[13].mxu0 }
 0x65a   : > { %v21342_v16 = vpop.f32.mrb[14].mxu0 }
 0x65b   : > { %21882 = vst [vmem:[#allocation56_spill] sm:$0xff] %v21342_v16  ;;  %v12587_v21 = vpop.f32.mrb[15].mxu0 }
 0x660   : > { %v21344_v33 = vpop.f32.mrb[16].mxu0 }
 0x661   : > { %21883 = vst [vmem:[#allocation57_spill] sm:$0xff] %v21344_v33  ;;  %v12592_v62 = vpop.f32.mrb[17].mxu0 }
 0x662   : > { %v21346_v17 = vpop.f32.mrb[18].mxu0 }
 0x663   : > { %21884 = vst [vmem:[#allocation58_spill] sm:$0xff] %v21346_v17  ;;  %v12595_v29 = vpop.f32.mrb[19].mxu0 }
 0x668   : > { %v21348_v7 = vpop.f32.mrb[20].mxu0 }
 0x669   : > { %21885 = vst [vmem:[#allocation59_spill] sm:$0xff] %v21348_v7  ;;  %v12600_v0 = vpop.f32.mrb[21].mxu0 }
 0x66a   : > { %v21350_v24 = vpop.f32.mrb[22].mxu0 }
 0x66b   : > { %21886 = vst [vmem:[#allocation60_spill] sm:$0xff] %v21350_v24  ;;  %v12603_v57 = vpop.f32.mrb[23].mxu0 }
 0x66c   : > { %v15662_v61 = vpop.f32.mrb[16].mxu1 }
 0x66d   : > { %v15820_v48 = vadd.f32 %v15662_v61, %v20291_v51  ;;  %v11134_v40 = vpop.f32.mrb[17].mxu1 }
 0x66e   : > { %v15821_v46 = vadd.f32 %v11134_v40, %v20318_v63  ;;  %v15663_v21 = vpop.f32.mrb[18].mxu1 }
 0x66f   : > { %v11462_v62 = vadd.f32 %v15820_v48, %v21355_v34  ;;  %v15822_v29 = vadd.f32 %v15663_v21, %v20326_v54  ;;  %v11137_v0 = vpop.f32.mrb[19].mxu1 }
 0x670   : > { %v11460_v17 = vadd.f32 %v15821_v46, %v21355_v34  ;;  %v15823_v24 = vadd.f32 %v11137_v0, %v20329_v9  ;;  %v21364_v7 = vpop.f32.mrb[24].mxu0 }
 0x671   : > { %v11463_v33 = vadd.f32 %v15822_v29, %v21355_v34  ;;  %21888 = vst [vmem:[#allocation61_spill] sm:$0xff] %v21364_v7  ;;  %v12608_v51 = vpop.f32.mrb[25].mxu0  ;;  %v11526_v61 = vmax.f32 %v11462_v62, 0.0 }
 0x672   : > { %v11461_v57 = vadd.f32 %v15823_v24, %v21355_v34  ;;  %v21367_v63 = vpop.f32.mrb[26].mxu0  ;;  %v11524_v40 = vmax.f32 %v11460_v17, 0.0  ;;  %v21890_v24 = vld [vmem:[#allocation8_spill] sm:$0xff] }
 0x673   : > { %v11527_v19 = vmax.f32 %v11463_v33, 0.0  ;;  %21889 = vst [vmem:[#allocation62_spill] sm:$0xff] %v21367_v63  ;;  %v12611_v54 = vpop.f32.mrb[27].mxu0  ;;  %v21891_v63 = vld [vmem:[#allocation25_spill] sm:$0xff] }
 0x674   : > { %v11525_v48 = vmax.f32 %v11461_v57, 0.0  ;;  %v15666_v16 = vpop.f32.mrb[20].mxu1 }
 0x675   : > { %v12189_v21 = vpack.c.bf16 %v11527_v19, %v11526_v61  ;;  %v15824_v46 = vadd.f32 %v15666_v16, %v20356_v43  ;;  %v11150_v41 = vpop.f32.mrb[21].mxu1 }
 0x676   : > { %v15825_v9 = vadd.f32 %v11150_v41, %v20363_v1  ;;  %v15667_v29 = vpop.f32.mrb[22].mxu1  ;;  %v12188_v0 = vpack.c.bf16 %v11525_v48, %v11524_v40 }
 0x677   : > { %v11466_v7 = vadd.f32 %v15824_v46, %v21355_v34  ;;  %v15826_v51 = vadd.f32 %v15667_v29, %v21890_v24  ;;  %v11153_v62 = vpop.f32.mrb[23].mxu1  ;;  %v21895_v24 = vld [vmem:[#allocation27_spill] sm:$0xff] }
 0x678   : > { %v11464_v33 = vadd.f32 %v15825_v9, %v21355_v34  ;;  %v15827_v17 = vadd.f32 %v11153_v62, %v21891_v63  ;;  %15740 = vmatprep.mubr.bf16.mxu0 %v12188_v0  ;;  %v21376_v19 = vpop.f32.mrb[28].mxu0  ;;  %v21894_v9 = vld [vmem:[#allocation26_spill] sm:$0xff] }
 0x679   : > { %v11467_v57 = vadd.f32 %v15826_v51, %v21355_v34  ;;  %15741 = vmatmul.mubr.bf16.vlgmr.msra.gmra.mrb[80].mxu0 %v12189_v21  ;;  %21892 = vst [vmem:[#allocation8_spill] sm:$0xff] %v21376_v19  ;;  %v12616_v1 = vpop.f32.mrb[29].mxu0  ;;  %v11530_v41 = vmax.f32 %v11466_v7, 0.0 }
 0x67a   : > { %v11465_v43 = vadd.f32 %v15827_v17, %v21355_v34  ;;  %v21379_v61 = vpop.f32.mrb[30].mxu0  ;;  %v11528_v40 = vmax.f32 %v11464_v33, 0.0  ;;  %v21896_v17 = vld [vmem:[#allocation28_spill] sm:$0xff] }
 0x67b   : > { %v11531_v16 = vmax.f32 %v11467_v57, 0.0  ;;  %21893 = vst [vmem:[#allocation25_spill] sm:$0xff] %v21379_v61  ;;  %v12619_v46 = vpop.f32.mrb[31].mxu0  ;;  %v21897_v61 = vld [vmem:[#allocation29_spill] sm:$0xff] }
 0x67c   : > { %v11529_v48 = vmax.f32 %v11465_v43, 0.0  ;;  %v15670_v54 = vpop.f32.mrb[24].mxu1 }
 0x67d   : > { %v15828_v29 = vadd.f32 %v15670_v54, %v21894_v9  ;;  %v11166_v63 = vpop.f32.mrb[25].mxu1  ;;  %v12191_v0 = vpack.c.bf16 %v11531_v16, %v11530_v41 }
 0x67e   : > { %v15829_v51 = vadd.f32 %v11166_v63, %v21895_v24  ;;  %v15671_v21 = vpop.f32.mrb[26].mxu1  ;;  %v12190_v62 = vpack.c.bf16 %v11529_v48, %v11528_v40 }
 0x67f   : > { %v11470_v19 = vadd.f32 %v15828_v29, %v21355_v34  ;;  %v15830_v1 = vadd.f32 %v15671_v21, %v21896_v17  ;;  %v11169_v7 = vpop.f32.mrb[27].mxu1  ;;  %v21901_v17 = vld [vmem:[#allocation31_spill] sm:$0xff] }
 0x680   : > { %v11468_v57 = vadd.f32 %v15829_v51, %v21355_v34  ;;  %v15831_v33 = vadd.f32 %v11169_v7, %v21897_v61  ;;  %15744 = vmatprep.mubr.bf16.mxu0 %v12190_v62  ;;  %v21388_v54 = vpop.f32.mrb[32].mxu0  ;;  %v21900_v51 = vld [vmem:[#allocation30_spill] sm:$0xff] }
 0x681   : > { %v11471_v43 = vadd.f32 %v15830_v1, %v21355_v34  ;;  %15745 = vmatmul.mubr.bf16.gmra.mrb[84].mxu0 %v12191_v0  ;;  %21898 = vst [vmem:[#allocation26_spill] sm:$0xff] %v21388_v54  ;;  %v12624_v16 = vpop.f32.mrb[33].mxu0  ;;  %v11534_v46 = vmax.f32 %v11470_v19, 0.0 }
 0x682   : > { %v11469_v41 = vadd.f32 %v15831_v33, %v21355_v34  ;;  %v21391_v48 = vpop.f32.mrb[34].mxu0  ;;  %v11532_v9 = vmax.f32 %v11468_v57, 0.0  ;;  %v21902_v33 = vld [vmem:[#allocation32_spill] sm:$0xff] }
 0x683   : > { %v11535_v40 = vmax.f32 %v11471_v43, 0.0  ;;  %21899 = vst [vmem:[#allocation27_spill] sm:$0xff] %v21391_v48  ;;  %v12627_v24 = vpop.f32.mrb[35].mxu0  ;;  %v21903_v48 = vld [vmem:[#allocation33_spill] sm:$0xff] }
 0x684   : > { %v11533_v29 = vmax.f32 %v11469_v41, 0.0  ;;  %v15674_v63 = vpop.f32.mrb[28].mxu1 }
 0x685   : > { %v15832_v21 = vadd.f32 %v15674_v63, %v21900_v51  ;;  %v11182_v61 = vpop.f32.mrb[29].mxu1  ;;  %v12193_v62 = vpack.c.bf16 %v11535_v40, %v11534_v46 }
 0x686   : > { %v15833_v1 = vadd.f32 %v11182_v61, %v21901_v17  ;;  %v15675_v0 = vpop.f32.mrb[30].mxu1  ;;  %v12192_v7 = vpack.c.bf16 %v11533_v29, %v11532_v9 }
 0x687   : > { %v11474_v54 = vadd.f32 %v15832_v21, %v21355_v34  ;;  %v15834_v16 = vadd.f32 %v15675_v0, %v21902_v33  ;;  %v11185_v19 = vpop.f32.mrb[31].mxu1  ;;  %v21907_v33 = vld [vmem:[#allocation35_spill] sm:$0xff] }
 0x688   : > { %v11472_v43 = vadd.f32 %v15833_v1, %v21355_v34  ;;  %v15835_v57 = vadd.f32 %v11185_v19, %v21903_v48  ;;  %15748 = vmatprep.mubr.bf16.mxu0 %v12192_v7  ;;  %v21400_v63 = vpop.f32.mrb[36].mxu0  ;;  %v21906_v1 = vld [vmem:[#allocation34_spill] sm:$0xff] }
 0x689   : > { %v11475_v41 = vadd.f32 %v15834_v16, %v21355_v34  ;;  %15749 = vmatmul.mubr.bf16.gmra.mrb[88].mxu0 %v12193_v62  ;;  %21904 = vst [vmem:[#allocation28_spill] sm:$0xff] %v21400_v63  ;;  %v12632_v40 = vpop.f32.mrb[37].mxu0  ;;  %v11538_v24 = vmax.f32 %v11474_v54, 0.0 }
 0x68a   : > { %v11473_v46 = vadd.f32 %v15835_v57, %v21355_v34  ;;  %v21403_v29 = vpop.f32.mrb[38].mxu0  ;;  %v11536_v51 = vmax.f32 %v11472_v43, 0.0  ;;  %v21908_v57 = vld [vmem:[#allocation36_spill] sm:$0xff] }
 0x68b   : > { %v11539_v9 = vmax.f32 %v11475_v41, 0.0  ;;  %21905 = vst [vmem:[#allocation29_spill] sm:$0xff] %v21403_v29  ;;  %v12635_v17 = vpop.f32.mrb[39].mxu0  ;;  %v21909_v29 = vld [vmem:[#allocation37_spill] sm:$0xff] }
 0x68c   : > { %v11537_v21 = vmax.f32 %v11473_v46, 0.0  ;;  %v15678_v61 = vpop.f32.mrb[32].mxu1 }
 0x68d   : > { %v15836_v0 = vadd.f32 %v15678_v61, %v21906_v1  ;;  %v11198_v48 = vpop.f32.mrb[33].mxu1  ;;  %v12195_v7 = vpack.c.bf16 %v11539_v9, %v11538_v24 }
 0x68e   : > { %v15837_v16 = vadd.f32 %v11198_v48, %v21907_v33  ;;  %v15679_v62 = vpop.f32.mrb[34].mxu1  ;;  %v12194_v19 = vpack.c.bf16 %v11537_v21, %v11536_v51 }
 0x68f   : > { %v11478_v63 = vadd.f32 %v15836_v0, %v21355_v34  ;;  %v15838_v40 = vadd.f32 %v15679_v62, %v21908_v57  ;;  %v11201_v54 = vpop.f32.mrb[35].mxu1 }
 0x690   : > { %v11476_v41 = vadd.f32 %v15837_v16, %v21355_v34  ;;  %v15839_v43 = vadd.f32 %v11201_v54, %v21909_v29  ;;  %15752 = vmatprep.mubr.bf16.mxu0 %v12194_v19  ;;  %v21412_v61 = vpop.f32.mrb[40].mxu0 }
 0x691   : > { %v11479_v46 = vadd.f32 %v15838_v40, %v21355_v34  ;;  %15753 = vmatmul.mubr.bf16.gmra.mrb[92].mxu0 %v12195_v7  ;;  %v12640_v9 = vpop.f32.mrb[41].mxu0  ;;  %v11542_v17 = vmax.f32 %v11478_v63, 0.0 }
 0x692   : > { %v11477_v24 = vadd.f32 %v15839_v43, %v21355_v34  ;;  %v21415_v21 = vpop.f32.mrb[42].mxu0  ;;  %v11540_v1 = vmax.f32 %v11476_v41, 0.0 }
 0x693   : > { %v11543_v51 = vmax.f32 %v11479_v46, 0.0  ;;  %v12643_v33 = vpop.f32.mrb[43].mxu0 }
 0x694   : > { %v11541_v0 = vmax.f32 %v11477_v24, 0.0  ;;  %v15682_v48 = vpop.f32.mrb[36].mxu1 }
 0x695   : > { %v15840_v16 = vadd.f32 %v15682_v48, %v20507_v53  ;;  %v11214_v29 = vpop.f32.mrb[37].mxu1  ;;  %v12197_v62 = vpack.c.bf16 %v11543_v51, %v11542_v17 }
 0x696   : > { %v15841_v19 = vadd.f32 %v11214_v29, %v20516_v10  ;;  %v15683_v7 = vpop.f32.mrb[38].mxu1  ;;  %v12196_v57 = vpack.c.bf16 %v11541_v0, %v11540_v1 }
 0x697   : > { %v11482_v40 = vadd.f32 %v15840_v16, %v21355_v34  ;;  %v15842_v54 = vadd.f32 %v15683_v7, %v20523_v42  ;;  %v11217_v63 = vpop.f32.mrb[39].mxu1 }
 0x698   : > { %v11480_v43 = vadd.f32 %v15841_v19, %v21355_v34  ;;  %v15843_v41 = vadd.f32 %v11217_v63, %v20530_v36  ;;  %15756 = vmatprep.mubr.bf16.mxu0 %v12196_v57  ;;  %v21424_v53 = vpop.f32.mrb[44].mxu0 }
 0x699   : > { %v11483_v46 = vadd.f32 %v15842_v54, %v21355_v34  ;;  %15757 = vmatmul.mubr.bf16.gmra.mrb[96].mxu0 %v12197_v62  ;;  %v12648_v10 = vpop.f32.mrb[45].mxu0  ;;  %v11546_v9 = vmax.f32 %v11482_v40, 0.0 }
 0x69a   : > { %v11481_v24 = vadd.f32 %v15843_v41, %v21355_v34  ;;  %v21427_v51 = vpop.f32.mrb[46].mxu0  ;;  %v11544_v1 = vmax.f32 %v11480_v43, 0.0 }
 0x69b   : > { %v11547_v17 = vmax.f32 %v11483_v46, 0.0  ;;  %v12651_v48 = vpop.f32.mrb[47].mxu0 }
 0x69c   : > { %v11545_v42 = vmax.f32 %v11481_v24, 0.0  ;;  %v15686_v0 = vpop.f32.mrb[40].mxu1  ;;  %v21910_v48 = vld [vmem:[#allocation38_spill] sm:$0xff] }
 0x69d   : > { %v15844_v33 = vadd.f32 %v15686_v0, %v20566_v38  ;;  %v11230_v36 = vpop.f32.mrb[41].mxu1  ;;  %v12199_v16 = vpack.c.bf16 %v11547_v17, %v11546_v9 }
 0x69e   : > { %v15845_v29 = vadd.f32 %v11230_v36, %v20576_v11  ;;  %v15687_v62 = vpop.f32.mrb[42].mxu1  ;;  %v12198_v19 = vpack.c.bf16 %v11545_v42, %v11544_v1 }
 0x69f   : > { %v11486_v7 = vadd.f32 %v15844_v33, %v21355_v34  ;;  %v15846_v57 = vadd.f32 %v15687_v62, %v20583_v2  ;;  %v11233_v40 = vpop.f32.mrb[43].mxu1  ;;  %v21911_v62 = vld [vmem:[#allocation39_spill] sm:$0xff] }
 0x6a0   : > { %v11484_v54 = vadd.f32 %v15845_v29, %v21355_v34  ;;  %v15847_v63 = vadd.f32 %v11233_v40, %v20590_v35  ;;  %15760 = vmatprep.mubr.bf16.mxu0 %v12198_v19  ;;  %v21436_v38 = vpop.f32.mrb[48].mxu0  ;;  %v21912_v40 = vld [vmem:[#allocation40_spill] sm:$0xff] }
 0x6a1   : > { %v11487_v43 = vadd.f32 %v15846_v57, %v21355_v34  ;;  %15761 = vmatmul.mubr.bf16.gmra.mrb[100].mxu0 %v12199_v16  ;;  %v12656_v11 = vpop.f32.mrb[49].mxu0  ;;  %v11550_v46 = vmax.f32 %v11486_v7, 0.0 }
 0x6a2   : > { %v11485_v41 = vadd.f32 %v15847_v63, %v21355_v34  ;;  %v21439_v10 = vpop.f32.mrb[50].mxu0  ;;  %v11548_v9 = vmax.f32 %v11484_v54, 0.0 }
 0x6a3   : > { %v11551_v24 = vmax.f32 %v11487_v43, 0.0  ;;  %v12659_v1 = vpop.f32.mrb[51].mxu0 }
 0x6a4   : > { %v11549_v2 = vmax.f32 %v11485_v41, 0.0  ;;  %v15690_v17 = vpop.f32.mrb[44].mxu1 }
 0x6a5   : > { %v15848_v42 = vadd.f32 %v15690_v17, %v20603_v49  ;;  %v11246_v35 = vpop.f32.mrb[45].mxu1  ;;  %v12201_v0 = vpack.c.bf16 %v11551_v24, %v11550_v46 }
 0x6a6   : > { %v15849_v33 = vadd.f32 %v11246_v35, %v21910_v48  ;;  %v15691_v36 = vpop.f32.mrb[46].mxu1  ;;  %v12200_v16 = vpack.c.bf16 %v11549_v2, %v11548_v9 }
 0x6a7   : > { %v11490_v29 = vadd.f32 %v15848_v42, %v21355_v34  ;;  %v15850_v19 = vadd.f32 %v15691_v36, %v21911_v62  ;;  %v11249_v7 = vpop.f32.mrb[47].mxu1  ;;  %v21913_v42 = vld [vmem:[#allocation41_spill] sm:$0xff]  ;;  %v21914_v36 = vld [vmem:[#allocation42_spill] sm:$0xff] }
 0x6a8   : > { %v11488_v57 = vadd.f32 %v15849_v33, %v21355_v34  ;;  %v15851_v54 = vadd.f32 %v11249_v7, %v21912_v40  ;;  %15764 = vmatprep.mubr.bf16.mxu0 %v12200_v16  ;;  %v21448_v49 = vpop.f32.mrb[52].mxu0  ;;  %v21915_v7 = vld [vmem:[#allocation43_spill] sm:$0xff] }
 0x6a9   : > { %v11491_v63 = vadd.f32 %v15850_v19, %v21355_v34  ;;  %15765 = vmatmul.mubr.bf16.gmra.mrb[104].mxu0 %v12201_v0  ;;  %v12664_v41 = vpop.f32.mrb[53].mxu0  ;;  %v11554_v11 = vmax.f32 %v11490_v29, 0.0 }
 0x6aa   : > { %v11489_v43 = vadd.f32 %v15851_v54, %v21355_v34  ;;  %v21451_v24 = vpop.f32.mrb[54].mxu0  ;;  %v11552_v9 = vmax.f32 %v11488_v57, 0.0 }
 0x6ab   : > { %v11555_v46 = vmax.f32 %v11491_v63, 0.0  ;;  %v12667_v1 = vpop.f32.mrb[55].mxu0  ;;  %v21916_v63 = vld [vmem:[#allocation44_spill] sm:$0xff] }
 0x6ac   : > { %v11553_v2 = vmax.f32 %v11489_v43, 0.0  ;;  %v15694_v17 = vpop.f32.mrb[48].mxu1 }
 0x6ad   : > { %v15852_v35 = vadd.f32 %v15694_v17, %v21913_v42  ;;  %v11262_v48 = vpop.f32.mrb[49].mxu1  ;;  %v12203_v33 = vpack.c.bf16 %v11555_v46, %v11554_v11 }
 0x6ae   : > { %v15853_v16 = vadd.f32 %v11262_v48, %v21914_v36  ;;  %v15695_v0 = vpop.f32.mrb[50].mxu1  ;;  %v12202_v62 = vpack.c.bf16 %v11553_v2, %v11552_v9  ;;  %v21917_v36 = vld [vmem:[#allocation45_spill] sm:$0xff] }
 0x6af   : > { %v11494_v19 = vadd.f32 %v15852_v35, %v21355_v34  ;;  %v15854_v40 = vadd.f32 %v15695_v0, %v21915_v7  ;;  %v11265_v29 = vpop.f32.mrb[51].mxu1  ;;  %v21918_v7 = vld [vmem:[#allocation46_spill] sm:$0xff] }
 0x6b0   : > { %v11492_v54 = vadd.f32 %v15853_v16, %v21355_v34  ;;  %v15855_v57 = vadd.f32 %v11265_v29, %v21916_v63  ;;  %15768 = vmatprep.mubr.bf16.mxu0 %v12202_v62  ;;  %v21460_v41 = vpop.f32.mrb[56].mxu0 }
 0x6b1   : > { %v11495_v43 = vadd.f32 %v15854_v40, %v21355_v34  ;;  %15769 = vmatmul.mubr.bf16.gmra.mrb[108].mxu0 %v12203_v33  ;;  %v12672_v46 = vpop.f32.mrb[57].mxu0  ;;  %v11558_v17 = vmax.f32 %v11494_v19, 0.0 }
 0x6b2   : > { %v11493_v11 = vadd.f32 %v15855_v57, %v21355_v34  ;;  %v21463_v2 = vpop.f32.mrb[58].mxu0  ;;  %v11556_v1 = vmax.f32 %v11492_v54, 0.0  ;;  %v21919_v57 = vld [vmem:[#allocation47_spill] sm:$0xff] }
 0x6b3   : > { %v11559_v9 = vmax.f32 %v11495_v43, 0.0  ;;  %v12675_v48 = vpop.f32.mrb[59].mxu0 }
 0x6b4   : > { %v11557_v42 = vmax.f32 %v11493_v11, 0.0  ;;  %v15698_v35 = vpop.f32.mrb[52].mxu1 }
 0x6b5   : > { %v15856_v16 = vadd.f32 %v15698_v35, %v21917_v36  ;;  %v11278_v0 = vpop.f32.mrb[53].mxu1  ;;  %v12205_v62 = vpack.c.bf16 %v11559_v9, %v11558_v17 }
 0x6b6   : > { %v15857_v40 = vadd.f32 %v11278_v0, %v21918_v7  ;;  %v15699_v33 = vpop.f32.mrb[54].mxu1  ;;  %v12204_v29 = vpack.c.bf16 %v11557_v42, %v11556_v1 }
 0x6b7   : > { %v11498_v63 = vadd.f32 %v15856_v16, %v21355_v34  ;;  %v15858_v46 = vadd.f32 %v15699_v33, %v21919_v57  ;;  %v11281_v19 = vpop.f32.mrb[55].mxu1 }
 0x6b8   : > { %v11496_v43 = vadd.f32 %v15857_v40, %v21355_v34  ;;  %v15859_v54 = vadd.f32 %v11281_v19, %v20692_v15  ;;  %15772 = vmatprep.mubr.bf16.mxu0 %v12204_v29  ;;  %v21472_v35 = vpop.f32.mrb[60].mxu0 }
 0x6b9   : > { %v11499_v11 = vadd.f32 %v15858_v46, %v21355_v34  ;;  %15773 = vmatmul.mubr.bf16.gmra.mrb[112].mxu0 %v12205_v62  ;;  %v12680_v9 = vpop.f32.mrb[61].mxu0  ;;  %v11562_v48 = vmax.f32 %v11498_v63, 0.0 }
 0x6ba   : > { %v11497_v17 = vadd.f32 %v15859_v54, %v21355_v34  ;;  %v21475_v42 = vpop.f32.mrb[62].mxu0  ;;  %v11560_v36 = vmax.f32 %v11496_v43, 0.0 }
 0x6bb   : > { %v11563_v1 = vmax.f32 %v11499_v11, 0.0  ;;  %v12683_v7 = vpop.f32.mrb[63].mxu0 }
 0x6bc   : > { %v11561_v16 = vmax.f32 %v11497_v17, 0.0  ;;  %v15702_v0 = vpop.f32.mrb[56].mxu1  ;;  %v21922_v7 = vld [vmem:[#allocation48_spill] sm:$0xff] }
 0x6bd   : > { %v15860_v40 = vadd.f32 %v15702_v0, %v20708_v32  ;;  %v11294_v15 = vpop.f32.mrb[57].mxu1  ;;  %v12207_v33 = vpack.c.bf16 %v11563_v1, %v11562_v48 }
 0x6be   : > { %v15861_v29 = vadd.f32 %v11294_v15, %v20714_v12  ;;  %v15703_v62 = vpop.f32.mrb[58].mxu1  ;;  %v12206_v57 = vpack.c.bf16 %v11561_v16, %v11560_v36 }
 0x6bf   : > { %v11502_v46 = vadd.f32 %v15860_v40, %v21355_v34  ;;  %v15862_v19 = vadd.f32 %v15703_v62, %v20731_v4  ;;  %v11297_v63 = vpop.f32.mrb[59].mxu1 }
 0x6c0   : > { %v11500_v54 = vadd.f32 %v15861_v29, %v21355_v34  ;;  %v15863_v43 = vadd.f32 %v11297_v63, %v20740_v58  ;;  %15776 = vmatprep.mubr.bf16.mxu0 %v12206_v57  ;;  %v21484_v32 = vpop.f32.mrb[64].mxu0  ;;  %v21923_v29 = vld [vmem:[#allocation49_spill] sm:$0xff]  ;;  %v21924_v63 = vld [vmem:[#allocation50_spill] sm:$0xff] }
 0x6c1   : > { %v11503_v11 = vadd.f32 %v15862_v19, %v21355_v34  ;;  %15777 = vmatmul.mubr.bf16.gmra.mrb[116].mxu0 %v12207_v33  ;;  %21920 = vst [vmem:[#allocation30_spill] sm:$0xff] %v21484_v32  ;;  %v12688_v12 = vpop.f32.mrb[65].mxu0  ;;  %v11566_v9 = vmax.f32 %v11502_v46, 0.0 }
 0x6c2   : > { %v11501_v17 = vadd.f32 %v15863_v43, %v21355_v34  ;;  %v21487_v1 = vpop.f32.mrb[66].mxu0  ;;  %v11564_v36 = vmax.f32 %v11500_v54, 0.0  ;;  %v21925_v12 = vld [vmem:[#allocation51_spill] sm:$0xff] }
 0x6c3   : > { %v11567_v48 = vmax.f32 %v11503_v11, 0.0  ;;  %21921 = vst [vmem:[#allocation31_spill] sm:$0xff] %v21487_v1  ;;  %v12691_v0 = vpop.f32.mrb[67].mxu0 }
 0x6c4   : > { %v11565_v4 = vmax.f32 %v11501_v17, 0.0  ;;  %v15706_v16 = vpop.f32.mrb[60].mxu1 }
 0x6c5   : > { %v15864_v40 = vadd.f32 %v15706_v16, %v21922_v7  ;;  %v11310_v58 = vpop.f32.mrb[61].mxu1  ;;  %v12209_v15 = vpack.c.bf16 %v11567_v48, %v11566_v9 }
 0x6c6   : > { %v15865_v62 = vadd.f32 %v11310_v58, %v21923_v29  ;;  %v15707_v33 = vpop.f32.mrb[62].mxu1  ;;  %v12208_v57 = vpack.c.bf16 %v11565_v4, %v11564_v36 }
 0x6c7   : > { %v11506_v19 = vadd.f32 %v15864_v40, %v21355_v34  ;;  %v15866_v43 = vadd.f32 %v15707_v33, %v21924_v63  ;;  %v11313_v46 = vpop.f32.mrb[63].mxu1 }
 0x6c8   : > { %v11504_v11 = vadd.f32 %v15865_v62, %v21355_v34  ;;  %v15867_v54 = vadd.f32 %v11313_v46, %v21925_v12  ;;  %15780 = vmatprep.mubr.bf16.mxu0 %v12208_v57  ;;  %v21496_v16 = vpop.f32.mrb[68].mxu0  ;;  %v21927_v62 = vld [vmem:[#allocation14_spill] sm:$0xff]  ;;  %v21928_v46 = vld [vmem:[#allocation15_spill] sm:$0xff] }
 0x6c9   : > { %v11507_v17 = vadd.f32 %v15866_v43, %v21355_v34  ;;  %15781 = vmatmul.mubr.bf16.gmra.mrb[120].mxu0 %v12209_v15  ;;  %v12696_v48 = vpop.f32.mrb[69].mxu0  ;;  %v11570_v0 = vmax.f32 %v11506_v19, 0.0 }
 0x6ca   : > { %v11505_v9 = vadd.f32 %v15867_v54, %v21355_v34  ;;  %v21499_v4 = vpop.f32.mrb[70].mxu0  ;;  %v11568_v7 = vmax.f32 %v11504_v11, 0.0  ;;  %v21929_v54 = vld [vmem:[#allocation24_spill] sm:$0xff] }
 0x6cb   : > { %v11571_v36 = vmax.f32 %v11507_v17, 0.0  ;;  %21926 = vst [vmem:[#allocation32_spill] sm:$0xff] %v21499_v4  ;;  %v12699_v29 = vpop.f32.mrb[71].mxu0  ;;  %v21930_v4 = vld [vmem:[#allocation18_spill] sm:$0xff] }
 0x6cc   : > { %v11569_v40 = vmax.f32 %v11505_v9, 0.0  ;;  %v15710_v58 = vpop.f32.mrb[0].mxu1 }
 0x6cd   : > { %v15868_v33 = vadd.f32 %v15710_v58, %v21927_v62  ;;  %v11326_v63 = vpop.f32.mrb[1].mxu1  ;;  %v12211_v57 = vpack.c.bf16 %v11571_v36, %v11570_v0 }
 0x6ce   : > { %v15869_v43 = vadd.f32 %v11326_v63, %v21928_v46  ;;  %v15711_v15 = vpop.f32.mrb[2].mxu1  ;;  %v12210_v12 = vpack.c.bf16 %v11569_v40, %v11568_v7 }
 0x6cf   : > { %v11510_v1 = vadd.f32 %v15868_v33, %v21355_v34  ;;  %v15870_v48 = vadd.f32 %v15711_v15, %v21929_v54  ;;  %v11329_v19 = vpop.f32.mrb[3].mxu1  ;;  %v21934_v54 = vld [vmem:[#allocation16_spill] sm:$0xff] }
 0x6d0   : > { %v11508_v17 = vadd.f32 %v15869_v43, %v21355_v34  ;;  %v15871_v11 = vadd.f32 %v11329_v19, %v21930_v4  ;;  %15784 = vmatprep.mubr.bf16.mxu0 %v12210_v12  ;;  %v21508_v58 = vpop.f32.mrb[72].mxu0  ;;  %v21933_v43 = vld [vmem:[#allocation20_spill] sm:$0xff] }
 0x6d1   : > { %v11511_v9 = vadd.f32 %v15870_v48, %v21355_v34  ;;  %15785 = vmatmul.mubr.bf16.gmra.mrb[124].mxu0 %v12211_v57  ;;  %21931 = vst [vmem:[#allocation33_spill] sm:$0xff] %v21508_v58  ;;  %v12704_v36 = vpop.f32.mrb[73].mxu0  ;;  %v11574_v29 = vmax.f32 %v11510_v1, 0.0 }
 0x6d2   : > { %v11509_v0 = vadd.f32 %v15871_v11, %v21355_v34  ;;  %v21511_v40 = vpop.f32.mrb[74].mxu0  ;;  %v11572_v62 = vmax.f32 %v11508_v17, 0.0  ;;  %v21935_v11 = vld [vmem:[#allocation17_spill] sm:$0xff] }
 0x6d3   : > { %v11575_v7 = vmax.f32 %v11511_v9, 0.0  ;;  %21932 = vst [vmem:[#allocation34_spill] sm:$0xff] %v21511_v40  ;;  %v12707_v46 = vpop.f32.mrb[75].mxu0  ;;  %v21936_v40 = vld [vmem:[#allocation19_spill] sm:$0xff] }
 0x6d4   : > { %v11573_v33 = vmax.f32 %v11509_v0, 0.0  ;;  %v15714_v63 = vpop.f32.mrb[4].mxu1 }
 0x6d5   : > { %v15872_v15 = vadd.f32 %v15714_v63, %v21933_v43  ;;  %v11342_v4 = vpop.f32.mrb[5].mxu1  ;;  %v12213_v12 = vpack.c.bf16 %v11575_v7, %v11574_v29 }
 0x6d6   : > { %v15873_v48 = vadd.f32 %v11342_v4, %v21934_v54  ;;  %v15715_v57 = vpop.f32.mrb[6].mxu1  ;;  %v12212_v19 = vpack.c.bf16 %v11573_v33, %v11572_v62 }
 0x6d7   : > { %v11514_v58 = vadd.f32 %v15872_v15, %v21355_v34  ;;  %v15874_v36 = vadd.f32 %v15715_v57, %v21935_v11  ;;  %v11345_v1 = vpop.f32.mrb[7].mxu1  ;;  %v21940_v11 = vld [vmem:[#allocation23_spill] sm:$0xff] }
 0x6d8   : > { %v11512_v9 = vadd.f32 %v15873_v48, %v21355_v34  ;;  %v15875_v17 = vadd.f32 %v11345_v1, %v21936_v40  ;;  %15788 = vmatprep.mubr.bf16.mxu0 %v12212_v19  ;;  %v21520_v63 = vpop.f32.mrb[76].mxu0  ;;  %v21939_v48 = vld [vmem:[#allocation22_spill] sm:$0xff] }
 0x6d9   : > { %v11515_v0 = vadd.f32 %v15874_v36, %v21355_v34  ;;  %15789 = vmatmul.mubr.bf16.gmra.mrb[128].mxu0 %v12213_v12  ;;  %21937 = vst [vmem:[#allocation35_spill] sm:$0xff] %v21520_v63  ;;  %v12712_v7 = vpop.f32.mrb[77].mxu0  ;;  %v11578_v46 = vmax.f32 %v11514_v58, 0.0 }
 0x6da   : > { %v11513_v29 = vadd.f32 %v15875_v17, %v21355_v34  ;;  %v21523_v33 = vpop.f32.mrb[78].mxu0  ;;  %v11576_v43 = vmax.f32 %v11512_v9, 0.0  ;;  %v21941_v17 = vld [vmem:[#allocation21_spill] sm:$0xff] }
 0x6db   : > { %v11579_v62 = vmax.f32 %v11515_v0, 0.0  ;;  %21938 = vst [vmem:[#allocation36_spill] sm:$0xff] %v21523_v33  ;;  %v12715_v54 = vpop.f32.mrb[79].mxu0  ;;  %v21942_v33 = vld [vmem:[#allocation10_spill] sm:$0xff] }
 0x6dc   : > { %v11577_v15 = vmax.f32 %v11513_v29, 0.0  ;;  %v15718_v4 = vpop.f32.mrb[8].mxu1 }
 0x6dd   : > { %v15876_v57 = vadd.f32 %v15718_v4, %v21939_v48  ;;  %v11358_v40 = vpop.f32.mrb[9].mxu1  ;;  %v12215_v19 = vpack.c.bf16 %v11579_v62, %v11578_v46 }
 0x6de   : > { %v15877_v36 = vadd.f32 %v11358_v40, %v21940_v11  ;;  %v15719_v12 = vpop.f32.mrb[10].mxu1  ;;  %v12214_v1 = vpack.c.bf16 %v11577_v15, %v11576_v43  ;;  %v21943_v15 = vld [vmem:[#allocation11_spill] sm:$0xff] }
 0x6df   : > { %v11518_v63 = vadd.f32 %v15876_v57, %v21355_v34  ;;  %v15878_v7 = vadd.f32 %v15719_v12, %v21941_v17  ;;  %v11361_v58 = vpop.f32.mrb[11].mxu1  ;;  %v21944_v12 = vld [vmem:[#allocation12_spill] sm:$0xff] }
 0x6e0   : > { %v11516_v0 = vadd.f32 %v15877_v36, %v21355_v34  ;;  %v15879_v9 = vadd.f32 %v11361_v58, %v21942_v33  ;;  %15792 = vmatprep.mubr.bf16.mxu0 %v12214_v1  ;;  %v21945_v1 = vld [vmem:[#allocation13_spill] sm:$0xff] }
 0x6e1   : > { %v11519_v29 = vadd.f32 %v15878_v7, %v21355_v34  ;;  %15793 = vmatmul.mubr.bf16.gmra.mrb[132].mxu0 %v12215_v19  ;;  %v11582_v46 = vmax.f32 %v11518_v63, 0.0  ;;  %v21946_v63 = vld [vmem:[#allocation9_spill] sm:$0xff] }
 0x6e2   : > { %v11517_v4 = vadd.f32 %v15879_v9, %v21355_v34  ;;  %v11580_v54 = vmax.f32 %v11516_v0, 0.0 }
 0x6e3   : > { %v11583_v62 = vmax.f32 %v11519_v29, 0.0 }
 0x6e4   : > { %v11581_v48 = vmax.f32 %v11517_v4, 0.0  ;;  %v15722_v43 = vpop.f32.mrb[12].mxu1 }
 0x6e5   : > { %v15880_v57 = vadd.f32 %v15722_v43, %v21943_v15  ;;  %v11374_v40 = vpop.f32.mrb[13].mxu1  ;;  %v12217_v11 = vpack.c.bf16 %v11583_v62, %v11582_v46 }
 0x6e6   : > { %v15881_v17 = vadd.f32 %v11374_v40, %v21944_v12  ;;  %v15723_v36 = vpop.f32.mrb[14].mxu1  ;;  %v12216_v32 = vpack.c.bf16 %v11581_v48, %v11580_v54 }
 0x6e7   : > { %v11522_v33 = vadd.f32 %v15880_v57, %v21355_v34  ;;  %v15882_v7 = vadd.f32 %v15723_v36, %v21945_v1  ;;  %v11377_v19 = vpop.f32.mrb[15].mxu1 }
 0x6e8   : > { %v11520_v58 = vadd.f32 %v15881_v17, %v21355_v34  ;;  %v15883_v9 = vadd.f32 %v11377_v19, %v21946_v63  ;;  %15796 = vmatprep.mubr.bf16.mxu0 %v12216_v32 }
 0x6e9   : > { %v11523_v0 = vadd.f32 %v15882_v7, %v21355_v34  ;;  %15797 = vmatmul.mubr.bf16.gmra.mrb[136].mxu0 %v12217_v11  ;;  %v11586_v4 = vmax.f32 %v11522_v33, 0.0 }
 0x6ea   : > { %v11521_v29 = vadd.f32 %v15883_v9, %v21355_v34  ;;  %v11584_v62 = vmax.f32 %v11520_v58, 0.0 }
 0x6eb   : > { %v11587_v46 = vmax.f32 %v11523_v0, 0.0 }
 0x6ec   : > { %v11585_v54 = vmax.f32 %v11521_v29, 0.0 }
 0x6ed   : > { %v12219_v48 = vpack.c.bf16 %v11587_v46, %v11586_v4 }
 0x6ee   : > { %v12218_v43 = vpack.c.bf16 %v11585_v54, %v11584_v62 }
 0x6f0   : > { %15800 = vmatprep.mubr.bf16.mxu0 %v12218_v43 }
 0x6f1   : > { %15801 = vmatmul.mubr.bf16.gmra.mrb[140].mxu0 %v12219_v48 }
 0x74c   : > { %v15742_v15 = vpop.f32.mrb[80].mxu0 }
 0x74d   : > { %v12808_v57 = vadd.f32 %v15742_v15, %v21177_v18  ;;  %v12799_v40 = vpop.f32.mrb[81].mxu0  ;;  %v21947_v18 = vld [vmem:[#allocation52_spill] sm:$0xff] }
 0x74e   : > { %v12800_v32 = vadd.f32 %v12799_v40, %v21133_v3  ;;  %v15743_v12 = vpop.f32.mrb[82].mxu0 }
 0x74f   : > { %v12811_v11 = vadd.f32 %v15743_v12, %v21189_v59  ;;  %v12802_v34 = vpop.f32.mrb[83].mxu0  ;;  %v21948_v59 = vld [vmem:[#allocation53_spill] sm:$0xff] }
 0x750   : > { %v12803_v17 = vadd.f32 %v12802_v34, %v21147_v50 }
 0x751   : > { %v14421_v36 = vpack.c.bf16 %v12811_v11, %v12808_v57 }
 0x752   : > { %v14416_v33 = vpack.c.bf16 %v12803_v17, %v12800_v32 }
 0x753   : > { %14573 = vst [vmem:[%s17029_s10 + $0x8] sm:$0xff] %v14421_v36  }
 0x754   : > { %14417 = vst [vmem:[%s17029_s10] sm:$0xff] %v14416_v33   ;;  %v15746_v1 = vpop.f32.mrb[84].mxu0 }
 0x755   : > { %v12824_v7 = vadd.f32 %v15746_v1, %v21266_v6  ;;  %v12815_v19 = vpop.f32.mrb[85].mxu0 }
 0x756   : > { %v12816_v58 = vadd.f32 %v12815_v19, %v21947_v18  ;;  %v15747_v63 = vpop.f32.mrb[86].mxu0 }
 0x757   : > { %v12827_v3 = vadd.f32 %v15747_v63, %v21270_v20  ;;  %v12818_v9 = vpop.f32.mrb[87].mxu0 }
 0x758   : > { %v12819_v0 = vadd.f32 %v12818_v9, %v21948_v59 }
 0x759   : > { %v14431_v50 = vpack.c.bf16 %v12827_v3, %v12824_v7 }
 0x75a   : > { %v14426_v29 = vpack.c.bf16 %v12819_v0, %v12816_v58 }
 0x75b   : > { %14575 = vst [vmem:[%s17029_s10 + $0x18] sm:$0xff] %v14431_v50  }
 0x75c   : > { %14574 = vst [vmem:[%s17029_s10 + $0x10] sm:$0xff] %v14426_v29   ;;  %v15750_v4 = vpop.f32.mrb[88].mxu0 }
 0x75d   : > { %v12840_v46 = vadd.f32 %v15750_v4, %v21296_v39  ;;  %v12831_v62 = vpop.f32.mrb[89].mxu0 }
 0x75e   : > { %v12832_v6 = vadd.f32 %v12831_v62, %v21284_v26  ;;  %v15751_v54 = vpop.f32.mrb[90].mxu0 }
 0x75f   : > { %v12843_v48 = vadd.f32 %v15751_v54, %v21302_v37  ;;  %v12834_v43 = vpop.f32.mrb[91].mxu0 }
 0x760   : > { %v12835_v20 = vadd.f32 %v12834_v43, %v21294_v5 }
 0x761   : > { %v14441_v15 = vpack.c.bf16 %v12843_v48, %v12840_v46 }
 0x762   : > { %v14436_v57 = vpack.c.bf16 %v12835_v20, %v12832_v6 }
 0x763   : > { %14577 = vst [vmem:[%s17029_s10 + $0x28] sm:$0xff] %v14441_v15  }
 0x764   : > { %14576 = vst [vmem:[%s17029_s10 + $0x20] sm:$0xff] %v14436_v57   ;;  %v15754_v40 = vpop.f32.mrb[92].mxu0 }
 0x765   : > { %v12856_v32 = vadd.f32 %v15754_v40, %v21308_v52  ;;  %v12847_v12 = vpop.f32.mrb[93].mxu0 }
 0x766   : > { %v12848_v39 = vadd.f32 %v12847_v12, %v21304_v25  ;;  %v15755_v11 = vpop.f32.mrb[94].mxu0 }
 0x767   : > { %v12859_v26 = vadd.f32 %v15755_v11, %v21310_v47  ;;  %v12850_v34 = vpop.f32.mrb[95].mxu0  ;;  %v21952_v11 = vld [vmem:[#allocation59_spill] sm:$0xff] }
 0x768   : > { %v12851_v37 = vadd.f32 %v12850_v34, %v21306_v27 }
 0x769   : > { %v14451_v5 = vpack.c.bf16 %v12859_v26, %v12856_v32 }
 0x76a   : > { %v14446_v17 = vpack.c.bf16 %v12851_v37, %v12848_v39 }
 0x76b   : > { %14579 = vst [vmem:[%s17029_s10 + $0x38] sm:$0xff] %v14451_v5  }
 0x76c   : > { %14578 = vst [vmem:[%s17029_s10 + $0x30] sm:$0xff] %v14446_v17   ;;  %v15758_v36 = vpop.f32.mrb[96].mxu0  ;;  %v21954_v17 = vld [vmem:[#allocation60_spill] sm:$0xff] }
 0x76d   : > { %v12872_v33 = vadd.f32 %v15758_v36, %v21316_v8  ;;  %v12863_v1 = vpop.f32.mrb[97].mxu0 }
 0x76e   : > { %v12864_v52 = vadd.f32 %v12863_v1, %v21312_v56  ;;  %v15759_v7 = vpop.f32.mrb[98].mxu0  ;;  %v21955_v1 = vld [vmem:[#allocation58_spill] sm:$0xff] }
 0x76f   : > { %v12875_v25 = vadd.f32 %v15759_v7, %v21318_v45  ;;  %v12866_v19 = vpop.f32.mrb[99].mxu0 }
 0x770   : > { %v12867_v47 = vadd.f32 %v12866_v19, %v21314_v30 }
 0x771   : > { %v14461_v27 = vpack.c.bf16 %v12875_v25, %v12872_v33 }
 0x772   : > { %v14456_v18 = vpack.c.bf16 %v12867_v47, %v12864_v52  ;;  %v21956_v47 = vld [vmem:[#allocation8_spill] sm:$0xff] }
 0x773   : > { %14581 = vst [vmem:[%s17029_s10 + $0x48] sm:$0xff] %v14461_v27  }
 0x774   : > { %14580 = vst [vmem:[%s17029_s10 + $0x40] sm:$0xff] %v14456_v18   ;;  %v15762_v58 = vpop.f32.mrb[100].mxu0 }
 0x775   : > { %v12888_v63 = vadd.f32 %v15762_v58, %v21324_v28  ;;  %v12879_v3 = vpop.f32.mrb[101].mxu0  ;;  %v21957_v58 = vld [vmem:[#allocation61_spill] sm:$0xff] }
 0x776   : > { %v12880_v8 = vadd.f32 %v12879_v3, %v21320_v31  ;;  %v15763_v9 = vpop.f32.mrb[102].mxu0 }
 0x777   : > { %v12891_v56 = vadd.f32 %v15763_v9, %v21326_v14  ;;  %v12882_v59 = vpop.f32.mrb[103].mxu0 }
 0x778   : > { %v12883_v45 = vadd.f32 %v12882_v59, %v21322_v23  ;;  %v21959_v59 = vld [vmem:[#allocation62_spill] sm:$0xff] }
 0x779   : > { %v14471_v30 = vpack.c.bf16 %v12891_v56, %v12888_v63 }
 0x77a   : > { %v14466_v0 = vpack.c.bf16 %v12883_v45, %v12880_v8  ;;  %v21958_v8 = vld [vmem:[#allocation25_spill] sm:$0xff] }
 0x77b   : > { %14583 = vst [vmem:[%s17029_s10 + $0x58] sm:$0xff] %v14471_v30  }
 0x77c   : > { %14582 = vst [vmem:[%s17029_s10 + $0x50] sm:$0xff] %v14466_v0   ;;  %v15766_v50 = vpop.f32.mrb[104].mxu0 }
 0x77d   : > { %v12904_v29 = vadd.f32 %v15766_v50, %v21332_v60  ;;  %v12895_v4 = vpop.f32.mrb[105].mxu0  ;;  %v21949_v60 = vld [vmem:[#allocation54_spill] sm:$0xff] }
 0x77e   : > { %v12896_v28 = vadd.f32 %v12895_v4, %v21328_v13  ;;  %v15767_v46 = vpop.f32.mrb[106].mxu0  ;;  %v21950_v13 = vld [vmem:[#allocation56_spill] sm:$0xff] }
 0x77f   : > { %v12907_v31 = vadd.f32 %v15767_v46, %v21334_v22  ;;  %v12898_v62 = vpop.f32.mrb[107].mxu0  ;;  %v21951_v22 = vld [vmem:[#allocation55_spill] sm:$0xff]  ;;  %v21961_v46 = vld [vmem:[#allocation26_spill] sm:$0xff] }
 0x780   : > { %v12899_v14 = vadd.f32 %v12898_v62, %v21330_v55 }
 0x781   : > { %v14481_v23 = vpack.c.bf16 %v12907_v31, %v12904_v29  ;;  %v21960_v29 = vld [vmem:[#allocation28_spill] sm:$0xff] }
 0x782   : > { %v14476_v6 = vpack.c.bf16 %v12899_v14, %v12896_v28  ;;  %v21962_v14 = vld [vmem:[#allocation29_spill] sm:$0xff] }
 0x783   : > { %14585 = vst [vmem:[%s17029_s10 + $0x68] sm:$0xff] %v14481_v23  }
 0x784   : > { %14584 = vst [vmem:[%s17029_s10 + $0x60] sm:$0xff] %v14476_v6   ;;  %v15770_v54 = vpop.f32.mrb[108].mxu0 }
 0x785   : > { %v12920_v48 = vadd.f32 %v15770_v54, %v21340_v44  ;;  %v12911_v43 = vpop.f32.mrb[109].mxu0  ;;  %v21953_v44 = vld [vmem:[#allocation57_spill] sm:$0xff]  ;;  %v21963_v54 = vld [vmem:[#allocation27_spill] sm:$0xff] }
 0x786   : > { %v12912_v20 = vadd.f32 %v12911_v43, %v21949_v60  ;;  %v15771_v15 = vpop.f32.mrb[110].mxu0 }
 0x787   : > { %v12923_v57 = vadd.f32 %v15771_v15, %v21950_v13  ;;  %v12914_v40 = vpop.f32.mrb[111].mxu0 }
 0x788   : > { %v12915_v32 = vadd.f32 %v12914_v40, %v21951_v22 }
 0x789   : > { %v14491_v55 = vpack.c.bf16 %v12923_v57, %v12920_v48 }
 0x78a   : > { %v14486_v12 = vpack.c.bf16 %v12915_v32, %v12912_v20 }
 0x78b   : > { %14587 = vst [vmem:[%s17029_s10 + $0x78] sm:$0xff] %v14491_v55  }
 0x78c   : > { %14586 = vst [vmem:[%s17029_s10 + $0x70] sm:$0xff] %v14486_v12   ;;  %v15774_v39 = vpop.f32.mrb[112].mxu0 }
 0x78d   : > { %v12936_v26 = vadd.f32 %v15774_v39, %v21952_v11  ;;  %v12927_v34 = vpop.f32.mrb[113].mxu0 }
 0x78e   : > { %v12928_v37 = vadd.f32 %v12927_v34, %v21953_v44  ;;  %v15775_v5 = vpop.f32.mrb[114].mxu0 }
 0x78f   : > { %v12939_v36 = vadd.f32 %v15775_v5, %v21954_v17  ;;  %v12930_v33 = vpop.f32.mrb[115].mxu0 }
 0x790   : > { %v12931_v52 = vadd.f32 %v12930_v33, %v21955_v1 }
 0x791   : > { %v14501_v7 = vpack.c.bf16 %v12939_v36, %v12936_v26 }
 0x792   : > { %v14496_v25 = vpack.c.bf16 %v12931_v52, %v12928_v37 }
 0x793   : > { %14589 = vst [vmem:[%s17029_s10 + $0x88] sm:$0xff] %v14501_v7  }
 0x794   : > { %14588 = vst [vmem:[%s17029_s10 + $0x80] sm:$0xff] %v14496_v25   ;;  %v15778_v19 = vpop.f32.mrb[116].mxu0 }
 0x795   : > { %v12952_v27 = vadd.f32 %v15778_v19, %v21956_v47  ;;  %v12943_v18 = vpop.f32.mrb[117].mxu0 }
 0x796   : > { %v12944_v63 = vadd.f32 %v12943_v18, %v21957_v58  ;;  %v15779_v3 = vpop.f32.mrb[118].mxu0 }
 0x797   : > { %v12955_v9 = vadd.f32 %v15779_v3, %v21958_v8  ;;  %v12946_v56 = vpop.f32.mrb[119].mxu0 }
 0x798   : > { %v12947_v45 = vadd.f32 %v12946_v56, %v21959_v59  ;;  %v21967_v56 = vld [vmem:[#allocation35_spill] sm:$0xff] }
 0x799   : > { %v14511_v30 = vpack.c.bf16 %v12955_v9, %v12952_v27 }
 0x79a   : > { %v14506_v0 = vpack.c.bf16 %v12947_v45, %v12944_v63 }
 0x79b   : > { %14591 = vst [vmem:[%s17029_s10 + $0x98] sm:$0xff] %v14511_v30  }
 0x79c   : > { %14590 = vst [vmem:[%s17029_s10 + $0x90] sm:$0xff] %v14506_v0   ;;  %v15782_v50 = vpop.f32.mrb[120].mxu0 }
 0x79d   : > { %v12968_v4 = vadd.f32 %v15782_v50, %v21960_v29  ;;  %v12959_v28 = vpop.f32.mrb[121].mxu0  ;;  %v21969_v50 = vld [vmem:[#allocation36_spill] sm:$0xff] }
 0x79e   : > { %v12960_v31 = vadd.f32 %v12959_v28, %v21961_v46  ;;  %v15783_v62 = vpop.f32.mrb[122].mxu0  ;;  %v21970_v28 = vld [vmem:[#allocation34_spill] sm:$0xff] }
 0x79f   : > { %v12971_v23 = vadd.f32 %v15783_v62, %v21962_v14  ;;  %v12962_v6 = vpop.f32.mrb[123].mxu0 }
 0x7a0   : > { %v12963_v48 = vadd.f32 %v12962_v6, %v21963_v54 }
 0x7a1   : > { %v14521_v43 = vpack.c.bf16 %v12971_v23, %v12968_v4 }
 0x7a2   : > { %v14516_v60 = vpack.c.bf16 %v12963_v48, %v12960_v31 }
 0x7a3   : > { %14593 = vst [vmem:[%s17029_s10 + $0xa8] sm:$0xff] %v14521_v43  }
 0x7a4   : > { %14592 = vst [vmem:[%s17029_s10 + $0xa0] sm:$0xff] %v14516_v60   ;;  %v15786_v20 = vpop.f32.mrb[124].mxu0 }
 0x7a5   : > { %v12984_v15 = vadd.f32 %v15786_v20, %v21424_v53  ;;  %v12975_v13 = vpop.f32.mrb[125].mxu0 }
 0x7a6   : > { %v12976_v57 = vadd.f32 %v12975_v13, %v21412_v61  ;;  %v15787_v40 = vpop.f32.mrb[126].mxu0 }
 0x7a7   : > { %v12987_v22 = vadd.f32 %v15787_v40, %v21427_v51  ;;  %v12978_v32 = vpop.f32.mrb[127].mxu0 }
 0x7a8   : > { %v12979_v55 = vadd.f32 %v12978_v32, %v21415_v21 }
 0x7a9   : > { %v14531_v12 = vpack.c.bf16 %v12987_v22, %v12984_v15 }
 0x7aa   : > { %v14526_v39 = vpack.c.bf16 %v12979_v55, %v12976_v57 }
 0x7ab   : > { %14595 = vst [vmem:[%s17029_s10 + $0xb8] sm:$0xff] %v14531_v12  }
 0x7ac   : > { %14594 = vst [vmem:[%s17029_s10 + $0xb0] sm:$0xff] %v14526_v39   ;;  %v15790_v11 = vpop.f32.mrb[128].mxu0 }
 0x7ad   : > { %v13000_v26 = vadd.f32 %v15790_v11, %v21448_v49  ;;  %v12991_v34 = vpop.f32.mrb[129].mxu0 }
 0x7ae   : > { %v12992_v53 = vadd.f32 %v12991_v34, %v21436_v38  ;;  %v15791_v44 = vpop.f32.mrb[130].mxu0 }
 0x7af   : > { %v13003_v61 = vadd.f32 %v15791_v44, %v21451_v24  ;;  %v12994_v37 = vpop.f32.mrb[131].mxu0 }
 0x7b0   : > { %v12995_v51 = vadd.f32 %v12994_v37, %v21439_v10 }
 0x7b1   : > { %v14541_v21 = vpack.c.bf16 %v13003_v61, %v13000_v26 }
 0x7b2   : > { %v14536_v5 = vpack.c.bf16 %v12995_v51, %v12992_v53 }
 0x7b3   : > { %14597 = vst [vmem:[%s17029_s10 + $0xc8] sm:$0xff] %v14541_v21  }
 0x7b4   : > { %14596 = vst [vmem:[%s17029_s10 + $0xc0] sm:$0xff] %v14536_v5   ;;  %v15794_v17 = vpop.f32.mrb[132].mxu0 }
 0x7b5   : > { %v13016_v36 = vadd.f32 %v15794_v17, %v21472_v35  ;;  %v13007_v33 = vpop.f32.mrb[133].mxu0  ;;  %v21964_v35 = vld [vmem:[#allocation30_spill] sm:$0xff] }
 0x7b6   : > { %v13008_v49 = vadd.f32 %v13007_v33, %v21460_v41  ;;  %v15795_v1 = vpop.f32.mrb[134].mxu0  ;;  %v21965_v41 = vld [vmem:[#allocation32_spill] sm:$0xff] }
 0x7b7   : > { %v13019_v38 = vadd.f32 %v15795_v1, %v21475_v42  ;;  %v13010_v52 = vpop.f32.mrb[135].mxu0  ;;  %v21966_v42 = vld [vmem:[#allocation31_spill] sm:$0xff] }
 0x7b8   : > { %v13011_v24 = vadd.f32 %v13010_v52, %v21463_v2 }
 0x7b9   : > { %v14551_v10 = vpack.c.bf16 %v13019_v38, %v13016_v36 }
 0x7ba   : > { %v14546_v7 = vpack.c.bf16 %v13011_v24, %v13008_v49 }
 0x7bb   : > { %14599 = vst [vmem:[%s17029_s10 + $0xd8] sm:$0xff] %v14551_v10  }
 0x7bc   : > { %14598 = vst [vmem:[%s17029_s10 + $0xd0] sm:$0xff] %v14546_v7   ;;  %v15798_v25 = vpop.f32.mrb[136].mxu0 }
 0x7bd   : > { %v13032_v19 = vadd.f32 %v15798_v25, %v21496_v16  ;;  %v13023_v47 = vpop.f32.mrb[137].mxu0  ;;  %v21968_v16 = vld [vmem:[#allocation33_spill] sm:$0xff] }
 0x7be   : > { %v13024_v27 = vadd.f32 %v13023_v47, %v21964_v35  ;;  %v15799_v18 = vpop.f32.mrb[138].mxu0 }
 0x7bf   : > { %v13035_v58 = vadd.f32 %v15799_v18, %v21965_v41  ;;  %v13026_v63 = vpop.f32.mrb[139].mxu0 }
 0x7c0   : > { %v13027_v3 = vadd.f32 %v13026_v63, %v21966_v42 }
 0x7c1   : > { %v14561_v2 = vpack.c.bf16 %v13035_v58, %v13032_v19 }
 0x7c2   : > { %v14556_v8 = vpack.c.bf16 %v13027_v3, %v13024_v27 }
 0x7c3   : > { %14601 = vst [vmem:[%s17029_s10 + $0xe8] sm:$0xff] %v14561_v2  }
 0x7c4   : > { %14600 = vst [vmem:[%s17029_s10 + $0xe0] sm:$0xff] %v14556_v8   ;;  %v15802_v9 = vpop.f32.mrb[140].mxu0 }
 0x7c5   : > { %v13048_v59 = vadd.f32 %v15802_v9, %v21967_v56  ;;  %v13039_v45 = vpop.f32.mrb[141].mxu0 }
 0x7c6   : > { %v13040_v30 = vadd.f32 %v13039_v45, %v21968_v16  ;;  %v15803_v0 = vpop.f32.mrb[142].mxu0 }
 0x7c7   : > { %v13051_v29 = vadd.f32 %v15803_v0, %v21969_v50  ;;  %v13042_v4 = vpop.f32.mrb[143].mxu0 }
 0x7c8   : > { %v13043_v46 = vadd.f32 %v13042_v4, %v21970_v28 }
 0x7c9   : > { %v14571_v31 = vpack.c.bf16 %v13051_v29, %v13048_v59 }
 0x7ca   : > { %v14566_v62 = vpack.c.bf16 %v13043_v46, %v13040_v30 }
 0x7cb   : > { %14603 = vst [vmem:[%s17029_s10 + $0xf8] sm:$0xff] %v14571_v31  }
 0x7cc   : > { %14602 = vst [vmem:[%s17029_s10 + $0xf0] sm:$0xff] %v14566_v62  }
 0x7cd PF: > { %s21971_s27 = sld [smem:[#allocation5_spill]]  ;;  %s21972_s25 = sld [smem:[#allocation3_spill]] }
 0x7ce   : > { %s21973_s26 = sld [smem:[#allocation4_spill]]  ;;  %s21975_s28 = sld [smem:[#allocation7_spill]] }
 0x7d3   : > { %s23_s29 = sadd.s32 1, %s21971_s27   ;;  %s21974_s27 = sld [smem:[#allocation6_spill]] }
 0x7d4   : > { %p20_p12 = scmp.ge.s32.totalorder %s23_s29, 6  }
 0x7d6   :  { %22 = sbr.rel (!%p20_p12) target bundleno = 4 (0x4), region = 127 }

</bundles_post_ra>
